<compile_context>
chip_gen: v7x
topology: tpu7x:2x2x1
jax: 0.10.0
libtpu: 0.0.40
codegen_flags: <defaults>
</compile_context>

<pallas_src>
import jax
import jax.numpy as jnp
from jax import lax
from jax.experimental import pallas as pl
from jax.experimental.pallas import tpu as pltpu

EPS = 1e-5           # nn.GroupNorm default
LEAKY_SLOPE = 0.01   # torch.nn.LeakyReLU default negative_slope ("Swish" here)
MARGIN = 8           # sublane-aligned left/right margin of padded conv scratch


# --------------------------- in-kernel building blocks ---------------------------
def _gn_lrelu(xf, g_ref, b_ref, m_ref):
    """GroupNorm + LeakyReLU on a (HW, C) f32 tile.

    m_ref is a (C, C) mask holding 1/(HW*group_size) for same-group channel
    pairs, so a single (1,C)x(C,C) matmul per moment yields the per-channel
    group mean (already broadcast back to channels)."""
    s1 = jnp.sum(xf, axis=0, keepdims=True)                     # (1, C)
    s2 = jnp.sum(xf * xf, axis=0, keepdims=True)                # (1, C)
    mean = jnp.dot(s1, m_ref[...], preferred_element_type=jnp.float32)
    msq = jnp.dot(s2, m_ref[...], preferred_element_type=jnp.float32)
    inv = lax.rsqrt(msq - mean * mean + EPS)                    # biased var (torch)
    y = (xf - mean) * inv * g_ref[...] + b_ref[...]
    return jnp.where(y > 0, y, LEAKY_SLOPE * y)                 # LeakyReLU


def _conv_same(pad_ref, x3d, w_ref, b_ref, K):
    """'same' KxK conv of x3d (H, W, C) f32 -> (H*W, Cout) f32.

    pad_ref is a VMEM scratch (H + 2*(K//2), W + 2*MARGIN, C); it is zeroed
    and the image stored at sublane offset MARGIN (aligned).  kw and Cin are
    folded into the contraction (weights pre-reshaped to (K, K*C, Cout) bf16
    in the wrapper), so the conv is K accumulating MXU matmuls."""
    H, W, C = x3d.shape
    p = K // 2
    Cout = w_ref.shape[-1]
    pad_ref[...] = jnp.zeros_like(pad_ref)
    pad_ref[p:p + H, MARGIN:MARGIN + W, :] = x3d
    base = MARGIN - p
    # Fold kw onto the lane/contraction axis: xs[hp, w, kw*C + ci]; cast once.
    xs = jnp.concatenate(
        [pad_ref[:, base + kw: base + kw + W, :] for kw in range(K)],
        axis=-1).astype(jnp.bfloat16)
    acc = jnp.zeros((H * W, Cout), jnp.float32)
    for kh in range(K):                                         # K matmuls, contraction K*C
        patch = xs[kh:kh + H].reshape(H * W, K * C)
        acc = acc + jnp.dot(patch, w_ref[kh],
                            preferred_element_type=jnp.float32)
    return acc + b_ref[...].astype(jnp.float32)


def _make_residual_kernel(H, W, Cin, Cout, K, KS, has_skip):
    def kernel(*refs):
        if has_skip:
            (x_ref, t_ref, g1, b1, m1, w1, c1b, lw, lb,
             g2, b2, m2, w2, c2b, skw, skb,
             o_ref, pad1, pad2, pads) = refs
        else:
            (x_ref, t_ref, g1, b1, m1, w1, c1b, lw, lb,
             g2, b2, m2, w2, c2b,
             o_ref, pad1, pad2) = refs

        x3 = x_ref[0].astype(jnp.float32)                       # (H, W, Cin)
        xf = x3.reshape(H * W, Cin)

        # norm1 -> swish1 -> conv1 (+ linear(time) broadcast over HW)
        y1 = _gn_lrelu(xf, g1, b1, m1)
        h = _conv_same(pad1, y1.reshape(H, W, Cin), w1, c1b, K)  # (HW, Cout)
        t = t_ref[0].astype(jnp.float32)                         # (1, Tc)
        h = h + (jnp.dot(t, lw[...], preferred_element_type=jnp.float32)
                 + lb[...])

        # norm2 -> swish2 -> conv2
        y2 = _gn_lrelu(h, g2, b2, m2)
        h2 = _conv_same(pad2, y2.reshape(H, W, Cout), w2, c2b, K)

        # skip connection (3x3 conv if Cin != Cout, identity otherwise)
        if has_skip:
            sk = _conv_same(pads, x3, skw, skb, KS)
        else:
            sk = xf
        o_ref[...] = (h2 + sk).reshape(1, H, W, Cout).astype(o_ref.dtype)

    return kernel


# ----------------------------------- wrapper -----------------------------------
def _group_avg_mask(C, G, hw):
    gs = C // G
    ch = jnp.arange(C)
    same = (ch[:, None] // gs) == (ch[None, :] // gs)
    return same.astype(jnp.float32) / float(hw * gs)


def _const_map(ndim):
    return lambda n: (0,) * ndim


def residual_forward(params, x_nhwc, time_emb, num_groups=8):
    """x_nhwc: (N, H, W, Cin) f32; time_emb: (N, Tc) f32 -> (N, H, W, Cout) f32."""
    N, H, W, Cin = x_nhwc.shape
    K = params["conv1_w"].shape[0]
    Cout = params["conv1_w"].shape[3]
    Tc = time_emb.shape[-1]
    G = num_groups
    has_skip = Cin != Cout
    KS = params["skip_w"].shape[0] if has_skip else 1

    def row(v):
        return v.reshape(1, -1).astype(jnp.float32)

    # group-average masks (1/(HW*group_size) folded in)
    m1 = _group_avg_mask(Cin, G, H * W)
    m2 = _group_avg_mask(Cout, G, H * W)
    # fold (kw, Cin) into the contraction; bf16 for the MXU
    w1 = params["conv1_w"].reshape(K, K * Cin, Cout).astype(jnp.bfloat16)
    w2 = params["conv2_w"].reshape(K, K * Cout, Cout).astype(jnp.bfloat16)

    weight_args = [row(params["gn1_g"]), row(params["gn1_b"]), m1,
                   w1, row(params["conv1_b"]),
                   params["lin_w"].astype(jnp.float32), row(params["lin_b"]),
                   row(params["gn2_g"]), row(params["gn2_b"]), m2,
                   w2, row(params["conv2_b"])]

    scratch = [pltpu.VMEM((H + 2 * (K // 2), W + 2 * MARGIN, Cin), jnp.float32),
               pltpu.VMEM((H + 2 * (K // 2), W + 2 * MARGIN, Cout), jnp.float32)]

    if has_skip:
        ws = params["skip_w"].reshape(KS, KS * Cin, Cout).astype(jnp.bfloat16)
        weight_args += [ws, row(params["skip_b"])]
        scratch.append(
            pltpu.VMEM((H + 2 * (KS // 2), W + 2 * MARGIN, Cin), jnp.float32))

    in_specs = ([pl.BlockSpec((1, H, W, Cin), lambda n: (n, 0, 0, 0)),
                 pl.BlockSpec((1, 1, Tc), lambda n: (n, 0, 0))]
                + [pl.BlockSpec(a.shape, _const_map(a.ndim)) for a in weight_args])
    args = [x_nhwc, time_emb.reshape(N, 1, Tc)] + weight_args

    kernel = _make_residual_kernel(H, W, Cin, Cout, K, KS, has_skip)

    return pl.pallas_call(
        kernel,
        out_shape=jax.ShapeDtypeStruct((N, H, W, Cout), x_nhwc.dtype),
        grid_spec=pltpu.PrefetchScalarGridSpec(
            num_scalar_prefetch=0,
            grid=(N,),                      # >= 2 parallel steps -> v7x megacore
            in_specs=in_specs,
            out_specs=pl.BlockSpec((1, H, W, Cout), lambda n: (n, 0, 0, 0)),
            scratch_shapes=scratch),
        compiler_params=pltpu.CompilerParams(
            dimension_semantics=("parallel",)),
    )(*args)


def residual_forward_nchw(params, x_nchw, time_emb, num_groups=8):
    """PyTorch-faithful NCHW interface: transpose to NHWC around the kernel."""
    x_nhwc = jnp.transpose(x_nchw, (0, 2, 3, 1))
    out = residual_forward(params, x_nhwc, time_emb, num_groups)
    return jnp.transpose(out, (0, 3, 1, 2))


# --------------------------- pure-JAX reference check --------------------------
def residual_reference(params, x, temb, num_groups=8):
    def gn(v, g, b):
        N, H, W, C = v.shape
        G = num_groups
        xg = v.reshape(N, H, W, G, C // G)
        mean = xg.mean(axis=(1, 2, 4), keepdims=True)
        var = xg.var(axis=(1, 2, 4), keepdims=True)
        return ((xg - mean) / jnp.sqrt(var + EPS)).reshape(N, H, W, C) * g + b

    def lrelu(v):
        return jnp.where(v > 0, v, LEAKY_SLOPE * v)

    def conv(v, w, b):
        p = w.shape[0] // 2
        return lax.conv_general_dilated(
            v, w, (1, 1), [(p, p), (p, p)],
            dimension_numbers=("NHWC", "HWIO", "NHWC")) + b

    y = conv(lrelu(gn(x, params["gn1_g"], params["gn1_b"])),
             params["conv1_w"], params["conv1_b"])
    y = y + (temb @ params["lin_w"] + params["lin_b"])[:, None, None, :]
    y = conv(lrelu(gn(y, params["gn2_g"], params["gn2_b"])),
             params["conv2_w"], params["conv2_b"])
    skip = (conv(x, params["skip_w"], params["skip_b"])
            if x.shape[-1] != params["conv1_w"].shape[3] else x)
    return y + skip


if __name__ == "__main__":
    N, Cin, Cout, H, W, Tc, G = 2, 16, 32, 16, 16, 8, 8

    key = jax.random.PRNGKey(0)
    ks = jax.random.split(key, 14)
    params = {
        "gn1_g": 1.0 + 0.1 * jax.random.normal(ks[0], (Cin,), jnp.float32),
        "gn1_b": 0.1 * jax.random.normal(ks[1], (Cin,), jnp.float32),
        "conv1_w": 0.05 * jax.random.normal(ks[2], (5, 5, Cin, Cout), jnp.float32),
        "conv1_b": 0.05 * jax.random.normal(ks[3], (Cout,), jnp.float32),
        "gn2_g": 1.0 + 0.1 * jax.random.normal(ks[4], (Cout,), jnp.float32),
        "gn2_b": 0.1 * jax.random.normal(ks[5], (Cout,), jnp.float32),
        "conv2_w": 0.05 * jax.random.normal(ks[6], (5, 5, Cout, Cout), jnp.float32),
        "conv2_b": 0.05 * jax.random.normal(ks[7], (Cout,), jnp.float32),
        "skip_w": 0.05 * jax.random.normal(ks[8], (3, 3, Cin, Cout), jnp.float32),
        "skip_b": 0.05 * jax.random.normal(ks[9], (Cout,), jnp.float32),
        "lin_w": 0.1 * jax.random.normal(ks[10], (Tc, Cout), jnp.float32),
        "lin_b": 0.1 * jax.random.normal(ks[11], (Cout,), jnp.float32),
    }

    x_nchw = jax.random.normal(ks[12], (N, Cin, H, W), jnp.float32)   # NCHW, like torch
    temb = jax.random.normal(ks[13], (N, Tc), jnp.float32)

    out = jax.block_until_ready(residual_forward_nchw(params, x_nchw, temb, G))
    assert out.shape == (N, Cout, H, W)

    x_nhwc = jnp.transpose(x_nchw, (0, 2, 3, 1))
    ref = jnp.transpose(residual_reference(params, x_nhwc, temb, G), (0, 3, 1, 2))
    err = float(jnp.max(jnp.abs(out - ref)))
    # bf16 matmul operands (f32 accumulation / f32 reference) -> looser tolerance
    assert jnp.allclose(out, ref, atol=5e-2, rtol=5e-2), f"max abs err {err}"
    print("KERNEL_OK")
</pallas_src>

<mosaic_0001>
module attributes {stable_mosaic.version = 11 : i64} {
  func.func @kernel(%arg0: i32, %arg1: memref<1x16x16x16xf32, #tpu.memory_space<vmem>>, %arg2: memref<1x1x8xf32, #tpu.memory_space<vmem>>, %arg3: memref<1x16xf32, #tpu.memory_space<vmem>>, %arg4: memref<1x16xf32, #tpu.memory_space<vmem>>, %arg5: memref<16x16xf32, #tpu.memory_space<vmem>>, %arg6: memref<5x80x32xbf16, #tpu.memory_space<vmem>>, %arg7: memref<1x32xf32, #tpu.memory_space<vmem>>, %arg8: memref<8x32xf32, #tpu.memory_space<vmem>>, %arg9: memref<1x32xf32, #tpu.memory_space<vmem>>, %arg10: memref<1x32xf32, #tpu.memory_space<vmem>>, %arg11: memref<1x32xf32, #tpu.memory_space<vmem>>, %arg12: memref<32x32xf32, #tpu.memory_space<vmem>>, %arg13: memref<5x160x32xbf16, #tpu.memory_space<vmem>>, %arg14: memref<1x32xf32, #tpu.memory_space<vmem>>, %arg15: memref<3x48x32xbf16, #tpu.memory_space<vmem>>, %arg16: memref<1x32xf32, #tpu.memory_space<vmem>>, %arg17: memref<1x16x16x32xf32, #tpu.memory_space<vmem>>, %arg18: memref<20x32x16xf32, #tpu.memory_space<vmem>>, %arg19: memref<20x32x32xf32, #tpu.memory_space<vmem>>, %arg20: memref<18x32x16xf32, #tpu.memory_space<vmem>>) attributes {dimension_semantics = [#tpu.dimension_semantics<parallel>], iteration_bounds = array<i64: 2>, scalar_prefetch = 0 : i64, scratch_operands = 3 : i64, tpu.core_type = #tpu.core_type<tc>, window_params = [{transform_indices = @transform_0, window_bounds = array<i64: 1, 16, 16, 16>}, {transform_indices = @transform_1, window_bounds = array<i64: 1, 1, 8>}, {pipeline_mode = #tpu.pipeline_mode<synchronous>, transform_indices = @transform_2, window_bounds = array<i64: 1, 16>}, {pipeline_mode = #tpu.pipeline_mode<synchronous>, transform_indices = @transform_3, window_bounds = array<i64: 1, 16>}, {pipeline_mode = #tpu.pipeline_mode<synchronous>, transform_indices = @transform_4, window_bounds = array<i64: 16, 16>}, {pipeline_mode = #tpu.pipeline_mode<synchronous>, transform_indices = @transform_5, window_bounds = array<i64: 5, 80, 32>}, {pipeline_mode = #tpu.pipeline_mode<synchronous>, transform_indices = @transform_6, window_bounds = array<i64: 1, 32>}, {pipeline_mode = #tpu.pipeline_mode<synchronous>, transform_indices = @transform_7, window_bounds = array<i64: 8, 32>}, {pipeline_mode = #tpu.pipeline_mode<synchronous>, transform_indices = @transform_8, window_bounds = array<i64: 1, 32>}, {pipeline_mode = #tpu.pipeline_mode<synchronous>, transform_indices = @transform_9, window_bounds = array<i64: 1, 32>}, {pipeline_mode = #tpu.pipeline_mode<synchronous>, transform_indices = @transform_10, window_bounds = array<i64: 1, 32>}, {pipeline_mode = #tpu.pipeline_mode<synchronous>, transform_indices = @transform_11, window_bounds = array<i64: 32, 32>}, {pipeline_mode = #tpu.pipeline_mode<synchronous>, transform_indices = @transform_12, window_bounds = array<i64: 5, 160, 32>}, {pipeline_mode = #tpu.pipeline_mode<synchronous>, transform_indices = @transform_13, window_bounds = array<i64: 1, 32>}, {pipeline_mode = #tpu.pipeline_mode<synchronous>, transform_indices = @transform_14, window_bounds = array<i64: 3, 48, 32>}, {pipeline_mode = #tpu.pipeline_mode<synchronous>, transform_indices = @transform_15, window_bounds = array<i64: 1, 32>}, {transform_indices = @transform_16, window_bounds = array<i64: 1, 16, 16, 32>}]} {
    %c0 = arith.constant 0 : index
    %c0_0 = arith.constant 0 : index
    %c0_1 = arith.constant 0 : index
    %c0_2 = arith.constant 0 : index
    %0 = vector.load %arg1[%c0, %c0_0, %c0_1, %c0_2] : memref<1x16x16x16xf32, #tpu.memory_space<vmem>>, vector<1x16x16x16xf32>
    %1 = vector.shape_cast %0 : vector<1x16x16x16xf32> to vector<16x16x16xf32>
    %2 = vector.shape_cast %1 : vector<16x16x16xf32> to vector<256x16xf32>
    %cst = arith.constant dense<0.000000e+00> : vector<16xf32>
    %3 = vector.multi_reduction <add>, %2, %cst [0] : vector<256x16xf32> to vector<16xf32>
    %4 = vector.shape_cast %3 : vector<16xf32> to vector<1x16xf32>
    %5 = arith.mulf %2, %2 : vector<256x16xf32>
    %cst_3 = arith.constant dense<0.000000e+00> : vector<16xf32>
    %6 = vector.multi_reduction <add>, %5, %cst_3 [0] : vector<256x16xf32> to vector<16xf32>
    %7 = vector.shape_cast %6 : vector<16xf32> to vector<1x16xf32>
    %c0_4 = arith.constant 0 : index
    %c0_5 = arith.constant 0 : index
    %8 = vector.load %arg5[%c0_4, %c0_5] : memref<16x16xf32, #tpu.memory_space<vmem>>, vector<16x16xf32>
    %cst_6 = arith.constant dense<0.000000e+00> : vector<1x16xf32>
    %9 = tpu.matmul %4, %8, %cst_6 {dimension_numbers = #tpu.dot_dimension_numbers<[1], [0], [0], [1], [0, 0, 1, 1], [], []>} : vector<1x16xf32>, vector<16x16xf32>, vector<1x16xf32> -> vector<1x16xf32>
    %c0_7 = arith.constant 0 : index
    %c0_8 = arith.constant 0 : index
    %10 = vector.load %arg5[%c0_7, %c0_8] : memref<16x16xf32, #tpu.memory_space<vmem>>, vector<16x16xf32>
    %cst_9 = arith.constant dense<0.000000e+00> : vector<1x16xf32>
    %11 = tpu.matmul %7, %10, %cst_9 {dimension_numbers = #tpu.dot_dimension_numbers<[1], [0], [0], [1], [0, 0, 1, 1], [], []>} : vector<1x16xf32>, vector<16x16xf32>, vector<1x16xf32> -> vector<1x16xf32>
    %12 = arith.mulf %9, %9 : vector<1x16xf32>
    %13 = arith.subf %11, %12 : vector<1x16xf32>
    %cst_10 = arith.constant 9.99999974E-6 : f32
    %14 = vector.broadcast %cst_10 : f32 to vector<1x16xf32>
    %15 = arith.addf %13, %14 : vector<1x16xf32>
    %16 = math.rsqrt %15 : vector<1x16xf32>
    %17 = vector.broadcast %9 : vector<1x16xf32> to vector<256x16xf32>
    %18 = arith.subf %2, %17 : vector<256x16xf32>
    %19 = vector.broadcast %16 : vector<1x16xf32> to vector<256x16xf32>
    %20 = arith.mulf %18, %19 : vector<256x16xf32>
    %c0_11 = arith.constant 0 : index
    %c0_12 = arith.constant 0 : index
    %21 = vector.load %arg3[%c0_11, %c0_12] : memref<1x16xf32, #tpu.memory_space<vmem>>, vector<1x16xf32>
    %22 = vector.broadcast %21 : vector<1x16xf32> to vector<256x16xf32>
    %23 = arith.mulf %20, %22 : vector<256x16xf32>
    %c0_13 = arith.constant 0 : index
    %c0_14 = arith.constant 0 : index
    %24 = vector.load %arg4[%c0_13, %c0_14] : memref<1x16xf32, #tpu.memory_space<vmem>>, vector<1x16xf32>
    %25 = vector.broadcast %24 : vector<1x16xf32> to vector<256x16xf32>
    %26 = arith.addf %23, %25 : vector<256x16xf32>
    %cst_15 = arith.constant 0.000000e+00 : f32
    %27 = vector.broadcast %cst_15 : f32 to vector<256x16xf32>
    %28 = arith.cmpf ogt, %26, %27 : vector<256x16xf32>
    %cst_16 = arith.constant 0.00999999977 : f32
    %29 = vector.broadcast %cst_16 : f32 to vector<256x16xf32>
    %30 = arith.mulf %29, %26 : vector<256x16xf32>
    %31 = arith.select %28, %26, %30 : vector<256x16xi1>, vector<256x16xf32>
    %32 = vector.shape_cast %31 : vector<256x16xf32> to vector<16x16x16xf32>
    %cst_17 = arith.constant 0.000000e+00 : f32
    %33 = vector.broadcast %cst_17 : f32 to vector<20x32x16xf32>
    %c0_18 = arith.constant 0 : index
    %c0_19 = arith.constant 0 : index
    %c0_20 = arith.constant 0 : index
    %34 = vector.load %arg18[%c0_18, %c0_19, %c0_20] : memref<20x32x16xf32, #tpu.memory_space<vmem>>, vector<20x32x16xf32>
    tpu.vector_store %arg18[%c0_18, %c0_19, %c0_20], %33 {strides = array<i32>} : memref<20x32x16xf32, #tpu.memory_space<vmem>>, vector<20x32x16xf32>,
    %c2 = arith.constant 2 : index
    %c8 = arith.constant 8 : index
    %c0_21 = arith.constant 0 : index
    %35 = vector.load %arg18[%c2, %c8, %c0_21] : memref<20x32x16xf32, #tpu.memory_space<vmem>>, vector<16x16x16xf32>
    tpu.vector_store %arg18[%c2, %c8, %c0_21], %32 {strides = array<i32>} : memref<20x32x16xf32, #tpu.memory_space<vmem>>, vector<16x16x16xf32>,
    %c0_22 = arith.constant 0 : index
    %c6 = arith.constant 6 : index
    %c0_23 = arith.constant 0 : index
    %36 = vector.load %arg18[%c0_22, %c6, %c0_23] : memref<20x32x16xf32, #tpu.memory_space<vmem>>, vector<20x16x16xf32>
    %c0_24 = arith.constant 0 : index
    %c7 = arith.constant 7 : index
    %c0_25 = arith.constant 0 : index
    %37 = vector.load %arg18[%c0_24, %c7, %c0_25] : memref<20x32x16xf32, #tpu.memory_space<vmem>>, vector<20x16x16xf32>
    %c0_26 = arith.constant 0 : index
    %c8_27 = arith.constant 8 : index
    %c0_28 = arith.constant 0 : index
    %38 = vector.load %arg18[%c0_26, %c8_27, %c0_28] : memref<20x32x16xf32, #tpu.memory_space<vmem>>, vector<20x16x16xf32>
    %c0_29 = arith.constant 0 : index
    %c9 = arith.constant 9 : index
    %c0_30 = arith.constant 0 : index
    %39 = vector.load %arg18[%c0_29, %c9, %c0_30] : memref<20x32x16xf32, #tpu.memory_space<vmem>>, vector<20x16x16xf32>
    %c0_31 = arith.constant 0 : index
    %c10 = arith.constant 10 : index
    %c0_32 = arith.constant 0 : index
    %40 = vector.load %arg18[%c0_31, %c10, %c0_32] : memref<20x32x16xf32, #tpu.memory_space<vmem>>, vector<20x16x16xf32>
    %41 = tpu.concatenate %36, %37, %38, %39, %40 in 2 : vector<20x16x16xf32>, vector<20x16x16xf32>, vector<20x16x16xf32>, vector<20x16x16xf32>, vector<20x16x16xf32> -> vector<20x16x80xf32>
    %42 = arith.truncf %41 : vector<20x16x80xf32> to vector<20x16x80xbf16>
    %cst_33 = arith.constant 0.000000e+00 : f32
    %43 = vector.broadcast %cst_33 : f32 to vector<256x32xf32>
    %44 = vector.extract_strided_slice %42 {offsets = [0, 0, 0], sizes = [16, 16, 80], strides = [1, 1, 1]} : vector<20x16x80xbf16> to vector<16x16x80xbf16>
    %45 = vector.shape_cast %44 : vector<16x16x80xbf16> to vector<256x80xbf16>
    %c0_34 = arith.constant 0 : index
    %c0_35 = arith.constant 0 : index
    %c0_36 = arith.constant 0 : index
    %46 = vector.load %arg6[%c0_34, %c0_35, %c0_36] : memref<5x80x32xbf16, #tpu.memory_space<vmem>>, vector<1x80x32xbf16>
    %47 = vector.shape_cast %46 : vector<1x80x32xbf16> to vector<80x32xbf16>
    %cst_37 = arith.constant dense<0.000000e+00> : vector<256x32xf32>
    %48 = tpu.matmul %45, %47, %cst_37 {dimension_numbers = #tpu.dot_dimension_numbers<[1], [0], [0], [1], [0, 0, 1, 1], [], []>} : vector<256x80xbf16>, vector<80x32xbf16>, vector<256x32xf32> -> vector<256x32xf32>
    %49 = arith.addf %43, %48 : vector<256x32xf32>
    %50 = vector.extract_strided_slice %42 {offsets = [1, 0, 0], sizes = [16, 16, 80], strides = [1, 1, 1]} : vector<20x16x80xbf16> to vector<16x16x80xbf16>
    %51 = vector.shape_cast %50 : vector<16x16x80xbf16> to vector<256x80xbf16>
    %c1 = arith.constant 1 : index
    %c0_38 = arith.constant 0 : index
    %c0_39 = arith.constant 0 : index
    %52 = vector.load %arg6[%c1, %c0_38, %c0_39] : memref<5x80x32xbf16, #tpu.memory_space<vmem>>, vector<1x80x32xbf16>
    %53 = vector.shape_cast %52 : vector<1x80x32xbf16> to vector<80x32xbf16>
    %cst_40 = arith.constant dense<0.000000e+00> : vector<256x32xf32>
    %54 = tpu.matmul %51, %53, %cst_40 {dimension_numbers = #tpu.dot_dimension_numbers<[1], [0], [0], [1], [0, 0, 1, 1], [], []>} : vector<256x80xbf16>, vector<80x32xbf16>, vector<256x32xf32> -> vector<256x32xf32>
    %55 = arith.addf %49, %54 : vector<256x32xf32>
    %56 = vector.extract_strided_slice %42 {offsets = [2, 0, 0], sizes = [16, 16, 80], strides = [1, 1, 1]} : vector<20x16x80xbf16> to vector<16x16x80xbf16>
    %57 = vector.shape_cast %56 : vector<16x16x80xbf16> to vector<256x80xbf16>
    %c2_41 = arith.constant 2 : index
    %c0_42 = arith.constant 0 : index
    %c0_43 = arith.constant 0 : index
    %58 = vector.load %arg6[%c2_41, %c0_42, %c0_43] : memref<5x80x32xbf16, #tpu.memory_space<vmem>>, vector<1x80x32xbf16>
    %59 = vector.shape_cast %58 : vector<1x80x32xbf16> to vector<80x32xbf16>
    %cst_44 = arith.constant dense<0.000000e+00> : vector<256x32xf32>
    %60 = tpu.matmul %57, %59, %cst_44 {dimension_numbers = #tpu.dot_dimension_numbers<[1], [0], [0], [1], [0, 0, 1, 1], [], []>} : vector<256x80xbf16>, vector<80x32xbf16>, vector<256x32xf32> -> vector<256x32xf32>
    %61 = arith.addf %55, %60 : vector<256x32xf32>
    %62 = vector.extract_strided_slice %42 {offsets = [3, 0, 0], sizes = [16, 16, 80], strides = [1, 1, 1]} : vector<20x16x80xbf16> to vector<16x16x80xbf16>
    %63 = vector.shape_cast %62 : vector<16x16x80xbf16> to vector<256x80xbf16>
    %c3 = arith.constant 3 : index
    %c0_45 = arith.constant 0 : index
    %c0_46 = arith.constant 0 : index
    %64 = vector.load %arg6[%c3, %c0_45, %c0_46] : memref<5x80x32xbf16, #tpu.memory_space<vmem>>, vector<1x80x32xbf16>
    %65 = vector.shape_cast %64 : vector<1x80x32xbf16> to vector<80x32xbf16>
    %cst_47 = arith.constant dense<0.000000e+00> : vector<256x32xf32>
    %66 = tpu.matmul %63, %65, %cst_47 {dimension_numbers = #tpu.dot_dimension_numbers<[1], [0], [0], [1], [0, 0, 1, 1], [], []>} : vector<256x80xbf16>, vector<80x32xbf16>, vector<256x32xf32> -> vector<256x32xf32>
    %67 = arith.addf %61, %66 : vector<256x32xf32>
    %68 = vector.extract_strided_slice %42 {offsets = [4, 0, 0], sizes = [16, 16, 80], strides = [1, 1, 1]} : vector<20x16x80xbf16> to vector<16x16x80xbf16>
    %69 = vector.shape_cast %68 : vector<16x16x80xbf16> to vector<256x80xbf16>
    %c4 = arith.constant 4 : index
    %c0_48 = arith.constant 0 : index
    %c0_49 = arith.constant 0 : index
    %70 = vector.load %arg6[%c4, %c0_48, %c0_49] : memref<5x80x32xbf16, #tpu.memory_space<vmem>>, vector<1x80x32xbf16>
    %71 = vector.shape_cast %70 : vector<1x80x32xbf16> to vector<80x32xbf16>
    %cst_50 = arith.constant dense<0.000000e+00> : vector<256x32xf32>
    %72 = tpu.matmul %69, %71, %cst_50 {dimension_numbers = #tpu.dot_dimension_numbers<[1], [0], [0], [1], [0, 0, 1, 1], [], []>} : vector<256x80xbf16>, vector<80x32xbf16>, vector<256x32xf32> -> vector<256x32xf32>
    %73 = arith.addf %67, %72 : vector<256x32xf32>
    %c0_51 = arith.constant 0 : index
    %c0_52 = arith.constant 0 : index
    %74 = vector.load %arg7[%c0_51, %c0_52] : memref<1x32xf32, #tpu.memory_space<vmem>>, vector<1x32xf32>
    %75 = vector.broadcast %74 : vector<1x32xf32> to vector<256x32xf32>
    %76 = arith.addf %73, %75 : vector<256x32xf32>
    %c0_53 = arith.constant 0 : index
    %c0_54 = arith.constant 0 : index
    %c0_55 = arith.constant 0 : index
    %77 = vector.load %arg2[%c0_53, %c0_54, %c0_55] : memref<1x1x8xf32, #tpu.memory_space<vmem>>, vector<1x1x8xf32>
    %78 = vector.shape_cast %77 : vector<1x1x8xf32> to vector<1x8xf32>
    %c0_56 = arith.constant 0 : index
    %c0_57 = arith.constant 0 : index
    %79 = vector.load %arg8[%c0_56, %c0_57] : memref<8x32xf32, #tpu.memory_space<vmem>>, vector<8x32xf32>
    %cst_58 = arith.constant dense<0.000000e+00> : vector<1x32xf32>
    %80 = tpu.matmul %78, %79, %cst_58 {dimension_numbers = #tpu.dot_dimension_numbers<[1], [0], [0], [1], [0, 0, 1, 1], [], []>} : vector<1x8xf32>, vector<8x32xf32>, vector<1x32xf32> -> vector<1x32xf32>
    %c0_59 = arith.constant 0 : index
    %c0_60 = arith.constant 0 : index
    %81 = vector.load %arg9[%c0_59, %c0_60] : memref<1x32xf32, #tpu.memory_space<vmem>>, vector<1x32xf32>
    %82 = arith.addf %80, %81 : vector<1x32xf32>
    %83 = vector.broadcast %82 : vector<1x32xf32> to vector<256x32xf32>
    %84 = arith.addf %76, %83 : vector<256x32xf32>
    %cst_61 = arith.constant dense<0.000000e+00> : vector<32xf32>
    %85 = vector.multi_reduction <add>, %84, %cst_61 [0] : vector<256x32xf32> to vector<32xf32>
    %86 = vector.shape_cast %85 : vector<32xf32> to vector<1x32xf32>
    %87 = arith.mulf %84, %84 : vector<256x32xf32>
    %cst_62 = arith.constant dense<0.000000e+00> : vector<32xf32>
    %88 = vector.multi_reduction <add>, %87, %cst_62 [0] : vector<256x32xf32> to vector<32xf32>
    %89 = vector.shape_cast %88 : vector<32xf32> to vector<1x32xf32>
    %c0_63 = arith.constant 0 : index
    %c0_64 = arith.constant 0 : index
    %90 = vector.load %arg12[%c0_63, %c0_64] : memref<32x32xf32, #tpu.memory_space<vmem>>, vector<32x32xf32>
    %cst_65 = arith.constant dense<0.000000e+00> : vector<1x32xf32>
    %91 = tpu.matmul %86, %90, %cst_65 {dimension_numbers = #tpu.dot_dimension_numbers<[1], [0], [0], [1], [0, 0, 1, 1], [], []>} : vector<1x32xf32>, vector<32x32xf32>, vector<1x32xf32> -> vector<1x32xf32>
    %c0_66 = arith.constant 0 : index
    %c0_67 = arith.constant 0 : index
    %92 = vector.load %arg12[%c0_66, %c0_67] : memref<32x32xf32, #tpu.memory_space<vmem>>, vector<32x32xf32>
    %cst_68 = arith.constant dense<0.000000e+00> : vector<1x32xf32>
    %93 = tpu.matmul %89, %92, %cst_68 {dimension_numbers = #tpu.dot_dimension_numbers<[1], [0], [0], [1], [0, 0, 1, 1], [], []>} : vector<1x32xf32>, vector<32x32xf32>, vector<1x32xf32> -> vector<1x32xf32>
    %94 = arith.mulf %91, %91 : vector<1x32xf32>
    %95 = arith.subf %93, %94 : vector<1x32xf32>
    %cst_69 = arith.constant 9.99999974E-6 : f32
    %96 = vector.broadcast %cst_69 : f32 to vector<1x32xf32>
    %97 = arith.addf %95, %96 : vector<1x32xf32>
    %98 = math.rsqrt %97 : vector<1x32xf32>
    %99 = vector.broadcast %91 : vector<1x32xf32> to vector<256x32xf32>
    %100 = arith.subf %84, %99 : vector<256x32xf32>
    %101 = vector.broadcast %98 : vector<1x32xf32> to vector<256x32xf32>
    %102 = arith.mulf %100, %101 : vector<256x32xf32>
    %c0_70 = arith.constant 0 : index
    %c0_71 = arith.constant 0 : index
    %103 = vector.load %arg10[%c0_70, %c0_71] : memref<1x32xf32, #tpu.memory_space<vmem>>, vector<1x32xf32>
    %104 = vector.broadcast %103 : vector<1x32xf32> to vector<256x32xf32>
    %105 = arith.mulf %102, %104 : vector<256x32xf32>
    %c0_72 = arith.constant 0 : index
    %c0_73 = arith.constant 0 : index
    %106 = vector.load %arg11[%c0_72, %c0_73] : memref<1x32xf32, #tpu.memory_space<vmem>>, vector<1x32xf32>
    %107 = vector.broadcast %106 : vector<1x32xf32> to vector<256x32xf32>
    %108 = arith.addf %105, %107 : vector<256x32xf32>
    %cst_74 = arith.constant 0.000000e+00 : f32
    %109 = vector.broadcast %cst_74 : f32 to vector<256x32xf32>
    %110 = arith.cmpf ogt, %108, %109 : vector<256x32xf32>
    %cst_75 = arith.constant 0.00999999977 : f32
    %111 = vector.broadcast %cst_75 : f32 to vector<256x32xf32>
    %112 = arith.mulf %111, %108 : vector<256x32xf32>
    %113 = arith.select %110, %108, %112 : vector<256x32xi1>, vector<256x32xf32>
    %114 = vector.shape_cast %113 : vector<256x32xf32> to vector<16x16x32xf32>
    %cst_76 = arith.constant 0.000000e+00 : f32
    %115 = vector.broadcast %cst_76 : f32 to vector<20x32x32xf32>
    %c0_77 = arith.constant 0 : index
    %c0_78 = arith.constant 0 : index
    %c0_79 = arith.constant 0 : index
    %116 = vector.load %arg19[%c0_77, %c0_78, %c0_79] : memref<20x32x32xf32, #tpu.memory_space<vmem>>, vector<20x32x32xf32>
    tpu.vector_store %arg19[%c0_77, %c0_78, %c0_79], %115 {strides = array<i32>} : memref<20x32x32xf32, #tpu.memory_space<vmem>>, vector<20x32x32xf32>,
    %c2_80 = arith.constant 2 : index
    %c8_81 = arith.constant 8 : index
    %c0_82 = arith.constant 0 : index
    %117 = vector.load %arg19[%c2_80, %c8_81, %c0_82] : memref<20x32x32xf32, #tpu.memory_space<vmem>>, vector<16x16x32xf32>
    tpu.vector_store %arg19[%c2_80, %c8_81, %c0_82], %114 {strides = array<i32>} : memref<20x32x32xf32, #tpu.memory_space<vmem>>, vector<16x16x32xf32>,
    %c0_83 = arith.constant 0 : index
    %c6_84 = arith.constant 6 : index
    %c0_85 = arith.constant 0 : index
    %118 = vector.load %arg19[%c0_83, %c6_84, %c0_85] : memref<20x32x32xf32, #tpu.memory_space<vmem>>, vector<20x16x32xf32>
    %c0_86 = arith.constant 0 : index
    %c7_87 = arith.constant 7 : index
    %c0_88 = arith.constant 0 : index
    %119 = vector.load %arg19[%c0_86, %c7_87, %c0_88] : memref<20x32x32xf32, #tpu.memory_space<vmem>>, vector<20x16x32xf32>
    %c0_89 = arith.constant 0 : index
    %c8_90 = arith.constant 8 : index
    %c0_91 = arith.constant 0 : index
    %120 = vector.load %arg19[%c0_89, %c8_90, %c0_91] : memref<20x32x32xf32, #tpu.memory_space<vmem>>, vector<20x16x32xf32>
    %c0_92 = arith.constant 0 : index
    %c9_93 = arith.constant 9 : index
    %c0_94 = arith.constant 0 : index
    %121 = vector.load %arg19[%c0_92, %c9_93, %c0_94] : memref<20x32x32xf32, #tpu.memory_space<vmem>>, vector<20x16x32xf32>
    %c0_95 = arith.constant 0 : index
    %c10_96 = arith.constant 10 : index
    %c0_97 = arith.constant 0 : index
    %122 = vector.load %arg19[%c0_95, %c10_96, %c0_97] : memref<20x32x32xf32, #tpu.memory_space<vmem>>, vector<20x16x32xf32>
    %123 = tpu.concatenate %118, %119, %120, %121, %122 in 2 : vector<20x16x32xf32>, vector<20x16x32xf32>, vector<20x16x32xf32>, vector<20x16x32xf32>, vector<20x16x32xf32> -> vector<20x16x160xf32>
    %124 = arith.truncf %123 : vector<20x16x160xf32> to vector<20x16x160xbf16>
    %cst_98 = arith.constant 0.000000e+00 : f32
    %125 = vector.broadcast %cst_98 : f32 to vector<256x32xf32>
    %126 = vector.extract_strided_slice %124 {offsets = [0, 0, 0], sizes = [16, 16, 160], strides = [1, 1, 1]} : vector<20x16x160xbf16> to vector<16x16x160xbf16>
    %127 = vector.shape_cast %126 : vector<16x16x160xbf16> to vector<256x160xbf16>
    %c0_99 = arith.constant 0 : index
    %c0_100 = arith.constant 0 : index
    %c0_101 = arith.constant 0 : index
    %128 = vector.load %arg13[%c0_99, %c0_100, %c0_101] : memref<5x160x32xbf16, #tpu.memory_space<vmem>>, vector<1x160x32xbf16>
    %129 = vector.shape_cast %128 : vector<1x160x32xbf16> to vector<160x32xbf16>
    %cst_102 = arith.constant dense<0.000000e+00> : vector<256x32xf32>
    %130 = tpu.matmul %127, %129, %cst_102 {dimension_numbers = #tpu.dot_dimension_numbers<[1], [0], [0], [1], [0, 0, 1, 1], [], []>} : vector<256x160xbf16>, vector<160x32xbf16>, vector<256x32xf32> -> vector<256x32xf32>
    %131 = arith.addf %125, %130 : vector<256x32xf32>
    %132 = vector.extract_strided_slice %124 {offsets = [1, 0, 0], sizes = [16, 16, 160], strides = [1, 1, 1]} : vector<20x16x160xbf16> to vector<16x16x160xbf16>
    %133 = vector.shape_cast %132 : vector<16x16x160xbf16> to vector<256x160xbf16>
    %c1_103 = arith.constant 1 : index
    %c0_104 = arith.constant 0 : index
    %c0_105 = arith.constant 0 : index
    %134 = vector.load %arg13[%c1_103, %c0_104, %c0_105] : memref<5x160x32xbf16, #tpu.memory_space<vmem>>, vector<1x160x32xbf16>
    %135 = vector.shape_cast %134 : vector<1x160x32xbf16> to vector<160x32xbf16>
    %cst_106 = arith.constant dense<0.000000e+00> : vector<256x32xf32>
    %136 = tpu.matmul %133, %135, %cst_106 {dimension_numbers = #tpu.dot_dimension_numbers<[1], [0], [0], [1], [0, 0, 1, 1], [], []>} : vector<256x160xbf16>, vector<160x32xbf16>, vector<256x32xf32> -> vector<256x32xf32>
    %137 = arith.addf %131, %136 : vector<256x32xf32>
    %138 = vector.extract_strided_slice %124 {offsets = [2, 0, 0], sizes = [16, 16, 160], strides = [1, 1, 1]} : vector<20x16x160xbf16> to vector<16x16x160xbf16>
    %139 = vector.shape_cast %138 : vector<16x16x160xbf16> to vector<256x160xbf16>
    %c2_107 = arith.constant 2 : index
    %c0_108 = arith.constant 0 : index
    %c0_109 = arith.constant 0 : index
    %140 = vector.load %arg13[%c2_107, %c0_108, %c0_109] : memref<5x160x32xbf16, #tpu.memory_space<vmem>>, vector<1x160x32xbf16>
    %141 = vector.shape_cast %140 : vector<1x160x32xbf16> to vector<160x32xbf16>
    %cst_110 = arith.constant dense<0.000000e+00> : vector<256x32xf32>
    %142 = tpu.matmul %139, %141, %cst_110 {dimension_numbers = #tpu.dot_dimension_numbers<[1], [0], [0], [1], [0, 0, 1, 1], [], []>} : vector<256x160xbf16>, vector<160x32xbf16>, vector<256x32xf32> -> vector<256x32xf32>
    %143 = arith.addf %137, %142 : vector<256x32xf32>
    %144 = vector.extract_strided_slice %124 {offsets = [3, 0, 0], sizes = [16, 16, 160], strides = [1, 1, 1]} : vector<20x16x160xbf16> to vector<16x16x160xbf16>
    %145 = vector.shape_cast %144 : vector<16x16x160xbf16> to vector<256x160xbf16>
    %c3_111 = arith.constant 3 : index
    %c0_112 = arith.constant 0 : index
    %c0_113 = arith.constant 0 : index
    %146 = vector.load %arg13[%c3_111, %c0_112, %c0_113] : memref<5x160x32xbf16, #tpu.memory_space<vmem>>, vector<1x160x32xbf16>
    %147 = vector.shape_cast %146 : vector<1x160x32xbf16> to vector<160x32xbf16>
    %cst_114 = arith.constant dense<0.000000e+00> : vector<256x32xf32>
    %148 = tpu.matmul %145, %147, %cst_114 {dimension_numbers = #tpu.dot_dimension_numbers<[1], [0], [0], [1], [0, 0, 1, 1], [], []>} : vector<256x160xbf16>, vector<160x32xbf16>, vector<256x32xf32> -> vector<256x32xf32>
    %149 = arith.addf %143, %148 : vector<256x32xf32>
    %150 = vector.extract_strided_slice %124 {offsets = [4, 0, 0], sizes = [16, 16, 160], strides = [1, 1, 1]} : vector<20x16x160xbf16> to vector<16x16x160xbf16>
    %151 = vector.shape_cast %150 : vector<16x16x160xbf16> to vector<256x160xbf16>
    %c4_115 = arith.constant 4 : index
    %c0_116 = arith.constant 0 : index
    %c0_117 = arith.constant 0 : index
    %152 = vector.load %arg13[%c4_115, %c0_116, %c0_117] : memref<5x160x32xbf16, #tpu.memory_space<vmem>>, vector<1x160x32xbf16>
    %153 = vector.shape_cast %152 : vector<1x160x32xbf16> to vector<160x32xbf16>
    %cst_118 = arith.constant dense<0.000000e+00> : vector<256x32xf32>
    %154 = tpu.matmul %151, %153, %cst_118 {dimension_numbers = #tpu.dot_dimension_numbers<[1], [0], [0], [1], [0, 0, 1, 1], [], []>} : vector<256x160xbf16>, vector<160x32xbf16>, vector<256x32xf32> -> vector<256x32xf32>
    %155 = arith.addf %149, %154 : vector<256x32xf32>
    %c0_119 = arith.constant 0 : index
    %c0_120 = arith.constant 0 : index
    %156 = vector.load %arg14[%c0_119, %c0_120] : memref<1x32xf32, #tpu.memory_space<vmem>>, vector<1x32xf32>
    %157 = vector.broadcast %156 : vector<1x32xf32> to vector<256x32xf32>
    %158 = arith.addf %155, %157 : vector<256x32xf32>
    %cst_121 = arith.constant 0.000000e+00 : f32
    %159 = vector.broadcast %cst_121 : f32 to vector<18x32x16xf32>
    %c0_122 = arith.constant 0 : index
    %c0_123 = arith.constant 0 : index
    %c0_124 = arith.constant 0 : index
    %160 = vector.load %arg20[%c0_122, %c0_123, %c0_124] : memref<18x32x16xf32, #tpu.memory_space<vmem>>, vector<18x32x16xf32>
    tpu.vector_store %arg20[%c0_122, %c0_123, %c0_124], %159 {strides = array<i32>} : memref<18x32x16xf32, #tpu.memory_space<vmem>>, vector<18x32x16xf32>,
    %c1_125 = arith.constant 1 : index
    %c8_126 = arith.constant 8 : index
    %c0_127 = arith.constant 0 : index
    %161 = vector.load %arg20[%c1_125, %c8_126, %c0_127] : memref<18x32x16xf32, #tpu.memory_space<vmem>>, vector<16x16x16xf32>
    tpu.vector_store %arg20[%c1_125, %c8_126, %c0_127], %1 {strides = array<i32>} : memref<18x32x16xf32, #tpu.memory_space<vmem>>, vector<16x16x16xf32>,
    %c0_128 = arith.constant 0 : index
    %c7_129 = arith.constant 7 : index
    %c0_130 = arith.constant 0 : index
    %162 = vector.load %arg20[%c0_128, %c7_129, %c0_130] : memref<18x32x16xf32, #tpu.memory_space<vmem>>, vector<18x16x16xf32>
    %c0_131 = arith.constant 0 : index
    %c8_132 = arith.constant 8 : index
    %c0_133 = arith.constant 0 : index
    %163 = vector.load %arg20[%c0_131, %c8_132, %c0_133] : memref<18x32x16xf32, #tpu.memory_space<vmem>>, vector<18x16x16xf32>
    %c0_134 = arith.constant 0 : index
    %c9_135 = arith.constant 9 : index
    %c0_136 = arith.constant 0 : index
    %164 = vector.load %arg20[%c0_134, %c9_135, %c0_136] : memref<18x32x16xf32, #tpu.memory_space<vmem>>, vector<18x16x16xf32>
    %165 = tpu.concatenate %162, %163, %164 in 2 : vector<18x16x16xf32>, vector<18x16x16xf32>, vector<18x16x16xf32> -> vector<18x16x48xf32>
    %166 = arith.truncf %165 : vector<18x16x48xf32> to vector<18x16x48xbf16>
    %cst_137 = arith.constant 0.000000e+00 : f32
    %167 = vector.broadcast %cst_137 : f32 to vector<256x32xf32>
    %168 = vector.extract_strided_slice %166 {offsets = [0, 0, 0], sizes = [16, 16, 48], strides = [1, 1, 1]} : vector<18x16x48xbf16> to vector<16x16x48xbf16>
    %169 = vector.shape_cast %168 : vector<16x16x48xbf16> to vector<256x48xbf16>
    %c0_138 = arith.constant 0 : index
    %c0_139 = arith.constant 0 : index
    %c0_140 = arith.constant 0 : index
    %170 = vector.load %arg15[%c0_138, %c0_139, %c0_140] : memref<3x48x32xbf16, #tpu.memory_space<vmem>>, vector<1x48x32xbf16>
    %171 = vector.shape_cast %170 : vector<1x48x32xbf16> to vector<48x32xbf16>
    %cst_141 = arith.constant dense<0.000000e+00> : vector<256x32xf32>
    %172 = tpu.matmul %169, %171, %cst_141 {dimension_numbers = #tpu.dot_dimension_numbers<[1], [0], [0], [1], [0, 0, 1, 1], [], []>} : vector<256x48xbf16>, vector<48x32xbf16>, vector<256x32xf32> -> vector<256x32xf32>
    %173 = arith.addf %167, %172 : vector<256x32xf32>
    %174 = vector.extract_strided_slice %166 {offsets = [1, 0, 0], sizes = [16, 16, 48], strides = [1, 1, 1]} : vector<18x16x48xbf16> to vector<16x16x48xbf16>
    %175 = vector.shape_cast %174 : vector<16x16x48xbf16> to vector<256x48xbf16>
    %c1_142 = arith.constant 1 : index
    %c0_143 = arith.constant 0 : index
    %c0_144 = arith.constant 0 : index
    %176 = vector.load %arg15[%c1_142, %c0_143, %c0_144] : memref<3x48x32xbf16, #tpu.memory_space<vmem>>, vector<1x48x32xbf16>
    %177 = vector.shape_cast %176 : vector<1x48x32xbf16> to vector<48x32xbf16>
    %cst_145 = arith.constant dense<0.000000e+00> : vector<256x32xf32>
    %178 = tpu.matmul %175, %177, %cst_145 {dimension_numbers = #tpu.dot_dimension_numbers<[1], [0], [0], [1], [0, 0, 1, 1], [], []>} : vector<256x48xbf16>, vector<48x32xbf16>, vector<256x32xf32> -> vector<256x32xf32>
    %179 = arith.addf %173, %178 : vector<256x32xf32>
    %180 = vector.extract_strided_slice %166 {offsets = [2, 0, 0], sizes = [16, 16, 48], strides = [1, 1, 1]} : vector<18x16x48xbf16> to vector<16x16x48xbf16>
    %181 = vector.shape_cast %180 : vector<16x16x48xbf16> to vector<256x48xbf16>
    %c2_146 = arith.constant 2 : index
    %c0_147 = arith.constant 0 : index
    %c0_148 = arith.constant 0 : index
    %182 = vector.load %arg15[%c2_146, %c0_147, %c0_148] : memref<3x48x32xbf16, #tpu.memory_space<vmem>>, vector<1x48x32xbf16>
    %183 = vector.shape_cast %182 : vector<1x48x32xbf16> to vector<48x32xbf16>
    %cst_149 = arith.constant dense<0.000000e+00> : vector<256x32xf32>
    %184 = tpu.matmul %181, %183, %cst_149 {dimension_numbers = #tpu.dot_dimension_numbers<[1], [0], [0], [1], [0, 0, 1, 1], [], []>} : vector<256x48xbf16>, vector<48x32xbf16>, vector<256x32xf32> -> vector<256x32xf32>
    %185 = arith.addf %179, %184 : vector<256x32xf32>
    %c0_150 = arith.constant 0 : index
    %c0_151 = arith.constant 0 : index
    %186 = vector.load %arg16[%c0_150, %c0_151] : memref<1x32xf32, #tpu.memory_space<vmem>>, vector<1x32xf32>
    %187 = vector.broadcast %186 : vector<1x32xf32> to vector<256x32xf32>
    %188 = arith.addf %185, %187 : vector<256x32xf32>
    %189 = arith.addf %158, %188 : vector<256x32xf32>
    %190 = vector.shape_cast %189 : vector<256x32xf32> to vector<1x16x16x32xf32>
    %c0_152 = arith.constant 0 : index
    %c0_153 = arith.constant 0 : index
    %c0_154 = arith.constant 0 : index
    %c0_155 = arith.constant 0 : index
    %191 = vector.load %arg17[%c0_152, %c0_153, %c0_154, %c0_155] : memref<1x16x16x32xf32, #tpu.memory_space<vmem>>, vector<1x16x16x32xf32>
    tpu.vector_store %arg17[%c0_152, %c0_153, %c0_154, %c0_155], %190 {strides = array<i32>} : memref<1x16x16x32xf32, #tpu.memory_space<vmem>>, vector<1x16x16x32xf32>,
    return
  }
  func.func @transform_0(%arg0: i32) -> (i32, i32, i32, i32) {
    %c0_i32 = arith.constant 0 : i32
    %c0_i32_0 = arith.constant 0 : i32
    %c0_i32_1 = arith.constant 0 : i32
    %c0_i32_2 = arith.constant 0 : i32
    return %arg0, %c0_i32, %c0_i32_0, %c0_i32_1 : i32, i32, i32, i32
  }
  func.func @transform_1(%arg0: i32) -> (i32, i32, i32) {
    %c0_i32 = arith.constant 0 : i32
    %c0_i32_0 = arith.constant 0 : i32
    %c0_i32_1 = arith.constant 0 : i32
    return %arg0, %c0_i32, %c0_i32_0 : i32, i32, i32
  }
  func.func @transform_2(%arg0: i32) -> (i32, i32) {
    %c0_i32 = arith.constant 0 : i32
    %c0_i32_0 = arith.constant 0 : i32
    %c0_i32_1 = arith.constant 0 : i32
    return %c0_i32, %c0_i32_0 : i32, i32
  }
  func.func @transform_3(%arg0: i32) -> (i32, i32) {
    %c0_i32 = arith.constant 0 : i32
    %c0_i32_0 = arith.constant 0 : i32
    %c0_i32_1 = arith.constant 0 : i32
    return %c0_i32, %c0_i32_0 : i32, i32
  }
  func.func @transform_4(%arg0: i32) -> (i32, i32) {
    %c0_i32 = arith.constant 0 : i32
    %c0_i32_0 = arith.constant 0 : i32
    %c0_i32_1 = arith.constant 0 : i32
    return %c0_i32, %c0_i32_0 : i32, i32
  }
  func.func @transform_5(%arg0: i32) -> (i32, i32, i32) {
    %c0_i32 = arith.constant 0 : i32
    %c0_i32_0 = arith.constant 0 : i32
    %c0_i32_1 = arith.constant 0 : i32
    %c0_i32_2 = arith.constant 0 : i32
    return %c0_i32, %c0_i32_0, %c0_i32_1 : i32, i32, i32
  }
  func.func @transform_6(%arg0: i32) -> (i32, i32) {
    %c0_i32 = arith.constant 0 : i32
    %c0_i32_0 = arith.constant 0 : i32
    %c0_i32_1 = arith.constant 0 : i32
    return %c0_i32, %c0_i32_0 : i32, i32
  }
  func.func @transform_7(%arg0: i32) -> (i32, i32) {
    %c0_i32 = arith.constant 0 : i32
    %c0_i32_0 = arith.constant 0 : i32
    %c0_i32_1 = arith.constant 0 : i32
    return %c0_i32, %c0_i32_0 : i32, i32
  }
  func.func @transform_8(%arg0: i32) -> (i32, i32) {
    %c0_i32 = arith.constant 0 : i32
    %c0_i32_0 = arith.constant 0 : i32
    %c0_i32_1 = arith.constant 0 : i32
    return %c0_i32, %c0_i32_0 : i32, i32
  }
  func.func @transform_9(%arg0: i32) -> (i32, i32) {
    %c0_i32 = arith.constant 0 : i32
    %c0_i32_0 = arith.constant 0 : i32
    %c0_i32_1 = arith.constant 0 : i32
    return %c0_i32, %c0_i32_0 : i32, i32
  }
  func.func @transform_10(%arg0: i32) -> (i32, i32) {
    %c0_i32 = arith.constant 0 : i32
    %c0_i32_0 = arith.constant 0 : i32
    %c0_i32_1 = arith.constant 0 : i32
    return %c0_i32, %c0_i32_0 : i32, i32
  }
  func.func @transform_11(%arg0: i32) -> (i32, i32) {
    %c0_i32 = arith.constant 0 : i32
    %c0_i32_0 = arith.constant 0 : i32
    %c0_i32_1 = arith.constant 0 : i32
    return %c0_i32, %c0_i32_0 : i32, i32
  }
  func.func @transform_12(%arg0: i32) -> (i32, i32, i32) {
    %c0_i32 = arith.constant 0 : i32
    %c0_i32_0 = arith.constant 0 : i32
    %c0_i32_1 = arith.constant 0 : i32
    %c0_i32_2 = arith.constant 0 : i32
    return %c0_i32, %c0_i32_0, %c0_i32_1 : i32, i32, i32
  }
  func.func @transform_13(%arg0: i32) -> (i32, i32) {
    %c0_i32 = arith.constant 0 : i32
    %c0_i32_0 = arith.constant 0 : i32
    %c0_i32_1 = arith.constant 0 : i32
    return %c0_i32, %c0_i32_0 : i32, i32
  }
  func.func @transform_14(%arg0: i32) -> (i32, i32, i32) {
    %c0_i32 = arith.constant 0 : i32
    %c0_i32_0 = arith.constant 0 : i32
    %c0_i32_1 = arith.constant 0 : i32
    %c0_i32_2 = arith.constant 0 : i32
    return %c0_i32, %c0_i32_0, %c0_i32_1 : i32, i32, i32
  }
  func.func @transform_15(%arg0: i32) -> (i32, i32) {
    %c0_i32 = arith.constant 0 : i32
    %c0_i32_0 = arith.constant 0 : i32
    %c0_i32_1 = arith.constant 0 : i32
    return %c0_i32, %c0_i32_0 : i32, i32
  }
  func.func @transform_16(%arg0: i32) -> (i32, i32, i32, i32) {
    %c0_i32 = arith.constant 0 : i32
    %c0_i32_0 = arith.constant 0 : i32
    %c0_i32_1 = arith.constant 0 : i32
    %c0_i32_2 = arith.constant 0 : i32
    return %arg0, %c0_i32, %c0_i32_0, %c0_i32_1 : i32, i32, i32, i32
  }
}

</mosaic_0001>

<bundles_post_ra>
// kernel: tpu_custom_call.1
= control target key start
LH: loop header
LB: loop body
LE: loop exit
PB: predicated region body
PF: predicated region fallthrough
CT: control target
= control target key end

     0   :  { %s14622_s0 = inlined_call_operand.vmem [shape: f32[2,16,16,16], index: 0, kind: input, shape index: {}]   ;;  %s14623_s1 = inlined_call_operand.vmem [shape: f32[2,1,8], index: 1, kind: input, shape index: {}]   ;;  %s14624_s2 = inlined_call_operand.vmem [shape: f32[1,16], index: 2, kind: input, shape index: {}]   ;;  %s14625_s3 = inlined_call_operand.vmem [shape: f32[1,16], index: 3, kind: input, shape index: {}]   ;;  %s14626_s4 = inlined_call_operand.vmem [shape: f32[16,16], index: 4, kind: input, shape index: {}]   ;;  %s14627_s5 = inlined_call_operand.vmem [shape: bf16[5,80,32], index: 5, kind: input, shape index: {}]   ;;  %s14628_s6 = inlined_call_operand.vmem [shape: f32[1,32], index: 6, kind: input, shape index: {}]   ;;  %s14629_s7 = inlined_call_operand.vmem [shape: f32[8,32], index: 7, kind: input, shape index: {}]   ;;  %s14630_s8 = inlined_call_operand.vmem [shape: f32[1,32], index: 8, kind: input, shape index: {}]   ;;  %s14631_s9 = inlined_call_operand.vmem [shape: f32[1,32], index: 9, kind: input, shape index: {}]   ;;  %s14632_s10 = inlined_call_operand.vmem [shape: f32[1,32], index: 10, kind: input, shape index: {}]   ;;  %s14633_s11 = inlined_call_operand.vmem [shape: f32[32,32], index: 11, kind: input, shape index: {}]   ;;  %s14634_s12 = inlined_call_operand.vmem [shape: bf16[5,160,32], index: 12, kind: input, shape index: {}]   ;;  %s14635_s13 = inlined_call_operand.vmem [shape: f32[1,32], index: 13, kind: input, shape index: {}]   ;;  %s14636_s14 = inlined_call_operand.vmem [shape: bf16[3,48,32], index: 14, kind: input, shape index: {}]   ;;  %s14637_s15 = inlined_call_operand.vmem [shape: f32[1,32], index: 15, kind: input, shape index: {}]   ;;  %s14638_s16 = inlined_call_operand.hbm [shape: f32[2,16,16,32], index: 16, kind: output, shape index: {}]  }
   0x1   :  { %14712 = sst [smem:[#allocation44_spill]] %s14622_s0 }
   0x2   :  { %14713 = sst [smem:[#allocation45_spill]] %s14623_s1 }
   0x3   :  { %14714 = sst [smem:[#allocation46_spill]] %s14624_s2 }
   0x4   :  { %14715 = sst [smem:[#allocation47_spill]] %s14625_s3 }
   0x5   :  { %14716 = sst [smem:[#allocation48_spill]] %s14626_s4 }
   0x6   :  { %21 = vsyncpa [#allocation6], 0 }
   0x7   :  { %23 = vsyncpa [#allocation6 + $0x1], 0  ;;  %s10354_s21 = smov 0   ;;  %s10356_s22 = smov 0  }
   0x8   :  { %s10358_s23 = smov 0   ;;  %s10360_s24 = smov 0  }
   0x9 LB: > { %s10375_s25 = sadd.s32 4294967295, %s10255_s24   ;;  %s7940_s26 = sadd.s32 4294967294, %s10255_s24   ;;  %s10255_s24 = sphi %s10360_s24, %s15070_s24   ;;  %s10251_s23 = sphi %s10358_s23, %s15069_s23   ;;  %s10247_s22 = sphi %s10356_s22, %s15068_s22   ;;  %s10243_s21 = sphi %s10354_s21, %s15067_s21  }
   0xa   : > { %s10379_s27 = sadd.s32 1, %s10255_s24   ;;  %s382_s28 = sadd.s32 1, %s10251_s23 }
   0xb   : > { %s379_s29 = ssub.s32 %s10255_s24, %s10379_s27  ;;  %p392_p0 = scmp.ne.s32.totalorder %s10251_s23, %s10247_s22 }
   0xc   : > { %p380_p1 = scmp.eq.s32.totalorder %s379_s29, 0  ;;  %p393_p2 = scmp.eq.s32.totalorder %s10375_s25, 1 }
   0xd   : > { %p398_p3 = scmp.ne.s32.totalorder %s10247_s22, %s10243_s21  ;;  %p399_p4 = scmp.eq.s32.totalorder %s7940_s26, 1 }
   0xe   : > { %s10390_s30 = scalar_select %p380_p1, %s10251_s23, %s382_s28  }
   0xf   : > { %p10392_p5 = por %p393_p2, %p392_p0  ;;  %p10396_p6 = por %p399_p4, %p398_p3 }
  0x10   : > { %p7943_p7 = scmp.ge.s32.totalorder %s10255_s24, 1  ;;  %p473_p8 = scmp.lt.s32.totalorder %s10255_s24, 3 }
  0x12   : > { %p474_p9 = pnand %p7943_p7, %p473_p8 }
  0x14   : > { %477 = sbr.rel (%p474_p9) target bundleno = 2382 (0x94e), region = 84 }
  0x1b   : > { %s14719_s4 = sld [smem:[#allocation48_spill]]  ;;  %p526_p10 = scmp.lt.s32.totalorder %s10375_s25, 1  ;;  %v14639_v2 = vmov 0.0|0.0   ;;  %vm10258_vm0 = vmmov 0   ;;  %v14641_v4 = vmov 0.0   ;;  %vm14692_vm1 = vcmask 130048  }
  0x1c   : > { %8935 = vmatprep.subr.bf16.mxu1 %v14639_v2  ;;  %8574 = vmatprep.mubr.msk.f32.mxu1 %vm10258_vm0, %v14641_v4  ;;  %1206 = vst.msk [vmem:[#allocation2 + $0x230] sm:$0xff] %vm14692_vm1, %v14641_v4  ;;  %6568 = vst.msk [vmem:[#allocation4 + $0x190] sm:$0xff] %vm14692_vm1, %v14641_v4  ;;  %s14721_s20 = sld [smem:[#allocation44_spill]]  ;;  %s14683_s18 = smov 48  }
  0x1d   : > { %s10415_s28 = scalar_select %p526_p10, %s10375_s25, 1  ;;  %6571 = vst.msk [vmem:[#allocation4 + $0x1a8] sm:$0xff] %vm14692_vm1, %v14641_v4  ;;  %6572 = vst.msk [vmem:[#allocation4 + $0x1b0] sm:$0xff] %vm14692_vm1, %v14641_v4 }
  0x1e   : > { %6575 = vst.msk [vmem:[#allocation4 + $0x1c8] sm:$0xff] %vm14692_vm1, %v14641_v4  ;;  %6576 = vst.msk [vmem:[#allocation4 + $0x1d0] sm:$0xff] %vm14692_vm1, %v14641_v4  ;;  %s14687_s19 = smov 32   ;;  %s14759_s2 = sld [smem:[#allocation46_spill]] }
  0x1f   : > { %6579 = vst.msk [vmem:[#allocation4 + $0x1e8] sm:$0xff] %vm14692_vm1, %v14641_v4  ;;  %6580 = vst.msk [vmem:[#allocation4 + $0x1f0] sm:$0xff] %vm14692_vm1, %v14641_v4  ;;  %s8388_s29 = sshll.u32 %s10415_s28, 8  ;;  %s14760_s3 = sld [smem:[#allocation47_spill]] }
  0x20   : > { %6583 = vst.msk [vmem:[#allocation4 + $0x208] sm:$0xff] %vm14692_vm1, %v14641_v4  ;;  %6584 = vst.msk [vmem:[#allocation4 + $0x210] sm:$0xff] %vm14692_vm1, %v14641_v4  ;;  %s14778_s1 = sld [smem:[#allocation45_spill]] }
  0x21   : > { %v738_v0 = vld [vmem:[%s14719_s4] sm:$0xff]  ;;  %v739_v1 = vld [vmem:[%s14719_s4 + $0x8] sm:$0xff]  ;;  %1136 = vst.msk [vmem:[#allocation2] sm:$0xff] %vm14692_vm1, %v14641_v4  ;;  %1137 = vst.msk [vmem:[#allocation2 + $0x8] sm:$0xff] %vm14692_vm1, %v14641_v4  ;;  %s14797_s4 = smov 16  }
  0x22   : > { %v10410_v3 = vpack.c.bf16 %v739_v1, %v738_v0  ;;  %1138 = vst.msk [vmem:[#allocation2 + $0x10] sm:$0xff] %vm14692_vm1, %v14641_v4  ;;  %1139 = vst.msk [vmem:[#allocation2 + $0x18] sm:$0xff] %vm14692_vm1, %v14641_v4  ;;  %s10727_s26 = scalar_lea.vmem %s14721_s20, %s8388_s29  ;;  %s14685_s29 = smov 16  }
  0x23   : > { %1140 = vst.msk [vmem:[#allocation2 + $0x20] sm:$0xff] %vm14692_vm1, %v14641_v4  ;;  %1141 = vst.msk [vmem:[#allocation2 + $0x28] sm:$0xff] %vm14692_vm1, %v14641_v4  ;;  %v10730_v5 = vld [vmem:[%s10727_s26] sm:$0xff]  ;;  %v10733_v6 = vld [vmem:[%s10727_s26 + $0x8] sm:$0xff]  ;;  %s14681_s20 = smov 64  }
  0x24   : > { %14720 = vst [vmem:[#allocation8_spill] sm:$0xff] %v10410_v3  ;;  %1142 = vst.msk [vmem:[#allocation2 + $0x30] sm:$0xff] %vm14692_vm1, %v14641_v4  ;;  %8937 = vmatpush3.bf16.msra.mxu1 %v10410_v3  ;;  %v10736_v7 = vld [vmem:[%s10727_s26 + $0x10] sm:$0xff]  ;;  %v10739_v8 = vld [vmem:[%s10727_s26 + $0x18] sm:$0xff]  ;;  %v568_v11 = vsel %vm14692_vm1, %v10730_v5, 0.0  ;;  %v569_v12 = vsel %vm14692_vm1, %v10733_v6, 0.0 }
  0x25   : > { %1143 = vst.msk [vmem:[#allocation2 + $0x38] sm:$0xff] %vm14692_vm1, %v14641_v4  ;;  %1144 = vst.msk [vmem:[#allocation2 + $0x40] sm:$0xff] %vm14692_vm1, %v14641_v4  ;;  %8938 = vmatprep.subr.bf16.mxu1 %v14639_v2  ;;  %v10742_v9 = vld [vmem:[%s10727_s26 + $0x20] sm:$0xff]  ;;  %v10745_v10 = vld [vmem:[%s10727_s26 + $0x28] sm:$0xff]  ;;  %v571_v13 = vsel %vm14692_vm1, %v10736_v7, 0.0  ;;  %v570_v17 = vadd.f32 %v569_v12, %v568_v11  ;;  %v573_v18 = vsel %vm14692_vm1, %v10739_v8, 0.0  ;;  %v639_v3 = vmul.f32 %v10736_v7, %v10736_v7 }
  0x26   : > { %1145 = vst.msk [vmem:[#allocation2 + $0x48] sm:$0xff] %vm14692_vm1, %v14641_v4  ;;  %1146 = vst.msk [vmem:[#allocation2 + $0x50] sm:$0xff] %vm14692_vm1, %v14641_v4  ;;  %v10760_v14 = vld [vmem:[%s10727_s26 + $0x30] sm:$0xff]  ;;  %v10763_v15 = vld [vmem:[%s10727_s26 + $0x38] sm:$0xff]  ;;  %v575_v19 = vsel %vm14692_vm1, %v10742_v9, 0.0  ;;  %v10774_v20 = vsel %vm14692_vm1, %v10745_v10, 0.0 }
  0x27   : > { %1147 = vst.msk [vmem:[#allocation2 + $0x58] sm:$0xff] %vm14692_vm1, %v14641_v4  ;;  %1148 = vst.msk [vmem:[#allocation2 + $0x60] sm:$0xff] %vm14692_vm1, %v14641_v4  ;;  %v10766_v16 = vld [vmem:[%s10727_s26 + $0x40] sm:$0xff]  ;;  %v10783_v21 = vld [vmem:[%s10727_s26 + $0x48] sm:$0xff]  ;;  %v10793_v24 = vsel %vm14692_vm1, %v10760_v14, 0.0  ;;  %v10797_v25 = vsel %vm14692_vm1, %v10763_v15, 0.0  ;;  %v572_v30 = vadd.f32 %v571_v13, %v570_v17 }
  0x28   : > { %1149 = vst.msk [vmem:[#allocation2 + $0x68] sm:$0xff] %vm14692_vm1, %v14641_v4  ;;  %1150 = vst.msk [vmem:[#allocation2 + $0x70] sm:$0xff] %vm14692_vm1, %v14641_v4  ;;  %v10786_v22 = vld [vmem:[%s10727_s26 + $0x50] sm:$0xff]  ;;  %v10789_v23 = vld [vmem:[%s10727_s26 + $0x58] sm:$0xff]  ;;  %v10801_v26 = vsel %vm14692_vm1, %v10766_v16, 0.0  ;;  %v10820_v31 = vsel %vm14692_vm1, %v10783_v21, 0.0 }
  0x29   : > { %1151 = vst.msk [vmem:[#allocation2 + $0x78] sm:$0xff] %vm14692_vm1, %v14641_v4  ;;  %1152 = vst.msk [vmem:[#allocation2 + $0x80] sm:$0xff] %vm14692_vm1, %v14641_v4  ;;  %v10810_v27 = vld [vmem:[%s10727_s26 + $0x60] sm:$0xff]  ;;  %v10813_v28 = vld [vmem:[%s10727_s26 + $0x68] sm:$0xff]  ;;  %v10824_v32 = vsel %vm14692_vm1, %v10786_v22, 0.0  ;;  %v10828_v33 = vsel %vm14692_vm1, %v10789_v23, 0.0  ;;  %v574_v43 = vadd.f32 %v573_v18, %v572_v30 }
  0x2a   : > { %1153 = vst.msk [vmem:[#allocation2 + $0x88] sm:$0xff] %vm14692_vm1, %v14641_v4  ;;  %1154 = vst.msk [vmem:[#allocation2 + $0x90] sm:$0xff] %vm14692_vm1, %v14641_v4  ;;  %v10816_v29 = vld [vmem:[%s10727_s26 + $0x70] sm:$0xff]  ;;  %v10837_v34 = vld [vmem:[%s10727_s26 + $0x78] sm:$0xff]  ;;  %v10847_v37 = vsel %vm14692_vm1, %v10810_v27, 0.0  ;;  %v10851_v38 = vsel %vm14692_vm1, %v10813_v28, 0.0 }
  0x2b   : > { %1155 = vst.msk [vmem:[#allocation2 + $0x98] sm:$0xff] %vm14692_vm1, %v14641_v4  ;;  %1156 = vst.msk [vmem:[#allocation2 + $0xa0] sm:$0xff] %vm14692_vm1, %v14641_v4  ;;  %v10840_v35 = vld [vmem:[%s10727_s26 + $0x80] sm:$0xff]  ;;  %v10843_v36 = vld [vmem:[%s10727_s26 + $0x88] sm:$0xff]  ;;  %v10855_v39 = vsel %vm14692_vm1, %v10816_v29, 0.0  ;;  %v10874_v44 = vsel %vm14692_vm1, %v10837_v34, 0.0  ;;  %v576_v56 = vadd.f32 %v575_v19, %v574_v43 }
  0x2c   : > { %1157 = vst.msk [vmem:[#allocation2 + $0xa8] sm:$0xff] %vm14692_vm1, %v14641_v4  ;;  %1158 = vst.msk [vmem:[#allocation2 + $0xb0] sm:$0xff] %vm14692_vm1, %v14641_v4  ;;  %v10864_v40 = vld [vmem:[%s10727_s26 + $0x90] sm:$0xff]  ;;  %v10867_v41 = vld [vmem:[%s10727_s26 + $0x98] sm:$0xff]  ;;  %v10878_v45 = vsel %vm14692_vm1, %v10840_v35, 0.0  ;;  %v10882_v46 = vsel %vm14692_vm1, %v10843_v36, 0.0 }
  0x2d   : > { %1159 = vst.msk [vmem:[#allocation2 + $0xb8] sm:$0xff] %vm14692_vm1, %v14641_v4  ;;  %1160 = vst.msk [vmem:[#allocation2 + $0xc0] sm:$0xff] %vm14692_vm1, %v14641_v4  ;;  %v10870_v42 = vld [vmem:[%s10727_s26 + $0xa0] sm:$0xff]  ;;  %v10891_v47 = vld [vmem:[%s10727_s26 + $0xa8] sm:$0xff]  ;;  %v10901_v50 = vsel %vm14692_vm1, %v10864_v40, 0.0  ;;  %v10905_v51 = vsel %vm14692_vm1, %v10867_v41, 0.0  ;;  %v578_v13 = vadd.f32 %v10774_v20, %v576_v56  ;;  %v637_v56 = vmul.f32 %v10730_v5, %v10730_v5 }
  0x2e   : > { %1161 = vst.msk [vmem:[#allocation2 + $0xc8] sm:$0xff] %vm14692_vm1, %v14641_v4  ;;  %1162 = vst.msk [vmem:[#allocation2 + $0xd0] sm:$0xff] %vm14692_vm1, %v14641_v4  ;;  %v10894_v48 = vld [vmem:[%s10727_s26 + $0xb0] sm:$0xff]  ;;  %v10897_v49 = vld [vmem:[%s10727_s26 + $0xb8] sm:$0xff]  ;;  %v10909_v52 = vsel %vm14692_vm1, %v10870_v42, 0.0  ;;  %v10928_v57 = vsel %vm14692_vm1, %v10891_v47, 0.0 }
  0x2f   : > { %1163 = vst.msk [vmem:[#allocation2 + $0xd8] sm:$0xff] %vm14692_vm1, %v14641_v4  ;;  %1164 = vst.msk [vmem:[#allocation2 + $0xe0] sm:$0xff] %vm14692_vm1, %v14641_v4  ;;  %v10918_v53 = vld [vmem:[%s10727_s26 + $0xc0] sm:$0xff]  ;;  %v10921_v54 = vld [vmem:[%s10727_s26 + $0xc8] sm:$0xff]  ;;  %v10932_v58 = vsel %vm14692_vm1, %v10894_v48, 0.0  ;;  %v10936_v59 = vsel %vm14692_vm1, %v10897_v49, 0.0  ;;  %v580_v43 = vadd.f32 %v10793_v24, %v578_v13  ;;  %v642_v24 = vmul.f32 %v10745_v10, %v10745_v10 }
  0x30   : > { %1165 = vst.msk [vmem:[#allocation2 + $0xe8] sm:$0xff] %vm14692_vm1, %v14641_v4  ;;  %1166 = vst.msk [vmem:[#allocation2 + $0xf0] sm:$0xff] %vm14692_vm1, %v14641_v4  ;;  %v10924_v55 = vld [vmem:[%s10727_s26 + $0xd0] sm:$0xff]  ;;  %v10945_v60 = vld [vmem:[%s10727_s26 + $0xd8] sm:$0xff]  ;;  %v10955_v63 = vsel %vm14692_vm1, %v10918_v53, 0.0  ;;  %v10959_v0 = vsel %vm14692_vm1, %v10921_v54, 0.0  ;;  %v643_v13 = vmul.f32 %v10760_v14, %v10760_v14 }
  0x31   : > { %1167 = vst.msk [vmem:[#allocation2 + $0xf8] sm:$0xff] %vm14692_vm1, %v14641_v4  ;;  %1168 = vst.msk [vmem:[#allocation2 + $0x100] sm:$0xff] %vm14692_vm1, %v14641_v4  ;;  %v10948_v61 = vld [vmem:[%s10727_s26 + $0xe0] sm:$0xff]  ;;  %v10951_v62 = vld [vmem:[%s10727_s26 + $0xe8] sm:$0xff]  ;;  %v10963_v1 = vsel %vm14692_vm1, %v10924_v55, 0.0  ;;  %v10980_v17 = vsel %vm14692_vm1, %v10945_v60, 0.0  ;;  %v582_v2 = vadd.f32 %v10797_v25, %v580_v43  ;;  %v644_v25 = vmul.f32 %v10763_v15, %v10763_v15 }
  0x32   : > { %1169 = vst.msk [vmem:[#allocation2 + $0x108] sm:$0xff] %vm14692_vm1, %v14641_v4  ;;  %1170 = vst.msk [vmem:[#allocation2 + $0x110] sm:$0xff] %vm14692_vm1, %v14641_v4  ;;  %v10972_v11 = vld [vmem:[%s10727_s26 + $0xf0] sm:$0xff]  ;;  %v10975_v12 = vld [vmem:[%s10727_s26 + $0xf8] sm:$0xff]  ;;  %v10984_v18 = vsel %vm14692_vm1, %v10948_v61, 0.0  ;;  %v10988_v19 = vsel %vm14692_vm1, %v10951_v62, 0.0 }
  0x33   : > { %1171 = vst.msk [vmem:[#allocation2 + $0x118] sm:$0xff] %vm14692_vm1, %v14641_v4  ;;  %1172 = vst.msk [vmem:[#allocation2 + $0x120] sm:$0xff] %vm14692_vm1, %v14641_v4  ;;  %v10998_v20 = vsel %vm14692_vm1, %v10972_v11, 0.0  ;;  %v11002_v30 = vsel %vm14692_vm1, %v10975_v12, 0.0  ;;  %v584_v43 = vadd.f32 %v10801_v26, %v582_v2  ;;  %v651_v2 = vmul.f32 %v10816_v29, %v10816_v29 }
  0x34   : > { %1173 = vst.msk [vmem:[#allocation2 + $0x128] sm:$0xff] %vm14692_vm1, %v14641_v4  ;;  %1174 = vst.msk [vmem:[#allocation2 + $0x130] sm:$0xff] %vm14692_vm1, %v14641_v4 }
  0x35   : > { %1175 = vst.msk [vmem:[#allocation2 + $0x138] sm:$0xff] %vm14692_vm1, %v14641_v4  ;;  %1176 = vst.msk [vmem:[#allocation2 + $0x140] sm:$0xff] %vm14692_vm1, %v14641_v4  ;;  %v586_v26 = vadd.f32 %v10820_v31, %v584_v43  ;;  %v656_v43 = vmul.f32 %v10867_v41, %v10867_v41 }
  0x36   : > { %1177 = vst.msk [vmem:[#allocation2 + $0x148] sm:$0xff] %vm14692_vm1, %v14641_v4  ;;  %1178 = vst.msk [vmem:[#allocation2 + $0x150] sm:$0xff] %vm14692_vm1, %v14641_v4 }
  0x37   : > { %1179 = vst.msk [vmem:[#allocation2 + $0x158] sm:$0xff] %vm14692_vm1, %v14641_v4  ;;  %1180 = vst.msk [vmem:[#allocation2 + $0x160] sm:$0xff] %vm14692_vm1, %v14641_v4  ;;  %v588_v31 = vadd.f32 %v10824_v32, %v586_v26  ;;  %v662_v26 = vmul.f32 %v10921_v54, %v10921_v54 }
  0x38   : > { %1181 = vst.msk [vmem:[#allocation2 + $0x168] sm:$0xff] %vm14692_vm1, %v14641_v4  ;;  %1182 = vst.msk [vmem:[#allocation2 + $0x170] sm:$0xff] %vm14692_vm1, %v14641_v4 }
  0x39   : > { %1183 = vst.msk [vmem:[#allocation2 + $0x178] sm:$0xff] %vm14692_vm1, %v14641_v4  ;;  %1184 = vst.msk [vmem:[#allocation2 + $0x180] sm:$0xff] %vm14692_vm1, %v14641_v4  ;;  %v590_v32 = vadd.f32 %v10828_v33, %v588_v31 }
  0x3a   : > { %1185 = vst.msk [vmem:[#allocation2 + $0x188] sm:$0xff] %vm14692_vm1, %v14641_v4  ;;  %1186 = vst.msk [vmem:[#allocation2 + $0x190] sm:$0xff] %vm14692_vm1, %v14641_v4 }
  0x3b   : > { %1187 = vst.msk [vmem:[#allocation2 + $0x198] sm:$0xff] %vm14692_vm1, %v14641_v4  ;;  %1188 = vst.msk [vmem:[#allocation2 + $0x1a0] sm:$0xff] %vm14692_vm1, %v14641_v4 }
  0x3c   : > { %1189 = vst.msk [vmem:[#allocation2 + $0x1a8] sm:$0xff] %vm14692_vm1, %v14641_v4  ;;  %1190 = vst.msk [vmem:[#allocation2 + $0x1b0] sm:$0xff] %vm14692_vm1, %v14641_v4 }
  0x3d   : > { %1191 = vst.msk [vmem:[#allocation2 + $0x1b8] sm:$0xff] %vm14692_vm1, %v14641_v4  ;;  %1192 = vst.msk [vmem:[#allocation2 + $0x1c0] sm:$0xff] %vm14692_vm1, %v14641_v4 }
  0x3e   : > { %1193 = vst.msk [vmem:[#allocation2 + $0x1c8] sm:$0xff] %vm14692_vm1, %v14641_v4  ;;  %1194 = vst.msk [vmem:[#allocation2 + $0x1d0] sm:$0xff] %vm14692_vm1, %v14641_v4 }
  0x3f   : > { %1195 = vst.msk [vmem:[#allocation2 + $0x1d8] sm:$0xff] %vm14692_vm1, %v14641_v4  ;;  %1196 = vst.msk [vmem:[#allocation2 + $0x1e0] sm:$0xff] %vm14692_vm1, %v14641_v4 }
  0x40   : > { %1197 = vst.msk [vmem:[#allocation2 + $0x1e8] sm:$0xff] %vm14692_vm1, %v14641_v4  ;;  %1198 = vst.msk [vmem:[#allocation2 + $0x1f0] sm:$0xff] %vm14692_vm1, %v14641_v4 }
  0x41   : > { %1199 = vst.msk [vmem:[#allocation2 + $0x1f8] sm:$0xff] %vm14692_vm1, %v14641_v4  ;;  %1200 = vst.msk [vmem:[#allocation2 + $0x200] sm:$0xff] %vm14692_vm1, %v14641_v4 }
  0x42   : > { %1201 = vst.msk [vmem:[#allocation2 + $0x208] sm:$0xff] %vm14692_vm1, %v14641_v4  ;;  %1202 = vst.msk [vmem:[#allocation2 + $0x210] sm:$0xff] %vm14692_vm1, %v14641_v4 }
  0x43   : > { %1203 = vst.msk [vmem:[#allocation2 + $0x218] sm:$0xff] %vm14692_vm1, %v14641_v4  ;;  %1204 = vst.msk [vmem:[#allocation2 + $0x220] sm:$0xff] %vm14692_vm1, %v14641_v4 }
  0x44   : > { %1205 = vst.msk [vmem:[#allocation2 + $0x228] sm:$0xff] %vm14692_vm1, %v14641_v4  ;;  %1207 = vst.msk [vmem:[#allocation2 + $0x238] sm:$0xff] %vm14692_vm1, %v14641_v4 }
  0x45   : > { %1208 = vst.msk [vmem:[#allocation2 + $0x240] sm:$0xff] %vm14692_vm1, %v14641_v4  ;;  %1209 = vst.msk [vmem:[#allocation2 + $0x248] sm:$0xff] %vm14692_vm1, %v14641_v4 }
  0x46   : > { %1210 = vst.msk [vmem:[#allocation2 + $0x250] sm:$0xff] %vm14692_vm1, %v14641_v4  ;;  %1211 = vst.msk [vmem:[#allocation2 + $0x258] sm:$0xff] %vm14692_vm1, %v14641_v4 }
  0x47   : > { %1212 = vst.msk [vmem:[#allocation2 + $0x260] sm:$0xff] %vm14692_vm1, %v14641_v4  ;;  %1213 = vst.msk [vmem:[#allocation2 + $0x268] sm:$0xff] %vm14692_vm1, %v14641_v4 }
  0x48   : > { %1214 = vst.msk [vmem:[#allocation2 + $0x270] sm:$0xff] %vm14692_vm1, %v14641_v4  ;;  %1215 = vst.msk [vmem:[#allocation2 + $0x278] sm:$0xff] %vm14692_vm1, %v14641_v4 }
  0x49   : > { %6518 = vst.msk [vmem:[#allocation4] sm:$0xff] %vm14692_vm1, %v14641_v4  ;;  %6519 = vst.msk [vmem:[#allocation4 + $0x8] sm:$0xff] %vm14692_vm1, %v14641_v4 }
  0x4a   : > { %6520 = vst.msk [vmem:[#allocation4 + $0x10] sm:$0xff] %vm14692_vm1, %v14641_v4  ;;  %6521 = vst.msk [vmem:[#allocation4 + $0x18] sm:$0xff] %vm14692_vm1, %v14641_v4 }
  0x4b   : > { %6522 = vst.msk [vmem:[#allocation4 + $0x20] sm:$0xff] %vm14692_vm1, %v14641_v4  ;;  %6523 = vst.msk [vmem:[#allocation4 + $0x28] sm:$0xff] %vm14692_vm1, %v14641_v4 }
  0x4c   : > { %6524 = vst.msk [vmem:[#allocation4 + $0x30] sm:$0xff] %vm14692_vm1, %v14641_v4  ;;  %6525 = vst.msk [vmem:[#allocation4 + $0x38] sm:$0xff] %vm14692_vm1, %v14641_v4 }
  0x4d   : > { %6526 = vst.msk [vmem:[#allocation4 + $0x40] sm:$0xff] %vm14692_vm1, %v14641_v4  ;;  %6527 = vst.msk [vmem:[#allocation4 + $0x48] sm:$0xff] %vm14692_vm1, %v14641_v4 }
  0x4e   : > { %6528 = vst.msk [vmem:[#allocation4 + $0x50] sm:$0xff] %vm14692_vm1, %v14641_v4  ;;  %6529 = vst.msk [vmem:[#allocation4 + $0x58] sm:$0xff] %vm14692_vm1, %v14641_v4 }
  0x4f   : > { %6530 = vst.msk [vmem:[#allocation4 + $0x60] sm:$0xff] %vm14692_vm1, %v14641_v4  ;;  %6531 = vst.msk [vmem:[#allocation4 + $0x68] sm:$0xff] %vm14692_vm1, %v14641_v4 }
  0x50   : > { %6532 = vst.msk [vmem:[#allocation4 + $0x70] sm:$0xff] %vm14692_vm1, %v14641_v4  ;;  %6533 = vst.msk [vmem:[#allocation4 + $0x78] sm:$0xff] %vm14692_vm1, %v14641_v4 }
  0x51   : > { %6534 = vst.msk [vmem:[#allocation4 + $0x80] sm:$0xff] %vm14692_vm1, %v14641_v4  ;;  %6535 = vst.msk [vmem:[#allocation4 + $0x88] sm:$0xff] %vm14692_vm1, %v14641_v4 }
  0x52   : > { %6536 = vst.msk [vmem:[#allocation4 + $0x90] sm:$0xff] %vm14692_vm1, %v14641_v4  ;;  %6537 = vst.msk [vmem:[#allocation4 + $0x98] sm:$0xff] %vm14692_vm1, %v14641_v4 }
  0x53   : > { %6538 = vst.msk [vmem:[#allocation4 + $0xa0] sm:$0xff] %vm14692_vm1, %v14641_v4  ;;  %6539 = vst.msk [vmem:[#allocation4 + $0xa8] sm:$0xff] %vm14692_vm1, %v14641_v4 }
  0x54   : > { %6540 = vst.msk [vmem:[#allocation4 + $0xb0] sm:$0xff] %vm14692_vm1, %v14641_v4  ;;  %6541 = vst.msk [vmem:[#allocation4 + $0xb8] sm:$0xff] %vm14692_vm1, %v14641_v4 }
  0x55   : > { %6542 = vst.msk [vmem:[#allocation4 + $0xc0] sm:$0xff] %vm14692_vm1, %v14641_v4  ;;  %6543 = vst.msk [vmem:[#allocation4 + $0xc8] sm:$0xff] %vm14692_vm1, %v14641_v4 }
  0x56   : > { %6544 = vst.msk [vmem:[#allocation4 + $0xd0] sm:$0xff] %vm14692_vm1, %v14641_v4  ;;  %6545 = vst.msk [vmem:[#allocation4 + $0xd8] sm:$0xff] %vm14692_vm1, %v14641_v4 }
  0x57   : > { %6546 = vst.msk [vmem:[#allocation4 + $0xe0] sm:$0xff] %vm14692_vm1, %v14641_v4  ;;  %6547 = vst.msk [vmem:[#allocation4 + $0xe8] sm:$0xff] %vm14692_vm1, %v14641_v4 }
  0x58   : > { %6548 = vst.msk [vmem:[#allocation4 + $0xf0] sm:$0xff] %vm14692_vm1, %v14641_v4  ;;  %6549 = vst.msk [vmem:[#allocation4 + $0xf8] sm:$0xff] %vm14692_vm1, %v14641_v4 }
  0x59   : > { %6550 = vst.msk [vmem:[#allocation4 + $0x100] sm:$0xff] %vm14692_vm1, %v14641_v4  ;;  %6551 = vst.msk [vmem:[#allocation4 + $0x108] sm:$0xff] %vm14692_vm1, %v14641_v4 }
  0x5a   : > { %6552 = vst.msk [vmem:[#allocation4 + $0x110] sm:$0xff] %vm14692_vm1, %v14641_v4  ;;  %6553 = vst.msk [vmem:[#allocation4 + $0x118] sm:$0xff] %vm14692_vm1, %v14641_v4 }
  0x5b   : > { %6554 = vst.msk [vmem:[#allocation4 + $0x120] sm:$0xff] %vm14692_vm1, %v14641_v4  ;;  %6555 = vst.msk [vmem:[#allocation4 + $0x128] sm:$0xff] %vm14692_vm1, %v14641_v4 }
  0x5c   : > { %6556 = vst.msk [vmem:[#allocation4 + $0x130] sm:$0xff] %vm14692_vm1, %v14641_v4  ;;  %6557 = vst.msk [vmem:[#allocation4 + $0x138] sm:$0xff] %vm14692_vm1, %v14641_v4 }
  0x5d   : > { %6558 = vst.msk [vmem:[#allocation4 + $0x140] sm:$0xff] %vm14692_vm1, %v14641_v4  ;;  %6559 = vst.msk [vmem:[#allocation4 + $0x148] sm:$0xff] %vm14692_vm1, %v14641_v4 }
  0x5e   : > { %6560 = vst.msk [vmem:[#allocation4 + $0x150] sm:$0xff] %vm14692_vm1, %v14641_v4  ;;  %6561 = vst.msk [vmem:[#allocation4 + $0x158] sm:$0xff] %vm14692_vm1, %v14641_v4 }
  0x5f   : > { %6562 = vst.msk [vmem:[#allocation4 + $0x160] sm:$0xff] %vm14692_vm1, %v14641_v4  ;;  %6563 = vst.msk [vmem:[#allocation4 + $0x168] sm:$0xff] %vm14692_vm1, %v14641_v4 }
  0x60   : > { %6564 = vst.msk [vmem:[#allocation4 + $0x170] sm:$0xff] %vm14692_vm1, %v14641_v4  ;;  %6565 = vst.msk [vmem:[#allocation4 + $0x178] sm:$0xff] %vm14692_vm1, %v14641_v4 }
  0x61   : > { %6566 = vst.msk [vmem:[#allocation4 + $0x180] sm:$0xff] %vm14692_vm1, %v14641_v4  ;;  %6567 = vst.msk [vmem:[#allocation4 + $0x188] sm:$0xff] %vm14692_vm1, %v14641_v4 }
  0x62   : > { %6569 = vst.msk [vmem:[#allocation4 + $0x198] sm:$0xff] %vm14692_vm1, %v14641_v4  ;;  %6570 = vst.msk [vmem:[#allocation4 + $0x1a0] sm:$0xff] %vm14692_vm1, %v14641_v4 }
  0x63   : > { %6573 = vst.msk [vmem:[#allocation4 + $0x1b8] sm:$0xff] %vm14692_vm1, %v14641_v4  ;;  %6574 = vst.msk [vmem:[#allocation4 + $0x1c0] sm:$0xff] %vm14692_vm1, %v14641_v4 }
  0x64   : > { %6577 = vst.msk [vmem:[#allocation4 + $0x1d8] sm:$0xff] %vm14692_vm1, %v14641_v4  ;;  %6578 = vst.msk [vmem:[#allocation4 + $0x1e0] sm:$0xff] %vm14692_vm1, %v14641_v4 }
  0x65   : > { %6581 = vst.msk [vmem:[#allocation4 + $0x1f8] sm:$0xff] %vm14692_vm1, %v14641_v4  ;;  %6582 = vst.msk [vmem:[#allocation4 + $0x200] sm:$0xff] %vm14692_vm1, %v14641_v4 }
  0x66   : > { %6585 = vst.msk [vmem:[#allocation4 + $0x218] sm:$0xff] %vm14692_vm1, %v14641_v4  ;;  %6586 = vst.msk [vmem:[#allocation4 + $0x220] sm:$0xff] %vm14692_vm1, %v14641_v4 }
  0x67   : > { %6587 = vst.msk [vmem:[#allocation4 + $0x228] sm:$0xff] %vm14692_vm1, %v14641_v4  ;;  %6588 = vst.msk [vmem:[#allocation4 + $0x230] sm:$0xff] %vm14692_vm1, %v14641_v4 }
  0x68   : > { %6589 = vst.msk [vmem:[#allocation4 + $0x238] sm:$0xff] %vm14692_vm1, %v14641_v4  ;;  %14722 = vst [vmem:[#allocation9_spill] sm:$0xff] %v10730_v5  ;;  %v638_v4 = vmul.f32 %v10733_v6, %v10733_v6 }
  0x69   : > { %14723 = vst [vmem:[#allocation10_spill] sm:$0xff] %v10733_v6  ;;  %14724 = vst [vmem:[#allocation11_spill] sm:$0xff] %v10736_v7 }
  0x6a   : > { %14725 = vst [vmem:[#allocation12_spill] sm:$0xff] %v10739_v8  ;;  %14726 = vst [vmem:[#allocation13_spill] sm:$0xff] %v10742_v9 }
  0x6b   : > { %14727 = vst [vmem:[#allocation14_spill] sm:$0xff] %v10745_v10  ;;  %6591 = vst.msk [vmem:[#allocation4 + $0x28] sm:$0xff] %vm14692_vm1, %v10730_v5  ;;  %v678_v5 = vsel %vm14692_vm1, %v642_v24, 0.0 }
  0x6c   : > { %6592 = vst.msk [vmem:[#allocation4 + $0x30] sm:$0xff] %vm14692_vm1, %v10733_v6  ;;  %6593 = vst.msk [vmem:[#allocation4 + $0x48] sm:$0xff] %vm14692_vm1, %v10736_v7  ;;  %v645_v7 = vmul.f32 %v10766_v16, %v10766_v16  ;;  %v659_v6 = vmul.f32 %v10894_v48, %v10894_v48 }
  0x6d   : > { %14728 = vst [vmem:[#allocation15_spill] sm:$0xff] %v10760_v14  ;;  %14729 = vst [vmem:[#allocation16_spill] sm:$0xff] %v10763_v15 }
  0x6e   : > { %14730 = vst [vmem:[#allocation17_spill] sm:$0xff] %v10766_v16  ;;  %6594 = vst.msk [vmem:[#allocation4 + $0x50] sm:$0xff] %vm14692_vm1, %v10739_v8  ;;  %v684_v33 = vsel %vm14692_vm1, %v645_v7, 0.0 }
  0x6f   : > { %6595 = vst.msk [vmem:[#allocation4 + $0x68] sm:$0xff] %vm14692_vm1, %v10742_v9  ;;  %6596 = vst.msk [vmem:[#allocation4 + $0x70] sm:$0xff] %vm14692_vm1, %v10745_v10  ;;  %v648_v10 = vmul.f32 %v10789_v23, %v10789_v23 }
  0x70   : > { %14731 = vst [vmem:[#allocation18_spill] sm:$0xff] %v10783_v21  ;;  %14732 = vst [vmem:[#allocation19_spill] sm:$0xff] %v10786_v22 }
  0x71   : > { %14733 = vst [vmem:[#allocation20_spill] sm:$0xff] %v10789_v23  ;;  %6597 = vst.msk [vmem:[#allocation4 + $0x88] sm:$0xff] %vm14692_vm1, %v10760_v14  ;;  %v649_v14 = vmul.f32 %v10810_v27, %v10810_v27 }
  0x72   : > { %6598 = vst.msk [vmem:[#allocation4 + $0x90] sm:$0xff] %vm14692_vm1, %v10763_v15  ;;  %6599 = vst.msk [vmem:[#allocation4 + $0xa8] sm:$0xff] %vm14692_vm1, %v10766_v16  ;;  %v650_v15 = vmul.f32 %v10813_v28, %v10813_v28  ;;  %v669_v16 = vsel %vm14692_vm1, %v637_v56, 0.0  ;;  %v661_v56 = vmul.f32 %v10918_v53, %v10918_v53 }
  0x73   : > { %14734 = vst [vmem:[#allocation21_spill] sm:$0xff] %v10810_v27  ;;  %14735 = vst [vmem:[#allocation22_spill] sm:$0xff] %v10813_v28 }
  0x74   : > { %14736 = vst [vmem:[#allocation23_spill] sm:$0xff] %v10816_v29  ;;  %6600 = vst.msk [vmem:[#allocation4 + $0xb0] sm:$0xff] %vm14692_vm1, %v10783_v21 }
  0x75   : > { %6601 = vst.msk [vmem:[#allocation4 + $0xc8] sm:$0xff] %vm14692_vm1, %v10786_v22  ;;  %6602 = vst.msk [vmem:[#allocation4 + $0xd0] sm:$0xff] %vm14692_vm1, %v10789_v23  ;;  %v654_v23 = vmul.f32 %v10843_v36, %v10843_v36 }
  0x76   : > { %14737 = vst [vmem:[#allocation24_spill] sm:$0xff] %v10837_v34  ;;  %14738 = vst [vmem:[#allocation25_spill] sm:$0xff] %v10840_v35 }
  0x77   : > { %14739 = vst [vmem:[#allocation26_spill] sm:$0xff] %v10843_v36  ;;  %6603 = vst.msk [vmem:[#allocation4 + $0xe8] sm:$0xff] %vm14692_vm1, %v10810_v27  ;;  %v655_v27 = vmul.f32 %v10864_v40, %v10864_v40  ;;  %v702_v7 = vsel %vm14692_vm1, %v654_v23, 0.0 }
  0x78   : > { %6604 = vst.msk [vmem:[#allocation4 + $0xf0] sm:$0xff] %vm14692_vm1, %v10813_v28  ;;  %6605 = vst.msk [vmem:[#allocation4 + $0x108] sm:$0xff] %vm14692_vm1, %v10816_v29  ;;  %v670_v28 = vsel %vm14692_vm1, %v638_v4, 0.0  ;;  %v672_v29 = vsel %vm14692_vm1, %v639_v3, 0.0  ;;  %v660_v4 = vmul.f32 %v10897_v49, %v10897_v49 }
  0x79   : > { %6606 = vst.msk [vmem:[#allocation4 + $0x110] sm:$0xff] %vm14692_vm1, %v10837_v34  ;;  %6607 = vst.msk [vmem:[#allocation4 + $0x128] sm:$0xff] %vm14692_vm1, %v10840_v35 }
  0x7a   : > { %6608 = vst.msk [vmem:[#allocation4 + $0x130] sm:$0xff] %vm14692_vm1, %v10843_v36  ;;  %14740 = vst [vmem:[#allocation27_spill] sm:$0xff] %v10891_v47  ;;  %v658_v36 = vmul.f32 %v10891_v47, %v10891_v47 }
  0x7b   : > { %14741 = vst [vmem:[#allocation28_spill] sm:$0xff] %v10894_v48  ;;  %14742 = vst [vmem:[#allocation29_spill] sm:$0xff] %v10897_v49 }
  0x7c   : > { %6609 = vst.msk [vmem:[#allocation4 + $0x148] sm:$0xff] %vm14692_vm1, %v10864_v40  ;;  %6610 = vst.msk [vmem:[#allocation4 + $0x150] sm:$0xff] %vm14692_vm1, %v10867_v41 }
  0x7d   : > { %6611 = vst.msk [vmem:[#allocation4 + $0x168] sm:$0xff] %vm14692_vm1, %v10870_v42  ;;  %14743 = vst [vmem:[#allocation30_spill] sm:$0xff] %v10918_v53 }
  0x7e   : > { %14744 = vst [vmem:[#allocation31_spill] sm:$0xff] %v10921_v54  ;;  %6614 = vst.msk [vmem:[#allocation4 + $0x190] sm:$0xff] %vm14692_vm1, %v10897_v49  ;;  %v592_v49 = vadd.f32 %v10847_v37, %v590_v32 }
  0x7f   : > { %6612 = vst.msk [vmem:[#allocation4 + $0x170] sm:$0xff] %vm14692_vm1, %v10891_v47  ;;  %6613 = vst.msk [vmem:[#allocation4 + $0x188] sm:$0xff] %vm14692_vm1, %v10894_v48  ;;  %v680_v48 = vsel %vm14692_vm1, %v643_v13, 0.0  ;;  %v682_v47 = vsel %vm14692_vm1, %v644_v25, 0.0  ;;  %v696_v13 = vsel %vm14692_vm1, %v651_v2, 0.0  ;;  %v714_v2 = vsel %vm14692_vm1, %v660_v4, 0.0 }
  0x80   : > { %14745 = vst [vmem:[#allocation32_spill] sm:$0xff] %v10951_v62  ;;  %6615 = vst.msk [vmem:[#allocation4 + $0x1a8] sm:$0xff] %vm14692_vm1, %v10918_v53 }
  0x81   : > { %6616 = vst.msk [vmem:[#allocation4 + $0x1b0] sm:$0xff] %vm14692_vm1, %v10921_v54  ;;  %6617 = vst.msk [vmem:[#allocation4 + $0x1c8] sm:$0xff] %vm14692_vm1, %v10924_v55  ;;  %v690_v54 = vsel %vm14692_vm1, %v648_v10, 0.0 }
  0x82   : > { %14746 = vst [vmem:[#allocation33_spill] sm:$0xff] %v10972_v11  ;;  %6618 = vst.msk [vmem:[#allocation4 + $0x1d0] sm:$0xff] %vm14692_vm1, %v10945_v60 }
  0x83   : > { %6619 = vst.msk [vmem:[#allocation4 + $0x1e8] sm:$0xff] %vm14692_vm1, %v10948_v61  ;;  %6620 = vst.msk [vmem:[#allocation4 + $0x1f0] sm:$0xff] %vm14692_vm1, %v10951_v62  ;;  %v640_v62 = vmul.f32 %v10739_v8, %v10739_v8  ;;  %v646_v8 = vmul.f32 %v10783_v21, %v10783_v21  ;;  %v652_v21 = vmul.f32 %v10837_v34, %v10837_v34 }
  0x84   : > { %6621 = vst.msk [vmem:[#allocation4 + $0x208] sm:$0xff] %vm14692_vm1, %v10972_v11  ;;  %6622 = vst.msk [vmem:[#allocation4 + $0x210] sm:$0xff] %vm14692_vm1, %v10975_v12  ;;  %v641_v11 = vmul.f32 %v10742_v9, %v10742_v9  ;;  %v647_v9 = vmul.f32 %v10786_v22, %v10786_v22  ;;  %v653_v22 = vmul.f32 %v10840_v35, %v10840_v35 }
  0x85   : > { %v657_v35 = vmul.f32 %v10870_v42, %v10870_v42  ;;  %v671_v34 = vadd.f32 %v670_v28, %v669_v16  ;;  %v674_v3 = vsel %vm14692_vm1, %v640_v62, 0.0  ;;  %v686_v31 = vsel %vm14692_vm1, %v646_v8, 0.0 }
  0x86   : > { %v676_v28 = vsel %vm14692_vm1, %v641_v11, 0.0  ;;  %v688_v53 = vsel %vm14692_vm1, %v647_v9, 0.0  ;;  %v594_v11 = vadd.f32 %v10851_v38, %v592_v49  ;;  %v698_v37 = vsel %vm14692_vm1, %v652_v21, 0.0 }
  0x87   : > { %v673_v16 = vadd.f32 %v672_v29, %v671_v34  ;;  %v692_v29 = vsel %vm14692_vm1, %v649_v14, 0.0  ;;  %v694_v34 = vsel %vm14692_vm1, %v650_v15, 0.0  ;;  %v700_v25 = vsel %vm14692_vm1, %v653_v22, 0.0 }
  0x88   : > { %v704_v8 = vsel %vm14692_vm1, %v655_v27, 0.0  ;;  %v706_v9 = vsel %vm14692_vm1, %v656_v43, 0.0  ;;  %v596_v10 = vadd.f32 %v10855_v39, %v594_v11  ;;  %v708_v15 = vsel %vm14692_vm1, %v657_v35, 0.0 }
  0x89   : > { %v675_v62 = vadd.f32 %v674_v3, %v673_v16  ;;  %v710_v38 = vsel %vm14692_vm1, %v658_v36, 0.0  ;;  %v712_v49 = vsel %vm14692_vm1, %v659_v6, 0.0  ;;  %v716_v21 = vsel %vm14692_vm1, %v661_v56, 0.0 }
  0x8a   : > { %v718_v22 = vsel %vm14692_vm1, %v662_v26, 0.0  ;;  %v598_v23 = vadd.f32 %v10874_v44, %v596_v10  ;;  %v14748_v10 = vld [vmem:[#allocation33_spill] sm:$0xff] }
  0x8b   : > { %v677_v24 = vadd.f32 %v676_v28, %v675_v62 }
  0x8c   : > { %v600_v43 = vadd.f32 %v10878_v45, %v598_v23 }
  0x8d   : > { %v679_v14 = vadd.f32 %v678_v5, %v677_v24 }
  0x8e   : > { %v602_v5 = vadd.f32 %v10882_v46, %v600_v43 }
  0x8f   : > { %v681_v27 = vadd.f32 %v680_v48, %v679_v14  ;;  %v667_v14 = vmul.f32 %v14748_v10, %v14748_v10 }
  0x90   : > { %v604_v35 = vadd.f32 %v10901_v50, %v602_v5  ;;  %v14750_v5 = vmov 0.0  }
  0x91   : > { %v683_v3 = vadd.f32 %v682_v47, %v681_v27  ;;  %v728_v27 = vsel %vm14692_vm1, %v667_v14, 0.0 }
  0x92   : > { %v606_v6 = vadd.f32 %v10905_v51, %v604_v35 }
  0x93   : > { %v685_v39 = vadd.f32 %v684_v33, %v683_v3  ;;  %v14749_v3 = vld [vmem:[#allocation8_spill] sm:$0xff] }
  0x94   : > { %v608_v4 = vadd.f32 %v10909_v52, %v606_v6 }
  0x95   : > { %v687_v36 = vadd.f32 %v686_v31, %v685_v39 }
  0x96   : > { %v610_v26 = vadd.f32 %v10928_v57, %v608_v4 }
  0x97   : > { %v689_v32 = vadd.f32 %v688_v53, %v687_v36 }
  0x98   : > { %v612_v44 = vadd.f32 %v10932_v58, %v610_v26 }
  0x99   : > { %v691_v56 = vadd.f32 %v690_v54, %v689_v32 }
  0x9a   : > { %v614_v45 = vadd.f32 %v10936_v59, %v612_v44  ;;  %v1291_v44 = vld [vmem:[#allocation2 + $0x27] sm:$0xff] }
  0x9b   : > { %v693_v16 = vadd.f32 %v692_v29, %v691_v56 }
  0x9c   : > { %v616_v46 = vadd.f32 %v10955_v63, %v614_v45  ;;  %v663_v63 = vmul.f32 %v10924_v55, %v10924_v55 }
  0x9d   : > { %v695_v48 = vadd.f32 %v694_v34, %v693_v16 }
  0x9e   : > { %v618_v50 = vadd.f32 %v10959_v0, %v616_v46  ;;  %v1372_v46 = vld [vmem:[#allocation2 + $0x31] sm:$0xff] }
  0x9f   : > { %v697_v47 = vadd.f32 %v696_v13, %v695_v48  ;;  %v1292_v48 = vld [vmem:[#allocation2 + $0x2f] sm:$0xff] }
  0xa0   : > { %v620_v51 = vadd.f32 %v10963_v1, %v618_v50  ;;  %v9215_v45 = vpack.i.bf16 %v1292_v48, %v1291_v44  ;;  %v1331_v50 = vld [vmem:[#allocation2 + $0x28] sm:$0xff] }
  0xa1   : > { %v699_v28 = vadd.f32 %v698_v37, %v697_v47  ;;  %v1371_v47 = vld [vmem:[#allocation2 + $0x29] sm:$0xff] }
  0xa2   : > { %v622_v52 = vadd.f32 %v10980_v17, %v620_v51  ;;  %v664_v17 = vmul.f32 %v10945_v60, %v10945_v60  ;;  %9216 = vrot.lane.b32.xlu0 %v9215_v45, %s14685_s29  ;;  %v11220_v45 = vld [vmem:[%s14760_s3] ss:$0 sm:$0xff]  ;;  %s14689_s3 = smov 96  }
  0xa3   : > { %v701_v62 = vadd.f32 %v700_v25, %v699_v28  ;;  %v9225_v28 = vpack.i.bf16 %v1372_v46, %v1371_v47  ;;  %v14761_v47 = vld [vmem:[#allocation12_spill] sm:$0xff] }
  0xa4   : > { %v624_v57 = vadd.f32 %v10984_v18, %v622_v52  ;;  %v720_v18 = vsel %vm14692_vm1, %v663_v63, 0.0  ;;  %v722_v25 = vsel %vm14692_vm1, %v664_v17, 0.0  ;;  %v1412_v52 = vld [vmem:[#allocation2 + $0x32] sm:$0xff] }
  0xa5   : > { %v703_v53 = vadd.f32 %v702_v7, %v701_v62  ;;  %v14747_v7 = vld [vmem:[#allocation32_spill] sm:$0xff]  ;;  %v1332_v62 = vld [vmem:[#allocation2 + $0x30] sm:$0xff] }
  0xa6   : > { %v626_v58 = vadd.f32 %v10988_v19, %v624_v57  ;;  %v665_v19 = vmul.f32 %v10948_v61, %v10948_v61  ;;  %v9220_v51 = vpack.i.bf16 %v1332_v62, %v1331_v50  ;;  %9226 = vrot.lane.b32.xlu0 %v9225_v28, %s14683_s18  ;;  %v14762_v28 = vld [vmem:[#allocation13_spill] sm:$0xff]  ;;  %v14763_v62 = vld [vmem:[#allocation14_spill] sm:$0xff] }
  0xa7   : > { %v705_v54 = vadd.f32 %v704_v8, %v703_v53  ;;  %v1411_v53 = vld [vmem:[#allocation2 + $0x2a] sm:$0xff] }
  0xa8   : > { %v628_v59 = vadd.f32 %v10998_v20, %v626_v58  ;;  %9221 = vrot.lane.b32.xlu1 %v9220_v51, %s14687_s19  ;;  %v890_v58 = vlaneseq }
  0xa9   : > { %v707_v33 = vadd.f32 %v706_v9, %v705_v54  ;;  %v9230_v54 = vpack.i.bf16 %v1412_v52, %v1411_v53  ;;  %v14764_v53 = vld [vmem:[#allocation15_spill] sm:$0xff] }
  0xaa   : > { %v630_v0 = vadd.f32 %v11002_v30, %v628_v59  ;;  %v666_v30 = vmul.f32 %v14747_v7, %v14747_v7  ;;  %v891_v63 = vshrl.u32 %v890_v58, 7 }
  0xab   : > { %v709_v31 = vadd.f32 %v708_v15, %v707_v33  ;;  %v724_v15 = vsel %vm14692_vm1, %v665_v19, 0.0  ;;  %9231 = vrot.lane.b32.xlu0 %v9230_v54, %s14681_s20  ;;  %s14776_s20 = smov 64  }
  0xac   : > { %v631_v1 = vrot.slane %v630_v0, 4 }
  0xad   : > { %v711_v29 = vadd.f32 %v710_v38, %v709_v31 }
  0xae   : > { %v632_v24 = vadd.f32 %v631_v1, %v630_v0  ;;  %v11142_v1 = vsub.s32 0, %v891_v63  ;;  %v10095_v63 = vld [vmem:[%s14627_s5 + $0x28] sm:$0xff]  }
  0xaf   : > { %v713_v34 = vadd.f32 %v712_v49, %v711_v29  ;;  %8584 = vmatprep.subr.bf16.mxu0 %v10095_v63 }
  0xb0   : > { %v633_v20 = vrot.slane %v632_v24, 2  ;;  %8585 = vmatpush3.bf16.msra.mxu0 %v10095_v63 }
  0xb1   : > { %v715_v11 = vadd.f32 %v714_v2, %v713_v34  ;;  %v668_v2 = vmul.f32 %v10975_v12, %v10975_v12 }
  0xb2   : > { %v634_v8 = vadd.f32 %v633_v20, %v632_v24  ;;  %v14752_v20 = vld [vmem:[#allocation28_spill] sm:$0xff] }
  0xb3   : > { %v717_v13 = vadd.f32 %v716_v21, %v715_v11  ;;  %v726_v21 = vsel %vm14692_vm1, %v666_v30, 0.0  ;;  %v730_v39 = vsel %vm14692_vm1, %v668_v2, 0.0 }
  0xb4   : > { %v635_v38 = vrot.slane %v634_v8, 1 }
  0xb5   : > { %v719_v37 = vadd.f32 %v718_v22, %v717_v13  ;;  %v14751_v13 = vld [vmem:[#allocation27_spill] sm:$0xff] }
  0xb6   : > { %v636_v22 = vadd.f32 %v635_v38, %v634_v8 }
  0xb7   : > { %v721_v9 = vadd.f32 %v720_v18, %v719_v37 }
  0xb8   : > { %8575 = vmatmul.mubr.msk.f32.vlgmr.msra.gmra.mrb[0].mxu1 %vm14692_vm1, %v636_v22 }
  0xb9   : > { %v723_v49 = vadd.f32 %v722_v25, %v721_v9  ;;  %8940 = vmatpush3.bf16.msra.mxu1 %v14749_v3  ;;  %8581 = vmatprep.mubr.msk.f32.mxu1 %vm10258_vm0, %v14750_v5  ;;  %v14753_v25 = vld [vmem:[#allocation29_spill] sm:$0xff]  ;;  %v14754_v9 = vld [vmem:[#allocation30_spill] sm:$0xff] }
  0xba   : > { %8794 = vmatprep.subr.mxu1 %v14750_v5 }
  0xbb   : > { %v725_v23 = vadd.f32 %v724_v15, %v723_v49  ;;  %v14755_v15 = vld [vmem:[#allocation31_spill] sm:$0xff] }
  0xbd   : > { %v727_v43 = vadd.f32 %v726_v21, %v725_v23 }
  0xbf   : > { %v729_v35 = vadd.f32 %v728_v27, %v727_v43 }
  0xc1   : > { %v731_v36 = vadd.f32 %v730_v39, %v729_v35 }
  0xc3   : > { %v732_v6 = vrot.slane %v731_v36, 4 }
  0xc5   : > { %v733_v32 = vadd.f32 %v732_v6, %v731_v36  ;;  %v11199_v36 = vld [vmem:[%s14759_s2] ss:$0 sm:$0xff]  ;;  %s523_s2 = sand.u32 1, %s10247_s22  }
  0xc7   : > { %v734_v4 = vrot.slane %v733_v32, 2 }
  0xc9   : > { %v735_v56 = vadd.f32 %v734_v4, %v733_v32 }
  0xcb   : > { %v736_v26 = vrot.slane %v735_v56, 1 }
  0xcd   : > { %v737_v16 = vadd.f32 %v736_v26, %v735_v56 }
  0xcf   : > { %8582 = vmatmul.mubr.msk.f32.vlgmr.msra.gmra.mrb[2].mxu1 %vm14692_vm1, %v737_v16 }
  0xd0   : > { %8796 = vmatprep.mubr.msk.f32.mxu1 %vm10258_vm0, %v14750_v5 }
 0x18b   : > { %v809_v57 = vpop.f32.mrb[0].mxu1 }
 0x18c   : > { %v8576_v33 = vpop.f32.mrb[1].mxu1  ;;  %v886_v31 = vmul.f32 %v809_v57, %v809_v57  ;;  %v11145_v17 = vrot.slane %v809_v57, %v11142_v1 }
 0x18d   : > { %v14765_v33 = vld [vmem:[#allocation16_spill] sm:$0xff] }
 0x18e   : > { %v912_v11 = vsub.f32 %v10864_v40, %v11145_v17  ;;  %v913_v18 = vsub.f32 %v10867_v41, %v11145_v17  ;;  %v914_v24 = vsub.f32 %v10870_v42, %v11145_v17  ;;  %v915_v19 = vsub.f32 %v14751_v13, %v11145_v17  ;;  %v14768_v13 = vld [vmem:[#allocation19_spill] sm:$0xff] }
 0x18f   : > { %v916_v37 = vsub.f32 %v14752_v20, %v11145_v17  ;;  %v917_v30 = vsub.f32 %v14753_v25, %v11145_v17  ;;  %v918_v14 = vsub.f32 %v14754_v9, %v11145_v17  ;;  %v919_v38 = vsub.f32 %v14755_v15, %v11145_v17  ;;  %v14769_v25 = vld [vmem:[#allocation20_spill] sm:$0xff] }
 0x190   : > { %v920_v49 = vsub.f32 %v10924_v55, %v11145_v17  ;;  %v921_v42 = vsub.f32 %v10945_v60, %v11145_v17  ;;  %v922_v2 = vsub.f32 %v10948_v61, %v11145_v17  ;;  %v923_v21 = vsub.f32 %v14747_v7, %v11145_v17  ;;  %v14756_v55 = vld [vmem:[#allocation9_spill] sm:$0xff]  ;;  %v14757_v60 = vld [vmem:[#allocation10_spill] sm:$0xff]  ;;  %v14758_v61 = vld [vmem:[#allocation11_spill] sm:$0xff] }
 0x191   : > { %v924_v22 = vsub.f32 %v14748_v10, %v11145_v17  ;;  %v925_v27 = vsub.f32 %v10975_v12, %v11145_v17  ;;  %v894_v43 = vsub.f32 %v14756_v55, %v11145_v17  ;;  %v895_v3 = vsub.f32 %v14757_v60, %v11145_v17  ;;  %v10096_v60 = vld [vmem:[%s14627_s5 + $0x30] sm:$0xff]  }
 0x192   : > { %v896_v39 = vsub.f32 %v14758_v61, %v11145_v17  ;;  %v897_v46 = vsub.f32 %v14761_v47, %v11145_v17  ;;  %v898_v50 = vsub.f32 %v14762_v28, %v11145_v17  ;;  %v899_v51 = vsub.f32 %v14763_v62, %v11145_v17  ;;  %8586 = vmatprep.subr.bf16.mxu0 %v10096_v60 }
 0x193   : > { %v900_v52 = vsub.f32 %v14764_v53, %v11145_v17  ;;  %v901_v58 = vsub.f32 %v14765_v33, %v11145_v17  ;;  %8587 = vmatpush3.bf16.msra.mxu0 %v10096_v60 }
 0x1a2   : > { %v882_v59 = vpop.f32.mrb[2].mxu1 }
 0x1a3   : > { %v887_v29 = vsub.f32 %v882_v59, %v886_v31  ;;  %v8583_v0 = vpop.f32.mrb[3].mxu1  ;;  %v14766_v31 = vld [vmem:[#allocation17_spill] sm:$0xff] }
 0x1a4   : > { %v902_v59 = vsub.f32 %v14766_v31, %v11145_v17 }
 0x1a5   : > { %v888_v34 = vadd.f32 1e-05, %v887_v29 }
 0x1a7   : > { %10179 = vrsqrt.f32 %v888_v34  ;;  %v14767_v34 = vld [vmem:[#allocation18_spill] sm:$0xff] }
 0x1b1   : > { %v10180_v8 = vpop.eup %10179 }
 0x1b2   : > { %v11174_v23 = vrot.slane %v10180_v8, %v11142_v1  ;;  %v14770_v8 = vld [vmem:[#allocation21_spill] sm:$0xff] }
 0x1b3   : > { %v906_v9 = vsub.f32 %v14770_v8, %v11145_v17 }
 0x1b4   : > { %v11185_v7 = vmul.f32 %v11174_v23, %v914_v24  ;;  %v11188_v10 = vmul.f32 %v11174_v23, %v915_v19  ;;  %v11191_v35 = vmul.f32 %v11174_v23, %v916_v37  ;;  %v11194_v12 = vmul.f32 %v11174_v23, %v917_v30 }
 0x1b5   : > { %v11202_v6 = vmul.f32 %v11174_v23, %v918_v14  ;;  %v11205_v32 = vmul.f32 %v11174_v23, %v919_v38  ;;  %v11208_v4 = vmul.f32 %v11174_v23, %v920_v49  ;;  %v11211_v56 = vmul.f32 %v11174_v23, %v921_v42  ;;  %v14771_v42 = vld [vmem:[#allocation22_spill] sm:$0xff] }
 0x1b6   : > { %v958_v26 = vmul.f32 %v11174_v23, %v922_v2  ;;  %v959_v16 = vmul.f32 %v11174_v23, %v923_v21  ;;  %v960_v44 = vmul.f32 %v11174_v23, %v924_v22  ;;  %v961_v48 = vmul.f32 %v11174_v23, %v925_v27  ;;  %v14772_v21 = vld [vmem:[#allocation23_spill] sm:$0xff]  ;;  %v14773_v27 = vld [vmem:[#allocation24_spill] sm:$0xff] }
 0x1b7   : > { %v903_v24 = vsub.f32 %v14767_v34, %v11145_v17  ;;  %v904_v19 = vsub.f32 %v14768_v13, %v11145_v17  ;;  %v905_v30 = vsub.f32 %v14769_v25, %v11145_v17  ;;  %v930_v38 = vmul.f32 %v11174_v23, %v894_v43  ;;  %v10098_v34 = vld [vmem:[%s14627_s5 + $0x40] sm:$0xff]  }
 0x1b8   : > { %v997_v54 = vmul.f32 %v11199_v36, %v958_v26  ;;  %v998_v57 = vmul.f32 %v11199_v36, %v959_v16  ;;  %v999_v29 = vmul.f32 %v11199_v36, %v960_v44  ;;  %v1000_v0 = vmul.f32 %v11199_v36, %v961_v48 }
 0x1b9   : > { %v931_v49 = vmul.f32 %v11174_v23, %v895_v3  ;;  %v907_v2 = vsub.f32 %v14771_v42, %v11145_v17  ;;  %v908_v22 = vsub.f32 %v14772_v21, %v11145_v17  ;;  %v909_v55 = vsub.f32 %v14773_v27, %v11145_v17  ;;  %v14775_v42 = vld [vmem:[#allocation26_spill] sm:$0xff] }
 0x1ba   : > { %v1036_v20 = vadd.f32 %v11220_v45, %v997_v54  ;;  %v1037_v37 = vadd.f32 %v11220_v45, %v998_v57  ;;  %v1038_v14 = vadd.f32 %v11220_v45, %v999_v29  ;;  %v1039_v15 = vadd.f32 %v11220_v45, %v1000_v0 }
 0x1bb   : > { %v969_v16 = vmul.f32 %v11199_v36, %v930_v38  ;;  %v970_v48 = vmul.f32 %v11199_v36, %v931_v49  ;;  %v932_v47 = vmul.f32 %v11174_v23, %v896_v39  ;;  %v933_v28 = vmul.f32 %v11174_v23, %v897_v46 }
 0x1bc   : > { %vm1068_vm2 = vcmp.gt.f32.partialorder %v1036_v20, 0.0  ;;  %vm1069_vm3 = vcmp.gt.f32.partialorder %v1037_v37, 0.0  ;;  %vm1070_vm4 = vcmp.gt.f32.partialorder %v1038_v14, 0.0  ;;  %vm1071_vm5 = vcmp.gt.f32.partialorder %v1039_v15, 0.0 }
 0x1bd   : > { %v1100_v43 = vmul.f32 0.01, %v1036_v20  ;;  %v1101_v3 = vmul.f32 0.01, %v1037_v37  ;;  %v1102_v61 = vmul.f32 0.01, %v1038_v14  ;;  %v1008_v57 = vadd.f32 %v11220_v45, %v969_v16 }
 0x1be   : > { %v1103_v26 = vmul.f32 0.01, %v1039_v15  ;;  %v1009_v33 = vadd.f32 %v11220_v45, %v970_v48  ;;  %v971_v39 = vmul.f32 %v11199_v36, %v932_v47  ;;  %v972_v46 = vmul.f32 %v11199_v36, %v933_v28 }
 0x1bf   : > { %v1132_v44 = vsel %vm1068_vm2, %v1036_v20, %v1100_v43  ;;  %v1133_v62 = vsel %vm1069_vm3, %v1037_v37, %v1101_v3  ;;  %v1134_v53 = vsel %vm1070_vm4, %v1038_v14, %v1102_v61  ;;  %v934_v63 = vmul.f32 %v11174_v23, %v898_v50 }
 0x1c0   : > { %v1135_v54 = vsel %vm1071_vm5, %v1039_v15, %v1103_v26  ;;  %1245 = vst.msk [vmem:[#allocation2 + $0x208] sm:$0xff] %vm14692_vm1, %v1132_v44  ;;  %1246 = vst.msk [vmem:[#allocation2 + $0x210] sm:$0xff] %vm14692_vm1, %v1133_v62  ;;  %vm1040_vm6 = vcmp.gt.f32.partialorder %v1008_v57, 0.0  ;;  %v1072_v29 = vmul.f32 0.01, %v1008_v57  ;;  %v935_v0 = vmul.f32 %v11174_v23, %v899_v51 }
 0x1c1   : > { %1247 = vst.msk [vmem:[#allocation2 + $0x228] sm:$0xff] %vm14692_vm1, %v1134_v53  ;;  %1248 = vst.msk [vmem:[#allocation2 + $0x230] sm:$0xff] %vm14692_vm1, %v1135_v54  ;;  %v936_v20 = vmul.f32 %v11174_v23, %v900_v52  ;;  %vm1041_vm7 = vcmp.gt.f32.partialorder %v1009_v33, 0.0  ;;  %v1073_v37 = vmul.f32 0.01, %v1009_v33  ;;  %v1010_v14 = vadd.f32 %v11220_v45, %v971_v39  ;;  %v10097_v52 = vld [vmem:[%s14627_s5 + $0x38] sm:$0xff]  }
 0x1c2   : > { %v1011_v15 = vadd.f32 %v11220_v45, %v972_v46  ;;  %v1104_v38 = vsel %vm1040_vm6, %v1008_v57, %v1072_v29  ;;  %v973_v49 = vmul.f32 %v11199_v36, %v934_v63  ;;  %v974_v60 = vmul.f32 %v11199_v36, %v935_v0  ;;  %8588 = vmatprep.subr.bf16.mxu0 %v10097_v52 }
 0x1c3   : > { %v937_v43 = vmul.f32 %v11174_v23, %v901_v58  ;;  %v1105_v50 = vsel %vm1041_vm7, %v1009_v33, %v1073_v37  ;;  %1217 = vst.msk [vmem:[#allocation2 + $0x48] sm:$0xff] %vm14692_vm1, %v1104_v38  ;;  %vm1042_vm8 = vcmp.gt.f32.partialorder %v1010_v14, 0.0  ;;  %v1074_v51 = vmul.f32 0.01, %v1010_v14  ;;  %8589 = vmatpush3.bf16.msra.mxu0 %v10097_v52 }
 0x1c4   : > { %vm1043_vm9 = vcmp.gt.f32.partialorder %v1011_v15, 0.0  ;;  %1218 = vst.msk [vmem:[#allocation2 + $0x50] sm:$0xff] %vm14692_vm1, %v1105_v50  ;;  %v1075_v3 = vmul.f32 0.01, %v1011_v15  ;;  %v1012_v61 = vadd.f32 %v11220_v45, %v973_v49  ;;  %v1013_v26 = vadd.f32 %v11220_v45, %v974_v60  ;;  %8590 = vmatprep.subr.bf16.mxu0 %v10098_v34 }
 0x1c5   : > { %v975_v16 = vmul.f32 %v11199_v36, %v936_v20  ;;  %v1106_v58 = vsel %vm1042_vm8, %v1010_v14, %v1074_v51  ;;  %v976_v44 = vmul.f32 %v11199_v36, %v937_v43  ;;  %v938_v48 = vmul.f32 %v11174_v23, %v902_v59 }
 0x1c6   : > { %v939_v47 = vmul.f32 %v11174_v23, %v903_v24  ;;  %v1107_v28 = vsel %vm1043_vm9, %v1011_v15, %v1075_v3  ;;  %1219 = vst.msk [vmem:[#allocation2 + $0x68] sm:$0xff] %vm14692_vm1, %v1106_v58  ;;  %vm1044_vm10 = vcmp.gt.f32.partialorder %v1012_v61, 0.0  ;;  %vm1045_vm11 = vcmp.gt.f32.partialorder %v1013_v26, 0.0 }
 0x1c7   : > { %v1076_v62 = vmul.f32 0.01, %v1012_v61  ;;  %1220 = vst.msk [vmem:[#allocation2 + $0x70] sm:$0xff] %vm14692_vm1, %v1107_v28  ;;  %v1077_v53 = vmul.f32 0.01, %v1013_v26  ;;  %v1014_v31 = vadd.f32 %v11220_v45, %v975_v16  ;;  %v1015_v59 = vadd.f32 %v11220_v45, %v976_v44  ;;  %8591 = vmatpush3.bf16.msra.mxu0 %v10098_v34 }
 0x1c8   : > { %v977_v54 = vmul.f32 %v11199_v36, %v938_v48  ;;  %v978_v57 = vmul.f32 %v11199_v36, %v939_v47  ;;  %v940_v33 = vmul.f32 %v11174_v23, %v904_v19  ;;  %v941_v39 = vmul.f32 %v11174_v23, %v905_v30 }
 0x1c9   : > { %v1108_v24 = vsel %vm1044_vm10, %v1012_v61, %v1076_v62  ;;  %v1109_v46 = vsel %vm1045_vm11, %v1013_v26, %v1077_v53  ;;  %vm1046_vm12 = vcmp.gt.f32.partialorder %v1014_v31, 0.0  ;;  %vm1047_vm13 = vcmp.gt.f32.partialorder %v1015_v59, 0.0 }
 0x1ca   : > { %1221 = vst.msk [vmem:[#allocation2 + $0x88] sm:$0xff] %vm14692_vm1, %v1108_v24  ;;  %v1078_v63 = vmul.f32 0.01, %v1014_v31  ;;  %v1333_v29 = vld [vmem:[#allocation2 + $0x48] sm:$0xff]  ;;  %1222 = vst.msk [vmem:[#allocation2 + $0x90] sm:$0xff] %vm14692_vm1, %v1109_v46  ;;  %v1016_v13 = vadd.f32 %v11220_v45, %v977_v54  ;;  %v1017_v19 = vadd.f32 %v11220_v45, %v978_v57  ;;  %v979_v25 = vmul.f32 %v11199_v36, %v940_v33 }
 0x1cb   : > { %v1293_v0 = vld [vmem:[#allocation2 + $0x47] sm:$0xff]  ;;  %v1079_v20 = vmul.f32 0.01, %v1015_v59  ;;  %v1334_v30 = vld [vmem:[#allocation2 + $0x50] sm:$0xff]  ;;  %v980_v15 = vmul.f32 %v11199_v36, %v941_v39  ;;  %v942_v38 = vmul.f32 %v11174_v23, %v906_v9  ;;  %v943_v49 = vmul.f32 %v11174_v23, %v907_v2 }
 0x1cc   : > { %v1294_v37 = vld [vmem:[#allocation2 + $0x4f] sm:$0xff]  ;;  %v1110_v14 = vsel %vm1046_vm12, %v1014_v31, %v1078_v63  ;;  %v9240_v60 = vpack.i.bf16 %v1334_v30, %v1333_v29  ;;  %vm1048_vm14 = vcmp.gt.f32.partialorder %v1016_v13, 0.0  ;;  %vm1049_vm15 = vcmp.gt.f32.partialorder %v1017_v19, 0.0 }
 0x1cd   : > { %v9235_v43 = vpack.i.bf16 %v1294_v37, %v1293_v0  ;;  %v1111_v50 = vsel %vm1047_vm13, %v1015_v59, %v1079_v20  ;;  %1223 = vst.msk [vmem:[#allocation2 + $0xa8] sm:$0xff] %vm14692_vm1, %v1110_v14  ;;  %v1373_v51 = vld [vmem:[#allocation2 + $0x49] sm:$0xff]  ;;  %v1374_v52 = vld [vmem:[#allocation2 + $0x51] sm:$0xff]  ;;  %v1080_v8 = vmul.f32 0.01, %v1016_v13  ;;  %v911_v2 = vsub.f32 %v14775_v42, %v11145_v17 }
 0x1ce   : > { %v1295_v3 = vld [vmem:[#allocation2 + $0x67] sm:$0xff]  ;;  %1224 = vst.msk [vmem:[#allocation2 + $0xb0] sm:$0xff] %vm14692_vm1, %v1111_v50  ;;  %9241 = vrot.lane.b32.xlu1 %v9240_v60, %s14687_s19  ;;  %v1296_v26 = vld [vmem:[#allocation2 + $0x6f] sm:$0xff]  ;;  %v1081_v16 = vmul.f32 0.01, %v1017_v19  ;;  %v1018_v58 = vadd.f32 %v11220_v45, %v979_v25  ;;  %v1019_v44 = vadd.f32 %v11220_v45, %v980_v15  ;;  %v981_v48 = vmul.f32 %v11199_v36, %v942_v38 }
 0x1cf   : > { %v14774_v9 = vld [vmem:[#allocation25_spill] sm:$0xff]  ;;  %9236 = vrot.lane.b32.xlu0 %v9235_v43, %s14685_s29  ;;  %v11346_v47 = vmul.f32 %v11199_v36, %v11191_v35  ;;  %v11350_v28 = vmul.f32 %v11199_v36, %v11194_v12  ;;  %v1112_v53 = vsel %vm1048_vm14, %v1016_v13, %v1080_v8  ;;  %v982_v31 = vmul.f32 %v11199_v36, %v943_v49  ;;  %v1414_v34 = vld [vmem:[#allocation2 + $0x52] sm:$0xff] }
 0x1d0   : > { %v910_v61 = vsub.f32 %v14774_v9, %v11145_v17  ;;  %v1413_v62 = vld [vmem:[#allocation2 + $0x4a] sm:$0xff]  ;;  %v9245_v59 = vpack.i.bf16 %v1374_v52, %v1373_v51  ;;  %v9255_v54 = vpack.i.bf16 %v1296_v26, %v1295_v3  ;;  %v1113_v33 = vsel %vm1049_vm15, %v1017_v19, %v1081_v16  ;;  %1225 = vst.msk [vmem:[#allocation2 + $0xc8] sm:$0xff] %vm14692_vm1, %v1112_v53  ;;  %v1416_v51 = vld [vmem:[#allocation2 + $0x72] sm:$0xff] }
 0x1d1   : > { %v1335_v24 = vld [vmem:[#allocation2 + $0x68] sm:$0xff]  ;;  %v1336_v57 = vld [vmem:[#allocation2 + $0x70] sm:$0xff]  ;;  %vm1050_vm2 = vcmp.gt.f32.partialorder %v1018_v58, 0.0  ;;  %1226 = vst.msk [vmem:[#allocation2 + $0xd0] sm:$0xff] %vm14692_vm1, %v1113_v33  ;;  %vm1051_vm3 = vcmp.gt.f32.partialorder %v1019_v44, 0.0  ;;  %v1020_v12 = vadd.f32 %v11220_v45, %v981_v48  ;;  %v1021_v39 = vadd.f32 %v11220_v45, %v982_v31 }
 0x1d2   : > { %v1082_v35 = vmul.f32 0.01, %v1018_v58  ;;  %v993_v46 = vmul.f32 %v11199_v36, %v11202_v6  ;;  %v994_v63 = vmul.f32 %v11199_v36, %v11205_v32  ;;  %9246 = vrot.lane.b32.xlu1 %v9245_v59, %s14683_s18  ;;  %v1083_v29 = vmul.f32 0.01, %v1019_v44  ;;  %v1375_v19 = vld [vmem:[#allocation2 + $0x69] sm:$0xff]  ;;  %v1376_v25 = vld [vmem:[#allocation2 + $0x71] sm:$0xff] }
 0x1d3   : > { %9256 = vrot.lane.b32.xlu0 %v9255_v54, %s14685_s29  ;;  %v944_v0 = vmul.f32 %v11174_v23, %v908_v22  ;;  %v9250_v20 = vpack.i.bf16 %v1414_v34, %v1413_v62  ;;  %v9265_v13 = vpack.i.bf16 %v1336_v57, %v1335_v24  ;;  %vm1052_vm4 = vcmp.gt.f32.partialorder %v1020_v12, 0.0  ;;  %v1297_v14 = vld [vmem:[#allocation2 + $0x87] sm:$0xff]  ;;  %v1298_v15 = vld [vmem:[#allocation2 + $0x8f] sm:$0xff]  ;;  %s14777_s18 = smov 48  }
 0x1d4   : > { %v1114_v30 = vsel %vm1050_vm2, %v1018_v58, %v1082_v35  ;;  %v1115_v6 = vsel %vm1051_vm3, %v1019_v44, %v1083_v29  ;;  %vm1053_vm5 = vcmp.gt.f32.partialorder %v1021_v39, 0.0  ;;  %v1084_v32 = vmul.f32 0.01, %v1020_v12  ;;  %v1337_v43 = vld [vmem:[#allocation2 + $0x88] sm:$0xff]  ;;  %v1338_v50 = vld [vmem:[#allocation2 + $0x90] sm:$0xff] }
 0x1d5   : > { %1227 = vst.msk [vmem:[#allocation2 + $0xe8] sm:$0xff] %vm14692_vm1, %v1114_v30  ;;  %v945_v21 = vmul.f32 %v11174_v23, %v909_v55  ;;  %v995_v22 = vmul.f32 %v11199_v36, %v11208_v4  ;;  %v996_v37 = vmul.f32 %v11199_v36, %v11211_v56  ;;  %1228 = vst.msk [vmem:[#allocation2 + $0xf0] sm:$0xff] %vm14692_vm1, %v1115_v6  ;;  %v1085_v38 = vmul.f32 0.01, %v1021_v39  ;;  %v1415_v55 = vld [vmem:[#allocation2 + $0x6a] sm:$0xff] }
 0x1d6   : > { %v983_v49 = vmul.f32 %v11199_v36, %v944_v0  ;;  %v11383_v60 = vadd.f32 %v11220_v45, %v993_v46  ;;  %9251 = vrot.lane.b32.xlu1 %v9250_v20, %s14776_s20  ;;  %v9275_v27 = vpack.i.bf16 %v1376_v25, %v1375_v19  ;;  %v1116_v4 = vsel %vm1052_vm4, %v1020_v12, %v1084_v32  ;;  %v10099_v56 = vld [vmem:[%s14627_s5 + $0x48] sm:$0xff]   ;;  %v1378_v53 = vld [vmem:[#allocation2 + $0x91] sm:$0xff] }
 0x1d7   : > { %9266 = vrot.lane.b32.xlu0 %v9265_v13, %s14687_s19  ;;  %v1117_v52 = vsel %vm1053_vm5, %v1021_v39, %v1085_v38  ;;  %1229 = vst.msk [vmem:[#allocation2 + $0x108] sm:$0xff] %vm14692_vm1, %v1116_v4  ;;  %v984_v3 = vmul.f32 %v11199_v36, %v945_v21  ;;  %v946_v26 = vmul.f32 %v11174_v23, %v910_v61  ;;  %v1377_v62 = vld [vmem:[#allocation2 + $0x89] sm:$0xff]  ;;  %v11446_v38 = vpop.permute.xlu0 %9216 }
 0x1d8   : > { %v1022_v8 = vadd.f32 %v11220_v45, %v983_v49  ;;  %v9260_v16 = vpack.i.bf16 %v1298_v15, %v1297_v14  ;;  %1230 = vst.msk [vmem:[#allocation2 + $0x110] sm:$0xff] %vm14692_vm1, %v1117_v52  ;;  %v947_v58 = vmul.f32 %v11174_v23, %v911_v2  ;;  %v948_v44 = vmul.f32 %v11174_v23, %v912_v11  ;;  %v1299_v57 = vld [vmem:[#allocation2 + $0xa7] sm:$0xff]  ;;  %v1300_v33 = vld [vmem:[#allocation2 + $0xaf] sm:$0xff] }
 0x1d9   : > { %v949_v9 = vmul.f32 %v11174_v23, %v913_v18  ;;  %8592 = vmatprep.subr.bf16.mxu0 %v10099_v56  ;;  %v11413_v61 = vadd.f32 %v11220_v45, %v994_v63  ;;  %v11416_v48 = vadd.f32 %v11220_v45, %v996_v37  ;;  %v1023_v42 = vadd.f32 %v11220_v45, %v984_v3  ;;  %v1417_v35 = vld [vmem:[#allocation2 + $0x8a] sm:$0xff] }
 0x1da   : > { %vm1054_vm6 = vcmp.gt.f32.partialorder %v1022_v8, 0.0  ;;  %8593 = vmatpush3.bf16.msra.mxu0 %v10099_v56  ;;  %9261 = vrot.lane.b32.xlu1 %v9260_v16, %s14685_s29  ;;  %v9270_v40 = vpack.i.bf16 %v1338_v50, %v1337_v43  ;;  %v9285_v11 = vpack.i.bf16 %v1416_v51, %v1415_v55  ;;  %v1086_v41 = vmul.f32 0.01, %v1022_v8  ;;  %v1339_v63 = vld [vmem:[#allocation2 + $0xa8] sm:$0xff]  ;;  %v1340_v29 = vld [vmem:[#allocation2 + $0xb0] sm:$0xff] }
 0x1db   : > { %9276 = vrot.lane.b32.xlu0 %v9275_v27, %s14777_s18  ;;  %v985_v17 = vmul.f32 %v11199_v36, %v946_v26  ;;  %vm1055_vm7 = vcmp.gt.f32.partialorder %v1023_v42, 0.0  ;;  %v1087_v18 = vmul.f32 0.01, %v1023_v42  ;;  %v986_v23 = vmul.f32 %v11199_v36, %v947_v58  ;;  %v1379_v14 = vld [vmem:[#allocation2 + $0xa9] sm:$0xff] }
 0x1dc   : > { %v987_v2 = vmul.f32 %v11199_v36, %v948_v44  ;;  %v1118_v31 = vsel %vm1054_vm6, %v1022_v8, %v1086_v41  ;;  %v988_v54 = vmul.f32 %v11199_v36, %v949_v9  ;;  %v989_v34 = vmul.f32 %v11199_v36, %v11185_v7  ;;  %v1418_v7 = vld [vmem:[#allocation2 + $0x92] sm:$0xff]  ;;  %v1301_v43 = vld [vmem:[#allocation2 + $0xc7] sm:$0xff]  ;;  %v11467_v9 = vpop.permute.xlu0 %9226 }
 0x1dd   : > { %v1024_v59 = vadd.f32 %v11220_v45, %v985_v17  ;;  %vm1067_vm8 = vcmp.gt.f32.partialorder %v11416_v48, 0.0  ;;  %v11430_v24 = vmul.f32 0.01, %v11416_v48  ;;  %v1119_v12 = vsel %vm1055_vm7, %v1023_v42, %v1087_v18  ;;  %1231 = vst.msk [vmem:[#allocation2 + $0x128] sm:$0xff] %vm14692_vm1, %v1118_v31  ;;  %v1302_v50 = vld [vmem:[#allocation2 + $0xcf] sm:$0xff]  ;;  %v1251_v17 = vld [vmem:[#allocation2 + $0x26] sm:$0xff] }
 0x1de   : > { %v1025_v39 = vadd.f32 %v11220_v45, %v986_v23  ;;  %v11435_v46 = vadd.f32 %v11220_v45, %v995_v22  ;;  %9271 = vrot.lane.b32.xlu1 %v9270_v40, %s14687_s19  ;;  %1232 = vst.msk [vmem:[#allocation2 + $0x130] sm:$0xff] %vm14692_vm1, %v1119_v12  ;;  %v990_v20 = vmul.f32 %v11199_v36, %v11188_v10  ;;  %v1380_v10 = vld [vmem:[#allocation2 + $0xb1] sm:$0xff]  ;;  %vm1064_vm3 = vcmp.gt.f32.partialorder %v11383_v60, 0.0  ;;  %v1341_v18 = vld [vmem:[#allocation2 + $0xc8] sm:$0xff] }
 0x1df   : > { %9286 = vrot.lane.b32.xlu0 %v9285_v11, %s14776_s20  ;;  %vm1056_vm9 = vcmp.gt.f32.partialorder %v1024_v59, 0.0  ;;  %v1088_v0 = vmul.f32 0.01, %v1024_v59  ;;  %v1026_v19 = vadd.f32 %v11220_v45, %v987_v2  ;;  %v1027_v25 = vadd.f32 %v11220_v45, %v988_v54  ;;  %v1419_v42 = vld [vmem:[#allocation2 + $0xaa] sm:$0xff]  ;;  %v1420_v2 = vld [vmem:[#allocation2 + $0xb2] sm:$0xff]  ;;  %v11483_v54 = vpop.permute.xlu1 %9221 }
 0x1e0   : > { %vm1057_vm10 = vcmp.gt.f32.partialorder %v1025_v39, 0.0  ;;  %v1089_v13 = vmul.f32 0.01, %v1025_v39  ;;  %v9280_v30 = vpack.i.bf16 %v1378_v53, %v1377_v62  ;;  %v9295_v6 = vpack.i.bf16 %v1300_v33, %v1299_v57  ;;  %v1342_v23 = vld [vmem:[#allocation2 + $0xd0] sm:$0xff] }
 0x1e1   : > { %v1120_v32 = vsel %vm1056_vm9, %v1024_v59, %v1088_v0  ;;  %v1028_v21 = vadd.f32 %v11220_v45, %v989_v34  ;;  %v9290_v22 = vpack.i.bf16 %v1418_v7, %v1417_v35  ;;  %v9305_v37 = vpack.i.bf16 %v1340_v29, %v1339_v63  ;;  %v11495_v33 = vld [vmem:[#allocation2 + $0xc9] sm:$0xff] }
 0x1e2   : > { %v1121_v15 = vsel %vm1057_vm10, %v1025_v39, %v1089_v13  ;;  %1233 = vst.msk [vmem:[#allocation2 + $0x148] sm:$0xff] %vm14692_vm1, %v1120_v32  ;;  %vm1058_vm11 = vcmp.gt.f32.partialorder %v1026_v19, 0.0  ;;  %9281 = vrot.lane.b32.xlu1 %v9280_v30, %s14777_s18  ;;  %vm1059_vm12 = vcmp.gt.f32.partialorder %v1027_v25, 0.0  ;;  %v1090_v36 = vmul.f32 0.01, %v1026_v19  ;;  %v11499_v39 = vld [vmem:[#allocation2 + $0xd1] sm:$0xff] }
 0x1e3   : > { %9296 = vrot.lane.b32.xlu0 %v9295_v6, %s14685_s29  ;;  %1234 = vst.msk [vmem:[#allocation2 + $0x150] sm:$0xff] %vm14692_vm1, %v1121_v15  ;;  %v1091_v49 = vmul.f32 0.01, %v1027_v25  ;;  %v1029_v27 = vadd.f32 %v11220_v45, %v990_v20  ;;  %vm1060_vm13 = vcmp.gt.f32.partialorder %v1028_v21, 0.0  ;;  %v1092_v55 = vmul.f32 0.01, %v1028_v21  ;;  %v11511_v20 = vpop.permute.xlu0 %9231 }
 0x1e4   : > { %v1030_v4 = vadd.f32 %v11220_v45, %v11346_v47  ;;  %v1031_v56 = vadd.f32 %v11220_v45, %v11350_v28  ;;  %v1122_v51 = vsel %vm1058_vm11, %v1026_v19, %v1090_v36  ;;  %v1098_v8 = vmul.f32 0.01, %v11435_v46  ;;  %v1421_v32 = vld [vmem:[#allocation2 + $0xca] sm:$0xff] }
 0x1e5   : > { %v1123_v52 = vsel %vm1059_vm12, %v1027_v25, %v1091_v49  ;;  %vm1061_vm14 = vcmp.gt.f32.partialorder %v1029_v27, 0.0  ;;  %v1093_v3 = vmul.f32 0.01, %v1029_v27  ;;  %v9315_v26 = vpack.i.bf16 %v1380_v10, %v1379_v14  ;;  %1235 = vst.msk [vmem:[#allocation2 + $0x168] sm:$0xff] %vm14692_vm1, %v1122_v51  ;;  %v1344_v14 = vld [vmem:[#allocation2 + $0xf0] sm:$0xff] }
 0x1e6   : > { %1236 = vst.msk [vmem:[#allocation2 + $0x170] sm:$0xff] %vm14692_vm1, %v1123_v52  ;;  %v1124_v16 = vsel %vm1060_vm13, %v1028_v21, %v1092_v55  ;;  %vm1062_vm15 = vcmp.gt.f32.partialorder %v1030_v4, 0.0  ;;  %9291 = vrot.lane.b32.xlu1 %v9290_v22, %s14776_s20  ;;  %vm1063_vm2 = vcmp.gt.f32.partialorder %v1031_v56, 0.0  ;;  %v1094_v47 = vmul.f32 0.01, %v1030_v4  ;;  %v1422_v22 = vld [vmem:[#allocation2 + $0xd2] sm:$0xff] }
 0x1e7   : > { %9306 = vrot.lane.b32.xlu0 %v9305_v37, %s14687_s19  ;;  %v1125_v45 = vsel %vm1061_vm14, %v1029_v27, %v1093_v3  ;;  %1237 = vst.msk [vmem:[#allocation2 + $0x188] sm:$0xff] %vm14692_vm1, %v1124_v16  ;;  %v9300_v28 = vpack.i.bf16 %v1302_v50, %v1301_v43  ;;  %v1095_v58 = vmul.f32 0.01, %v1031_v56  ;;  %vm1065_vm4 = vcmp.gt.f32.partialorder %v11413_v61, 0.0  ;;  %v1343_v37 = vld [vmem:[#allocation2 + $0xe8] sm:$0xff]  ;;  %v1384_v50 = vld [vmem:[#allocation2 + $0xf1] sm:$0xff] }
 0x1e8   : > { %1238 = vst.msk [vmem:[#allocation2 + $0x190] sm:$0xff] %vm14692_vm1, %v1125_v45  ;;  %v1096_v44 = vmul.f32 0.01, %v11383_v60  ;;  %v1126_v40 = vsel %vm1062_vm15, %v1030_v4, %v1094_v47  ;;  %v1097_v11 = vmul.f32 0.01, %v11413_v61  ;;  %vm1066_vm5 = vcmp.gt.f32.partialorder %v11435_v46, 0.0 }
 0x1e9   : > { %v1131_v41 = vsel %vm1067_vm8, %v11416_v48, %v11430_v24  ;;  %v1127_v62 = vsel %vm1063_vm2, %v1031_v56, %v1095_v58  ;;  %1239 = vst.msk [vmem:[#allocation2 + $0x1a8] sm:$0xff] %vm14692_vm1, %v1126_v40  ;;  %v1130_v31 = vsel %vm1066_vm5, %v11435_v46, %v1098_v8  ;;  %v9219_v59 = vunpack.i.h.bf16 %v11446_v38  ;;  %v11503_v46 = vld [vmem:[#allocation2 + $0xef] sm:$0xff]  ;;  %v1305_v56 = vld [vmem:[#allocation2 + $0x107] sm:$0xff] }
 0x1ea   : > { %v1128_v53 = vsel %vm1064_vm3, %v11383_v60, %v1096_v44  ;;  %1244 = vst.msk [vmem:[#allocation2 + $0x1f0] sm:$0xff] %vm14692_vm1, %v1131_v41  ;;  %9301 = vrot.lane.b32.xlu1 %v9300_v28, %s14685_s29  ;;  %1240 = vst.msk [vmem:[#allocation2 + $0x1b0] sm:$0xff] %vm14692_vm1, %v1127_v62  ;;  %v1129_v48 = vsel %vm1065_vm4, %v11413_v61, %v1097_v11  ;;  %v1252_v60 = vld [vmem:[#allocation2 + $0x2e] sm:$0xff]  ;;  %v9218_v34 = vunpack.i.l.bf16 %v11446_v38  ;;  %v9224_v12 = vunpack.i.h.bf16 %v11483_v54 }
 0x1eb   : > { %9316 = vrot.lane.b32.xlu0 %v9315_v26, %s14777_s18  ;;  %1241 = vst.msk [vmem:[#allocation2 + $0x1c8] sm:$0xff] %vm14692_vm1, %v1128_v53  ;;  %1243 = vst.msk [vmem:[#allocation2 + $0x1e8] sm:$0xff] %vm14692_vm1, %v1130_v31  ;;  %v9310_v24 = vpack.i.bf16 %v1342_v23, %v1341_v18  ;;  %v9325_v57 = vpack.i.bf16 %v1420_v2, %v1419_v42  ;;  %v11501_v61 = vld [vmem:[#allocation2 + $0xe7] sm:$0xff]  ;;  %v11506_v7 = vsel %vm14692_vm1, %v1252_v60, %v9219_v59  ;;  %vm2129_vm6 = vcmask 261120   ;;  %v1306_v43 = vld [vmem:[#allocation2 + $0x10f] sm:$0xff] }
 0x1ec   : > { %1242 = vst.msk [vmem:[#allocation2 + $0x1d0] sm:$0xff] %vm14692_vm1, %v1129_v48  ;;  %v2091_v35 = vsel %vm14692_vm1, %v1251_v17, %v9218_v34  ;;  %v9229_v63 = vunpack.i.h.bf16 %v11467_v9  ;;  %v9228_v29 = vunpack.i.l.bf16 %v11467_v9  ;;  %v9223_v0 = vunpack.i.l.bf16 %v11483_v54  ;;  %v1383_v55 = vld [vmem:[#allocation2 + $0xe9] sm:$0xff]  ;;  %v1424_v16 = vld [vmem:[#allocation2 + $0xf2] sm:$0xff]  ;;  %v11720_v54 = vld [vmem:[%s14627_s5] sm:$0xff]  }
 0x1ed   : > { %v9233_v13 = vunpack.i.l.bf16 %v11511_v20  ;;  %v9234_v19 = vunpack.i.h.bf16 %v11511_v20  ;;  %4160 = vst.msk [vmem:[#allocation3] sm:$0xff] %vm2129_vm6, %v14750_v5  ;;  %4161 = vst.msk [vmem:[#allocation3 + $0x8] sm:$0xff] %vm2129_vm6, %v14750_v5  ;;  %v9320_v30 = vpack.i.bf16 %v11499_v39, %v11495_v33  ;;  %v9335_v6 = vpack.i.bf16 %v11503_v46, %v11501_v61  ;;  %v1423_v3 = vld [vmem:[#allocation2 + $0xea] sm:$0xff]  ;;  %v1426_v41 = vld [vmem:[#allocation2 + $0x112] sm:$0xff]  ;;  %8626 = vmatprep.subr.bf16.mxu0 %v11720_v54 }
 0x1ee   : > { %9311 = vrot.lane.b32.xlu1 %v9310_v24, %s14687_s19  ;;  %v11518_v25 = vsel %vm2129_vm6, %v2091_v35, %v9223_v0  ;;  %4162 = vst.msk [vmem:[#allocation3 + $0x10] sm:$0xff] %vm2129_vm6, %v14750_v5  ;;  %4163 = vst.msk [vmem:[#allocation3 + $0x18] sm:$0xff] %vm2129_vm6, %v14750_v5  ;;  %v2133_v21 = vsel %vm2129_vm6, %v11506_v7, %v9224_v12  ;;  %vm14691_vm7 = vcmask 392192   ;;  %vm14694_vm8 = vcmask 523264   ;;  %v1345_v8 = vld [vmem:[#allocation2 + $0x108] sm:$0xff]  ;;  %v1346_v26 = vld [vmem:[#allocation2 + $0x110] sm:$0xff] }
 0x1ef   : > { %9326 = vrot.lane.b32.xlu0 %v9325_v57, %s14776_s20  ;;  %4164 = vst.msk [vmem:[#allocation3 + $0x20] sm:$0xff] %vm2129_vm6, %v14750_v5  ;;  %4165 = vst.msk [vmem:[#allocation3 + $0x28] sm:$0xff] %vm2129_vm6, %v14750_v5  ;;  %v2173_v15 = vsel %vm14691_vm7, %v11518_v25, %v9228_v29  ;;  %v2174_v38 = vsel %vm14691_vm7, %v2133_v21, %v9229_v63  ;;  %v9330_v49 = vpack.i.bf16 %v1422_v22, %v1421_v32  ;;  %vm2323_vm9 = vcmask 654336   ;;  %v1385_v28 = vld [vmem:[#allocation2 + $0x109] sm:$0xff]  ;;  %v1386_v58 = vld [vmem:[#allocation2 + $0x111] sm:$0xff] }
 0x1f0   : > { %4166 = vst.msk [vmem:[#allocation3 + $0x30] sm:$0xff] %vm2129_vm6, %v14750_v5  ;;  %4167 = vst.msk [vmem:[#allocation3 + $0x38] sm:$0xff] %vm2129_vm6, %v14750_v5  ;;  %v2214_v10 = vsel %vm14694_vm8, %v2173_v15, %v9233_v13  ;;  %v2215_v36 = vsel %vm14694_vm8, %v2174_v38, %v9234_v19  ;;  %v9345_v27 = vpack.i.bf16 %v1344_v14, %v1343_v37  ;;  %v1307_v44 = vld [vmem:[#allocation2 + $0x127] sm:$0xff]  ;;  %v1308_v9 = vld [vmem:[#allocation2 + $0x12f] sm:$0xff]  ;;  %vm3480_vm10 = vcmask 64512  }
 0x1f1   : > { %4168 = vst.msk [vmem:[#allocation3 + $0x40] sm:$0xff] %vm2129_vm6, %v14750_v5  ;;  %4169 = vst.msk [vmem:[#allocation3 + $0x48] sm:$0xff] %vm2129_vm6, %v14750_v5  ;;  %v11703_v4 = vpack.c.bf16 %v2215_v36, %v2214_v10  ;;  %v9340_v51 = vpack.i.bf16 %v1306_v43, %v1305_v56  ;;  %v9355_v52 = vpack.i.bf16 %v1384_v50, %v1383_v55  ;;  %v1425_v11 = vld [vmem:[#allocation2 + $0x10a] sm:$0xff]  ;;  %v1428_v33 = vld [vmem:[#allocation2 + $0x132] sm:$0xff] }
 0x1f2   : > { %4170 = vst.msk [vmem:[#allocation3 + $0x50] sm:$0xff] %vm2129_vm6, %v14750_v5  ;;  %4171 = vst.msk [vmem:[#allocation3 + $0x58] sm:$0xff] %vm2129_vm6, %v14750_v5  ;;  %9321 = vrot.lane.b32.xlu1 %v9320_v30, %s14777_s18  ;;  %v9350_v45 = vpack.i.bf16 %v1346_v26, %v1345_v8  ;;  %v9365_v47 = vpack.i.bf16 %v1424_v16, %v1423_v3  ;;  %v9360_v42 = vpack.i.bf16 %v1386_v58, %v1385_v28  ;;  %v1347_v17 = vld [vmem:[#allocation2 + $0x128] sm:$0xff]  ;;  %v1348_v18 = vld [vmem:[#allocation2 + $0x130] sm:$0xff] }
 0x1f3   : > { %4172 = vst.msk [vmem:[#allocation3 + $0x60] sm:$0xff] %vm2129_vm6, %v14750_v5  ;;  %4173 = vst.msk [vmem:[#allocation3 + $0x68] sm:$0xff] %vm2129_vm6, %v14750_v5  ;;  %9336 = vrot.lane.b32.xlu0 %v9335_v6, %s14685_s29  ;;  %8594 = vmatprep.mubr.msk.bf16.mxu0 %vm2323_vm9, %v11703_v4  ;;  %v9375_v40 = vpack.i.bf16 %v1308_v9, %v1307_v44  ;;  %v9370_v23 = vpack.i.bf16 %v1426_v41, %v1425_v11  ;;  %v1387_v62 = vld [vmem:[#allocation2 + $0x129] sm:$0xff]  ;;  %v1388_v59 = vld [vmem:[#allocation2 + $0x131] sm:$0xff] }
 0x1f4   : > { %4174 = vst.msk [vmem:[#allocation3 + $0x70] sm:$0xff] %vm2129_vm6, %v14750_v5  ;;  %4175 = vst.msk [vmem:[#allocation3 + $0x78] sm:$0xff] %vm2129_vm6, %v14750_v5  ;;  %v9385_v2 = vpack.i.bf16 %v1348_v18, %v1347_v17  ;;  %v1309_v53 = vld [vmem:[#allocation2 + $0x147] sm:$0xff]  ;;  %v1310_v31 = vld [vmem:[#allocation2 + $0x14f] sm:$0xff]  ;;  %v9395_v60 = vpack.i.bf16 %v1388_v59, %v1387_v62 }
 0x1f5   : > { %4176 = vst.msk [vmem:[#allocation3 + $0x80] sm:$0xff] %vm2129_vm6, %v14750_v5  ;;  %4177 = vst.msk [vmem:[#allocation3 + $0x88] sm:$0xff] %vm2129_vm6, %v14750_v5  ;;  %v9380_v48 = vpack.i.bf16 %v1310_v31, %v1309_v53  ;;  %v1427_v34 = vld [vmem:[#allocation2 + $0x12a] sm:$0xff]  ;;  %v1430_v20 = vld [vmem:[#allocation2 + $0x152] sm:$0xff] }
 0x1f6   : > { %4178 = vst.msk [vmem:[#allocation3 + $0x90] sm:$0xff] %vm2129_vm6, %v14750_v5  ;;  %4179 = vst.msk [vmem:[#allocation3 + $0x98] sm:$0xff] %vm2129_vm6, %v14750_v5  ;;  %9331 = vrot.lane.b32.xlu1 %v9330_v49, %s14776_s20  ;;  %v1349_v24 = vld [vmem:[#allocation2 + $0x148] sm:$0xff]  ;;  %v1350_v57 = vld [vmem:[#allocation2 + $0x150] sm:$0xff]  ;;  %v9405_v12 = vpack.i.bf16 %v1428_v33, %v1427_v34 }
 0x1f7   : > { %4180 = vst.msk [vmem:[#allocation3 + $0xa0] sm:$0xff] %vm2129_vm6, %v14750_v5  ;;  %4181 = vst.msk [vmem:[#allocation3 + $0xa8] sm:$0xff] %vm2129_vm6, %v14750_v5  ;;  %9346 = vrot.lane.b32.xlu0 %v9345_v27, %s14687_s19  ;;  %v9390_v35 = vpack.i.bf16 %v1350_v57, %v1349_v24  ;;  %v1389_v39 = vld [vmem:[#allocation2 + $0x149] sm:$0xff]  ;;  %v1390_v61 = vld [vmem:[#allocation2 + $0x151] sm:$0xff] }
 0x1f8   : > { %4182 = vst.msk [vmem:[#allocation3 + $0xb0] sm:$0xff] %vm2129_vm6, %v14750_v5  ;;  %4183 = vst.msk [vmem:[#allocation3 + $0xb8] sm:$0xff] %vm2129_vm6, %v14750_v5  ;;  %v1311_v46 = vld [vmem:[#allocation2 + $0x167] sm:$0xff]  ;;  %v1312_v7 = vld [vmem:[#allocation2 + $0x16f] sm:$0xff]  ;;  %v9400_v63 = vpack.i.bf16 %v1390_v61, %v1389_v39 }
 0x1f9   : > { %4184 = vst.msk [vmem:[#allocation3 + $0xc0] sm:$0xff] %vm2129_vm6, %v14750_v5  ;;  %4185 = vst.msk [vmem:[#allocation3 + $0xc8] sm:$0xff] %vm2129_vm6, %v14750_v5  ;;  %v9415_v29 = vpack.i.bf16 %v1312_v7, %v1311_v46  ;;  %v1429_v0 = vld [vmem:[#allocation2 + $0x14a] sm:$0xff]  ;;  %v1432_v36 = vld [vmem:[#allocation2 + $0x172] sm:$0xff] }
 0x1fa   : > { %4186 = vst.msk [vmem:[#allocation3 + $0xd0] sm:$0xff] %vm2129_vm6, %v14750_v5  ;;  %4187 = vst.msk [vmem:[#allocation3 + $0xd8] sm:$0xff] %vm2129_vm6, %v14750_v5  ;;  %9341 = vrot.lane.b32.xlu1 %v9340_v51, %s14685_s29  ;;  %v1351_v13 = vld [vmem:[#allocation2 + $0x168] sm:$0xff]  ;;  %v1352_v19 = vld [vmem:[#allocation2 + $0x170] sm:$0xff]  ;;  %v9410_v25 = vpack.i.bf16 %v1430_v20, %v1429_v0 }
 0x1fb   : > { %4188 = vst.msk [vmem:[#allocation3 + $0xe0] sm:$0xff] %vm2129_vm6, %v14750_v5  ;;  %4189 = vst.msk [vmem:[#allocation3 + $0xe8] sm:$0xff] %vm2129_vm6, %v14750_v5  ;;  %9356 = vrot.lane.b32.xlu0 %v9355_v52, %s14777_s18  ;;  %v9425_v30 = vpack.i.bf16 %v1352_v19, %v1351_v13  ;;  %v1313_v6 = vld [vmem:[#allocation2 + $0x187] sm:$0xff]  ;;  %v1314_v32 = vld [vmem:[#allocation2 + $0x18f] sm:$0xff] }
 0x1fc   : > { %4190 = vst.msk [vmem:[#allocation3 + $0xf0] sm:$0xff] %vm2129_vm6, %v14750_v5  ;;  %4191 = vst.msk [vmem:[#allocation3 + $0xf8] sm:$0xff] %vm2129_vm6, %v14750_v5  ;;  %v1391_v21 = vld [vmem:[#allocation2 + $0x169] sm:$0xff]  ;;  %v1392_v22 = vld [vmem:[#allocation2 + $0x171] sm:$0xff]  ;;  %v9420_v37 = vpack.i.bf16 %v1314_v32, %v1313_v6 }
 0x1fd   : > { %4192 = vst.msk [vmem:[#allocation3 + $0x100] sm:$0xff] %vm2129_vm6, %v14750_v5  ;;  %4193 = vst.msk [vmem:[#allocation3 + $0x108] sm:$0xff] %vm2129_vm6, %v14750_v5  ;;  %v9435_v14 = vpack.i.bf16 %v1392_v22, %v1391_v21  ;;  %v1353_v15 = vld [vmem:[#allocation2 + $0x188] sm:$0xff]  ;;  %v1354_v38 = vld [vmem:[#allocation2 + $0x190] sm:$0xff] }
 0x1fe   : > { %4194 = vst.msk [vmem:[#allocation3 + $0x110] sm:$0xff] %vm2129_vm6, %v14750_v5  ;;  %4195 = vst.msk [vmem:[#allocation3 + $0x118] sm:$0xff] %vm2129_vm6, %v14750_v5  ;;  %9351 = vrot.lane.b32.xlu1 %v9350_v45, %s14687_s19  ;;  %v1431_v10 = vld [vmem:[#allocation2 + $0x16a] sm:$0xff]  ;;  %v9430_v49 = vpack.i.bf16 %v1354_v38, %v1353_v15  ;;  %v1434_v8 = vld [vmem:[#allocation2 + $0x192] sm:$0xff] }
 0x1ff   : > { %4196 = vst.msk [vmem:[#allocation3 + $0x120] sm:$0xff] %vm2129_vm6, %v14750_v5  ;;  %4197 = vst.msk [vmem:[#allocation3 + $0x128] sm:$0xff] %vm2129_vm6, %v14750_v5  ;;  %9366 = vrot.lane.b32.xlu0 %v9365_v47, %s14776_s20  ;;  %v9445_v27 = vpack.i.bf16 %v1432_v36, %v1431_v10  ;;  %v1393_v55 = vld [vmem:[#allocation2 + $0x189] sm:$0xff]  ;;  %v1394_v56 = vld [vmem:[#allocation2 + $0x191] sm:$0xff] }
 0x200   : > { %4198 = vst.msk [vmem:[#allocation3 + $0x130] sm:$0xff] %vm2129_vm6, %v14750_v5  ;;  %4199 = vst.msk [vmem:[#allocation3 + $0x138] sm:$0xff] %vm2129_vm6, %v14750_v5  ;;  %v1315_v43 = vld [vmem:[#allocation2 + $0x1a7] sm:$0xff]  ;;  %v1316_v50 = vld [vmem:[#allocation2 + $0x1af] sm:$0xff]  ;;  %v9440_v51 = vpack.i.bf16 %v1394_v56, %v1393_v55 }
 0x201   : > { %4200 = vst.msk [vmem:[#allocation3 + $0x140] sm:$0xff] %vm2129_vm6, %v14750_v5  ;;  %4201 = vst.msk [vmem:[#allocation3 + $0x148] sm:$0xff] %vm2129_vm6, %v14750_v5  ;;  %v9455_v52 = vpack.i.bf16 %v1316_v50, %v1315_v43  ;;  %v1433_v3 = vld [vmem:[#allocation2 + $0x18a] sm:$0xff]  ;;  %v1436_v18 = vld [vmem:[#allocation2 + $0x1b2] sm:$0xff] }
 0x202   : > { %4202 = vst.msk [vmem:[#allocation3 + $0x150] sm:$0xff] %vm2129_vm6, %v14750_v5  ;;  %4203 = vst.msk [vmem:[#allocation3 + $0x158] sm:$0xff] %vm2129_vm6, %v14750_v5  ;;  %9361 = vrot.lane.b32.xlu1 %v9360_v42, %s14777_s18  ;;  %v1355_v26 = vld [vmem:[#allocation2 + $0x1a8] sm:$0xff]  ;;  %v1356_v16 = vld [vmem:[#allocation2 + $0x1b0] sm:$0xff]  ;;  %v9450_v45 = vpack.i.bf16 %v1434_v8, %v1433_v3 }
 0x203   : > { %4204 = vst.msk [vmem:[#allocation3 + $0x160] sm:$0xff] %vm2129_vm6, %v14750_v5  ;;  %4205 = vst.msk [vmem:[#allocation3 + $0x168] sm:$0xff] %vm2129_vm6, %v14750_v5  ;;  %9376 = vrot.lane.b32.xlu0 %v9375_v40, %s14685_s29  ;;  %v9465_v47 = vpack.i.bf16 %v1356_v16, %v1355_v26  ;;  %v1317_v28 = vld [vmem:[#allocation2 + $0x1c7] sm:$0xff]  ;;  %v1318_v58 = vld [vmem:[#allocation2 + $0x1cf] sm:$0xff] }
 0x204   : > { %4206 = vst.msk [vmem:[#allocation3 + $0x170] sm:$0xff] %vm2129_vm6, %v14750_v5  ;;  %4207 = vst.msk [vmem:[#allocation3 + $0x178] sm:$0xff] %vm2129_vm6, %v14750_v5  ;;  %v1395_v44 = vld [vmem:[#allocation2 + $0x1a9] sm:$0xff]  ;;  %v1396_v9 = vld [vmem:[#allocation2 + $0x1b1] sm:$0xff]  ;;  %v9460_v42 = vpack.i.bf16 %v1318_v58, %v1317_v28 }
 0x205   : > { %4208 = vst.msk [vmem:[#allocation3 + $0x180] sm:$0xff] %vm2129_vm6, %v14750_v5  ;;  %4209 = vst.msk [vmem:[#allocation3 + $0x188] sm:$0xff] %vm2129_vm6, %v14750_v5  ;;  %v9475_v40 = vpack.i.bf16 %v1396_v9, %v1395_v44  ;;  %v1357_v11 = vld [vmem:[#allocation2 + $0x1c8] sm:$0xff]  ;;  %v1358_v41 = vld [vmem:[#allocation2 + $0x1d0] sm:$0xff] }
 0x206   : > { %4210 = vst.msk [vmem:[#allocation3 + $0x190] sm:$0xff] %vm2129_vm6, %v14750_v5  ;;  %4211 = vst.msk [vmem:[#allocation3 + $0x198] sm:$0xff] %vm2129_vm6, %v14750_v5  ;;  %9371 = vrot.lane.b32.xlu1 %v9370_v23, %s14776_s20  ;;  %v1435_v17 = vld [vmem:[#allocation2 + $0x1aa] sm:$0xff]  ;;  %v9470_v23 = vpack.i.bf16 %v1358_v41, %v1357_v11  ;;  %v1438_v24 = vld [vmem:[#allocation2 + $0x1d2] sm:$0xff] }
 0x207   : > { %4212 = vst.msk [vmem:[#allocation3 + $0x1a0] sm:$0xff] %vm2129_vm6, %v14750_v5  ;;  %4213 = vst.msk [vmem:[#allocation3 + $0x1a8] sm:$0xff] %vm2129_vm6, %v14750_v5  ;;  %9386 = vrot.lane.b32.xlu0 %v9385_v2, %s14687_s19  ;;  %v9485_v2 = vpack.i.bf16 %v1436_v18, %v1435_v17  ;;  %v1397_v62 = vld [vmem:[#allocation2 + $0x1c9] sm:$0xff]  ;;  %v1398_v53 = vld [vmem:[#allocation2 + $0x1d1] sm:$0xff] }
 0x208   : > { %4214 = vst.msk [vmem:[#allocation3 + $0x1b0] sm:$0xff] %vm2129_vm6, %v14750_v5  ;;  %4215 = vst.msk [vmem:[#allocation3 + $0x1b8] sm:$0xff] %vm2129_vm6, %v14750_v5  ;;  %v1319_v31 = vld [vmem:[#allocation2 + $0x1e7] sm:$0xff]  ;;  %v1320_v59 = vld [vmem:[#allocation2 + $0x1ef] sm:$0xff] }
 0x209   : > { %4216 = vst.msk [vmem:[#allocation3 + $0x1c0] sm:$0xff] %vm2129_vm6, %v14750_v5  ;;  %4217 = vst.msk [vmem:[#allocation3 + $0x1c8] sm:$0xff] %vm2129_vm6, %v14750_v5  ;;  %v1437_v34 = vld [vmem:[#allocation2 + $0x1ca] sm:$0xff]  ;;  %v1440_v19 = vld [vmem:[#allocation2 + $0x1f2] sm:$0xff] }
 0x20a   : > { %4218 = vst.msk [vmem:[#allocation3 + $0x1d0] sm:$0xff] %vm2129_vm6, %v14750_v5  ;;  %4219 = vst.msk [vmem:[#allocation3 + $0x1d8] sm:$0xff] %vm2129_vm6, %v14750_v5  ;;  %9381 = vrot.lane.b32.xlu1 %v9380_v48, %s14685_s29  ;;  %v9480_v48 = vpack.i.bf16 %v1398_v53, %v1397_v62  ;;  %v1359_v57 = vld [vmem:[#allocation2 + $0x1e8] sm:$0xff]  ;;  %v1360_v33 = vld [vmem:[#allocation2 + $0x1f0] sm:$0xff] }
 0x20b   : > { %4220 = vst.msk [vmem:[#allocation3 + $0x1e0] sm:$0xff] %vm2129_vm6, %v14750_v5  ;;  %4221 = vst.msk [vmem:[#allocation3 + $0x1e8] sm:$0xff] %vm2129_vm6, %v14750_v5  ;;  %9396 = vrot.lane.b32.xlu0 %v9395_v60, %s14777_s18  ;;  %v9495_v60 = vpack.i.bf16 %v1320_v59, %v1319_v31  ;;  %v1321_v39 = vld [vmem:[#allocation2 + $0x207] sm:$0xff]  ;;  %v1322_v61 = vld [vmem:[#allocation2 + $0x20f] sm:$0xff] }
 0x20c   : > { %4222 = vst.msk [vmem:[#allocation3 + $0x1f0] sm:$0xff] %vm2129_vm6, %v14750_v5  ;;  %4223 = vst.msk [vmem:[#allocation3 + $0x1f8] sm:$0xff] %vm2129_vm6, %v14750_v5  ;;  %v1399_v46 = vld [vmem:[#allocation2 + $0x1e9] sm:$0xff]  ;;  %v1400_v7 = vld [vmem:[#allocation2 + $0x1f1] sm:$0xff] }
 0x20d   : > { %4224 = vst.msk [vmem:[#allocation3 + $0x200] sm:$0xff] %vm2129_vm6, %v14750_v5  ;;  %4225 = vst.msk [vmem:[#allocation3 + $0x208] sm:$0xff] %vm2129_vm6, %v14750_v5  ;;  %v1361_v0 = vld [vmem:[#allocation2 + $0x208] sm:$0xff]  ;;  %v1362_v20 = vld [vmem:[#allocation2 + $0x210] sm:$0xff] }
 0x20e   : > { %4226 = vst.msk [vmem:[#allocation3 + $0x210] sm:$0xff] %vm2129_vm6, %v14750_v5  ;;  %4227 = vst.msk [vmem:[#allocation3 + $0x218] sm:$0xff] %vm2129_vm6, %v14750_v5  ;;  %9391 = vrot.lane.b32.xlu1 %v9390_v35, %s14687_s19  ;;  %v9490_v35 = vpack.i.bf16 %v1438_v24, %v1437_v34  ;;  %v1439_v13 = vld [vmem:[#allocation2 + $0x1ea] sm:$0xff]  ;;  %v9510_v6 = vpack.i.bf16 %v1362_v20, %v1361_v0  ;;  %v1410_v17 = vld [vmem:[#allocation2 + $0x12] sm:$0xff] }
 0x20f   : > { %4228 = vst.msk [vmem:[#allocation3 + $0x220] sm:$0xff] %vm2129_vm6, %v14750_v5  ;;  %4229 = vst.msk [vmem:[#allocation3 + $0x228] sm:$0xff] %vm2129_vm6, %v14750_v5  ;;  %9406 = vrot.lane.b32.xlu0 %v9405_v12, %s14776_s20  ;;  %v9505_v12 = vpack.i.bf16 %v1360_v33, %v1359_v57  ;;  %v9525_v32 = vpack.i.bf16 %v1440_v19, %v1439_v13  ;;  %v1401_v21 = vld [vmem:[#allocation2 + $0x209] sm:$0xff]  ;;  %v1402_v22 = vld [vmem:[#allocation2 + $0x211] sm:$0xff] }
 0x210   : > { %4230 = vst.msk [vmem:[#allocation3 + $0x230] sm:$0xff] %vm2129_vm6, %v14750_v5  ;;  %4231 = vst.msk [vmem:[#allocation3 + $0x238] sm:$0xff] %vm2129_vm6, %v14750_v5  ;;  %v1370_v15 = vld [vmem:[#allocation2 + $0x11] sm:$0xff]  ;;  %v9520_v36 = vpack.i.bf16 %v1402_v22, %v1401_v21  ;;  %v1329_v50 = vld [vmem:[#allocation2 + $0x8] sm:$0xff] }
 0x211   : > { %4232 = vst.msk [vmem:[#allocation3 + $0x240] sm:$0xff] %vm2129_vm6, %v14750_v5  ;;  %4233 = vst.msk [vmem:[#allocation3 + $0x248] sm:$0xff] %vm2129_vm6, %v14750_v5  ;;  %v1323_v26 = vld [vmem:[#allocation2 + $0x227] sm:$0xff]  ;;  %v1324_v44 = vld [vmem:[#allocation2 + $0x22f] sm:$0xff] }
 0x212   : > { %4234 = vst.msk [vmem:[#allocation3 + $0x250] sm:$0xff] %vm2129_vm6, %v14750_v5  ;;  %4235 = vst.msk [vmem:[#allocation3 + $0x258] sm:$0xff] %vm2129_vm6, %v14750_v5  ;;  %9401 = vrot.lane.b32.xlu1 %v9400_v63, %s14777_s18  ;;  %v9500_v63 = vpack.i.bf16 %v1322_v61, %v1321_v39  ;;  %v1254_v28 = vld [vmem:[#allocation2 + $0x4e] sm:$0xff] }
 0x213   : > { %4236 = vst.msk [vmem:[#allocation3 + $0x260] sm:$0xff] %vm2129_vm6, %v14750_v5  ;;  %4237 = vst.msk [vmem:[#allocation3 + $0x268] sm:$0xff] %vm2129_vm6, %v14750_v5  ;;  %9416 = vrot.lane.b32.xlu0 %v9415_v29, %s14685_s29  ;;  %v9515_v29 = vpack.i.bf16 %v1400_v7, %v1399_v46  ;;  %v1409_v41 = vld [vmem:[#allocation2 + $0xa] sm:$0xff] }
 0x214   : > { %4238 = vst.msk [vmem:[#allocation3 + $0x270] sm:$0xff] %vm2129_vm6, %v14750_v5  ;;  %4239 = vst.msk [vmem:[#allocation3 + $0x278] sm:$0xff] %vm2129_vm6, %v14750_v5  ;;  %v9550_v57 = vpack.i.bf16 %v1410_v17, %v1409_v41  ;;  %v1363_v20 = vld [vmem:[#allocation2 + $0x228] sm:$0xff]  ;;  %v1364_v13 = vld [vmem:[#allocation2 + $0x230] sm:$0xff] }
 0x215   : > { %v10101_v19 = vld [vmem:[%s14627_s5 + $0x8] sm:$0xff]  }
 0x216   : > { %9411 = vrot.lane.b32.xlu1 %v9410_v25, %s14776_s20  ;;  %v1289_v25 = vld [vmem:[#allocation2 + $0x7] sm:$0xff] }
 0x217   : > { %9426 = vrot.lane.b32.xlu0 %v9425_v30, %s14687_s19  ;;  %v1290_v30 = vld [vmem:[#allocation2 + $0xf] sm:$0xff] }
 0x21a   : > { %9421 = vrot.lane.b32.xlu1 %v9420_v37, %s14685_s29  ;;  %v9530_v37 = vpack.i.bf16 %v1290_v30, %v1289_v25 }
 0x21b   : > { %9436 = vrot.lane.b32.xlu0 %v9435_v14, %s14777_s18  ;;  %v1369_v14 = vld [vmem:[#allocation2 + $0x9] sm:$0xff] }
 0x21c   : > { %v9545_v43 = vpack.i.bf16 %v1370_v15, %v1369_v14  ;;  %v9560_v15 = vpack.i.bf16 %v1364_v13, %v1363_v20  ;;  %v1260_v20 = vld [vmem:[#allocation2 + $0xae] sm:$0xff] }
 0x21e   : > { %9431 = vrot.lane.b32.xlu1 %v9430_v49, %s14687_s19  ;;  %v1441_v49 = vld [vmem:[#allocation2 + $0x20a] sm:$0xff] }
 0x21f   : > { %9446 = vrot.lane.b32.xlu0 %v9445_v27, %s14776_s20  ;;  %v1442_v27 = vld [vmem:[#allocation2 + $0x212] sm:$0xff] }
 0x220   : > { %v9535_v8 = vpack.i.bf16 %v1442_v27, %v1441_v49  ;;  %v1443_v27 = vld [vmem:[#allocation2 + $0x22a] sm:$0xff] }
 0x222   : > { %9441 = vrot.lane.b32.xlu1 %v9440_v51, %s14777_s18  ;;  %v1330_v51 = vld [vmem:[#allocation2 + $0x10] sm:$0xff] }
 0x223   : > { %9456 = vrot.lane.b32.xlu0 %v9455_v52, %s14685_s29  ;;  %v9540_v58 = vpack.i.bf16 %v1330_v51, %v1329_v50 }
 0x226   : > { %9451 = vrot.lane.b32.xlu1 %v9450_v45, %s14776_s20 }
 0x227   : > { %9466 = vrot.lane.b32.xlu0 %v9465_v47, %s14687_s19  ;;  %v1253_v47 = vld [vmem:[#allocation2 + $0x46] sm:$0xff] }
 0x22a   : > { %9461 = vrot.lane.b32.xlu1 %v9460_v42, %s14685_s29 }
 0x22b   : > { %9476 = vrot.lane.b32.xlu0 %v9475_v40, %s14777_s18 }
 0x22e   : > { %9471 = vrot.lane.b32.xlu1 %v9470_v23, %s14687_s19 }
 0x22f   : > { %9486 = vrot.lane.b32.xlu0 %v9485_v2, %s14776_s20  ;;  %v9555_v2 = vpack.i.bf16 %v1324_v44, %v1323_v26 }
 0x232   : > { %9481 = vrot.lane.b32.xlu1 %v9480_v48, %s14777_s18  ;;  %v1403_v48 = vld [vmem:[#allocation2 + $0x229] sm:$0xff] }
 0x233   : > { %9496 = vrot.lane.b32.xlu0 %v9495_v60, %s14685_s29  ;;  %v1404_v60 = vld [vmem:[#allocation2 + $0x231] sm:$0xff] }
 0x234   : > { %v9565_v7 = vpack.i.bf16 %v1404_v60, %v1403_v48 }
 0x236   : > { %9491 = vrot.lane.b32.xlu1 %v9490_v35, %s14776_s20 }
 0x237   : > { %9506 = vrot.lane.b32.xlu0 %v9505_v12, %s14687_s19 }
 0x23a   : > { %9501 = vrot.lane.b32.xlu1 %v9500_v63, %s14685_s29 }
 0x23b   : > { %9516 = vrot.lane.b32.xlu0 %v9515_v29, %s14777_s18 }
 0x23e   : > { %9511 = vrot.lane.b32.xlu1 %v9510_v6, %s14687_s19  ;;  %v1255_v6 = vld [vmem:[#allocation2 + $0x66] sm:$0xff] }
 0x23f   : > { %9526 = vrot.lane.b32.xlu0 %v9525_v32, %s14776_s20  ;;  %v1256_v32 = vld [vmem:[#allocation2 + $0x6e] sm:$0xff] }
 0x240   : > { %v9242_v38 = vpop.permute.xlu1 %9241 }
 0x241   : > { %v9237_v10 = vpop.permute.xlu0 %9236  ;;  %v9244_v16 = vunpack.i.h.bf16 %v9242_v38  ;;  %v9243_v45 = vunpack.i.l.bf16 %v9242_v38 }
 0x242   : > { %v9239_v55 = vunpack.i.h.bf16 %v9237_v10  ;;  %v9238_v56 = vunpack.i.l.bf16 %v9237_v10  ;;  %9521 = vrot.lane.b32.xlu1 %v9520_v36, %s14777_s18 }
 0x243   : > { %9531 = vrot.lane.b32.xlu0 %v9530_v37, %s14685_s29 }
 0x244   : > { %v9247_v52 = vpop.permute.xlu1 %9246  ;;  %v2093_v9 = vsel %vm14692_vm1, %v1253_v47, %v9238_v56  ;;  %v2094_v42 = vsel %vm14692_vm1, %v1254_v28, %v9239_v55  ;;  %v1444_v55 = vld [vmem:[#allocation2 + $0x232] sm:$0xff] }
 0x245   : > { %v9257_v3 = vpop.permute.xlu0 %9256  ;;  %v9249_v40 = vunpack.i.h.bf16 %v9247_v52  ;;  %v9248_v11 = vunpack.i.l.bf16 %v9247_v52  ;;  %v2134_v62 = vsel %vm2129_vm6, %v2093_v9, %v9243_v45  ;;  %v2135_v53 = vsel %vm2129_vm6, %v2094_v42, %v9244_v16  ;;  %v10102_v56 = vld [vmem:[%s14627_s5 + $0x10] sm:$0xff]   ;;  %v1257_v42 = vld [vmem:[#allocation2 + $0x86] sm:$0xff] }
 0x246   : > { %9536 = vrot.lane.b32.xlu1 %v9535_v8, %s14776_s20  ;;  %v9259_v12 = vunpack.i.h.bf16 %v9257_v3  ;;  %v9258_v39 = vunpack.i.l.bf16 %v9257_v3  ;;  %v9570_v16 = vpack.i.bf16 %v1444_v55, %v1443_v27 }
 0x247   : > { %9546 = vrot.lane.b32.xlu0 %v9545_v43, %s14777_s18  ;;  %v2175_v34 = vsel %vm14691_vm7, %v2134_v62, %v9248_v11  ;;  %v2176_v24 = vsel %vm14691_vm7, %v2135_v53, %v9249_v40  ;;  %v1258_v40 = vld [vmem:[#allocation2 + $0x8e] sm:$0xff] }
 0x248   : > { %v9252_v18 = vpop.permute.xlu1 %9251  ;;  %v2096_v21 = vsel %vm14692_vm1, %v1256_v32, %v9259_v12  ;;  %v2095_v22 = vsel %vm14692_vm1, %v1255_v6, %v9258_v39 }
 0x249   : > { %v9267_v23 = vpop.permute.xlu0 %9266  ;;  %v9254_v31 = vunpack.i.h.bf16 %v9252_v18  ;;  %v9253_v59 = vunpack.i.l.bf16 %v9252_v18 }
 0x24a   : > { %9541 = vrot.lane.b32.xlu1 %v9540_v58, %s14687_s19  ;;  %v9269_v29 = vunpack.i.h.bf16 %v9267_v23  ;;  %v9268_v0 = vunpack.i.l.bf16 %v9267_v23  ;;  %v10103_v58 = vld [vmem:[%s14627_s5 + $0x18] sm:$0xff]  }
 0x24b   : > { %9556 = vrot.lane.b32.xlu0 %v9555_v2, %s14685_s29  ;;  %v2216_v33 = vsel %vm14694_vm8, %v2175_v34, %v9253_v59  ;;  %v2217_v35 = vsel %vm14694_vm8, %v2176_v24, %v9254_v31  ;;  %v10104_v31 = vld [vmem:[%s14627_s5 + $0x20] sm:$0xff]  }
 0x24c   : > { %v9262_v61 = vpop.permute.xlu1 %9261  ;;  %v11765_v63 = vpack.c.bf16 %v2217_v35, %v2216_v33  ;;  %v2136_v38 = vsel %vm2129_vm6, %v2095_v22, %v9268_v0  ;;  %v2137_v10 = vsel %vm2129_vm6, %v2096_v21, %v9269_v29  ;;  %v1259_v0 = vld [vmem:[#allocation2 + $0xa6] sm:$0xff] }
 0x24d   : > { %v9277_v46 = vpop.permute.xlu0 %9276  ;;  %v9264_v52 = vunpack.i.h.bf16 %v9262_v61  ;;  %v9263_v3 = vunpack.i.l.bf16 %v9262_v61 }
 0x24e   : > { %v9279_v25 = vunpack.i.h.bf16 %v9277_v46  ;;  %v9278_v30 = vunpack.i.l.bf16 %v9277_v46  ;;  %9551 = vrot.lane.b32.xlu1 %v9550_v57, %s14776_s20  ;;  %8595 = vmatmul.mubr.msk.bf16.vlgmr.msra.gmra.mrb[0].mxu0 %vm2323_vm9, %v11765_v63  ;;  %v11811_v46 = vld [vmem:[%s14627_s5 + $0x50] sm:$0xff]  }
 0x24f   : > { %9566 = vrot.lane.b32.xlu0 %v9565_v7, %s14777_s18  ;;  %8627 = vmatpush3.bf16.msra.mxu0 %v11720_v54  ;;  %v2098_v11 = vsel %vm14692_vm1, %v1258_v40, %v9264_v52  ;;  %v2097_v41 = vsel %vm14692_vm1, %v1257_v42, %v9263_v3  ;;  %v1262_v52 = vld [vmem:[#allocation2 + $0xce] sm:$0xff] }
 0x250   : > { %v9272_v37 = vpop.permute.xlu1 %9271  ;;  %8628 = vmatprep.subr.bf16.mxu0 %v10101_v19  ;;  %v2177_v43 = vsel %vm14691_vm7, %v2136_v38, %v9278_v30  ;;  %v2178_v50 = vsel %vm14691_vm7, %v2137_v10, %v9279_v25 }
 0x251   : > { %v9287_v14 = vpop.permute.xlu0 %9286  ;;  %v9274_v47 = vunpack.i.h.bf16 %v9272_v37  ;;  %v9273_v28 = vunpack.i.l.bf16 %v9272_v37 }
 0x252   : > { %v9289_v36 = vunpack.i.h.bf16 %v9287_v14  ;;  %v9288_v49 = vunpack.i.l.bf16 %v9287_v14  ;;  %9561 = vrot.lane.b32.xlu1 %v9560_v15, %s14687_s19 }
 0x253   : > { %8629 = vmatpush3.bf16.msra.mxu0 %v10101_v19  ;;  %v2138_v23 = vsel %vm2129_vm6, %v2097_v41, %v9273_v28  ;;  %v2139_v2 = vsel %vm2129_vm6, %v2098_v11, %v9274_v47 }
 0x254   : > { %v2218_v54 = vsel %vm14694_vm8, %v2177_v43, %v9288_v49  ;;  %v2219_v51 = vsel %vm14694_vm8, %v2178_v50, %v9289_v36  ;;  %v9282_v8 = vpop.permute.xlu1 %9281  ;;  %8630 = vmatprep.subr.bf16.mxu0 %v10102_v56 }
 0x255   : > { %v9297_v26 = vpop.permute.xlu0 %9296  ;;  %v11787_v45 = vpack.c.bf16 %v2219_v51, %v2218_v54  ;;  %v9284_v44 = vunpack.i.h.bf16 %v9282_v8  ;;  %v9283_v9 = vunpack.i.l.bf16 %v9282_v8  ;;  %v1261_v51 = vld [vmem:[#allocation2 + $0xc6] sm:$0xff] }
 0x256   : > { %9571 = vrot.lane.b32.xlu1 %v9570_v16, %s14776_s20  ;;  %v9299_v24 = vunpack.i.h.bf16 %v9297_v26  ;;  %v9298_v57 = vunpack.i.l.bf16 %v9297_v26 }
 0x257   : > { %8598 = vmatprep.mubr.msk.bf16.mxu0 %vm2323_vm9, %v11787_v45  ;;  %8631 = vmatpush3.bf16.msra.mxu0 %v10102_v56  ;;  %v2179_v59 = vsel %vm14691_vm7, %v2138_v23, %v9283_v9  ;;  %v2180_v48 = vsel %vm14691_vm7, %v2139_v2, %v9284_v44 }
 0x258   : > { %v9292_v17 = vpop.permute.xlu1 %9291  ;;  %8632 = vmatprep.subr.bf16.mxu0 %v10103_v58  ;;  %v2100_v13 = vsel %vm14692_vm1, %v1260_v20, %v9299_v24  ;;  %v2099_v19 = vsel %vm14692_vm1, %v1259_v0, %v9298_v57 }
 0x259   : > { %v9307_v18 = vpop.permute.xlu0 %9306  ;;  %v9294_v62 = vunpack.i.h.bf16 %v9292_v17  ;;  %v9293_v53 = vunpack.i.l.bf16 %v9292_v17 }
 0x25a   : > { %v9309_v39 = vunpack.i.h.bf16 %v9307_v18  ;;  %v9308_v61 = vunpack.i.l.bf16 %v9307_v18 }
 0x25b   : > { %v2220_v60 = vsel %vm14694_vm8, %v2179_v59, %v9293_v53  ;;  %v2221_v34 = vsel %vm14694_vm8, %v2180_v48, %v9294_v62  ;;  %8633 = vmatpush3.bf16.msra.mxu0 %v10103_v58  ;;  %v1263_v48 = vld [vmem:[#allocation2 + $0xe6] sm:$0xff] }
 0x25c   : > { %v11806_v33 = vpack.c.bf16 %v2221_v34, %v2220_v60  ;;  %v9302_v35 = vpop.permute.xlu1 %9301  ;;  %8634 = vmatprep.subr.bf16.mxu0 %v10104_v31  ;;  %v2140_v6 = vsel %vm2129_vm6, %v2099_v19, %v9308_v61  ;;  %v2141_v32 = vsel %vm2129_vm6, %v2100_v13, %v9309_v39  ;;  %v1264_v60 = vld [vmem:[#allocation2 + $0xee] sm:$0xff] }
 0x25d   : > { %v9317_v12 = vpop.permute.xlu0 %9316  ;;  %v9304_v10 = vunpack.i.h.bf16 %v9302_v35  ;;  %v9303_v36 = vunpack.i.l.bf16 %v9302_v35 }
 0x25e   : > { %v9319_v7 = vunpack.i.h.bf16 %v9317_v12  ;;  %v9318_v29 = vunpack.i.l.bf16 %v9317_v12  ;;  %8599 = vmatmul.mubr.msk.bf16.gmra.mrb[4].mxu0 %vm2323_vm9, %v11806_v33 }
 0x25f   : > { %8635 = vmatpush3.bf16.msra.mxu0 %v10104_v31  ;;  %v2102_v3 = vsel %vm14692_vm1, %v1262_v52, %v9304_v10  ;;  %v2101_v8 = vsel %vm14692_vm1, %v1261_v51, %v9303_v36 }
 0x260   : > { %v9312_v25 = vpop.permute.xlu1 %9311  ;;  %8668 = vmatprep.subr.bf16.mxu0 %v11811_v46  ;;  %v2181_v37 = vsel %vm14691_vm7, %v2140_v6, %v9318_v29  ;;  %v2182_v14 = vsel %vm14691_vm7, %v2141_v32, %v9319_v7 }
 0x261   : > { %v9327_v30 = vpop.permute.xlu0 %9326  ;;  %v9314_v56 = vunpack.i.h.bf16 %v9312_v25  ;;  %v9313_v43 = vunpack.i.l.bf16 %v9312_v25 }
 0x262   : > { %v9329_v21 = vunpack.i.h.bf16 %v9327_v30  ;;  %v9328_v22 = vunpack.i.l.bf16 %v9327_v30 }
 0x263   : > { %v2142_v47 = vsel %vm2129_vm6, %v2101_v8, %v9313_v43  ;;  %v2143_v28 = vsel %vm2129_vm6, %v2102_v3, %v9314_v56 }
 0x264   : > { %v2222_v15 = vsel %vm14694_vm8, %v2181_v37, %v9328_v22  ;;  %v2223_v38 = vsel %vm14694_vm8, %v2182_v14, %v9329_v21  ;;  %v9322_v27 = vpop.permute.xlu1 %9321 }
 0x265   : > { %v11824_v49 = vpack.c.bf16 %v2223_v38, %v2222_v15  ;;  %v9337_v55 = vpop.permute.xlu0 %9336  ;;  %v9324_v50 = vunpack.i.h.bf16 %v9322_v27  ;;  %v9323_v54 = vunpack.i.l.bf16 %v9322_v27  ;;  %v1265_v15 = vld [vmem:[#allocation2 + $0x106] sm:$0xff]  ;;  %v1266_v38 = vld [vmem:[#allocation2 + $0x10e] sm:$0xff] }
 0x266   : > { %v9339_v41 = vunpack.i.h.bf16 %v9337_v55  ;;  %v9338_v17 = vunpack.i.l.bf16 %v9337_v55 }
 0x267   : > { %8602 = vmatprep.mubr.msk.bf16.mxu0 %vm2323_vm9, %v11824_v49  ;;  %v2183_v9 = vsel %vm14691_vm7, %v2142_v47, %v9323_v54  ;;  %v2184_v42 = vsel %vm14691_vm7, %v2143_v28, %v9324_v50 }
 0x268   : > { %v9332_v26 = vpop.permute.xlu1 %9331  ;;  %v2104_v34 = vsel %vm14692_vm1, %v1264_v60, %v9339_v41  ;;  %v2103_v24 = vsel %vm14692_vm1, %v1263_v48, %v9338_v17  ;;  %v1268_v41 = vld [vmem:[#allocation2 + $0x12e] sm:$0xff] }
 0x269   : > { %v9347_v16 = vpop.permute.xlu0 %9346  ;;  %v9334_v58 = vunpack.i.h.bf16 %v9332_v26  ;;  %v9333_v44 = vunpack.i.l.bf16 %v9332_v26  ;;  %v1325_v17 = vld [vmem:[#allocation2 + $0x247] sm:$0xff]  ;;  %v1366_v60 = vld [vmem:[#allocation2 + $0x250] sm:$0xff] }
 0x26a   : > { %v9349_v62 = vunpack.i.h.bf16 %v9347_v16  ;;  %v9348_v53 = vunpack.i.l.bf16 %v9347_v16  ;;  %v1365_v48 = vld [vmem:[#allocation2 + $0x248] sm:$0xff] }
 0x26b   : > { %v2224_v40 = vsel %vm14694_vm8, %v2183_v9, %v9333_v44  ;;  %v2225_v11 = vsel %vm14694_vm8, %v2184_v42, %v9334_v58  ;;  %v1267_v42 = vld [vmem:[#allocation2 + $0x126] sm:$0xff] }
 0x26c   : > { %v11836_v18 = vpack.c.bf16 %v2225_v11, %v2224_v40  ;;  %v9342_v23 = vpop.permute.xlu1 %9341  ;;  %v2144_v12 = vsel %vm2129_vm6, %v2103_v24, %v9348_v53  ;;  %v2145_v39 = vsel %vm2129_vm6, %v2104_v34, %v9349_v62  ;;  %v1405_v34 = vld [vmem:[#allocation2 + $0x249] sm:$0xff] }
 0x26d   : > { %v9357_v2 = vpop.permute.xlu0 %9356  ;;  %v9344_v19 = vunpack.i.h.bf16 %v9342_v23  ;;  %v9343_v25 = vunpack.i.l.bf16 %v9342_v23  ;;  %v1326_v23 = vld [vmem:[#allocation2 + $0x24f] sm:$0xff] }
 0x26e   : > { %v9359_v31 = vunpack.i.h.bf16 %v9357_v2  ;;  %v9358_v59 = vunpack.i.l.bf16 %v9357_v2  ;;  %8603 = vmatmul.mubr.msk.bf16.gmra.mrb[8].mxu0 %vm2323_vm9, %v11836_v18 }
 0x26f   : > { %v2106_v10 = vsel %vm14692_vm1, %v1266_v38, %v9344_v19  ;;  %v2105_v36 = vsel %vm14692_vm1, %v1265_v15, %v9343_v25 }
 0x270   : > { %v9352_v57 = vpop.permute.xlu1 %9351  ;;  %v2185_v29 = vsel %vm14691_vm7, %v2144_v12, %v9358_v59  ;;  %v2186_v0 = vsel %vm14691_vm7, %v2145_v39, %v9359_v31  ;;  %v9575_v59 = vpack.i.bf16 %v1326_v23, %v1325_v17  ;;  %v1406_v39 = vld [vmem:[#allocation2 + $0x251] sm:$0xff] }
 0x271   : > { %v9367_v35 = vpop.permute.xlu0 %9366  ;;  %v9354_v21 = vunpack.i.h.bf16 %v9352_v57  ;;  %v9353_v22 = vunpack.i.l.bf16 %v9352_v57 }
 0x272   : > { %v9369_v61 = vunpack.i.h.bf16 %v9367_v35  ;;  %v9368_v7 = vunpack.i.l.bf16 %v9367_v35  ;;  %9576 = vrot.lane.b32.xlu0 %v9575_v59, %s14685_s29 }
 0x273   : > { %v2146_v56 = vsel %vm2129_vm6, %v2105_v36, %v9353_v22  ;;  %v2147_v43 = vsel %vm2129_vm6, %v2106_v10, %v9354_v21 }
 0x274   : > { %v2226_v20 = vsel %vm14694_vm8, %v2185_v29, %v9368_v7  ;;  %v2227_v13 = vsel %vm14694_vm8, %v2186_v0, %v9369_v61  ;;  %v9362_v6 = vpop.permute.xlu1 %9361  ;;  %v1445_v61 = vld [vmem:[#allocation2 + $0x24a] sm:$0xff]  ;;  %v1446_v7 = vld [vmem:[#allocation2 + $0x252] sm:$0xff] }
 0x275   : > { %v11848_v30 = vpack.c.bf16 %v2227_v13, %v2226_v20  ;;  %v9377_v32 = vpop.permute.xlu0 %9376  ;;  %v9364_v37 = vunpack.i.h.bf16 %v9362_v6  ;;  %v9363_v14 = vunpack.i.l.bf16 %v9362_v6  ;;  %v9580_v20 = vpack.i.bf16 %v1366_v60, %v1365_v48 }
 0x276   : > { %v9379_v26 = vunpack.i.h.bf16 %v9377_v32  ;;  %v9378_v16 = vunpack.i.l.bf16 %v9377_v32  ;;  %v9585_v13 = vpack.i.bf16 %v1406_v39, %v1405_v34 }
 0x277   : > { %8606 = vmatprep.mubr.msk.bf16.mxu0 %vm2323_vm9, %v11848_v30  ;;  %v2187_v51 = vsel %vm14691_vm7, %v2146_v56, %v9363_v14  ;;  %v2188_v52 = vsel %vm14691_vm7, %v2147_v43, %v9364_v37  ;;  %9581 = vrot.lane.b32.xlu1 %v9580_v20, %s14687_s19  ;;  %v9590_v14 = vpack.i.bf16 %v1446_v7, %v1445_v61 }
 0x278   : > { %v9372_v27 = vpop.permute.xlu1 %9371  ;;  %v2108_v2 = vsel %vm14692_vm1, %v1268_v41, %v9379_v26  ;;  %v2107_v62 = vsel %vm14692_vm1, %v1267_v42, %v9378_v16  ;;  %9586 = vrot.lane.b32.xlu0 %v9585_v13, %s14777_s18 }
 0x279   : > { %v9387_v55 = vpop.permute.xlu0 %9386  ;;  %v9374_v50 = vunpack.i.h.bf16 %v9372_v27  ;;  %v9373_v54 = vunpack.i.l.bf16 %v9372_v27  ;;  %v1269_v27 = vld [vmem:[#allocation2 + $0x146] sm:$0xff] }
 0x27a   : > { %v9389_v44 = vunpack.i.h.bf16 %v9387_v55  ;;  %v9388_v9 = vunpack.i.l.bf16 %v9387_v55  ;;  %v1270_v55 = vld [vmem:[#allocation2 + $0x14e] sm:$0xff] }
 0x27b   : > { %v2228_v3 = vsel %vm14694_vm8, %v2187_v51, %v9373_v54  ;;  %v2229_v8 = vsel %vm14694_vm8, %v2188_v52, %v9374_v50  ;;  %9591 = vrot.lane.b32.xlu1 %v9590_v14, %s14776_s20  ;;  %v1274_v14 = vld [vmem:[#allocation2 + $0x18e] sm:$0xff] }
 0x27c   : > { %v11860_v47 = vpack.c.bf16 %v2229_v8, %v2228_v3  ;;  %v9382_v28 = vpop.permute.xlu1 %9381  ;;  %v2148_v24 = vsel %vm2129_vm6, %v2107_v62, %v9388_v9  ;;  %v2149_v57 = vsel %vm2129_vm6, %v2108_v2, %v9389_v44  ;;  %v1271_v62 = vld [vmem:[#allocation2 + $0x166] sm:$0xff] }
 0x27d   : > { %v9397_v58 = vpop.permute.xlu0 %9396  ;;  %v9384_v6 = vunpack.i.h.bf16 %v9382_v28  ;;  %v9383_v32 = vunpack.i.l.bf16 %v9382_v28 }
 0x27e   : > { %v9399_v40 = vunpack.i.h.bf16 %v9397_v58  ;;  %v9398_v11 = vunpack.i.l.bf16 %v9397_v58  ;;  %8607 = vmatmul.mubr.msk.bf16.gmra.mrb[12].mxu0 %vm2323_vm9, %v11860_v47 }
 0x27f   : > { %v2110_v56 = vsel %vm14692_vm1, %v1270_v55, %v9384_v6  ;;  %v2109_v43 = vsel %vm14692_vm1, %v1269_v27, %v9383_v32 }
 0x280   : > { %v9392_v53 = vpop.permute.xlu1 %9391  ;;  %v2189_v29 = vsel %vm14691_vm7, %v2148_v24, %v9398_v11  ;;  %v2190_v0 = vsel %vm14691_vm7, %v2149_v57, %v9399_v40 }
 0x281   : > { %v9407_v31 = vpop.permute.xlu0 %9406  ;;  %v9394_v15 = vunpack.i.h.bf16 %v9392_v53  ;;  %v9393_v38 = vunpack.i.l.bf16 %v9392_v53  ;;  %v1272_v53 = vld [vmem:[#allocation2 + $0x16e] sm:$0xff] }
 0x282   : > { %v9409_v35 = vunpack.i.h.bf16 %v9407_v31  ;;  %v9408_v12 = vunpack.i.l.bf16 %v9407_v31 }
 0x283   : > { %v2150_v51 = vsel %vm2129_vm6, %v2109_v43, %v9393_v38  ;;  %v2151_v52 = vsel %vm2129_vm6, %v2110_v56, %v9394_v15 }
 0x284   : > { %v2230_v19 = vsel %vm14694_vm8, %v2189_v29, %v9408_v12  ;;  %v2231_v25 = vsel %vm14694_vm8, %v2190_v0, %v9409_v35  ;;  %v9402_v22 = vpop.permute.xlu1 %9401 }
 0x285   : > { %v11873_v21 = vpack.c.bf16 %v2231_v25, %v2230_v19  ;;  %v9417_v37 = vpop.permute.xlu0 %9416  ;;  %v9404_v10 = vunpack.i.h.bf16 %v9402_v22  ;;  %v9403_v36 = vunpack.i.l.bf16 %v9402_v22 }
 0x286   : > { %v9419_v44 = vunpack.i.h.bf16 %v9417_v37  ;;  %v9418_v9 = vunpack.i.l.bf16 %v9417_v37  ;;  %v1273_v37 = vld [vmem:[#allocation2 + $0x186] sm:$0xff] }
 0x287   : > { %8610 = vmatprep.mubr.msk.bf16.mxu0 %vm2323_vm9, %v11873_v21  ;;  %v2191_v26 = vsel %vm14691_vm7, %v2150_v51, %v9403_v36  ;;  %v2192_v16 = vsel %vm14691_vm7, %v2151_v52, %v9404_v10 }
 0x288   : > { %v9412_v50 = vpop.permute.xlu1 %9411  ;;  %v2112_v31 = vsel %vm14692_vm1, %v1272_v53, %v9419_v44  ;;  %v2111_v59 = vsel %vm14692_vm1, %v1271_v62, %v9418_v9 }
 0x289   : > { %v9427_v54 = vpop.permute.xlu0 %9426  ;;  %v9414_v3 = vunpack.i.h.bf16 %v9412_v50  ;;  %v9413_v8 = vunpack.i.l.bf16 %v9412_v50 }
 0x28a   : > { %v9429_v41 = vunpack.i.h.bf16 %v9427_v54  ;;  %v9428_v17 = vunpack.i.l.bf16 %v9427_v54 }
 0x28b   : > { %v2232_v28 = vsel %vm14694_vm8, %v2191_v26, %v9413_v8  ;;  %v2233_v58 = vsel %vm14694_vm8, %v2192_v16, %v9414_v3 }
 0x28c   : > { %v11888_v42 = vpack.c.bf16 %v2233_v58, %v2232_v28  ;;  %v9422_v40 = vpop.permute.xlu1 %9421  ;;  %v2152_v34 = vsel %vm2129_vm6, %v2111_v59, %v9428_v17  ;;  %v2153_v24 = vsel %vm2129_vm6, %v2112_v31, %v9429_v41  ;;  %v1276_v41 = vld [vmem:[#allocation2 + $0x1ae] sm:$0xff] }
 0x28d   : > { %v9437_v11 = vpop.permute.xlu0 %9436  ;;  %v9424_v29 = vunpack.i.h.bf16 %v9422_v40  ;;  %v9423_v0 = vunpack.i.l.bf16 %v9422_v40 }
 0x28e   : > { %v9439_v23 = vunpack.i.h.bf16 %v9437_v11  ;;  %v9438_v2 = vunpack.i.l.bf16 %v9437_v11  ;;  %8611 = vmatmul.mubr.msk.bf16.gmra.mrb[16].mxu0 %vm2323_vm9, %v11888_v42  ;;  %v1275_v11 = vld [vmem:[#allocation2 + $0x1a6] sm:$0xff] }
 0x28f   : > { %v2114_v15 = vsel %vm14692_vm1, %v1274_v14, %v9424_v29  ;;  %v2113_v38 = vsel %vm14692_vm1, %v1273_v37, %v9423_v0 }
 0x290   : > { %v9432_v48 = vpop.permute.xlu1 %9431  ;;  %v2193_v12 = vsel %vm14691_vm7, %v2152_v34, %v9438_v2  ;;  %v2194_v39 = vsel %vm14691_vm7, %v2153_v24, %v9439_v23 }
 0x291   : > { %v9447_v60 = vpop.permute.xlu0 %9446  ;;  %v9434_v25 = vunpack.i.h.bf16 %v9432_v48  ;;  %v9433_v6 = vunpack.i.l.bf16 %v9432_v48 }
 0x292   : > { %v9449_v57 = vunpack.i.h.bf16 %v9447_v60  ;;  %v9448_v35 = vunpack.i.l.bf16 %v9447_v60 }
 0x293   : > { %v2154_v27 = vsel %vm2129_vm6, %v2113_v38, %v9433_v6  ;;  %v2155_v55 = vsel %vm2129_vm6, %v2114_v15, %v9434_v25  ;;  %v1277_v25 = vld [vmem:[#allocation2 + $0x1c6] sm:$0xff]  ;;  %v1278_v6 = vld [vmem:[#allocation2 + $0x1ce] sm:$0xff] }
 0x294   : > { %v2234_v61 = vsel %vm14694_vm8, %v2193_v12, %v9448_v35  ;;  %v2235_v7 = vsel %vm14694_vm8, %v2194_v39, %v9449_v57  ;;  %v9442_v13 = vpop.permute.xlu1 %9441 }
 0x295   : > { %v11900_v20 = vpack.c.bf16 %v2235_v7, %v2234_v61  ;;  %v9457_v19 = vpop.permute.xlu0 %9456  ;;  %v9444_v32 = vunpack.i.h.bf16 %v9442_v13  ;;  %v9443_v22 = vunpack.i.l.bf16 %v9442_v13 }
 0x296   : > { %v9459_v3 = vunpack.i.h.bf16 %v9457_v19  ;;  %v9458_v8 = vunpack.i.l.bf16 %v9457_v19 }
 0x297   : > { %8614 = vmatprep.mubr.msk.bf16.mxu0 %vm2323_vm9, %v11900_v20  ;;  %v2195_v50 = vsel %vm14691_vm7, %v2154_v27, %v9443_v22  ;;  %v2196_v54 = vsel %vm14691_vm7, %v2155_v55, %v9444_v32 }
 0x298   : > { %v9452_v10 = vpop.permute.xlu1 %9451  ;;  %v2116_v17 = vsel %vm14692_vm1, %v1276_v41, %v9459_v3  ;;  %v2115_v23 = vsel %vm14692_vm1, %v1275_v11, %v9458_v8 }
 0x299   : > { %v9467_v36 = vpop.permute.xlu0 %9466  ;;  %v9454_v56 = vunpack.i.h.bf16 %v9452_v10  ;;  %v9453_v43 = vunpack.i.l.bf16 %v9452_v10 }
 0x29a   : > { %v9469_v58 = vunpack.i.h.bf16 %v9467_v36  ;;  %v9468_v44 = vunpack.i.l.bf16 %v9467_v36 }
 0x29b   : > { %v2236_v51 = vsel %vm14694_vm8, %v2195_v50, %v9453_v43  ;;  %v2237_v52 = vsel %vm14694_vm8, %v2196_v54, %v9454_v56 }
 0x29c   : > { %v11912_v26 = vpack.c.bf16 %v2237_v52, %v2236_v51  ;;  %v9462_v16 = vpop.permute.xlu1 %9461  ;;  %v2156_v53 = vsel %vm2129_vm6, %v2115_v23, %v9468_v44  ;;  %v2157_v31 = vsel %vm2129_vm6, %v2116_v17, %v9469_v58  ;;  %v1279_v44 = vld [vmem:[#allocation2 + $0x1e6] sm:$0xff] }
 0x29d   : > { %v9477_v28 = vpop.permute.xlu0 %9476  ;;  %v9464_v35 = vunpack.i.h.bf16 %v9462_v16  ;;  %v9463_v12 = vunpack.i.l.bf16 %v9462_v16 }
 0x29e   : > { %v9479_v9 = vunpack.i.h.bf16 %v9477_v28  ;;  %v9478_v40 = vunpack.i.l.bf16 %v9477_v28  ;;  %8615 = vmatmul.mubr.msk.bf16.gmra.mrb[20].mxu0 %vm2323_vm9, %v11912_v26 }
 0x29f   : > { %v2118_v32 = vsel %vm14692_vm1, %v1278_v6, %v9464_v35  ;;  %v2117_v22 = vsel %vm14692_vm1, %v1277_v25, %v9463_v12 }
 0x2a0   : > { %v9472_v2 = vpop.permute.xlu1 %9471  ;;  %v2197_v60 = vsel %vm14691_vm7, %v2156_v53, %v9478_v40  ;;  %v2198_v34 = vsel %vm14691_vm7, %v2157_v31, %v9479_v9  ;;  %v1280_v9 = vld [vmem:[#allocation2 + $0x1ee] sm:$0xff] }
 0x2a1   : > { %v9487_v62 = vpop.permute.xlu0 %9486  ;;  %v9474_v29 = vunpack.i.h.bf16 %v9472_v2  ;;  %v9473_v0 = vunpack.i.l.bf16 %v9472_v2 }
 0x2a2   : > { %v9489_v59 = vunpack.i.h.bf16 %v9487_v62  ;;  %v9488_v48 = vunpack.i.l.bf16 %v9487_v62 }
 0x2a3   : > { %v2158_v15 = vsel %vm2129_vm6, %v2117_v22, %v9473_v0  ;;  %v2159_v38 = vsel %vm2129_vm6, %v2118_v32, %v9474_v29  ;;  %v1281_v0 = vld [vmem:[#allocation2 + $0x206] sm:$0xff] }
 0x2a4   : > { %v2238_v24 = vsel %vm14694_vm8, %v2197_v60, %v9488_v48  ;;  %v2239_v57 = vsel %vm14694_vm8, %v2198_v34, %v9489_v59  ;;  %v9482_v61 = vpop.permute.xlu1 %9481 }
 0x2a5   : > { %v11924_v39 = vpack.c.bf16 %v2239_v57, %v2238_v24  ;;  %v9497_v7 = vpop.permute.xlu0 %9496  ;;  %v9484_v13 = vunpack.i.h.bf16 %v9482_v61  ;;  %v9483_v19 = vunpack.i.l.bf16 %v9482_v61 }
 0x2a6   : > { %v9499_v50 = vunpack.i.h.bf16 %v9497_v7  ;;  %v9498_v54 = vunpack.i.l.bf16 %v9497_v7 }
 0x2a7   : > { %8618 = vmatprep.mubr.msk.bf16.mxu0 %vm2323_vm9, %v11924_v39  ;;  %v2199_v27 = vsel %vm14691_vm7, %v2158_v15, %v9483_v19  ;;  %v2200_v55 = vsel %vm14691_vm7, %v2159_v38, %v9484_v13  ;;  %v1282_v13 = vld [vmem:[#allocation2 + $0x20e] sm:$0xff]  ;;  %v1249_v38 = vld [vmem:[#allocation2 + $0x6] sm:$0xff] }
 0x2a8   : > { %v9492_v37 = vpop.permute.xlu1 %9491  ;;  %v2120_v40 = vsel %vm14692_vm1, %v1280_v9, %v9499_v50  ;;  %v2119_v11 = vsel %vm14692_vm1, %v1279_v44, %v9498_v54 }
 0x2a9   : > { %v9507_v14 = vpop.permute.xlu0 %9506  ;;  %v9494_v10 = vunpack.i.h.bf16 %v9492_v37  ;;  %v9493_v36 = vunpack.i.l.bf16 %v9492_v37 }
 0x2aa   : > { %v9509_v8 = vunpack.i.h.bf16 %v9507_v14  ;;  %v9508_v16 = vunpack.i.l.bf16 %v9507_v14 }
 0x2ab   : > { %v2240_v56 = vsel %vm14694_vm8, %v2199_v27, %v9493_v36  ;;  %v2241_v43 = vsel %vm14694_vm8, %v2200_v55, %v9494_v10  ;;  %v1250_v10 = vld [vmem:[#allocation2 + $0xe] sm:$0xff] }
 0x2ac   : > { %v11936_v51 = vpack.c.bf16 %v2241_v43, %v2240_v56  ;;  %v9502_v52 = vpop.permute.xlu1 %9501  ;;  %v2160_v23 = vsel %vm2129_vm6, %v2119_v11, %v9508_v16  ;;  %v2161_v2 = vsel %vm2129_vm6, %v2120_v40, %v9509_v8 }
 0x2ad   : > { %v9517_v3 = vpop.permute.xlu0 %9516  ;;  %v9504_v34 = vunpack.i.h.bf16 %v9502_v52  ;;  %v9503_v24 = vunpack.i.l.bf16 %v9502_v52 }
 0x2ae   : > { %v9519_v28 = vunpack.i.h.bf16 %v9517_v3  ;;  %v9518_v58 = vunpack.i.l.bf16 %v9517_v3  ;;  %8619 = vmatmul.mubr.msk.bf16.gmra.mrb[24].mxu0 %vm2323_vm9, %v11936_v51 }
 0x2af   : > { %v2122_v25 = vsel %vm14692_vm1, %v1282_v13, %v9504_v34  ;;  %v2121_v6 = vsel %vm14692_vm1, %v1281_v0, %v9503_v24 }
 0x2b0   : > { %v9512_v41 = vpop.permute.xlu1 %9511  ;;  %v2201_v31 = vsel %vm14691_vm7, %v2160_v23, %v9518_v58  ;;  %v2202_v59 = vsel %vm14691_vm7, %v2161_v2, %v9519_v28 }
 0x2b1   : > { %v9527_v17 = vpop.permute.xlu0 %9526  ;;  %v9514_v12 = vunpack.i.h.bf16 %v9512_v41  ;;  %v9513_v61 = vunpack.i.l.bf16 %v9512_v41  ;;  %v1327_v41 = vld [vmem:[#allocation2 + $0x267] sm:$0xff] }
 0x2b2   : > { %v9529_v62 = vunpack.i.h.bf16 %v9527_v17  ;;  %v9528_v53 = vunpack.i.l.bf16 %v9527_v17  ;;  %v1328_v17 = vld [vmem:[#allocation2 + $0x26f] sm:$0xff] }
 0x2b3   : > { %v2162_v14 = vsel %vm2129_vm6, %v2121_v6, %v9513_v61  ;;  %v2163_v15 = vsel %vm2129_vm6, %v2122_v25, %v9514_v12  ;;  %v9595_v2 = vpack.i.bf16 %v1328_v17, %v1327_v41  ;;  %v1447_v61 = vld [vmem:[#allocation2 + $0x26a] sm:$0xff]  ;;  %v10107_v6 = vld [vmem:[%s14627_s5 + $0x60] sm:$0xff]  }
 0x2b4   : > { %v2242_v48 = vsel %vm14694_vm8, %v2201_v31, %v9528_v53  ;;  %v2243_v60 = vsel %vm14694_vm8, %v2202_v59, %v9529_v62  ;;  %v9522_v35 = vpop.permute.xlu1 %9521  ;;  %v1367_v62 = vld [vmem:[#allocation2 + $0x268] sm:$0xff]  ;;  %v1368_v53 = vld [vmem:[#allocation2 + $0x270] sm:$0xff] }
 0x2b5   : > { %v11948_v57 = vpack.c.bf16 %v2243_v60, %v2242_v48  ;;  %v9524_v7 = vunpack.i.h.bf16 %v9522_v35  ;;  %v9523_v29 = vunpack.i.l.bf16 %v9522_v35  ;;  %v9532_v19 = vpop.permute.xlu0 %9531  ;;  %v1407_v31 = vld [vmem:[#allocation2 + $0x269] sm:$0xff]  ;;  %v1408_v60 = vld [vmem:[#allocation2 + $0x271] sm:$0xff]  ;;  %9596 = vrot.lane.b32.xlu0 %v9595_v2, %s14685_s29  ;;  %v9600_v35 = vpack.i.bf16 %v1368_v53, %v1367_v62  ;;  %s533_s29 = scalar_lea.vmem %s14778_s1, %s10415_s28  ;;  %s14780_s28 = smov 32  }
 0x2b6   : > { %v9534_v32 = vunpack.i.h.bf16 %v9532_v19  ;;  %v9533_v22 = vunpack.i.l.bf16 %v9532_v19  ;;  %v9605_v12 = vpack.i.bf16 %v1408_v60, %v1407_v31  ;;  %v10106_v19 = vld [vmem:[%s14627_s5 + $0x58] sm:$0xff]   ;;  %v10117_v60 = vld [vmem:[%s14627_s5 + $0xb0] sm:$0xff]  }
 0x2b7   : > { %8622 = vmatprep.mubr.msk.bf16.mxu0 %vm2323_vm9, %v11948_v57  ;;  %v2203_v55 = vsel %vm14691_vm7, %v2162_v14, %v9523_v29  ;;  %v2204_v56 = vsel %vm14691_vm7, %v2163_v15, %v9524_v7  ;;  %v1448_v7 = vld [vmem:[#allocation2 + $0x272] sm:$0xff]  ;;  %9601 = vrot.lane.b32.xlu1 %v9600_v35, %s14687_s19  ;;  %v14779_v14 = vmov 0.0|0.0   ;;  %v10112_v15 = vld [vmem:[%s14627_s5 + $0x88] sm:$0xff]  }
 0x2b8   : > { %v9537_v37 = vpop.permute.xlu1 %9536  ;;  %v2090_v54 = vsel %vm14692_vm1, %v1250_v10, %v9534_v32  ;;  %v2089_v52 = vsel %vm14692_vm1, %v1249_v38, %v9533_v22  ;;  %v9610_v25 = vpack.i.bf16 %v1448_v7, %v1447_v61  ;;  %v10108_v32 = vld [vmem:[%s14627_s5 + $0x68] sm:$0xff]   ;;  %v3478_v22 = vld [vmem:[%s14629_s7] sm:$0xff]  ;;  %v10113_v38 = vld [vmem:[%s14627_s5 + $0x90] sm:$0xff]  }
 0x2b9   : > { %v9539_v36 = vunpack.i.h.bf16 %v9537_v37  ;;  %v9538_v27 = vunpack.i.l.bf16 %v9537_v37  ;;  %v9547_v16 = vpop.permute.xlu0 %9546  ;;  %9606 = vrot.lane.b32.xlu0 %v9605_v12, %s14777_s18  ;;  %8795 = vmatpush3.msra.mxu1 %v3478_v22  ;;  %v3477_v37 = vld [vmem:[%s533_s29] sm:$0x1]  ;;  %v10114_v10 = vld [vmem:[%s14627_s5 + $0x98] sm:$0xff]   ;;  %v1285_v7 = vld [vmem:[#allocation2 + $0x246] sm:$0xff]  ;;  %s14796_s29 = smov 96  }
 0x2ba   : > { %v9549_v44 = vunpack.i.h.bf16 %v9547_v16  ;;  %v9548_v9 = vunpack.i.l.bf16 %v9547_v16  ;;  %8797 = vmatmul.mubr.msk.f32.vlgmr.msra.gmra.mrb[4].mxu1 %vm3480_vm10, %v3477_v37  ;;  %8941 = vmatprep.subr.bf16.mxu1 %v14779_v14  ;;  %v1284_v16 = vld [vmem:[#allocation2 + $0x22e] sm:$0xff] }
 0x2bb   : > { %v2244_v43 = vsel %vm14694_vm8, %v2203_v55, %v9538_v27  ;;  %v2245_v50 = vsel %vm14694_vm8, %v2204_v56, %v9539_v36  ;;  %9611 = vrot.lane.b32.xlu1 %v9610_v25, %s14776_s20  ;;  %8807 = vmatprep.mubr.msk.f32.mxu1 %vm10258_vm0, %v14750_v5  ;;  %v10115_v36 = vld [vmem:[%s14627_s5 + $0xa0] sm:$0xff]  }
 0x2bc   : > { %v9542_v3 = vpop.permute.xlu1 %9541  ;;  %v11962_v8 = vpack.c.bf16 %v2245_v50, %v2244_v43 }
 0x2bd   : > { %v9544_v28 = vunpack.i.h.bf16 %v9542_v3  ;;  %v9543_v58 = vunpack.i.l.bf16 %v9542_v3  ;;  %v9557_v55 = vpop.permute.xlu0 %9556  ;;  %v1283_v3 = vld [vmem:[#allocation2 + $0x226] sm:$0xff] }
 0x2be   : > { %8623 = vmatmul.mubr.msk.bf16.gmra.mrb[28].mxu0 %vm2323_vm9, %v11962_v8  ;;  %v9559_v56 = vunpack.i.h.bf16 %v9557_v55  ;;  %v9558_v43 = vunpack.i.l.bf16 %v9557_v55 }
 0x2bf   : > { %v2130_v40 = vsel %vm2129_vm6, %v2089_v52, %v9543_v58  ;;  %v2131_v11 = vsel %vm2129_vm6, %v2090_v54, %v9544_v28 }
 0x2c0   : > { %v9552_v23 = vpop.permute.xlu1 %9551  ;;  %v2171_v34 = vsel %vm14691_vm7, %v2130_v40, %v9548_v9  ;;  %v2172_v24 = vsel %vm14691_vm7, %v2131_v11, %v9549_v44  ;;  %v2124_v58 = vsel %vm14692_vm1, %v1284_v16, %v9559_v56  ;;  %v2123_v44 = vsel %vm14692_vm1, %v1283_v3, %v9558_v43 }
 0x2c1   : > { %v9554_v59 = vunpack.i.h.bf16 %v9552_v23  ;;  %v9553_v48 = vunpack.i.l.bf16 %v9552_v23  ;;  %v9567_v28 = vpop.permute.xlu0 %9566 }
 0x2c2   : > { %v9569_v17 = vunpack.i.h.bf16 %v9567_v28  ;;  %v9568_v23 = vunpack.i.l.bf16 %v9567_v28 }
 0x2c3   : > { %v2212_v29 = vsel %vm14694_vm8, %v2171_v34, %v9553_v48  ;;  %v2213_v0 = vsel %vm14694_vm8, %v2172_v24, %v9554_v59  ;;  %v10116_v48 = vld [vmem:[%s14627_s5 + $0xa8] sm:$0xff]   ;;  %v10119_v34 = vld [vmem:[%s14627_s5 + $0xc0] sm:$0xff]  }
 0x2c4   : > { %v2252_v13 = vpack.c.bf16 %v2213_v0, %v2212_v29  ;;  %v9562_v27 = vpop.permute.xlu1 %9561  ;;  %v1286_v29 = vld [vmem:[#allocation2 + $0x24e] sm:$0xff] }
 0x2c5   : > { %v9564_v50 = vunpack.i.h.bf16 %v9562_v27  ;;  %v9563_v54 = vunpack.i.l.bf16 %v9562_v27 }
 0x2c6   : > { %8636 = vmatprep.mubr.msk.bf16.mxu0 %vm2323_vm9, %v2252_v13 }
 0x2c7   : > { %8637 = vmatmul.mubr.msk.bf16.vlgmr.msra.gmra.mrb[0].mxu0 %vm2323_vm9, %v11703_v4  ;;  %v10109_v4 = vld [vmem:[%s14627_s5 + $0x70] sm:$0xff]   ;;  %v2164_v9 = vsel %vm2129_vm6, %v2123_v44, %v9563_v54  ;;  %v2165_v40 = vsel %vm2129_vm6, %v2124_v58, %v9564_v50 }
 0x2c8   : > { %8669 = vmatpush3.bf16.msra.mxu0 %v11811_v46  ;;  %8640 = vmatprep.mubr.msk.bf16.mxu0 %vm2323_vm9, %v11765_v63  ;;  %v10110_v46 = vld [vmem:[%s14627_s5 + $0x78] sm:$0xff]   ;;  %v9572_v52 = vpop.permute.xlu1 %9571  ;;  %v2205_v2 = vsel %vm14691_vm7, %v2164_v9, %v9568_v23  ;;  %v2206_v62 = vsel %vm14691_vm7, %v2165_v40, %v9569_v17  ;;  %v3762_v17 = vld [vmem:[%s14633_s11 + $0x10] sm:$0xff] }
 0x2c9   : > { %8670 = vmatprep.subr.bf16.mxu0 %v10106_v19  ;;  %v9574_v11 = vunpack.i.h.bf16 %v9572_v52  ;;  %v9573_v41 = vunpack.i.l.bf16 %v9572_v52 }
 0x2cb   : > { %v2246_v53 = vsel %vm14694_vm8, %v2205_v2, %v9573_v41  ;;  %v2247_v31 = vsel %vm14694_vm8, %v2206_v62, %v9574_v11  ;;  %v3760_v11 = vld [vmem:[%s14633_s11] sm:$0xff]  ;;  %v3761_v41 = vld [vmem:[%s14633_s11 + $0x8] sm:$0xff]  ;;  %v3763_v2 = vld [vmem:[%s14633_s11 + $0x18] sm:$0xff] }
 0x2cc   : > { %8671 = vmatpush3.bf16.msra.mxu0 %v10106_v19  ;;  %v12086_v59 = vpack.c.bf16 %v2247_v31, %v2246_v53  ;;  %v12188_v23 = vpack.c.bf16 %v3761_v41, %v3760_v11  ;;  %v12194_v62 = vpack.c.bf16 %v3763_v2, %v3762_v17  ;;  %v4315_v53 = vld [vmem:[#allocation3 + $0x27] sm:$0xff]  ;;  %v4316_v31 = vld [vmem:[#allocation3 + $0x2f] sm:$0xff] }
 0x2cd   : > { %8672 = vmatprep.subr.bf16.mxu0 %v10107_v6 }
 0x2ce   : > { %8943 = vmatpush3.bf16.msra.mxu1 %v12188_v23 }
 0x2cf   : > { %8641 = vmatmul.mubr.msk.bf16.gmra.mrb[4].mxu0 %vm2323_vm9, %v11787_v45  ;;  %8944 = vmatprep.subr.bf16.mxu1 %v14779_v14 }
 0x2d0   : > { %8644 = vmatprep.mubr.msk.bf16.mxu0 %vm2323_vm9, %v11806_v33  ;;  %8673 = vmatpush3.bf16.msra.mxu0 %v10107_v6 }
 0x2d1   : > { %8674 = vmatprep.subr.bf16.mxu0 %v10108_v32 }
 0x2d2   : > { %8946 = vmatpush3.bf16.msra.mxu1 %v12194_v62 }
 0x2d3   : > { %8947 = vmatprep.subr.bf16.mxu1 %v14779_v14 }
 0x2d4   : > { %8675 = vmatpush3.bf16.msra.mxu0 %v10108_v32 }
 0x2d5   : > { %8676 = vmatprep.subr.bf16.mxu0 %v10109_v4 }
 0x2d7   : > { %8645 = vmatmul.mubr.msk.bf16.gmra.mrb[8].mxu0 %vm2323_vm9, %v11824_v49 }
 0x2d8   : > { %8648 = vmatprep.mubr.msk.bf16.mxu0 %vm2323_vm9, %v11836_v18  ;;  %8677 = vmatpush3.bf16.msra.mxu0 %v10109_v4 }
 0x2d9   : > { %8710 = vmatprep.subr.bf16.mxu0 %v10110_v46 }
 0x2df   : > { %8649 = vmatmul.mubr.msk.bf16.gmra.mrb[12].mxu0 %vm2323_vm9, %v11848_v30 }
 0x2e0   : > { %8652 = vmatprep.mubr.msk.bf16.mxu0 %vm2323_vm9, %v11860_v47 }
 0x2e4   : > { %v9577_v24 = vpop.permute.xlu0 %9576 }
 0x2e5   : > { %v9579_v35 = vunpack.i.h.bf16 %v9577_v24  ;;  %v9578_v12 = vunpack.i.l.bf16 %v9577_v24 }
 0x2e7   : > { %8653 = vmatmul.mubr.msk.bf16.gmra.mrb[16].mxu0 %vm2323_vm9, %v11873_v21  ;;  %v2126_v25 = vsel %vm14692_vm1, %v1286_v29, %v9579_v35  ;;  %v2125_v6 = vsel %vm14692_vm1, %v1285_v7, %v9578_v12  ;;  %v3479_v12 = vld [vmem:[%s14630_s8] sm:$0x1] }
 0x2e8   : > { %8656 = vmatprep.mubr.msk.bf16.mxu0 %vm2323_vm9, %v11888_v42  ;;  %v12208_v7 = vld [vmem:[%s14628_s6] ss:$0 sm:$0xff] }
 0x2e9   : > { %v9582_v61 = vpop.permute.xlu1 %9581 }
 0x2ea   : > { %v9584_v0 = vunpack.i.h.bf16 %v9582_v61  ;;  %v9583_v13 = vunpack.i.l.bf16 %v9582_v61  ;;  %v9587_v19 = vpop.permute.xlu0 %9586 }
 0x2eb   : > { %v9589_v32 = vunpack.i.h.bf16 %v9587_v19  ;;  %v9588_v4 = vunpack.i.l.bf16 %v9587_v19 }
 0x2ec   : > { %v2166_v22 = vsel %vm2129_vm6, %v2125_v6, %v9583_v13  ;;  %v2167_v37 = vsel %vm2129_vm6, %v2126_v25, %v9584_v0 }
 0x2ef   : > { %8657 = vmatmul.mubr.msk.bf16.gmra.mrb[20].mxu0 %vm2323_vm9, %v11900_v20 }
 0x2f0   : > { %8660 = vmatprep.mubr.msk.bf16.mxu0 %vm2323_vm9, %v11912_v26 }
 0x2f7   : > { %8661 = vmatmul.mubr.msk.bf16.gmra.mrb[24].mxu0 %vm2323_vm9, %v11924_v39 }
 0x2f8   : > { %8664 = vmatprep.mubr.msk.bf16.mxu0 %vm2323_vm9, %v11936_v51 }
 0x2ff   : > { %8665 = vmatmul.mubr.msk.bf16.gmra.mrb[28].mxu0 %vm2323_vm9, %v11948_v57 }
 0x300   : > { %8678 = vmatprep.mubr.msk.bf16.mxu0 %vm2323_vm9, %v11765_v63  ;;  %v10111_v63 = vld [vmem:[%s14627_s5 + $0x80] sm:$0xff]  }
 0x307   : > { %8679 = vmatmul.mubr.msk.bf16.vlgmr.msra.gmra.mrb[0].mxu0 %vm2323_vm9, %v11787_v45 }
 0x308   : > { %8711 = vmatpush3.bf16.msra.mxu0 %v10110_v46  ;;  %8682 = vmatprep.mubr.msk.bf16.mxu0 %vm2323_vm9, %v11806_v33  ;;  %v9592_v46 = vpop.permute.xlu1 %9591 }
 0x309   : > { %8712 = vmatprep.subr.bf16.mxu0 %v10111_v63 }
 0x30c   : > { %8713 = vmatpush3.bf16.msra.mxu0 %v10111_v63  ;;  %v9594_v63 = vunpack.i.h.bf16 %v9592_v46 }
 0x30d   : > { %8714 = vmatprep.subr.bf16.mxu0 %v10112_v15 }
 0x30f   : > { %8683 = vmatmul.mubr.msk.bf16.gmra.mrb[4].mxu0 %vm2323_vm9, %v11824_v49 }
 0x310   : > { %8686 = vmatprep.mubr.msk.bf16.mxu0 %vm2323_vm9, %v11836_v18  ;;  %8715 = vmatpush3.bf16.msra.mxu0 %v10112_v15  ;;  %v9593_v15 = vunpack.i.l.bf16 %v9592_v46 }
 0x311   : > { %8716 = vmatprep.subr.bf16.mxu0 %v10113_v38 }
 0x314   : > { %8717 = vmatpush3.bf16.msra.mxu0 %v10113_v38  ;;  %v2207_v38 = vsel %vm14691_vm7, %v2166_v22, %v9588_v4 }
 0x315   : > { %8718 = vmatprep.subr.bf16.mxu0 %v10114_v10 }
 0x317   : > { %8687 = vmatmul.mubr.msk.bf16.gmra.mrb[8].mxu0 %vm2323_vm9, %v11848_v30 }
 0x318   : > { %8690 = vmatprep.mubr.msk.bf16.mxu0 %vm2323_vm9, %v11860_v47  ;;  %8719 = vmatpush3.bf16.msra.mxu0 %v10114_v10  ;;  %v2208_v10 = vsel %vm14691_vm7, %v2167_v37, %v9589_v32 }
 0x319   : > { %8752 = vmatprep.subr.bf16.mxu0 %v10115_v36  ;;  %v2249_v27 = vsel %vm14694_vm8, %v2208_v10, %v9594_v63 }
 0x31f   : > { %8691 = vmatmul.mubr.msk.bf16.gmra.mrb[12].mxu0 %vm2323_vm9, %v11873_v21 }
 0x320   : > { %8694 = vmatprep.mubr.msk.bf16.mxu0 %vm2323_vm9, %v11888_v42 }
 0x327   : > { %8695 = vmatmul.mubr.msk.bf16.gmra.mrb[16].mxu0 %vm2323_vm9, %v11900_v20 }
 0x328   : > { %8698 = vmatprep.mubr.msk.bf16.mxu0 %vm2323_vm9, %v11912_v26 }
 0x32f   : > { %8699 = vmatmul.mubr.msk.bf16.gmra.mrb[20].mxu0 %vm2323_vm9, %v11924_v39 }
 0x330   : > { %8702 = vmatprep.mubr.msk.bf16.mxu0 %vm2323_vm9, %v11936_v51 }
 0x337   : > { %8703 = vmatmul.mubr.msk.bf16.gmra.mrb[24].mxu0 %vm2323_vm9, %v11948_v57 }
 0x338   : > { %8706 = vmatprep.mubr.msk.bf16.mxu0 %vm2323_vm9, %v11962_v8 }
 0x33f   : > { %8707 = vmatmul.mubr.msk.bf16.gmra.mrb[28].mxu0 %vm2323_vm9, %v12086_v59 }
 0x340   : > { %8720 = vmatprep.mubr.msk.bf16.mxu0 %vm2323_vm9, %v11787_v45  ;;  %v10118_v45 = vld [vmem:[%s14627_s5 + $0xb8] sm:$0xff]  }
 0x347   : > { %8721 = vmatmul.mubr.msk.bf16.vlgmr.msra.gmra.mrb[0].mxu0 %vm2323_vm9, %v11806_v33 }
 0x348   : > { %8753 = vmatpush3.bf16.msra.mxu0 %v10115_v36  ;;  %8724 = vmatprep.mubr.msk.bf16.mxu0 %vm2323_vm9, %v11824_v49  ;;  %v2248_v36 = vsel %vm14694_vm8, %v2207_v38, %v9593_v15 }
 0x349   : > { %8754 = vmatprep.subr.bf16.mxu0 %v10116_v48  ;;  %v2270_v55 = vpack.c.bf16 %v2249_v27, %v2248_v36 }
 0x34c   : > { %8755 = vmatpush3.bf16.msra.mxu0 %v10116_v48  ;;  %v9615_v48 = vpack.i.bf16 %v4316_v31, %v4315_v53 }
 0x34d   : > { %8756 = vmatprep.subr.bf16.mxu0 %v10117_v60 }
 0x34e   : > { %9616 = vrot.lane.b32.xlu0 %v9615_v48, %s14780_s28 }
 0x34f   : > { %8725 = vmatmul.mubr.msk.bf16.gmra.mrb[4].mxu0 %vm2323_vm9, %v11836_v18 }
 0x350   : > { %8728 = vmatprep.mubr.msk.bf16.mxu0 %vm2323_vm9, %v11848_v30  ;;  %8757 = vmatpush3.bf16.msra.mxu0 %v10117_v60  ;;  %v4356_v60 = vld [vmem:[#allocation3 + $0x30] sm:$0xff] }
 0x351   : > { %8758 = vmatprep.subr.bf16.mxu0 %v10118_v45 }
 0x354   : > { %8759 = vmatpush3.bf16.msra.mxu0 %v10118_v45  ;;  %v4395_v45 = vld [vmem:[#allocation3 + $0x29] sm:$0xff] }
 0x355   : > { %8760 = vmatprep.subr.bf16.mxu0 %v10119_v34 }
 0x357   : > { %8729 = vmatmul.mubr.msk.bf16.gmra.mrb[8].mxu0 %vm2323_vm9, %v11860_v47 }
 0x358   : > { %8732 = vmatprep.mubr.msk.bf16.mxu0 %vm2323_vm9, %v11873_v21  ;;  %8761 = vmatpush3.bf16.msra.mxu0 %v10119_v34  ;;  %v4396_v34 = vld [vmem:[#allocation3 + $0x31] sm:$0xff] }
 0x359   : > { %v9625_v35 = vpack.i.bf16 %v4396_v34, %v4395_v45 }
 0x35b   : > { %9626 = vrot.lane.b32.xlu0 %v9625_v35, %s14689_s3  ;;  %s7944_s3 = sshll.u32 %s523_s2, 8 }
 0x35f   : > { %8733 = vmatmul.mubr.msk.bf16.gmra.mrb[12].mxu0 %vm2323_vm9, %v11888_v42 }
 0x360   : > { %8736 = vmatprep.mubr.msk.bf16.mxu0 %vm2323_vm9, %v11900_v20 }
 0x367   : > { %8737 = vmatmul.mubr.msk.bf16.gmra.mrb[16].mxu0 %vm2323_vm9, %v11912_v26 }
 0x368   : > { %8740 = vmatprep.mubr.msk.bf16.mxu0 %vm2323_vm9, %v11924_v39 }
 0x36f   : > { %8741 = vmatmul.mubr.msk.bf16.gmra.mrb[20].mxu0 %vm2323_vm9, %v11936_v51 }
 0x370   : > { %8744 = vmatprep.mubr.msk.bf16.mxu0 %vm2323_vm9, %v11948_v57 }
 0x377   : > { %8745 = vmatmul.mubr.msk.bf16.gmra.mrb[24].mxu0 %vm2323_vm9, %v11962_v8 }
 0x378   : > { %8748 = vmatprep.mubr.msk.bf16.mxu0 %vm2323_vm9, %v12086_v59 }
 0x37f   : > { %8749 = vmatmul.mubr.msk.bf16.gmra.mrb[28].mxu0 %vm2323_vm9, %v2270_v55 }
 0x380   : > { %8762 = vmatprep.mubr.msk.bf16.mxu0 %vm2323_vm9, %v11806_v33  ;;  %v9597_v33 = vpop.permute.xlu0 %9596 }
 0x387   : > { %8763 = vmatmul.mubr.msk.bf16.vlgmr.msra.gmra.mrb[0].mxu0 %vm2323_vm9, %v11824_v49  ;;  %v9599_v49 = vunpack.i.h.bf16 %v9597_v33 }
 0x388   : > { %8766 = vmatprep.mubr.msk.bf16.mxu0 %vm2323_vm9, %v11836_v18  ;;  %v9598_v18 = vunpack.i.l.bf16 %v9597_v33 }
 0x38d   : > { %v3550_v9 = vpop.f32.mrb[4].mxu1 }
 0x38e   : > { %v8798_v40 = vpop.f32.mrb[5].mxu1  ;;  %v3551_v61 = vadd.f32 %v3550_v9, %v3479_v12 }
 0x38f   : > { %8767 = vmatmul.mubr.msk.bf16.gmra.mrb[4].mxu0 %vm2323_vm9, %v11848_v30  ;;  %v9602_v30 = vpop.permute.xlu1 %9601 }
 0x390   : > { %8770 = vmatprep.mubr.msk.bf16.mxu0 %vm2323_vm9, %v11860_v47  ;;  %v1287_v47 = vld [vmem:[#allocation2 + $0x266] sm:$0xff]  ;;  %v12211_v29 = vrot.slane %v3551_v61, %v11142_v1 }
 0x391   : > { %v2127_v56 = vsel %vm14692_vm1, %v1287_v47, %v9598_v18 }
 0x393   : > { %v9612_v50 = vpop.permute.xlu1 %9611 }
 0x394   : > { %v9614_v3 = vunpack.i.h.bf16 %v9612_v50  ;;  %v9613_v16 = vunpack.i.l.bf16 %v9612_v50 }
 0x397   : > { %8771 = vmatmul.mubr.msk.bf16.gmra.mrb[8].mxu0 %vm2323_vm9, %v11873_v21  ;;  %v1288_v21 = vld [vmem:[#allocation2 + $0x26e] sm:$0xff] }
 0x398   : > { %8774 = vmatprep.mubr.msk.bf16.mxu0 %vm2323_vm9, %v11888_v42  ;;  %v9604_v42 = vunpack.i.h.bf16 %v9602_v30 }
 0x39f   : > { %8775 = vmatmul.mubr.msk.bf16.gmra.mrb[12].mxu0 %vm2323_vm9, %v11900_v20  ;;  %v9603_v20 = vunpack.i.l.bf16 %v9602_v30 }
 0x3a0   : > { %8778 = vmatprep.mubr.msk.bf16.mxu0 %vm2323_vm9, %v11912_v26  ;;  %v9607_v26 = vpop.permute.xlu0 %9606 }
 0x3a1   : > { %v9608_v43 = vunpack.i.l.bf16 %v9607_v26  ;;  %v2168_v54 = vsel %vm2129_vm6, %v2127_v56, %v9603_v20 }
 0x3a7   : > { %8779 = vmatmul.mubr.msk.bf16.gmra.mrb[16].mxu0 %vm2323_vm9, %v11924_v39  ;;  %v2128_v39 = vsel %vm14692_vm1, %v1288_v21, %v9599_v49 }
 0x3a8   : > { %8782 = vmatprep.mubr.msk.bf16.mxu0 %vm2323_vm9, %v11936_v51  ;;  %v9609_v51 = vunpack.i.h.bf16 %v9607_v26  ;;  %v2169_v52 = vsel %vm2129_vm6, %v2128_v39, %v9604_v42 }
 0x3af   : > { %8783 = vmatmul.mubr.msk.bf16.gmra.mrb[20].mxu0 %vm2323_vm9, %v11948_v57  ;;  %v2209_v57 = vsel %vm14691_vm7, %v2168_v54, %v9608_v43 }
 0x3b0   : > { %8786 = vmatprep.mubr.msk.bf16.mxu0 %vm2323_vm9, %v11962_v8  ;;  %v2210_v8 = vsel %vm14691_vm7, %v2169_v52, %v9609_v51  ;;  %v2250_v28 = vsel %vm14694_vm8, %v2209_v57, %v9613_v16 }
 0x3b1   : > { %v2251_v58 = vsel %vm14694_vm8, %v2210_v8, %v9614_v3 }
 0x3b2   : > { %v2271_v44 = vpack.c.bf16 %v2251_v58, %v2250_v28 }
 0x3b7   : > { %8787 = vmatmul.mubr.msk.bf16.gmra.mrb[24].mxu0 %vm2323_vm9, %v12086_v59  ;;  %v4355_v59 = vld [vmem:[#allocation3 + $0x28] sm:$0xff] }
 0x3b8   : > { %8790 = vmatprep.mubr.msk.bf16.mxu0 %vm2323_vm9, %v2270_v55  ;;  %v9620_v24 = vpack.i.bf16 %v4356_v60, %v4355_v59 }
 0x3ba   : > { %9621 = vrot.lane.b32.xlu1 %v9620_v24, %s14776_s20 }
 0x3bf   : > { %8791 = vmatmul.mubr.msk.bf16.gmra.mrb[28].mxu0 %vm2323_vm9, %v2271_v44 }
 0x45a   : > { %v8764_v0 = vpop.f32.mrb[0].mxu0 }
 0x45b   : > { %v3447_v13 = vadd.f32 %v8764_v0, %v12208_v7  ;;  %v3279_v19 = vpop.f32.mrb[1].mxu0 }
 0x45c   : > { %v3445_v25 = vadd.f32 %v12208_v7, %v3279_v19  ;;  %v8765_v6 = vpop.f32.mrb[2].mxu0 }
 0x45d   : > { %v12216_v32 = vadd.f32 %v12211_v29, %v3447_v13  ;;  %v3448_v4 = vadd.f32 %v8765_v6, %v12208_v7  ;;  %v3282_v46 = vpop.f32.mrb[3].mxu0 }
 0x45e   : > { %v12220_v22 = vadd.f32 %v12211_v29, %v3445_v25  ;;  %v3446_v37 = vadd.f32 %v12208_v7, %v3282_v46 }
 0x45f   : > { %v12224_v63 = vadd.f32 %v12211_v29, %v3448_v4  ;;  %v3661_v10 = vmul.f32 %v12216_v32, %v12216_v32  ;;  %v3593_v21 = vsel %vm2129_vm6, %v12216_v32, 0.0 }
 0x460   : > { %v3659_v15 = vmul.f32 %v12220_v22, %v12220_v22  ;;  %v12229_v38 = vadd.f32 %v12211_v29, %v3446_v37  ;;  %v3590_v36 = vsel %vm2129_vm6, %v12220_v22, 0.0 }
 0x461   : > { %v3662_v49 = vmul.f32 %v12224_v63, %v12224_v63  ;;  %v3694_v52 = vsel %vm2129_vm6, %v3661_v10, 0.0  ;;  %v3595_v3 = vsel %vm2129_vm6, %v12224_v63, 0.0 }
 0x462   : > { %v3591_v27 = vsel %vm2129_vm6, %v12229_v38, 0.0  ;;  %v3660_v55 = vmul.f32 %v12229_v38, %v12229_v38  ;;  %v8768_v33 = vpop.f32.mrb[4].mxu0  ;;  %v3691_v42 = vsel %vm2129_vm6, %v3659_v15, 0.0 }
 0x463   : > { %v3592_v18 = vadd.f32 %v3591_v27, %v3590_v36  ;;  %v3451_v30 = vadd.f32 %v8768_v33, %v12208_v7  ;;  %v3295_v47 = vpop.f32.mrb[5].mxu0  ;;  %v3696_v8 = vsel %vm2129_vm6, %v3662_v49, 0.0 }
 0x464   : > { %v3692_v20 = vsel %vm2129_vm6, %v3660_v55, 0.0  ;;  %v3449_v26 = vadd.f32 %v12208_v7, %v3295_v47  ;;  %v8769_v39 = vpop.f32.mrb[6].mxu0 }
 0x465   : > { %v3594_v56 = vadd.f32 %v3593_v21, %v3592_v18  ;;  %v3693_v51 = vadd.f32 %v3692_v20, %v3691_v42  ;;  %v12248_v43 = vadd.f32 %v12211_v29, %v3451_v30  ;;  %v3452_v50 = vadd.f32 %v8769_v39, %v12208_v7  ;;  %v3298_v54 = vpop.f32.mrb[7].mxu0 }
 0x466   : > { %v12255_v16 = vadd.f32 %v12211_v29, %v3449_v26  ;;  %v3450_v57 = vadd.f32 %v12208_v7, %v3298_v54 }
 0x467   : > { %v3695_v28 = vadd.f32 %v3694_v52, %v3693_v51  ;;  %v3596_v58 = vadd.f32 %v3595_v3, %v3594_v56  ;;  %v12264_v40 = vadd.f32 %v12211_v29, %v3452_v50  ;;  %v3665_v2 = vmul.f32 %v12248_v43, %v12248_v43 }
 0x468   : > { %v3597_v44 = vsel %vm2129_vm6, %v12255_v16, 0.0  ;;  %v3663_v9 = vmul.f32 %v12255_v16, %v12255_v16  ;;  %v12267_v11 = vadd.f32 %v12211_v29, %v3450_v57  ;;  %v3601_v35 = vsel %vm2129_vm6, %v12248_v43, 0.0 }
 0x469   : > { %v3598_v41 = vadd.f32 %v3597_v44, %v3596_v58  ;;  %v3697_v17 = vadd.f32 %v3696_v8, %v3695_v28  ;;  %v3666_v12 = vmul.f32 %v12264_v40, %v12264_v40  ;;  %v3603_v46 = vsel %vm2129_vm6, %v12264_v40, 0.0 }
 0x46a   : > { %v3698_v53 = vsel %vm2129_vm6, %v3663_v9, 0.0  ;;  %v3599_v31 = vsel %vm2129_vm6, %v12267_v11, 0.0  ;;  %v8772_v59 = vpop.f32.mrb[8].mxu0  ;;  %v3664_v45 = vmul.f32 %v12267_v11, %v12267_v11  ;;  %v3702_v36 = vsel %vm2129_vm6, %v3665_v2, 0.0 }
 0x46b   : > { %v3699_v48 = vadd.f32 %v3698_v53, %v3697_v17  ;;  %v3600_v60 = vadd.f32 %v3599_v31, %v3598_v41  ;;  %v3455_v34 = vadd.f32 %v8772_v59, %v12208_v7  ;;  %v3311_v24 = vpop.f32.mrb[9].mxu0  ;;  %v3704_v47 = vsel %vm2129_vm6, %v3666_v12, 0.0 }
 0x46c   : > { %v3453_v61 = vadd.f32 %v12208_v7, %v3311_v24  ;;  %v8773_v0 = vpop.f32.mrb[10].mxu0  ;;  %v3700_v19 = vsel %vm2129_vm6, %v3664_v45, 0.0 }
 0x46d   : > { %v3602_v13 = vadd.f32 %v3601_v35, %v3600_v60  ;;  %v12284_v25 = vadd.f32 %v12211_v29, %v3455_v34  ;;  %v3456_v6 = vadd.f32 %v8773_v0, %v12208_v7  ;;  %v3314_v4 = vpop.f32.mrb[11].mxu0  ;;  %v3701_v37 = vadd.f32 %v3700_v19, %v3699_v48 }
 0x46e   : > { %v12290_v15 = vadd.f32 %v12211_v29, %v3453_v61  ;;  %v3454_v10 = vadd.f32 %v12208_v7, %v3314_v4 }
 0x46f   : > { %v3604_v27 = vadd.f32 %v3603_v46, %v3602_v13  ;;  %v12295_v55 = vadd.f32 %v12211_v29, %v3456_v6  ;;  %v3703_v33 = vadd.f32 %v3702_v36, %v3701_v37  ;;  %v3669_v51 = vmul.f32 %v12284_v25, %v12284_v25 }
 0x470   : > { %v3605_v49 = vsel %vm2129_vm6, %v12290_v15, 0.0  ;;  %v3667_v18 = vmul.f32 %v12290_v15, %v12290_v15  ;;  %v12302_v30 = vadd.f32 %v12211_v29, %v3454_v10  ;;  %v3609_v3 = vsel %vm2129_vm6, %v12284_v25, 0.0 }
 0x471   : > { %v3606_v21 = vadd.f32 %v3605_v49, %v3604_v27  ;;  %v3705_v42 = vadd.f32 %v3704_v47, %v3703_v33  ;;  %v3670_v44 = vmul.f32 %v12295_v55, %v12295_v55  ;;  %v3611_v53 = vsel %vm2129_vm6, %v12295_v55, 0.0 }
 0x472   : > { %v3706_v20 = vsel %vm2129_vm6, %v3667_v18, 0.0  ;;  %v3607_v26 = vsel %vm2129_vm6, %v12302_v30, 0.0  ;;  %v3668_v39 = vmul.f32 %v12302_v30, %v12302_v30  ;;  %v8776_v56 = vpop.f32.mrb[12].mxu0  ;;  %v3710_v60 = vsel %vm2129_vm6, %v3669_v51, 0.0 }
 0x473   : > { %v3608_v50 = vadd.f32 %v3607_v26, %v3606_v21  ;;  %v3459_v54 = vadd.f32 %v8776_v56, %v12208_v7  ;;  %v3327_v52 = vpop.f32.mrb[13].mxu0  ;;  %v3707_v57 = vadd.f32 %v3706_v20, %v3705_v42  ;;  %v3712_v0 = vsel %vm2129_vm6, %v3670_v44, 0.0 }
 0x474   : > { %v3708_v8 = vsel %vm2129_vm6, %v3668_v39, 0.0  ;;  %v3457_v28 = vadd.f32 %v12208_v7, %v3327_v52  ;;  %v8777_v58 = vpop.f32.mrb[14].mxu0 }
 0x475   : > { %v3610_v9 = vadd.f32 %v3609_v3, %v3608_v50  ;;  %v12320_v41 = vadd.f32 %v12211_v29, %v3459_v54  ;;  %v3460_v17 = vadd.f32 %v8777_v58, %v12208_v7  ;;  %v3330_v2 = vpop.f32.mrb[15].mxu0  ;;  %v3709_v31 = vadd.f32 %v3708_v8, %v3707_v57 }
 0x476   : > { %v12326_v59 = vadd.f32 %v12211_v29, %v3457_v28  ;;  %v3458_v48 = vadd.f32 %v12208_v7, %v3330_v2 }
 0x477   : > { %v3612_v45 = vadd.f32 %v3611_v53, %v3610_v9  ;;  %v12331_v34 = vadd.f32 %v12211_v29, %v3460_v17  ;;  %v3711_v24 = vadd.f32 %v3710_v60, %v3709_v31  ;;  %v3673_v10 = vmul.f32 %v12320_v41, %v12320_v41 }
 0x478   : > { %v3613_v35 = vsel %vm2129_vm6, %v12326_v59, 0.0  ;;  %v3671_v12 = vmul.f32 %v12326_v59, %v12326_v59  ;;  %v12338_v61 = vadd.f32 %v12211_v29, %v3458_v48  ;;  %v3617_v49 = vsel %vm2129_vm6, %v12320_v41, 0.0 }
 0x479   : > { %v3614_v13 = vadd.f32 %v3613_v35, %v3612_v45  ;;  %v3713_v19 = vadd.f32 %v3712_v0, %v3711_v24  ;;  %v3674_v20 = vmul.f32 %v12331_v34, %v12331_v34  ;;  %v3619_v50 = vsel %vm2129_vm6, %v12331_v34, 0.0 }
 0x47a   : > { %v3714_v6 = vsel %vm2129_vm6, %v3671_v12, 0.0  ;;  %v3615_v4 = vsel %vm2129_vm6, %v12338_v61, 0.0  ;;  %v3672_v46 = vmul.f32 %v12338_v61, %v12338_v61  ;;  %v8780_v37 = vpop.f32.mrb[16].mxu0  ;;  %v3718_v57 = vsel %vm2129_vm6, %v3673_v10, 0.0 }
 0x47b   : > { %v3616_v36 = vadd.f32 %v3615_v4, %v3614_v13  ;;  %v3463_v27 = vadd.f32 %v8780_v37, %v12208_v7  ;;  %v3343_v33 = vpop.f32.mrb[17].mxu0  ;;  %v3715_v18 = vadd.f32 %v3714_v6, %v3713_v19  ;;  %v3720_v2 = vsel %vm2129_vm6, %v3674_v20, 0.0 }
 0x47c   : > { %v3716_v47 = vsel %vm2129_vm6, %v3672_v46, 0.0  ;;  %v3461_v21 = vadd.f32 %v12208_v7, %v3343_v33  ;;  %v8781_v42 = vpop.f32.mrb[18].mxu0 }
 0x47d   : > { %v3618_v26 = vadd.f32 %v3617_v49, %v3616_v36  ;;  %v12356_v39 = vadd.f32 %v12211_v29, %v3463_v27  ;;  %v3464_v56 = vadd.f32 %v8781_v42, %v12208_v7  ;;  %v3346_v51 = vpop.f32.mrb[19].mxu0  ;;  %v3717_v54 = vadd.f32 %v3716_v47, %v3715_v18 }
 0x47e   : > { %v12362_v52 = vadd.f32 %v12211_v29, %v3461_v21  ;;  %v3462_v3 = vadd.f32 %v12208_v7, %v3346_v51 }
 0x47f   : > { %v3620_v8 = vadd.f32 %v3619_v50, %v3618_v26  ;;  %v12367_v28 = vadd.f32 %v12211_v29, %v3464_v56  ;;  %v3719_v58 = vadd.f32 %v3718_v57, %v3717_v54  ;;  %v3677_v35 = vmul.f32 %v12356_v39, %v12356_v39 }
 0x480   : > { %v3621_v44 = vsel %vm2129_vm6, %v12362_v52, 0.0  ;;  %v3675_v9 = vmul.f32 %v12362_v52, %v12362_v52  ;;  %v12374_v17 = vadd.f32 %v12211_v29, %v3462_v3  ;;  %v3625_v19 = vsel %vm2129_vm6, %v12356_v39, 0.0 }
 0x481   : > { %v3622_v53 = vadd.f32 %v3621_v44, %v3620_v8  ;;  %v3721_v31 = vadd.f32 %v3720_v2, %v3719_v58  ;;  %v3678_v10 = vmul.f32 %v12367_v28, %v12367_v28  ;;  %v3627_v18 = vsel %vm2129_vm6, %v12367_v28, 0.0 }
 0x482   : > { %v3722_v48 = vsel %vm2129_vm6, %v3675_v9, 0.0  ;;  %v3623_v60 = vsel %vm2129_vm6, %v12374_v17, 0.0  ;;  %v3676_v45 = vmul.f32 %v12374_v17, %v12374_v17  ;;  %v8784_v24 = vpop.f32.mrb[20].mxu0  ;;  %v3726_v20 = vsel %vm2129_vm6, %v3677_v35, 0.0 }
 0x483   : > { %v3624_v12 = vadd.f32 %v3623_v60, %v3622_v53  ;;  %v3467_v0 = vadd.f32 %v8784_v24, %v12208_v7  ;;  %v3359_v13 = vpop.f32.mrb[21].mxu0  ;;  %v3723_v6 = vadd.f32 %v3722_v48, %v3721_v31  ;;  %v3728_v57 = vsel %vm2129_vm6, %v3678_v10, 0.0 }
 0x484   : > { %v3724_v4 = vsel %vm2129_vm6, %v3676_v45, 0.0  ;;  %v3465_v46 = vadd.f32 %v12208_v7, %v3359_v13  ;;  %v8785_v37 = vpop.f32.mrb[22].mxu0 }
 0x485   : > { %v3626_v36 = vadd.f32 %v3625_v19, %v3624_v12  ;;  %v12392_v27 = vadd.f32 %v12211_v29, %v3467_v0  ;;  %v3468_v33 = vadd.f32 %v8785_v37, %v12208_v7  ;;  %v3362_v49 = vpop.f32.mrb[23].mxu0  ;;  %v3725_v47 = vadd.f32 %v3724_v4, %v3723_v6 }
 0x486   : > { %v12398_v21 = vadd.f32 %v12211_v29, %v3465_v46  ;;  %v3466_v42 = vadd.f32 %v12208_v7, %v3362_v49 }
 0x487   : > { %v3628_v26 = vadd.f32 %v3627_v18, %v3626_v36  ;;  %v12403_v56 = vadd.f32 %v12211_v29, %v3468_v33  ;;  %v3727_v51 = vadd.f32 %v3726_v20, %v3725_v47  ;;  %v3681_v31 = vmul.f32 %v12392_v27, %v12392_v27 }
 0x488   : > { %v3629_v50 = vsel %vm2129_vm6, %v12398_v21, 0.0  ;;  %v3679_v54 = vmul.f32 %v12398_v21, %v12398_v21  ;;  %v12410_v3 = vadd.f32 %v12211_v29, %v3466_v42  ;;  %v3633_v24 = vsel %vm2129_vm6, %v12392_v27, 0.0 }
 0x489   : > { %v3630_v8 = vadd.f32 %v3629_v50, %v3628_v26  ;;  %v3729_v58 = vadd.f32 %v3728_v57, %v3727_v51  ;;  %v3682_v19 = vmul.f32 %v12403_v56, %v12403_v56  ;;  %v3635_v10 = vsel %vm2129_vm6, %v12403_v56, 0.0 }
 0x48a   : > { %v3730_v44 = vsel %vm2129_vm6, %v3679_v54, 0.0  ;;  %v3631_v9 = vsel %vm2129_vm6, %v12410_v3, 0.0  ;;  %v3680_v2 = vmul.f32 %v12410_v3, %v12410_v3  ;;  %v8788_v53 = vpop.f32.mrb[24].mxu0  ;;  %v3734_v18 = vsel %vm2129_vm6, %v3681_v31, 0.0 }
 0x48b   : > { %v3632_v48 = vadd.f32 %v3631_v9, %v3630_v8  ;;  %v3471_v60 = vadd.f32 %v8788_v53, %v12208_v7  ;;  %v3375_v45 = vpop.f32.mrb[25].mxu0  ;;  %v3731_v35 = vadd.f32 %v3730_v44, %v3729_v58  ;;  %v3736_v54 = vsel %vm2129_vm6, %v3682_v19, 0.0 }
 0x48c   : > { %v3732_v12 = vsel %vm2129_vm6, %v3680_v2, 0.0  ;;  %v3469_v0 = vadd.f32 %v12208_v7, %v3375_v45  ;;  %v8789_v13 = vpop.f32.mrb[26].mxu0 }
 0x48d   : > { %v3634_v6 = vadd.f32 %v3633_v24, %v3632_v48  ;;  %v12428_v4 = vadd.f32 %v12211_v29, %v3471_v60  ;;  %v3472_v46 = vadd.f32 %v8789_v13, %v12208_v7  ;;  %v3378_v37 = vpop.f32.mrb[27].mxu0  ;;  %v3733_v36 = vadd.f32 %v3732_v12, %v3731_v35 }
 0x48e   : > { %v12434_v33 = vadd.f32 %v12211_v29, %v3469_v0  ;;  %v3470_v49 = vadd.f32 %v12208_v7, %v3378_v37 }
 0x48f   : > { %v3636_v47 = vadd.f32 %v3635_v10, %v3634_v6  ;;  %v12439_v42 = vadd.f32 %v12211_v29, %v3472_v46  ;;  %v3735_v20 = vadd.f32 %v3734_v18, %v3733_v36  ;;  %v3685_v53 = vmul.f32 %v12428_v4, %v12428_v4 }
 0x490   : > { %v3637_v26 = vsel %vm2129_vm6, %v12434_v33, 0.0  ;;  %v3683_v51 = vmul.f32 %v12434_v33, %v12434_v33  ;;  %v12446_v50 = vadd.f32 %v12211_v29, %v3470_v49  ;;  %v3641_v45 = vsel %vm2129_vm6, %v12428_v4, 0.0 }
 0x491   : > { %v3638_v57 = vadd.f32 %v3637_v26, %v3636_v47  ;;  %v3737_v8 = vadd.f32 %v3736_v54, %v3735_v20  ;;  %v3686_v13 = vmul.f32 %v12439_v42, %v12439_v42  ;;  %v3643_v10 = vsel %vm2129_vm6, %v12439_v42, 0.0 }
 0x492   : > { %v3738_v58 = vsel %vm2129_vm6, %v3683_v51, 0.0  ;;  %v3639_v44 = vsel %vm2129_vm6, %v12446_v50, 0.0  ;;  %v3684_v9 = vmul.f32 %v12446_v50, %v12446_v50  ;;  %v8792_v2 = vpop.f32.mrb[28].mxu0  ;;  %v3742_v47 = vsel %vm2129_vm6, %v3685_v53, 0.0 }
 0x493   : > { %v3640_v31 = vadd.f32 %v3639_v44, %v3638_v57  ;;  %v3475_v48 = vadd.f32 %v8792_v2, %v12208_v7  ;;  %v3391_v60 = vpop.f32.mrb[29].mxu0  ;;  %v3739_v24 = vadd.f32 %v3738_v58, %v3737_v8  ;;  %v3744_v58 = vsel %vm2129_vm6, %v3686_v13, 0.0 }
 0x494   : > { %v3740_v35 = vsel %vm2129_vm6, %v3684_v9, 0.0  ;;  %v3473_v12 = vadd.f32 %v12208_v7, %v3391_v60  ;;  %v8793_v0 = vpop.f32.mrb[30].mxu0 }
 0x495   : > { %v3642_v19 = vadd.f32 %v3641_v45, %v3640_v31  ;;  %v12464_v6 = vadd.f32 %v12211_v29, %v3475_v48  ;;  %v3476_v46 = vadd.f32 %v8793_v0, %v12208_v7  ;;  %v3394_v37 = vpop.f32.mrb[31].mxu0  ;;  %v3741_v36 = vadd.f32 %v3740_v35, %v3739_v24 }
 0x496   : > { %v12470_v49 = vadd.f32 %v12211_v29, %v3473_v12  ;;  %v3474_v18 = vadd.f32 %v12208_v7, %v3394_v37 }
 0x497   : > { %v3644_v20 = vadd.f32 %v3643_v10, %v3642_v19  ;;  %v12475_v26 = vadd.f32 %v12211_v29, %v3476_v46  ;;  %v3743_v51 = vadd.f32 %v3742_v47, %v3741_v36  ;;  %v3689_v31 = vmul.f32 %v12464_v6, %v12464_v6 }
 0x498   : > { %v3645_v54 = vsel %vm2129_vm6, %v12470_v49, 0.0  ;;  %v3687_v57 = vmul.f32 %v12470_v49, %v12470_v49  ;;  %v12482_v8 = vadd.f32 %v12211_v29, %v3474_v18  ;;  %v3649_v29 = vsel %vm2129_vm6, %v12464_v6, 0.0 }
 0x499   : > { %v3646_v44 = vadd.f32 %v3645_v54, %v3644_v20  ;;  %v3745_v7 = vadd.f32 %v3744_v58, %v3743_v51  ;;  %v3690_v24 = vmul.f32 %v12475_v26, %v12475_v26  ;;  %v3651_v12 = vsel %vm2129_vm6, %v12475_v26, 0.0 }
 0x49a   : > { %v3746_v9 = vsel %vm2129_vm6, %v3687_v57, 0.0  ;;  %v3647_v2 = vsel %vm2129_vm6, %v12482_v8, 0.0  ;;  %v3688_v53 = vmul.f32 %v12482_v8, %v12482_v8  ;;  %v3750_v13 = vsel %vm2129_vm6, %v3689_v31, 0.0 }
 0x49b   : > { %v3648_v48 = vadd.f32 %v3647_v2, %v3646_v44  ;;  %v3747_v60 = vadd.f32 %v3746_v9, %v3745_v7  ;;  %v3752_v37 = vsel %vm2129_vm6, %v3690_v24, 0.0  ;;  %v14695_v31 = vmov 0   ;;  %v4275_v24 = vld [vmem:[#allocation3 + $0x26] sm:$0xff] }
 0x49c   : > { %v3748_v45 = vsel %vm2129_vm6, %v3688_v53, 0.0  ;;  %v10120_v53 = vld [vmem:[%s14634_s12 + $0x50] sm:$0xff]   ;;  %6009 = vmatprep.subr.bf16.mxu0 %v14695_v31 }
 0x49d   : > { %v3650_v35 = vadd.f32 %v3649_v29, %v3648_v48  ;;  %v3749_v0 = vadd.f32 %v3748_v45, %v3747_v60  ;;  %v10125_v48 = vld [vmem:[%s14634_s12 + $0x78] sm:$0xff]   ;;  %v10126_v29 = vld [vmem:[%s14634_s12 + $0x80] sm:$0xff]   ;;  %v9617_v60 = vpop.permute.xlu0 %9616  ;;  %v9622_v45 = vpop.permute.xlu1 %9621 }
 0x49f   : > { %v3652_v19 = vadd.f32 %v3651_v12, %v3650_v35  ;;  %v3751_v46 = vadd.f32 %v3750_v13, %v3749_v0  ;;  %v4276_v35 = vld [vmem:[#allocation3 + $0x2e] sm:$0xff]  ;;  %v9619_v12 = vunpack.i.h.bf16 %v9617_v60  ;;  %v9618_v0 = vunpack.i.l.bf16 %v9617_v60 }
 0x4a0   : > { %v10127_v13 = vld [vmem:[%s14634_s12 + $0x88] sm:$0xff]  }
 0x4a1   : > { %v3653_v10 = vrot.slane %v3652_v19, 4  ;;  %v3753_v36 = vadd.f32 %v3752_v37, %v3751_v46  ;;  %v4436_v46 = vld [vmem:[#allocation3 + $0x32] sm:$0xff]  ;;  %v9624_v37 = vunpack.i.h.bf16 %v9622_v45 }
 0x4a3   : > { %v3654_v18 = vadd.f32 %v3653_v10, %v3652_v19  ;;  %v3754_v47 = vrot.slane %v3753_v36, 4  ;;  %v4435_v19 = vld [vmem:[#allocation3 + $0x2a] sm:$0xff]  ;;  %v9623_v10 = vunpack.i.l.bf16 %v9622_v45 }
 0x4a5   : > { %v3655_v20 = vrot.slane %v3654_v18, 2  ;;  %v3755_v51 = vadd.f32 %v3754_v47, %v3753_v36  ;;  %v12541_v36 = vpack.c.bf16 %v4436_v46, %v4435_v19  ;;  %v4955_v47 = vsel %vm2129_vm6, %v4275_v24, %v9618_v0 }
 0x4a7   : > { %v3656_v54 = vadd.f32 %v3655_v20, %v3654_v18  ;;  %v3756_v57 = vrot.slane %v3755_v51, 2  ;;  %v4956_v18 = vsel %vm2129_vm6, %v4276_v35, %v9619_v12  ;;  %v9627_v20 = vpop.permute.xlu0 %9626 }
 0x4a9   : > { %v3657_v58 = vrot.slane %v3656_v54, 1  ;;  %v3757_v7 = vadd.f32 %v3756_v57, %v3755_v51  ;;  %v10128_v51 = vld [vmem:[%s14634_s12 + $0x90] sm:$0xff]   ;;  %v9628_v57 = vunpack.i.l.bf16 %v9627_v20 }
 0x4ab   : > { %v3658_v44 = vadd.f32 %v3657_v58, %v3656_v54  ;;  %v3758_v9 = vrot.slane %v3757_v7, 1  ;;  %v9629_v54 = vunpack.i.h.bf16 %v9627_v20  ;;  %v4995_v58 = vsel %vm14694_vm8, %v4955_v47, %v9623_v10 }
 0x4ad   : > { %8808 = vmatmul.mubr.msk.f32.vlgmr.msra.gmra.mrb[6].mxu1 %vm2129_vm6, %v3658_v44  ;;  %v3759_v2 = vadd.f32 %v3758_v9, %v3757_v7  ;;  %v4996_v44 = vsel %vm14694_vm8, %v4956_v18, %v9624_v37 }
 0x4ae   : > { %8949 = vmatpush3.bf16.msra.mxu1 %v12188_v23  ;;  %8818 = vmatprep.mubr.msk.f32.mxu1 %vm10258_vm0, %v14750_v5  ;;  %v10121_v5 = vld [vmem:[%s14634_s12 + $0x58] sm:$0xff]   ;;  %v10123_v23 = vld [vmem:[%s14634_s12 + $0x68] sm:$0xff]   ;;  %vm14693_vm0 = vcmask 785408  }
 0x4af   : > { %8950 = vmatprep.subr.bf16.mxu1 %v14779_v14  ;;  %v10122_v14 = vld [vmem:[%s14634_s12 + $0x60] sm:$0xff]   ;;  %v5036_v7 = vsel %vm14693_vm0, %v4995_v58, %v9628_v57  ;;  %v5037_v9 = vsel %vm14693_vm0, %v4996_v44, %v9629_v54 }
 0x4b2   : > { %8952 = vmatpush3.bf16.msra.mxu1 %v12194_v62  ;;  %v10124_v62 = vld [vmem:[%s14634_s12 + $0x70] sm:$0xff]  }
 0x4b3   : > { %5263 = vmatprep.subr.bf16.mxu1 %v14695_v31 }
 0x4b5   : > { %8819 = vmatmul.mubr.msk.f32.vlgmr.msra.gmra.mrb[8].mxu1 %vm2129_vm6, %v3759_v2  ;;  %v10129_v2 = vld [vmem:[%s14634_s12 + $0x98] sm:$0xff]  }
 0x4b6   : > { %5264 = vmatpush1.bf16.msra.mxu1 %v10120_v53  ;;  %8132 = vmatprep.mubr.msk.bf16.mxu1 %vm2129_vm6, %v12541_v36  ;;  %v12559_v53 = vpack.c.bf16 %v5037_v9, %v5036_v7 }
 0x4b7   : > { %5265 = vmatprep.subr.bf16.mxu1 %v14695_v31 }
 0x4ba   : > { %5266 = vmatpush1.bf16.msra.mxu1 %v10121_v5 }
 0x4bb   : > { %5267 = vmatprep.subr.bf16.mxu1 %v14695_v31 }
 0x4be   : > { %5268 = vmatpush1.bf16.msra.mxu1 %v10122_v14 }
 0x4bf   : > { %5269 = vmatprep.subr.bf16.mxu1 %v14695_v31 }
 0x4c2   : > { %5270 = vmatpush1.bf16.msra.mxu1 %v10123_v23 }
 0x4c3   : > { %5271 = vmatprep.subr.bf16.mxu1 %v14695_v31 }
 0x4c6   : > { %5272 = vmatpush1.bf16.msra.mxu1 %v10124_v62 }
 0x4c7   : > { %5273 = vmatprep.subr.bf16.mxu1 %v14695_v31 }
 0x4ca   : > { %5274 = vmatpush1.bf16.msra.mxu1 %v10125_v48 }
 0x4cb   : > { %5275 = vmatprep.subr.bf16.mxu1 %v14695_v31 }
 0x4ce   : > { %5276 = vmatpush1.bf16.msra.mxu1 %v10126_v29 }
 0x4cf   : > { %5277 = vmatprep.subr.bf16.mxu1 %v14695_v31 }
 0x4d2   : > { %5278 = vmatpush1.bf16.msra.mxu1 %v10127_v13 }
 0x4d3   : > { %5279 = vmatprep.subr.bf16.mxu1 %v14695_v31 }
 0x4d6   : > { %5280 = vmatpush1.bf16.msra.mxu1 %v10128_v51 }
 0x4d7   : > { %5281 = vmatprep.subr.bf16.mxu1 %v14695_v31 }
 0x4da   : > { %5282 = vmatpush1.bf16.msra.mxu1 %v10129_v2 }
 0x4db   : > { %5487 = vmatprep.subr.bf16.mxu1 %v14695_v31 }
 0x4dd   : > { %5296 = vmatmul.mubr.bf16.vlgmr.msra.gmra.mrb[12].mxu1 %v12559_v53 }
 0x580   : > { %v3833_v5 = vpop.f32.mrb[6].mxu1 }
 0x581   : > { %v8809_v14 = vpop.f32.mrb[7].mxu1  ;;  %v3910_v62 = vmul.f32 %v3833_v5, %v3833_v5  ;;  %v12564_v45 = vrot.slane %v3833_v5, %v11142_v1 }
 0x583   : > { %v3918_v24 = vsub.f32 %v12220_v22, %v12564_v45  ;;  %v3919_v35 = vsub.f32 %v12229_v38, %v12564_v45  ;;  %v3920_v12 = vsub.f32 %v12216_v32, %v12564_v45  ;;  %v3921_v0 = vsub.f32 %v12224_v63, %v12564_v45 }
 0x584   : > { %v3922_v13 = vsub.f32 %v12255_v16, %v12564_v45  ;;  %v3923_v19 = vsub.f32 %v12267_v11, %v12564_v45  ;;  %v3924_v46 = vsub.f32 %v12248_v43, %v12564_v45  ;;  %v3925_v22 = vsub.f32 %v12264_v40, %v12564_v45 }
 0x585   : > { %v3926_v38 = vsub.f32 %v12290_v15, %v12564_v45  ;;  %v3927_v32 = vsub.f32 %v12302_v30, %v12564_v45  ;;  %v3928_v63 = vsub.f32 %v12284_v25, %v12564_v45  ;;  %v3929_v16 = vsub.f32 %v12295_v55, %v12564_v45 }
 0x586   : > { %v3930_v11 = vsub.f32 %v12326_v59, %v12564_v45  ;;  %v3931_v43 = vsub.f32 %v12338_v61, %v12564_v45  ;;  %v3932_v40 = vsub.f32 %v12320_v41, %v12564_v45  ;;  %v3933_v15 = vsub.f32 %v12331_v34, %v12564_v45 }
 0x587   : > { %v3934_v30 = vsub.f32 %v12362_v52, %v12564_v45  ;;  %v3935_v25 = vsub.f32 %v12374_v17, %v12564_v45  ;;  %v3936_v55 = vsub.f32 %v12356_v39, %v12564_v45  ;;  %v3937_v59 = vsub.f32 %v12367_v28, %v12564_v45 }
 0x588   : > { %v3906_v23 = vpop.f32.mrb[8].mxu1  ;;  %v3938_v61 = vsub.f32 %v12398_v21, %v12564_v45  ;;  %v3939_v41 = vsub.f32 %v12410_v3, %v12564_v45  ;;  %v3940_v34 = vsub.f32 %v12392_v27, %v12564_v45  ;;  %v3941_v52 = vsub.f32 %v12403_v56, %v12564_v45 }
 0x589   : > { %v8820_v48 = vpop.f32.mrb[9].mxu1  ;;  %v3911_v29 = vsub.f32 %v3906_v23, %v3910_v62  ;;  %v3942_v17 = vsub.f32 %v12434_v33, %v12564_v45  ;;  %v3943_v39 = vsub.f32 %v12446_v50, %v12564_v45  ;;  %v3944_v28 = vsub.f32 %v12428_v4, %v12564_v45 }
 0x58a   : > { %v3945_v21 = vsub.f32 %v12439_v42, %v12564_v45  ;;  %v3946_v27 = vsub.f32 %v12470_v49, %v12564_v45  ;;  %v3947_v56 = vsub.f32 %v12482_v8, %v12564_v45  ;;  %v3948_v33 = vsub.f32 %v12464_v6, %v12564_v45 }
 0x58b   : > { %v3912_v60 = vadd.f32 1e-05, %v3911_v29  ;;  %v3949_v50 = vsub.f32 %v12475_v26, %v12564_v45 }
 0x58d   : > { %10181 = vrsqrt.f32 %v3912_v60 }
 0x597   : > { %v10182_v37 = vpop.eup %10181 }
 0x598   : > { %v3953_v3 = vrot.slane %v10182_v37, %v11142_v1 }
 0x59a   : > { %v3954_v10 = vmul.f32 %v3953_v3, %v3918_v24  ;;  %v3955_v18 = vmul.f32 %v3953_v3, %v3919_v35  ;;  %v3956_v4 = vmul.f32 %v3953_v3, %v3920_v12  ;;  %v3957_v47 = vmul.f32 %v3953_v3, %v3921_v0 }
 0x59b   : > { %v3958_v20 = vmul.f32 %v3953_v3, %v3922_v13  ;;  %v3959_v42 = vmul.f32 %v3953_v3, %v3923_v19  ;;  %v3960_v51 = vmul.f32 %v3953_v3, %v3924_v46  ;;  %v3961_v1 = vmul.f32 %v3953_v3, %v3925_v22  ;;  %v8100_v19 = vld [vmem:[%s14631_s9] ss:$0 sm:$0xff]  ;;  %v10130_v46 = vld [vmem:[%s14634_s12 + $0xf0] sm:$0xff]  }
 0x59c   : > { %v3962_v54 = vmul.f32 %v3953_v3, %v3926_v38  ;;  %v3963_v57 = vmul.f32 %v3953_v3, %v3927_v32  ;;  %v3964_v49 = vmul.f32 %v3953_v3, %v3928_v63  ;;  %v3965_v58 = vmul.f32 %v3953_v3, %v3929_v16  ;;  %6010 = vmatpush1.bf16.msra.mxu0 %v10130_v46 }
 0x59d   : > { %v3966_v44 = vmul.f32 %v3953_v3, %v3930_v11  ;;  %v3967_v8 = vmul.f32 %v3953_v3, %v3931_v43  ;;  %v3968_v7 = vmul.f32 %v3953_v3, %v3932_v40  ;;  %v3969_v9 = vmul.f32 %v3953_v3, %v3933_v15  ;;  %6011 = vmatprep.subr.bf16.mxu0 %v14695_v31  ;;  %v10131_v15 = vld [vmem:[%s14634_s12 + $0xf8] sm:$0xff]  }
 0x59e   : > { %v3970_v6 = vmul.f32 %v3953_v3, %v3934_v30  ;;  %v3971_v2 = vmul.f32 %v3953_v3, %v3935_v25  ;;  %v3972_v5 = vmul.f32 %v3953_v3, %v3936_v55  ;;  %v3973_v26 = vmul.f32 %v3953_v3, %v3937_v59 }
 0x59f   : > { %v3974_v14 = vmul.f32 %v3953_v3, %v3938_v61  ;;  %v3975_v23 = vmul.f32 %v3953_v3, %v3939_v41  ;;  %v3976_v62 = vmul.f32 %v3953_v3, %v3940_v34  ;;  %v3977_v48 = vmul.f32 %v3953_v3, %v3941_v52 }
 0x5a0   : > { %v3978_v29 = vmul.f32 %v3953_v3, %v3942_v17  ;;  %v3979_v60 = vmul.f32 %v3953_v3, %v3943_v39  ;;  %v3980_v45 = vmul.f32 %v3953_v3, %v3944_v28  ;;  %v3981_v24 = vmul.f32 %v3953_v3, %v3945_v21  ;;  %6012 = vmatpush1.bf16.msra.mxu0 %v10131_v15  ;;  %v12645_v21 = vld [vmem:[%s14632_s10] ss:$0 sm:$0xff] }
 0x5a1   : > { %v3982_v35 = vmul.f32 %v3953_v3, %v3946_v27  ;;  %v3983_v12 = vmul.f32 %v3953_v3, %v3947_v56  ;;  %v3984_v0 = vmul.f32 %v3953_v3, %v3948_v33  ;;  %v3985_v13 = vmul.f32 %v3953_v3, %v3949_v50  ;;  %6013 = vmatprep.subr.bf16.mxu0 %v14695_v31  ;;  %v10132_v50 = vld [vmem:[%s14634_s12 + $0x100] sm:$0xff]  }
 0x5a2   : > { %v3993_v22 = vmul.f32 %v8100_v19, %v3954_v10  ;;  %v3994_v38 = vmul.f32 %v8100_v19, %v3955_v18  ;;  %v3995_v32 = vmul.f32 %v8100_v19, %v3956_v4  ;;  %v3996_v63 = vmul.f32 %v8100_v19, %v3957_v47 }
 0x5a3   : > { %v3997_v16 = vmul.f32 %v8100_v19, %v3958_v20  ;;  %v3998_v11 = vmul.f32 %v8100_v19, %v3959_v42  ;;  %v3999_v43 = vmul.f32 %v8100_v19, %v3960_v51  ;;  %v4000_v40 = vmul.f32 %v8100_v19, %v3961_v1 }
 0x5a4   : > { %v4001_v30 = vmul.f32 %v8100_v19, %v3962_v54  ;;  %v4002_v25 = vmul.f32 %v8100_v19, %v3963_v57  ;;  %v4003_v55 = vmul.f32 %v8100_v19, %v3964_v49  ;;  %v4004_v59 = vmul.f32 %v8100_v19, %v3965_v58  ;;  %6014 = vmatpush1.bf16.msra.mxu0 %v10132_v50 }
 0x5a5   : > { %v4005_v61 = vmul.f32 %v8100_v19, %v3966_v44  ;;  %v4006_v37 = vmul.f32 %v8100_v19, %v3967_v8  ;;  %v4007_v41 = vmul.f32 %v8100_v19, %v3968_v7  ;;  %v4008_v34 = vmul.f32 %v8100_v19, %v3969_v9  ;;  %6015 = vmatprep.subr.bf16.mxu0 %v14695_v31 }
 0x5a6   : > { %v4009_v52 = vmul.f32 %v8100_v19, %v3970_v6  ;;  %v4010_v17 = vmul.f32 %v8100_v19, %v3971_v2  ;;  %v4011_v39 = vmul.f32 %v8100_v19, %v3972_v5  ;;  %v4012_v28 = vmul.f32 %v8100_v19, %v3973_v26  ;;  %v10133_v6 = vld [vmem:[%s14634_s12 + $0x108] sm:$0xff]  }
 0x5a7   : > { %v4013_v3 = vmul.f32 %v8100_v19, %v3974_v14  ;;  %v4014_v27 = vmul.f32 %v8100_v19, %v3975_v23  ;;  %v4015_v56 = vmul.f32 %v8100_v19, %v3976_v62  ;;  %v4016_v33 = vmul.f32 %v8100_v19, %v3977_v48 }
 0x5a8   : > { %v4017_v10 = vmul.f32 %v8100_v19, %v3978_v29  ;;  %v4018_v18 = vmul.f32 %v8100_v19, %v3979_v60  ;;  %v4019_v4 = vmul.f32 %v8100_v19, %v3980_v45  ;;  %v4020_v47 = vmul.f32 %v8100_v19, %v3981_v24  ;;  %6016 = vmatpush1.bf16.msra.mxu0 %v10133_v6 }
 0x5a9   : > { %v4021_v20 = vmul.f32 %v8100_v19, %v3982_v35  ;;  %v4022_v42 = vmul.f32 %v8100_v19, %v3983_v12  ;;  %v4023_v51 = vmul.f32 %v8100_v19, %v3984_v0  ;;  %v4024_v1 = vmul.f32 %v8100_v19, %v3985_v13  ;;  %6017 = vmatprep.subr.bf16.mxu0 %v14695_v31 }
 0x5aa   : > { %v12651_v54 = vadd.f32 %v12645_v21, %v3993_v22  ;;  %v12654_v57 = vadd.f32 %v12645_v21, %v3994_v38  ;;  %v12657_v49 = vadd.f32 %v12645_v21, %v3995_v32  ;;  %v12660_v58 = vadd.f32 %v12645_v21, %v3996_v63  ;;  %v10134_v63 = vld [vmem:[%s14634_s12 + $0x110] sm:$0xff]  }
 0x5ab   : > { %v12664_v44 = vadd.f32 %v12645_v21, %v3997_v16  ;;  %v12667_v8 = vadd.f32 %v12645_v21, %v3998_v11  ;;  %v12670_v7 = vadd.f32 %v12645_v21, %v3999_v43  ;;  %v12673_v9 = vadd.f32 %v12645_v21, %v4000_v40 }
 0x5ac   : > { %v12679_v2 = vadd.f32 %v12645_v21, %v4001_v30  ;;  %v12682_v5 = vadd.f32 %v12645_v21, %v4002_v25  ;;  %v12685_v26 = vadd.f32 %v12645_v21, %v4003_v55  ;;  %v12688_v14 = vadd.f32 %v12645_v21, %v4004_v59  ;;  %6018 = vmatpush1.bf16.msra.mxu0 %v10134_v63 }
 0x5ad   : > { %v12691_v23 = vadd.f32 %v12645_v21, %v4005_v61  ;;  %v12694_v62 = vadd.f32 %v12645_v21, %v4006_v37  ;;  %v12697_v48 = vadd.f32 %v12645_v21, %v4007_v41  ;;  %v12700_v29 = vadd.f32 %v12645_v21, %v4008_v34  ;;  %6019 = vmatprep.subr.bf16.mxu0 %v14695_v31 }
 0x5ae   : > { %v12703_v60 = vadd.f32 %v12645_v21, %v4009_v52  ;;  %v12706_v45 = vadd.f32 %v12645_v21, %v4010_v17  ;;  %v12709_v24 = vadd.f32 %v12645_v21, %v4011_v39  ;;  %v12712_v35 = vadd.f32 %v12645_v21, %v4012_v28 }
 0x5af   : > { %v12716_v12 = vadd.f32 %v12645_v21, %v4013_v3  ;;  %v12719_v0 = vadd.f32 %v12645_v21, %v4014_v27  ;;  %v12722_v13 = vadd.f32 %v12645_v21, %v4015_v56  ;;  %v12725_v19 = vadd.f32 %v12645_v21, %v4016_v33 }
 0x5b0   : > { %v12728_v46 = vadd.f32 %v12645_v21, %v4017_v10  ;;  %v12731_v22 = vadd.f32 %v12645_v21, %v4018_v18  ;;  %v12734_v38 = vadd.f32 %v12645_v21, %v4019_v4  ;;  %v12737_v32 = vadd.f32 %v12645_v21, %v4020_v47 }
 0x5b1   : > { %v12743_v16 = vadd.f32 %v12645_v21, %v4021_v20  ;;  %v12746_v11 = vadd.f32 %v12645_v21, %v4022_v42  ;;  %vm4064_vm11 = vcmp.gt.f32.partialorder %v12651_v54, 0.0  ;;  %vm4065_vm12 = vcmp.gt.f32.partialorder %v12654_v57, 0.0 }
 0x5b2   : > { %vm4066_vm13 = vcmp.gt.f32.partialorder %v12657_v49, 0.0  ;;  %vm4067_vm14 = vcmp.gt.f32.partialorder %v12660_v58, 0.0  ;;  %vm4068_vm15 = vcmp.gt.f32.partialorder %v12664_v44, 0.0  ;;  %vm4069_vm2 = vcmp.gt.f32.partialorder %v12667_v8, 0.0 }
 0x5b3   : > { %vm4070_vm3 = vcmp.gt.f32.partialorder %v12670_v7, 0.0  ;;  %vm4071_vm4 = vcmp.gt.f32.partialorder %v12673_v9, 0.0  ;;  %v12760_v43 = vadd.f32 %v12645_v21, %v4023_v51  ;;  %v4096_v40 = vmul.f32 0.01, %v12651_v54 }
 0x5b4   : > { %v4097_v15 = vmul.f32 0.01, %v12654_v57  ;;  %v4098_v30 = vmul.f32 0.01, %v12657_v49  ;;  %v12770_v25 = vadd.f32 %v12645_v21, %v4024_v1  ;;  %vm4079_vm9 = vcmp.gt.f32.partialorder %v12700_v29, 0.0 }
 0x5b5   : > { %vm4080_vm10 = vcmp.gt.f32.partialorder %v12703_v60, 0.0  ;;  %v4099_v55 = vmul.f32 0.01, %v12660_v58  ;;  %v4100_v59 = vmul.f32 0.01, %v12664_v44  ;;  %vm4085_vm8 = vcmp.gt.f32.partialorder %v12719_v0, 0.0 }
 0x5b6   : > { %v4101_v61 = vmul.f32 0.01, %v12667_v8  ;;  %v4102_v37 = vmul.f32 0.01, %v12670_v7  ;;  %v4103_v41 = vmul.f32 0.01, %v12673_v9  ;;  %v4128_v52 = vsel %vm4064_vm11, %v12651_v54, %v4096_v40 }
 0x5b7   : > { %v4104_v34 = vmul.f32 0.01, %v12679_v2  ;;  %vm4086_vm7 = vcmp.gt.f32.partialorder %v12722_v13, 0.0  ;;  %v4105_v17 = vmul.f32 0.01, %v12682_v5  ;;  %v4129_v21 = vsel %vm4065_vm12, %v12654_v57, %v4097_v15  ;;  %4241 = vst.msk [vmem:[#allocation3 + $0x48] sm:$0xff] %vm2129_vm6, %v4128_v52 }
 0x5b8   : > { %v4106_v39 = vmul.f32 0.01, %v12685_v26  ;;  %v4107_v28 = vmul.f32 0.01, %v12688_v14  ;;  %vm4090_vm11 = vcmp.gt.f32.partialorder %v12734_v38, 0.0  ;;  %vm4092_vm1 = vcmp.gt.f32.partialorder %v12743_v16, 0.0 }
 0x5b9   : > { %vm4093_vm5 = vcmp.gt.f32.partialorder %v12746_v11, 0.0  ;;  %v4108_v3 = vmul.f32 0.01, %v12691_v23  ;;  %v4109_v27 = vmul.f32 0.01, %v12694_v62  ;;  %v4130_v33 = vsel %vm4066_vm13, %v12657_v49, %v4098_v30  ;;  %4242 = vst.msk [vmem:[#allocation3 + $0x50] sm:$0xff] %vm2129_vm6, %v4129_v21 }
 0x5ba   : > { %v4110_v56 = vmul.f32 0.01, %v12697_v48  ;;  %vm4094_vm12 = vcmp.gt.f32.partialorder %v12760_v43, 0.0  ;;  %vm4095_vm0 = vcmp.gt.f32.partialorder %v12770_v25, 0.0  ;;  %v4111_v50 = vmul.f32 0.01, %v12700_v29 }
 0x5bb   : > { %v4112_v10 = vmul.f32 0.01, %v12703_v60  ;;  %v4113_v18 = vmul.f32 0.01, %v12706_v45  ;;  %v4131_v4 = vsel %vm4067_vm14, %v12660_v58, %v4099_v55  ;;  %4243 = vst.msk [vmem:[#allocation3 + $0x68] sm:$0xff] %vm2129_vm6, %v4130_v33  ;;  %v4132_v51 = vsel %vm4068_vm15, %v12664_v44, %v4100_v59 }
 0x5bc   : > { %v4114_v47 = vmul.f32 0.01, %v12709_v24  ;;  %v4115_v20 = vmul.f32 0.01, %v12712_v35  ;;  %v4116_v42 = vmul.f32 0.01, %v12716_v12  ;;  %v4133_v49 = vsel %vm4069_vm2, %v12667_v8, %v4101_v61 }
 0x5bd   : > { %4244 = vst.msk [vmem:[#allocation3 + $0x70] sm:$0xff] %vm2129_vm6, %v4131_v4  ;;  %v4117_v1 = vmul.f32 0.01, %v12719_v0  ;;  %v4118_v54 = vmul.f32 0.01, %v12722_v13  ;;  %4245 = vst.msk [vmem:[#allocation3 + $0x88] sm:$0xff] %vm2129_vm6, %v4132_v51  ;;  %v4134_v63 = vsel %vm4070_vm3, %v12670_v7, %v4102_v37  ;;  %v4135_v30 = vsel %vm4071_vm4, %v12673_v9, %v4103_v41 }
 0x5be   : > { %v4119_v57 = vmul.f32 0.01, %v12725_v19  ;;  %v4120_v58 = vmul.f32 0.01, %v12728_v46  ;;  %v4121_v6 = vmul.f32 0.01, %v12731_v22 }
 0x5bf   : > { %v4122_v44 = vmul.f32 0.01, %v12734_v38  ;;  %4246 = vst.msk [vmem:[#allocation3 + $0x90] sm:$0xff] %vm2129_vm6, %v4133_v49  ;;  %v4123_v40 = vmul.f32 0.01, %v12737_v32  ;;  %4247 = vst.msk [vmem:[#allocation3 + $0xa8] sm:$0xff] %vm2129_vm6, %v4134_v63 }
 0x5c0   : > { %v4124_v15 = vmul.f32 0.01, %v12743_v16  ;;  %v4125_v8 = vmul.f32 0.01, %v12746_v11  ;;  %v4126_v55 = vmul.f32 0.01, %v12760_v43 }
 0x5c1   : > { %v4127_v59 = vmul.f32 0.01, %v12770_v25  ;;  %vm14781_vm13 = vcmp.gt.f32.partialorder %v12679_v2, 0.0  ;;  %vm14782_vm14 = vcmp.gt.f32.partialorder %v12682_v5, 0.0  ;;  %4248 = vst.msk [vmem:[#allocation3 + $0xb0] sm:$0xff] %vm2129_vm6, %v4135_v30  ;;  %vm14783_vm15 = vcmp.gt.f32.partialorder %v12685_v26, 0.0 }
 0x5c2   : > { %v4136_v7 = vsel %vm14781_vm13, %v12679_v2, %v4104_v34  ;;  %v4137_v61 = vsel %vm14782_vm14, %v12682_v5, %v4105_v17  ;;  %v4138_v9 = vsel %vm14783_vm15, %v12685_v26, %v4106_v39  ;;  %vm14784_vm2 = vcmp.gt.f32.partialorder %v12688_v14, 0.0  ;;  %v4318_v21 = vld [vmem:[#allocation3 + $0x4f] sm:$0xff] }
 0x5c3   : > { %v4139_v37 = vsel %vm14784_vm2, %v12688_v14, %v4107_v28  ;;  %vm14785_vm3 = vcmp.gt.f32.partialorder %v12691_v23, 0.0  ;;  %vm14786_vm4 = vcmp.gt.f32.partialorder %v12694_v62, 0.0  ;;  %4249 = vst.msk [vmem:[#allocation3 + $0xc8] sm:$0xff] %vm2129_vm6, %v4136_v7  ;;  %4250 = vst.msk [vmem:[#allocation3 + $0xd0] sm:$0xff] %vm2129_vm6, %v4137_v61  ;;  %vm14787_vm13 = vcmp.gt.f32.partialorder %v12697_v48, 0.0  ;;  %v4317_v28 = vld [vmem:[#allocation3 + $0x47] sm:$0xff] }
 0x5c4   : > { %v4140_v41 = vsel %vm14785_vm3, %v12691_v23, %v4108_v3  ;;  %v4141_v2 = vsel %vm14786_vm4, %v12694_v62, %v4109_v27  ;;  %v4142_v5 = vsel %vm14787_vm13, %v12697_v48, %v4110_v56  ;;  %v4143_v26 = vsel %vm4079_vm9, %v12700_v29, %v4111_v50  ;;  %4251 = vst.msk [vmem:[#allocation3 + $0xe8] sm:$0xff] %vm2129_vm6, %v4138_v9  ;;  %v4437_v62 = vld [vmem:[#allocation3 + $0x4a] sm:$0xff]  ;;  %v4440_v17 = vld [vmem:[#allocation3 + $0x72] sm:$0xff] }
 0x5c5   : > { %v4144_v14 = vsel %vm4080_vm10, %v12703_v60, %v4112_v10  ;;  %vm14788_vm14 = vcmp.gt.f32.partialorder %v12706_v45, 0.0  ;;  %4252 = vst.msk [vmem:[#allocation3 + $0xf0] sm:$0xff] %vm2129_vm6, %v4139_v37  ;;  %4253 = vst.msk [vmem:[#allocation3 + $0x108] sm:$0xff] %vm2129_vm6, %v4140_v41  ;;  %v4357_v48 = vld [vmem:[#allocation3 + $0x48] sm:$0xff]  ;;  %vm14789_vm9 = vcmp.gt.f32.partialorder %v12709_v24, 0.0  ;;  %vm14790_vm10 = vcmp.gt.f32.partialorder %v12712_v35, 0.0 }
 0x5c6   : > { %v4145_v23 = vsel %vm14788_vm14, %v12706_v45, %v4113_v18  ;;  %4254 = vst.msk [vmem:[#allocation3 + $0x110] sm:$0xff] %vm2129_vm6, %v4141_v2  ;;  %v4146_v29 = vsel %vm14789_vm9, %v12709_v24, %v4114_v47  ;;  %v4147_v60 = vsel %vm14790_vm10, %v12712_v35, %v4115_v20  ;;  %vm14791_vm15 = vcmp.gt.f32.partialorder %v12716_v12, 0.0  ;;  %4255 = vst.msk [vmem:[#allocation3 + $0x128] sm:$0xff] %vm2129_vm6, %v4142_v5  ;;  %v4438_v24 = vld [vmem:[#allocation3 + $0x52] sm:$0xff]  ;;  %v4439_v52 = vld [vmem:[#allocation3 + $0x6a] sm:$0xff] }
 0x5c7   : > { %v4148_v45 = vsel %vm14791_vm15, %v12716_v12, %v4116_v42  ;;  %v4149_v34 = vsel %vm4085_vm8, %v12719_v0, %v4117_v1  ;;  %4256 = vst.msk [vmem:[#allocation3 + $0x130] sm:$0xff] %vm2129_vm6, %v4143_v26  ;;  %4257 = vst.msk [vmem:[#allocation3 + $0x148] sm:$0xff] %vm2129_vm6, %v4144_v14  ;;  %v4150_v35 = vsel %vm4086_vm7, %v12722_v13, %v4118_v54  ;;  %vm14792_vm2 = vcmp.gt.f32.partialorder %v12725_v19, 0.0  ;;  %v4358_v13 = vld [vmem:[#allocation3 + $0x50] sm:$0xff]  ;;  %v4319_v56 = vld [vmem:[#allocation3 + $0x67] sm:$0xff] }
 0x5c8   : > { %4258 = vst.msk [vmem:[#allocation3 + $0x150] sm:$0xff] %vm2129_vm6, %v4145_v23  ;;  %v4151_v12 = vsel %vm14792_vm2, %v12725_v19, %v4119_v57  ;;  %vm14793_vm8 = vcmp.gt.f32.partialorder %v12728_v46, 0.0  ;;  %vm14794_vm3 = vcmp.gt.f32.partialorder %v12731_v22, 0.0  ;;  %4259 = vst.msk [vmem:[#allocation3 + $0x168] sm:$0xff] %vm2129_vm6, %v4146_v29  ;;  %v4154_v19 = vsel %vm4090_vm11, %v12734_v38, %v4122_v44  ;;  %v4397_v33 = vld [vmem:[#allocation3 + $0x49] sm:$0xff]  ;;  %v4398_v50 = vld [vmem:[#allocation3 + $0x51] sm:$0xff] }
 0x5c9   : > { %v4152_v0 = vsel %vm14793_vm8, %v12728_v46, %v4120_v58  ;;  %v4153_v39 = vsel %vm14794_vm3, %v12731_v22, %v4121_v6  ;;  %4260 = vst.msk [vmem:[#allocation3 + $0x170] sm:$0xff] %vm2129_vm6, %v4147_v60  ;;  %4261 = vst.msk [vmem:[#allocation3 + $0x188] sm:$0xff] %vm2129_vm6, %v4148_v45  ;;  %vm14795_vm7 = vcmp.gt.f32.partialorder %v12737_v32, 0.0  ;;  %v4156_v22 = vsel %vm4092_vm1, %v12743_v16, %v4124_v15  ;;  %v4399_v4 = vld [vmem:[#allocation3 + $0x69] sm:$0xff]  ;;  %v4400_v47 = vld [vmem:[#allocation3 + $0x71] sm:$0xff] }
 0x5ca   : > { %4262 = vst.msk [vmem:[#allocation3 + $0x190] sm:$0xff] %vm2129_vm6, %v4149_v34  ;;  %v4155_v46 = vsel %vm14795_vm7, %v12737_v32, %v4123_v40  ;;  %v4157_v3 = vsel %vm4093_vm5, %v12746_v11, %v4125_v8  ;;  %4263 = vst.msk [vmem:[#allocation3 + $0x1a8] sm:$0xff] %vm2129_vm6, %v4150_v35  ;;  %v4158_v38 = vsel %vm4094_vm12, %v12760_v43, %v4126_v55  ;;  %v4359_v20 = vld [vmem:[#allocation3 + $0x68] sm:$0xff]  ;;  %v4360_v42 = vld [vmem:[#allocation3 + $0x70] sm:$0xff]  ;;  %vm14798_vm1 = vcmask 523264  }
 0x5cb   : > { %4264 = vst.msk [vmem:[#allocation3 + $0x1b0] sm:$0xff] %vm2129_vm6, %v4151_v12  ;;  %4265 = vst.msk [vmem:[#allocation3 + $0x1c8] sm:$0xff] %vm2129_vm6, %v4152_v0  ;;  %v4159_v32 = vsel %vm4095_vm0, %v12770_v25, %v4127_v59  ;;  %v12945_v16 = vpack.c.bf16 %v4438_v24, %v4437_v62  ;;  %v12947_v11 = vpack.c.bf16 %v4440_v17, %v4439_v52  ;;  %v4320_v25 = vld [vmem:[#allocation3 + $0x6f] sm:$0xff]  ;;  %v4321_v49 = vld [vmem:[#allocation3 + $0x87] sm:$0xff]  ;;  %vm14800_vm5 = vcmask 785408  }
 0x5cc   : > { %4266 = vst.msk [vmem:[#allocation3 + $0x1d0] sm:$0xff] %vm2129_vm6, %v4153_v39  ;;  %4267 = vst.msk [vmem:[#allocation3 + $0x1e8] sm:$0xff] %vm2129_vm6, %v4154_v19  ;;  %v9635_v43 = vpack.i.bf16 %v4358_v13, %v4357_v48  ;;  %v9630_v27 = vpack.i.bf16 %v4318_v21, %v4317_v28  ;;  %v9645_v10 = vpack.i.bf16 %v4320_v25, %v4319_v56  ;;  %v4361_v54 = vld [vmem:[#allocation3 + $0x88] sm:$0xff]  ;;  %v4362_v57 = vld [vmem:[#allocation3 + $0x90] sm:$0xff] }
 0x5cd   : > { %4268 = vst.msk [vmem:[#allocation3 + $0x1f0] sm:$0xff] %vm2129_vm6, %v4155_v46  ;;  %4269 = vst.msk [vmem:[#allocation3 + $0x208] sm:$0xff] %vm2129_vm6, %v4156_v22  ;;  %8133 = vmatprep.mubr.msk.bf16.mxu1 %vm2129_vm6, %v12945_v16  ;;  %8250 = vmatprep.mubr.msk.bf16.mxu0 %vm2129_vm6, %v12947_v11  ;;  %v9640_v18 = vpack.i.bf16 %v4398_v50, %v4397_v33  ;;  %v9655_v51 = vpack.i.bf16 %v4400_v47, %v4399_v4  ;;  %v4322_v58 = vld [vmem:[#allocation3 + $0x8f] sm:$0xff]  ;;  %v4323_v63 = vld [vmem:[#allocation3 + $0xa7] sm:$0xff] }
 0x5ce   : > { %4270 = vst.msk [vmem:[#allocation3 + $0x210] sm:$0xff] %vm2129_vm6, %v4157_v3  ;;  %4271 = vst.msk [vmem:[#allocation3 + $0x228] sm:$0xff] %vm2129_vm6, %v4158_v38  ;;  %9636 = vrot.lane.b32.xlu0 %v9635_v43, %s14776_s20  ;;  %9631 = vrot.lane.b32.xlu1 %v9630_v27, %s14780_s28  ;;  %v9650_v1 = vpack.i.bf16 %v4360_v42, %v4359_v20  ;;  %v9665_v6 = vpack.i.bf16 %v4362_v57, %v4361_v54  ;;  %v4324_v40 = vld [vmem:[#allocation3 + $0xaf] sm:$0xff]  ;;  %v4325_v26 = vld [vmem:[#allocation3 + $0xc7] sm:$0xff] }
 0x5cf   : > { %4272 = vst.msk [vmem:[#allocation3 + $0x230] sm:$0xff] %vm2129_vm6, %v4159_v32  ;;  %v9660_v44 = vpack.i.bf16 %v4322_v58, %v4321_v49  ;;  %v4401_v15 = vld [vmem:[#allocation3 + $0x89] sm:$0xff]  ;;  %v4402_v8 = vld [vmem:[#allocation3 + $0x91] sm:$0xff]  ;;  %v9675_v30 = vpack.i.bf16 %v4324_v40, %v4323_v63  ;;  %v10136_v24 = vld [vmem:[%s14634_s12 + $0x120] sm:$0xff]  }
 0x5d0   : > { %v9670_v55 = vpack.i.bf16 %v4402_v8, %v4401_v15  ;;  %v4403_v59 = vld [vmem:[#allocation3 + $0xa9] sm:$0xff]  ;;  %v4404_v7 = vld [vmem:[#allocation3 + $0xb1] sm:$0xff]  ;;  %v10137_v52 = vld [vmem:[%s14634_s12] sm:$0xff]  }
 0x5d1   : > { %v4363_v61 = vld [vmem:[#allocation3 + $0xa8] sm:$0xff]  ;;  %v4364_v9 = vld [vmem:[#allocation3 + $0xb0] sm:$0xff]  ;;  %v9685_v37 = vpack.i.bf16 %v4404_v7, %v4403_v59  ;;  %v10135_v29 = vld [vmem:[%s14634_s12 + $0x118] sm:$0xff]   ;;  %5488 = vmatpush1.bf16.msra.mxu1 %v10137_v52 }
 0x5d2   : > { %9646 = vrot.lane.b32.xlu0 %v9645_v10, %s14780_s28  ;;  %9641 = vrot.lane.b32.xlu1 %v9640_v18, %s14796_s29  ;;  %v9680_v41 = vpack.i.bf16 %v4364_v9, %v4363_v61  ;;  %v4365_v2 = vld [vmem:[#allocation3 + $0xc8] sm:$0xff]  ;;  %v4366_v5 = vld [vmem:[#allocation3 + $0xd0] sm:$0xff]  ;;  %v10140_v4 = vld [vmem:[%s14634_s12 + $0x138] sm:$0xff]  }
 0x5d3   : > { %v4326_v14 = vld [vmem:[#allocation3 + $0xcf] sm:$0xff]  ;;  %v9695_v23 = vpack.i.bf16 %v4366_v5, %v4365_v2  ;;  %v4327_v48 = vld [vmem:[#allocation3 + $0xe7] sm:$0xff]  ;;  %6020 = vmatpush1.bf16.msra.mxu0 %v10135_v29  ;;  %5489 = vmatprep.subr.bf16.mxu1 %v14695_v31  ;;  %vm14799_vm0 = vmmov %vm14798_vm1 }
 0x5d4   : > { %v9690_v62 = vpack.i.bf16 %v4326_v14, %v4325_v26  ;;  %v4328_v60 = vld [vmem:[#allocation3 + $0xef] sm:$0xff]  ;;  %6021 = vmatprep.subr.bf16.mxu0 %v14695_v31  ;;  %v4329_v3 = vld [vmem:[#allocation3 + $0x107] sm:$0xff]  ;;  %vm14801_vm11 = vmmov %vm14800_vm5 }
 0x5d5   : > { %v4405_v45 = vld [vmem:[#allocation3 + $0xc9] sm:$0xff]  ;;  %v4406_v34 = vld [vmem:[#allocation3 + $0xd1] sm:$0xff]  ;;  %v9705_v17 = vpack.i.bf16 %v4328_v60, %v4327_v48  ;;  %vm14802_vm12 = vmmov %vm14799_vm0 }
 0x5d6   : > { %9656 = vrot.lane.b32.xlu0 %v9655_v51, %s14796_s29  ;;  %9651 = vrot.lane.b32.xlu1 %v9650_v1, %s14776_s20  ;;  %v9700_v35 = vpack.i.bf16 %v4406_v34, %v4405_v45  ;;  %v4407_v12 = vld [vmem:[#allocation3 + $0xe9] sm:$0xff]  ;;  %v4408_v0 = vld [vmem:[#allocation3 + $0xf1] sm:$0xff]  ;;  %vm14803_vm4 = vmmov %vm14799_vm0 }
 0x5d7   : > { %v4367_v39 = vld [vmem:[#allocation3 + $0xe8] sm:$0xff]  ;;  %v4368_v13 = vld [vmem:[#allocation3 + $0xf0] sm:$0xff]  ;;  %6022 = vmatpush1.bf16.msra.mxu0 %v10136_v24  ;;  %v9715_v21 = vpack.i.bf16 %v4408_v0, %v4407_v12  ;;  %v10143_v51 = vld [vmem:[%s14634_s12 + $0x18] sm:$0xff]  }
 0x5d8   : > { %v10138_v28 = vld [vmem:[%s14634_s12 + $0x128] sm:$0xff]   ;;  %v9710_v19 = vpack.i.bf16 %v4368_v13, %v4367_v39  ;;  %6023 = vmatprep.subr.bf16.mxu0 %v14695_v31  ;;  %v4370_v22 = vld [vmem:[#allocation3 + $0x110] sm:$0xff]  ;;  %vm14804_vm13 = vmmov %vm14800_vm5 }
 0x5d9   : > { %v4369_v46 = vld [vmem:[#allocation3 + $0x108] sm:$0xff]  ;;  %v10139_v43 = vld [vmem:[%s14634_s12 + $0x130] sm:$0xff]   ;;  %vm14805_vm14 = vmmov %vm14800_vm5 }
 0x5da   : > { %9666 = vrot.lane.b32.xlu0 %v9665_v6, %s14776_s20  ;;  %9661 = vrot.lane.b32.xlu1 %v9660_v44, %s14780_s28  ;;  %v4330_v38 = vld [vmem:[#allocation3 + $0x10f] sm:$0xff]  ;;  %v9725_v27 = vpack.i.bf16 %v4370_v22, %v4369_v46  ;;  %v4331_v25 = vld [vmem:[#allocation3 + $0x127] sm:$0xff]  ;;  %vm14807_vm9 = vmmov %vm14799_vm0 }
 0x5db   : > { %v10141_v32 = vld [vmem:[%s14634_s12 + $0x8] sm:$0xff]   ;;  %6024 = vmatpush1.bf16.msra.mxu0 %v10138_v28  ;;  %v9720_v56 = vpack.i.bf16 %v4330_v38, %v4329_v3  ;;  %v4410_v10 = vld [vmem:[#allocation3 + $0x111] sm:$0xff]  ;;  %v10144_v44 = vld [vmem:[%s14634_s12 + $0x20] sm:$0xff]  }
 0x5dc   : > { %v4332_v33 = vld [vmem:[#allocation3 + $0x12f] sm:$0xff]  ;;  %6025 = vmatprep.subr.bf16.mxu0 %v14695_v31  ;;  %5490 = vmatpush1.bf16.msra.mxu1 %v10141_v32  ;;  %v4333_v40 = vld [vmem:[#allocation3 + $0x147] sm:$0xff]  ;;  %vm14808_vm10 = vmmov %vm14799_vm0 }
 0x5dd   : > { %v4409_v50 = vld [vmem:[#allocation3 + $0x109] sm:$0xff]  ;;  %5491 = vmatprep.subr.bf16.mxu1 %v14695_v31  ;;  %v9735_v47 = vpack.i.bf16 %v4332_v33, %v4331_v25  ;;  %v4412_v1 = vld [vmem:[#allocation3 + $0x131] sm:$0xff]  ;;  %vm14809_vm15 = vmmov %vm14800_vm5 }
 0x5de   : > { %9676 = vrot.lane.b32.xlu0 %v9675_v30, %s14780_s28  ;;  %9671 = vrot.lane.b32.xlu1 %v9670_v55, %s14796_s29  ;;  %v10142_v18 = vld [vmem:[%s14634_s12 + $0x10] sm:$0xff]   ;;  %v9730_v20 = vpack.i.bf16 %v4410_v10, %v4409_v50  ;;  %v4371_v54 = vld [vmem:[#allocation3 + $0x128] sm:$0xff]  ;;  %vm14810_vm2 = vmmov %vm14800_vm5 }
 0x5df   : > { %6026 = vmatpush1.bf16.msra.mxu0 %v10139_v43  ;;  %v4411_v42 = vld [vmem:[#allocation3 + $0x129] sm:$0xff]  ;;  %v4414_v61 = vld [vmem:[#allocation3 + $0x151] sm:$0xff]  ;;  %vm14811_vm8 = vmmov %vm14799_vm0 }
 0x5e0   : > { %6027 = vmatprep.subr.bf16.mxu0 %v14695_v31  ;;  %5492 = vmatpush1.bf16.msra.mxu1 %v10142_v18  ;;  %v4372_v57 = vld [vmem:[#allocation3 + $0x130] sm:$0xff]  ;;  %v9745_v49 = vpack.i.bf16 %v4412_v1, %v4411_v42  ;;  %v4373_v6 = vld [vmem:[#allocation3 + $0x148] sm:$0xff]  ;;  %vm14812_vm3 = vmmov %vm14799_vm0 }
 0x5e1   : > { %5493 = vmatprep.subr.bf16.mxu1 %v14695_v31  ;;  %v9740_v58 = vpack.i.bf16 %v4372_v57, %v4371_v54  ;;  %v4374_v63 = vld [vmem:[#allocation3 + $0x150] sm:$0xff]  ;;  %v4335_v55 = vld [vmem:[#allocation3 + $0x167] sm:$0xff]  ;;  %vm14813_vm7 = vmmov %vm14810_vm2 }
 0x5e2   : > { %9686 = vrot.lane.b32.xlu0 %v9685_v37, %s14796_s29  ;;  %9681 = vrot.lane.b32.xlu1 %v9680_v41, %s14776_s20  ;;  %v4334_v15 = vld [vmem:[#allocation3 + $0x14f] sm:$0xff]  ;;  %v9755_v8 = vpack.i.bf16 %v4374_v63, %v4373_v6  ;;  %v4337_v60 = vld [vmem:[#allocation3 + $0x187] sm:$0xff] }
 0x5e3   : > { %6028 = vmatpush1.bf16.msra.mxu0 %v10140_v4  ;;  %v9750_v30 = vpack.i.bf16 %v4334_v15, %v4333_v40  ;;  %v4336_v59 = vld [vmem:[#allocation3 + $0x16f] sm:$0xff]  ;;  %v4339_v52 = vld [vmem:[#allocation3 + $0x1a7] sm:$0xff] }
 0x5e4   : > { %5494 = vmatpush1.bf16.msra.mxu1 %v10143_v51  ;;  %v4413_v7 = vld [vmem:[#allocation3 + $0x149] sm:$0xff]  ;;  %v9765_v9 = vpack.i.bf16 %v4336_v59, %v4335_v55  ;;  %v4416_v2 = vld [vmem:[#allocation3 + $0x171] sm:$0xff] }
 0x5e5   : > { %5495 = vmatprep.subr.bf16.mxu1 %v14695_v31  ;;  %v9760_v37 = vpack.i.bf16 %v4414_v61, %v4413_v7  ;;  %v4415_v41 = vld [vmem:[#allocation3 + $0x169] sm:$0xff]  ;;  %v4418_v12 = vld [vmem:[#allocation3 + $0x191] sm:$0xff] }
 0x5e6   : > { %9696 = vrot.lane.b32.xlu0 %v9695_v23, %s14776_s20  ;;  %9691 = vrot.lane.b32.xlu1 %v9690_v62, %s14780_s28  ;;  %v4375_v5 = vld [vmem:[#allocation3 + $0x168] sm:$0xff]  ;;  %v4376_v26 = vld [vmem:[#allocation3 + $0x170] sm:$0xff]  ;;  %v9775_v14 = vpack.i.bf16 %v4416_v2, %v4415_v41 }
 0x5e7   : > { %v9770_v23 = vpack.i.bf16 %v4376_v26, %v4375_v5  ;;  %v4377_v62 = vld [vmem:[#allocation3 + $0x188] sm:$0xff]  ;;  %v4378_v29 = vld [vmem:[#allocation3 + $0x190] sm:$0xff] }
 0x5e8   : > { %5496 = vmatpush1.bf16.msra.mxu1 %v10144_v44  ;;  %v10145_v48 = vld [vmem:[%s14634_s12 + $0x28] sm:$0xff]   ;;  %v9785_v34 = vpack.i.bf16 %v4378_v29, %v4377_v62  ;;  %v4420_v28 = vld [vmem:[#allocation3 + $0x1b1] sm:$0xff] }
 0x5e9   : > { %5497 = vmatprep.subr.bf16.mxu1 %v14695_v31  ;;  %v4338_v45 = vld [vmem:[#allocation3 + $0x18f] sm:$0xff]  ;;  %v4341_v43 = vld [vmem:[#allocation3 + $0x1c7] sm:$0xff] }
 0x5ea   : > { %9706 = vrot.lane.b32.xlu0 %v9705_v17, %s14780_s28  ;;  %9701 = vrot.lane.b32.xlu1 %v9700_v35, %s14796_s29  ;;  %v9780_v24 = vpack.i.bf16 %v4338_v45, %v4337_v60  ;;  %v4340_v17 = vld [vmem:[#allocation3 + $0x1af] sm:$0xff]  ;;  %v4343_v33 = vld [vmem:[#allocation3 + $0x1e7] sm:$0xff] }
 0x5eb   : > { %v4417_v35 = vld [vmem:[#allocation3 + $0x189] sm:$0xff]  ;;  %v9795_v0 = vpack.i.bf16 %v4340_v17, %v4339_v52  ;;  %v4422_v18 = vld [vmem:[#allocation3 + $0x1d1] sm:$0xff]  ;;  %v10148_v17 = vld [vmem:[%s14634_s12 + $0x40] sm:$0xff]  }
 0x5ec   : > { %5498 = vmatpush1.bf16.msra.mxu1 %v10145_v48  ;;  %v9790_v39 = vpack.i.bf16 %v4418_v12, %v4417_v35  ;;  %v4419_v13 = vld [vmem:[#allocation3 + $0x1a9] sm:$0xff]  ;;  %v4424_v42 = vld [vmem:[#allocation3 + $0x1f1] sm:$0xff] }
 0x5ed   : > { %5499 = vmatprep.subr.bf16.mxu1 %v14695_v31  ;;  %v9805_v46 = vpack.i.bf16 %v4420_v28, %v4419_v13  ;;  %v4381_v3 = vld [vmem:[#allocation3 + $0x1c8] sm:$0xff]  ;;  %v10146_v38 = vld [vmem:[%s14634_s12 + $0x30] sm:$0xff]  }
 0x5ee   : > { %9716 = vrot.lane.b32.xlu0 %v9715_v21, %s14796_s29  ;;  %9711 = vrot.lane.b32.xlu1 %v9710_v19, %s14776_s20  ;;  %v4379_v21 = vld [vmem:[#allocation3 + $0x1a8] sm:$0xff]  ;;  %v4380_v19 = vld [vmem:[#allocation3 + $0x1b0] sm:$0xff] }
 0x5ef   : > { %v9800_v22 = vpack.i.bf16 %v4380_v19, %v4379_v21  ;;  %v4382_v32 = vld [vmem:[#allocation3 + $0x1d0] sm:$0xff]  ;;  %v4383_v51 = vld [vmem:[#allocation3 + $0x1e8] sm:$0xff] }
 0x5f0   : > { %5500 = vmatpush1.bf16.msra.mxu1 %v10146_v38  ;;  %v4344_v50 = vld [vmem:[#allocation3 + $0x1ef] sm:$0xff]  ;;  %v4345_v44 = vld [vmem:[#allocation3 + $0x207] sm:$0xff] }
 0x5f1   : > { %5501 = vmatprep.subr.bf16.mxu1 %v14695_v31  ;;  %v4421_v10 = vld [vmem:[#allocation3 + $0x1c9] sm:$0xff]  ;;  %v9825_v4 = vpack.i.bf16 %v4344_v50, %v4343_v33  ;;  %v4426_v59 = vld [vmem:[#allocation3 + $0x211] sm:$0xff] }
 0x5f2   : > { %9726 = vrot.lane.b32.xlu0 %v9725_v27, %s14776_s20  ;;  %9721 = vrot.lane.b32.xlu1 %v9720_v56, %s14780_s28  ;;  %v4342_v27 = vld [vmem:[#allocation3 + $0x1cf] sm:$0xff]  ;;  %v9815_v56 = vpack.i.bf16 %v4382_v32, %v4381_v3  ;;  %v4313_v40 = vld [vmem:[#allocation3 + $0x7] sm:$0xff] }
 0x5f3   : > { %v9810_v25 = vpack.i.bf16 %v4342_v27, %v4341_v43  ;;  %v4384_v1 = vld [vmem:[#allocation3 + $0x1f0] sm:$0xff]  ;;  %v6661_v62 = vld [vmem:[#allocation4 + $0x28] sm:$0xff] }
 0x5f4   : > { %v9830_v57 = vpack.i.bf16 %v4384_v1, %v4383_v51  ;;  %v4386_v6 = vld [vmem:[#allocation3 + $0x210] sm:$0xff]  ;;  %v6665_v13 = vld [vmem:[#allocation4 + $0x68] sm:$0xff] }
 0x5f5   : > { %v4346_v63 = vld [vmem:[#allocation3 + $0x20f] sm:$0xff] }
 0x5f6   : > { %9736 = vrot.lane.b32.xlu0 %v9735_v47, %s14780_s28  ;;  %9731 = vrot.lane.b32.xlu1 %v9730_v20, %s14796_s29  ;;  %v9820_v47 = vpack.i.bf16 %v4422_v18, %v4421_v10  ;;  %v4423_v20 = vld [vmem:[#allocation3 + $0x1e9] sm:$0xff]  ;;  %v6698_v52 = vld [vmem:[#allocation4 + $0x31] sm:$0xff] }
 0x5f7   : > { %v9835_v54 = vpack.i.bf16 %v4424_v42, %v4423_v20  ;;  %v4314_v15 = vld [vmem:[#allocation3 + $0xf] sm:$0xff] }
 0x5f8   : > { %v4425_v55 = vld [vmem:[#allocation3 + $0x209] sm:$0xff]  ;;  %v9855_v7 = vpack.i.bf16 %v4314_v15, %v4313_v40  ;;  %v6702_v38 = vld [vmem:[#allocation4 + $0x71] sm:$0xff] }
 0x5f9   : > { %v4393_v61 = vld [vmem:[#allocation3 + $0x9] sm:$0xff]  ;;  %v9850_v2 = vpack.i.bf16 %v4426_v59, %v4425_v55 }
 0x5fa   : > { %9746 = vrot.lane.b32.xlu0 %v9745_v49, %s14796_s29  ;;  %9741 = vrot.lane.b32.xlu1 %v9740_v58, %s14776_s20  ;;  %v4385_v49 = vld [vmem:[#allocation3 + $0x208] sm:$0xff]  ;;  %v10147_v58 = vld [vmem:[%s14634_s12 + $0x38] sm:$0xff]   ;;  %v4354_v41 = vld [vmem:[#allocation3 + $0x10] sm:$0xff] }
 0x5fb   : > { %5502 = vmatpush1.bf16.msra.mxu1 %v10147_v58  ;;  %v6662_v48 = vld [vmem:[#allocation4 + $0x30] sm:$0xff]  ;;  %v10149_v50 = vld [vmem:[%s14634_s12 + $0x48] sm:$0xff]  }
 0x5fc   : > { %5503 = vmatprep.subr.bf16.mxu1 %v14695_v31  ;;  %v9870_v60 = vpack.i.bf16 %v6662_v48, %v6661_v62  ;;  %v6699_v45 = vld [vmem:[#allocation4 + $0x49] sm:$0xff] }
 0x5fd   : > { %v6666_v28 = vld [vmem:[#allocation4 + $0x70] sm:$0xff]  ;;  %v6671_v20 = vld [vmem:[#allocation4 + $0xc8] sm:$0xff] }
 0x5fe   : > { %9756 = vrot.lane.b32.xlu0 %v9755_v8, %s14776_s20  ;;  %9751 = vrot.lane.b32.xlu1 %v9750_v30, %s14780_s28  ;;  %v9845_v8 = vpack.i.bf16 %v4386_v6, %v4385_v49  ;;  %v9840_v30 = vpack.i.bf16 %v4346_v63, %v4345_v44  ;;  %v9890_v19 = vpack.i.bf16 %v6666_v28, %v6665_v13  ;;  %v6701_v3 = vld [vmem:[#allocation4 + $0x69] sm:$0xff] }
 0x5ff   : > { %5504 = vmatpush1.bf16.msra.mxu1 %v10148_v17  ;;  %v9900_v43 = vpack.i.bf16 %v6702_v38, %v6701_v3  ;;  %v6705_v27 = vld [vmem:[#allocation4 + $0xa9] sm:$0xff] }
 0x600   : > { %5505 = vmatprep.subr.bf16.mxu1 %v14695_v31  ;;  %v6670_v33 = vld [vmem:[#allocation4 + $0xb0] sm:$0xff]  ;;  %v4387_v63 = vld [vmem:[#allocation3 + $0x228] sm:$0xff] }
 0x601   : > { %v6672_v42 = vld [vmem:[#allocation4 + $0xd0] sm:$0xff]  ;;  %v6675_v48 = vld [vmem:[#allocation4 + $0x108] sm:$0xff] }
 0x602   : > { %9766 = vrot.lane.b32.xlu0 %v9765_v9, %s14780_s28  ;;  %9761 = vrot.lane.b32.xlu1 %v9760_v37, %s14796_s29  ;;  %v4394_v9 = vld [vmem:[#allocation3 + $0x11] sm:$0xff]  ;;  %v4353_v37 = vld [vmem:[#allocation3 + $0x8] sm:$0xff]  ;;  %v9915_v1 = vpack.i.bf16 %v6672_v42, %v6671_v20 }
 0x603   : > { %v9865_v5 = vpack.i.bf16 %v4394_v9, %v4393_v61  ;;  %v9860_v26 = vpack.i.bf16 %v4354_v41, %v4353_v37  ;;  %5506 = vmatpush1.bf16.msra.mxu1 %v10149_v50  ;;  %v4388_v40 = vld [vmem:[#allocation3 + $0x230] sm:$0xff]  ;;  %v6677_v20 = vld [vmem:[#allocation4 + $0x128] sm:$0xff] }
 0x604   : > { %5732 = vmatprep.subr.bf16.mxu1 %v14695_v31  ;;  %v4278_v55 = vld [vmem:[#allocation3 + $0x4e] sm:$0xff]  ;;  %v9945_v41 = vpack.i.bf16 %v4388_v40, %v4387_v63 }
 0x605   : > { %v4348_v62 = vld [vmem:[#allocation3 + $0x22f] sm:$0xff] }
 0x606   : > { %9776 = vrot.lane.b32.xlu0 %v9775_v14, %s14796_s29  ;;  %9771 = vrot.lane.b32.xlu1 %v9770_v23, %s14776_s20  ;;  %v6663_v14 = vld [vmem:[#allocation4 + $0x48] sm:$0xff]  ;;  %v6664_v23 = vld [vmem:[#allocation4 + $0x50] sm:$0xff] }
 0x607   : > { %v9875_v29 = vpack.i.bf16 %v6664_v23, %v6663_v14  ;;  %v6678_v42 = vld [vmem:[#allocation4 + $0x130] sm:$0xff]  ;;  %v6679_v40 = vld [vmem:[#allocation4 + $0x148] sm:$0xff] }
 0x60a   : > { %9786 = vrot.lane.b32.xlu0 %v9785_v34, %s14776_s20  ;;  %9781 = vrot.lane.b32.xlu1 %v9780_v24, %s14780_s28  ;;  %v6700_v34 = vld [vmem:[#allocation4 + $0x51] sm:$0xff]  ;;  %v6697_v24 = vld [vmem:[#allocation4 + $0x29] sm:$0xff] }
 0x60b   : > { %v9885_v35 = vpack.i.bf16 %v6700_v34, %v6699_v45  ;;  %v9880_v12 = vpack.i.bf16 %v6698_v52, %v6697_v24 }
 0x60e   : > { %9796 = vrot.lane.b32.xlu0 %v9795_v0, %s14780_s28  ;;  %9791 = vrot.lane.b32.xlu1 %v9790_v39, %s14796_s29  ;;  %v6667_v0 = vld [vmem:[#allocation4 + $0x88] sm:$0xff]  ;;  %v6668_v39 = vld [vmem:[#allocation4 + $0x90] sm:$0xff] }
 0x60f   : > { %v9895_v21 = vpack.i.bf16 %v6668_v39, %v6667_v0 }
 0x612   : > { %9806 = vrot.lane.b32.xlu0 %v9805_v46, %s14796_s29  ;;  %9801 = vrot.lane.b32.xlu1 %v9800_v22, %s14776_s20  ;;  %v6703_v46 = vld [vmem:[#allocation4 + $0x89] sm:$0xff]  ;;  %v6704_v22 = vld [vmem:[#allocation4 + $0x91] sm:$0xff] }
 0x613   : > { %v9905_v32 = vpack.i.bf16 %v6704_v22, %v6703_v46  ;;  %v4279_v46 = vld [vmem:[#allocation3 + $0x66] sm:$0xff]  ;;  %v4280_v22 = vld [vmem:[#allocation3 + $0x6e] sm:$0xff] }
 0x616   : > { %9816 = vrot.lane.b32.xlu0 %v9815_v56, %s14776_s20  ;;  %9811 = vrot.lane.b32.xlu1 %v9810_v25, %s14780_s28  ;;  %v6706_v56 = vld [vmem:[#allocation4 + $0xb1] sm:$0xff]  ;;  %v6669_v25 = vld [vmem:[#allocation4 + $0xa8] sm:$0xff] }
 0x617   : > { %v9920_v10 = vpack.i.bf16 %v6706_v56, %v6705_v27  ;;  %v9910_v18 = vpack.i.bf16 %v6670_v33, %v6669_v25  ;;  %v4441_v27 = vld [vmem:[#allocation3 + $0x8a] sm:$0xff]  ;;  %v4442_v33 = vld [vmem:[#allocation3 + $0x92] sm:$0xff] }
 0x61a   : > { %9826 = vrot.lane.b32.xlu0 %v9825_v4, %s14780_s28  ;;  %9821 = vrot.lane.b32.xlu1 %v9820_v47, %s14796_s29  ;;  %v6673_v4 = vld [vmem:[#allocation4 + $0xe8] sm:$0xff]  ;;  %v6674_v47 = vld [vmem:[#allocation4 + $0xf0] sm:$0xff] }
 0x61b   : > { %v9930_v51 = vpack.i.bf16 %v6674_v47, %v6673_v4 }
 0x61e   : > { %9836 = vrot.lane.b32.xlu0 %v9835_v54, %s14796_s29  ;;  %9831 = vrot.lane.b32.xlu1 %v9830_v57, %s14776_s20  ;;  %v6707_v54 = vld [vmem:[#allocation4 + $0xc9] sm:$0xff]  ;;  %v6708_v57 = vld [vmem:[#allocation4 + $0xd1] sm:$0xff] }
 0x61f   : > { %v9925_v59 = vpack.i.bf16 %v6708_v57, %v6707_v54 }
 0x622   : > { %9846 = vrot.lane.b32.xlu0 %v9845_v8, %s14776_s20  ;;  %9841 = vrot.lane.b32.xlu1 %v9840_v30, %s14780_s28  ;;  %v4277_v30 = vld [vmem:[#allocation3 + $0x46] sm:$0xff] }
 0x626   : > { %9856 = vrot.lane.b32.xlu0 %v9855_v7, %s14780_s28  ;;  %9851 = vrot.lane.b32.xlu1 %v9850_v2, %s14796_s29  ;;  %v4427_v2 = vld [vmem:[#allocation3 + $0x229] sm:$0xff] }
 0x62a   : > { %9866 = vrot.lane.b32.xlu0 %v9865_v5, %s14796_s29  ;;  %9861 = vrot.lane.b32.xlu1 %v9860_v26, %s14776_s20  ;;  %v4428_v5 = vld [vmem:[#allocation3 + $0x231] sm:$0xff]  ;;  %v4347_v26 = vld [vmem:[#allocation3 + $0x227] sm:$0xff] }
 0x62b   : > { %v9950_v13 = vpack.i.bf16 %v4428_v5, %v4427_v2  ;;  %v9935_v28 = vpack.i.bf16 %v4348_v62, %v4347_v26  ;;  %v4444_v62 = vld [vmem:[#allocation3 + $0xb2] sm:$0xff] }
 0x62e   : > { %9876 = vrot.lane.b32.xlu0 %v9875_v29, %s14797_s4  ;;  %9871 = vrot.lane.b32.xlu1 %v9870_v60, %s14797_s4  ;;  %v6676_v29 = vld [vmem:[#allocation4 + $0x110] sm:$0xff] }
 0x632   : > { %9886 = vrot.lane.b32.xlu0 %v9885_v35, %s14780_s28  ;;  %9881 = vrot.lane.b32.xlu1 %v9880_v12, %s14780_s28  ;;  %v6709_v35 = vld [vmem:[#allocation4 + $0xe9] sm:$0xff]  ;;  %v6710_v12 = vld [vmem:[#allocation4 + $0xf1] sm:$0xff] }
 0x633   : > { %v9955_v50 = vpack.i.bf16 %v6710_v12, %v6709_v35  ;;  %v6681_v35 = vld [vmem:[#allocation4 + $0x168] sm:$0xff]  ;;  %v6682_v12 = vld [vmem:[#allocation4 + $0x170] sm:$0xff] }
 0x636   : > { %9896 = vrot.lane.b32.xlu0 %v9895_v21, %s14797_s4  ;;  %9891 = vrot.lane.b32.xlu1 %v9890_v19, %s14797_s4  ;;  %v9940_v19 = vpack.i.bf16 %v6676_v29, %v6675_v48 }
 0x63a   : > { %9906 = vrot.lane.b32.xlu0 %v9905_v32, %s14780_s28  ;;  %9901 = vrot.lane.b32.xlu1 %v9900_v43, %s14780_s28 }
 0x63e   : > { %9921 = vrot.lane.b32.xlu0 %v9920_v10, %s14780_s28  ;;  %9911 = vrot.lane.b32.xlu1 %v9910_v18, %s14797_s4  ;;  %v6711_v10 = vld [vmem:[#allocation4 + $0x109] sm:$0xff]  ;;  %v6712_v18 = vld [vmem:[#allocation4 + $0x111] sm:$0xff] }
 0x63f   : > { %v9960_v63 = vpack.i.bf16 %v6712_v18, %v6711_v10  ;;  %v6684_v18 = vld [vmem:[#allocation4 + $0x190] sm:$0xff] }
 0x640   : > { %v9637_v49 = vpop.permute.xlu0 %9636  ;;  %v9632_v58 = vpop.permute.xlu1 %9631 }
 0x641   : > { %v9634_v6 = vunpack.i.h.bf16 %v9632_v58  ;;  %v9633_v44 = vunpack.i.l.bf16 %v9632_v58  ;;  %v9639_v15 = vunpack.i.h.bf16 %v9637_v49  ;;  %v9638_v8 = vunpack.i.l.bf16 %v9637_v49  ;;  %v4282_v58 = vld [vmem:[#allocation3 + $0x8e] sm:$0xff] }
 0x642   : > { %9931 = vrot.lane.b32.xlu0 %v9930_v51, %s14797_s4  ;;  %9916 = vrot.lane.b32.xlu1 %v9915_v1, %s14797_s4 }
 0x643   : > { %v4957_v7 = vsel %vm2129_vm6, %v4277_v30, %v9633_v44  ;;  %v4958_v61 = vsel %vm2129_vm6, %v4278_v55, %v9634_v6  ;;  %v13097_v44 = vpack.c.bf16 %v4442_v33, %v4441_v27  ;;  %v9965_v55 = vpack.i.bf16 %v6678_v42, %v6677_v20 }
 0x644   : > { %v9647_v9 = vpop.permute.xlu0 %9646  ;;  %v9642_v37 = vpop.permute.xlu1 %9641  ;;  %v4997_v34 = vsel %vm14798_vm1, %v4957_v7, %v9638_v8  ;;  %v4998_v24 = vsel %vm14799_vm0, %v4958_v61, %v9639_v15  ;;  %v6713_v7 = vld [vmem:[#allocation4 + $0x129] sm:$0xff]  ;;  %v6714_v61 = vld [vmem:[#allocation4 + $0x131] sm:$0xff]  ;;  %v9985_v27 = vpack.i.bf16 %v6682_v12, %v6681_v35  ;;  %vm14814_vm1 = vmmov %vm14810_vm2 }
 0x645   : > { %v9644_v14 = vunpack.i.h.bf16 %v9642_v37  ;;  %v9643_v23 = vunpack.i.l.bf16 %v9642_v37  ;;  %v9649_v60 = vunpack.i.h.bf16 %v9647_v9  ;;  %v9648_v45 = vunpack.i.l.bf16 %v9647_v9  ;;  %14806 = vst [vmem:[#allocation32_spill] sm:$0xff] %v13097_v44  ;;  %v4281_v9 = vld [vmem:[#allocation3 + $0x86] sm:$0xff] }
 0x646   : > { %9946 = vrot.lane.b32.xlu0 %v9945_v41, %s14776_s20  ;;  %9926 = vrot.lane.b32.xlu1 %v9925_v59, %s14780_s28  ;;  %v6680_v59 = vld [vmem:[#allocation4 + $0x150] sm:$0xff]  ;;  %v9975_v29 = vpack.i.bf16 %v6714_v61, %v6713_v7 }
 0x647   : > { %v5038_v52 = vsel %vm14800_vm5, %v4997_v34, %v9643_v23  ;;  %v5039_v17 = vsel %vm14801_vm11, %v4998_v24, %v9644_v14  ;;  %v4960_v56 = vsel %vm2129_vm6, %v4280_v22, %v9649_v60  ;;  %v4959_v25 = vsel %vm2129_vm6, %v4279_v46, %v9648_v45  ;;  %v4443_v23 = vld [vmem:[#allocation3 + $0xaa] sm:$0xff]  ;;  %vm14815_vm5 = vmmov %vm14799_vm0 }
 0x648   : > { %v9657_v0 = vpop.permute.xlu0 %9656  ;;  %v9652_v39 = vpop.permute.xlu1 %9651  ;;  %v13082_v21 = vpack.c.bf16 %v5039_v17, %v5038_v52  ;;  %v9970_v48 = vpack.i.bf16 %v6680_v59, %v6679_v40  ;;  %v6715_v60 = vld [vmem:[#allocation4 + $0x149] sm:$0xff]  ;;  %v6716_v17 = vld [vmem:[#allocation4 + $0x151] sm:$0xff]  ;;  %v13117_v46 = vpack.c.bf16 %v4444_v62, %v4443_v23  ;;  %vm14816_vm11 = vmmov %vm14814_vm1 }
 0x649   : > { %v9659_v3 = vunpack.i.h.bf16 %v9657_v0  ;;  %v9658_v38 = vunpack.i.l.bf16 %v9657_v0  ;;  %v9654_v32 = vunpack.i.h.bf16 %v9652_v39  ;;  %v9653_v43 = vunpack.i.l.bf16 %v9652_v39  ;;  %v4283_v22 = vld [vmem:[#allocation3 + $0xa6] sm:$0xff]  ;;  %v6720_v40 = vld [vmem:[#allocation4 + $0x191] sm:$0xff] }
 0x64a   : > { %9951 = vrot.lane.b32.xlu0 %v9950_v13, %s14796_s29  ;;  %9936 = vrot.lane.b32.xlu1 %v9935_v28, %s14780_s28  ;;  %v6685_v59 = vld [vmem:[#allocation4 + $0x1a8] sm:$0xff]  ;;  %v6686_v7 = vld [vmem:[#allocation4 + $0x1b0] sm:$0xff] }
 0x64b   : > { %v5000_v4 = vsel %vm14802_vm12, %v4960_v56, %v9654_v32  ;;  %v4999_v47 = vsel %vm14803_vm4, %v4959_v25, %v9653_v43  ;;  %5304 = vmatmul.mubr.bf16.gmra.mrb[16].mxu1 %v13082_v21  ;;  %v9980_v43 = vpack.i.bf16 %v6716_v17, %v6715_v60  ;;  %v6683_v56 = vld [vmem:[#allocation4 + $0x188] sm:$0xff]  ;;  %v10005_v62 = vpack.i.bf16 %v6686_v7, %v6685_v59  ;;  %v6722_v17 = vld [vmem:[#allocation4 + $0x1b1] sm:$0xff]  ;;  %vm14817_vm12 = vmmov %vm14814_vm1 }
 0x64c   : > { %v5041_v51 = vsel %vm14804_vm13, %v5000_v4, %v9659_v3  ;;  %v5040_v1 = vsel %vm14805_vm14, %v4999_v47, %v9658_v38  ;;  %8134 = vmatprep.mubr.msk.bf16.mxu1 %vm2129_vm6, %v12947_v11  ;;  %v9667_v54 = vpop.permute.xlu0 %9666  ;;  %v9662_v57 = vpop.permute.xlu1 %9661  ;;  %v4284_v3 = vld [vmem:[#allocation3 + $0xae] sm:$0xff]  ;;  %vm14818_vm4 = vmmov %vm14799_vm0 }
 0x64d   : > { %v13095_v49 = vpack.c.bf16 %v5041_v51, %v5040_v1  ;;  %v9664_v6 = vunpack.i.h.bf16 %v9662_v57  ;;  %v9669_v15 = vunpack.i.h.bf16 %v9667_v54  ;;  %v9668_v8 = vunpack.i.l.bf16 %v9667_v54  ;;  %v6717_v4 = vld [vmem:[#allocation4 + $0x169] sm:$0xff]  ;;  %v6718_v47 = vld [vmem:[#allocation4 + $0x171] sm:$0xff]  ;;  %vm14819_vm13 = vmmov %vm14799_vm0 }
 0x64e   : > { %v9663_v30 = vunpack.i.l.bf16 %v9662_v57  ;;  %9941 = vrot.lane.b32.xlu1 %v9940_v19, %s14797_s4  ;;  %9956 = vrot.lane.b32.xlu0 %v9955_v50, %s14780_s28  ;;  %v4445_v54 = vld [vmem:[#allocation3 + $0xca] sm:$0xff]  ;;  %v4446_v57 = vld [vmem:[#allocation3 + $0xd2] sm:$0xff]  ;;  %vm14820_vm14 = vmmov %vm14814_vm1 }
 0x64f   : > { %v4962_v37 = vsel %vm2129_vm6, %v4282_v58, %v9664_v6  ;;  %6042 = vmatmul.mubr.bf16.vlgmr.msra.gmra.mrb[32].mxu0 %v13095_v49  ;;  %v9990_v58 = vpack.i.bf16 %v6684_v18, %v6683_v56  ;;  %v9995_v6 = vpack.i.bf16 %v6718_v47, %v6717_v4  ;;  %v4286_v23 = vld [vmem:[#allocation3 + $0xce] sm:$0xff] }
 0x650   : > { %v4961_v41 = vsel %vm2129_vm6, %v4281_v9, %v9663_v30  ;;  %v9677_v2 = vpop.permute.xlu0 %9676  ;;  %v9672_v5 = vpop.permute.xlu1 %9671  ;;  %8251 = vmatprep.mubr.msk.bf16.mxu0 %vm2129_vm6, %v13097_v44  ;;  %v5002_v52 = vsel %vm14808_vm10, %v4962_v37, %v9669_v15  ;;  %v13135_v37 = vpack.c.bf16 %v4446_v57, %v4445_v54  ;;  %vm14822_vm10 = vmmov %vm14799_vm0 }
 0x651   : > { %v9674_v26 = vunpack.i.h.bf16 %v9672_v5  ;;  %v9673_v14 = vunpack.i.l.bf16 %v9672_v5  ;;  %v9679_v45 = vunpack.i.h.bf16 %v9677_v2  ;;  %v9678_v34 = vunpack.i.l.bf16 %v9677_v2 }
 0x652   : > { %v5001_v24 = vsel %vm14807_vm9, %v4961_v41, %v9668_v8  ;;  %9961 = vrot.lane.b32.xlu1 %v9960_v63, %s14780_s28  ;;  %9966 = vrot.lane.b32.xlu0 %v9965_v55, %s14797_s4  ;;  %v6719_v63 = vld [vmem:[#allocation4 + $0x189] sm:$0xff]  ;;  %vm14821_vm9 = vmmov %vm14814_vm1 }
 0x653   : > { %v5042_v0 = vsel %vm14809_vm15, %v5001_v24, %v9673_v14  ;;  %v5043_v39 = vsel %vm14810_vm2, %v5002_v52, %v9674_v26  ;;  %5312 = vmatmul.mubr.bf16.gmra.mrb[20].mxu1 %v13095_v49  ;;  %v4964_v25 = vsel %vm2129_vm6, %v4284_v3, %v9679_v45  ;;  %v4963_v33 = vsel %vm2129_vm6, %v4283_v22, %v9678_v34  ;;  %v4285_v14 = vld [vmem:[#allocation3 + $0xc6] sm:$0xff]  ;;  %v6688_v24 = vld [vmem:[#allocation4 + $0x1d0] sm:$0xff]  ;;  %vm14823_vm15 = vmmov %vm14799_vm0 }
 0x654   : > { %v13113_v13 = vpack.c.bf16 %v5043_v39, %v5042_v0  ;;  %8135 = vmatprep.mubr.msk.bf16.mxu1 %vm2129_vm6, %v13097_v44  ;;  %v9687_v28 = vpop.permute.xlu0 %9686  ;;  %v9682_v19 = vpop.permute.xlu1 %9681  ;;  %v10000_v41 = vpack.i.bf16 %v6720_v40, %v6719_v63  ;;  %v6721_v52 = vld [vmem:[#allocation4 + $0x1a9] sm:$0xff]  ;;  %vm14824_vm2 = vmmov %vm14814_vm1 }
 0x655   : > { %v9684_v38 = vunpack.i.h.bf16 %v9682_v19  ;;  %v9683_v32 = vunpack.i.l.bf16 %v9682_v19  ;;  %v9689_v50 = vunpack.i.h.bf16 %v9687_v28  ;;  %v9688_v10 = vunpack.i.l.bf16 %v9687_v28  ;;  %v4447_v28 = vld [vmem:[#allocation3 + $0xea] sm:$0xff]  ;;  %v4448_v19 = vld [vmem:[#allocation3 + $0xf2] sm:$0xff] }
 0x656   : > { %9971 = vrot.lane.b32.xlu1 %v9970_v48, %s14797_s4  ;;  %9976 = vrot.lane.b32.xlu0 %v9975_v29, %s14780_s28  ;;  %v6687_v48 = vld [vmem:[#allocation4 + $0x1c8] sm:$0xff]  ;;  %v10015_v3 = vpack.i.bf16 %v6722_v17, %v6721_v52 }
 0x657   : > { %v5004_v20 = vsel %vm14811_vm8, %v4964_v25, %v9684_v38  ;;  %v5003_v42 = vsel %vm14812_vm3, %v4963_v33, %v9683_v32  ;;  %6050 = vmatmul.mubr.bf16.gmra.mrb[36].mxu0 %v13113_v13  ;;  %v10010_v22 = vpack.i.bf16 %v6688_v24, %v6687_v48  ;;  %v6723_v38 = vld [vmem:[#allocation4 + $0x1c9] sm:$0xff]  ;;  %v6724_v25 = vld [vmem:[#allocation4 + $0x1d1] sm:$0xff]  ;;  %vm14825_vm8 = vmmov %vm14814_vm1 }
 0x658   : > { %v9697_v51 = vpop.permute.xlu0 %9696  ;;  %v9692_v1 = vpop.permute.xlu1 %9691  ;;  %8252 = vmatprep.mubr.msk.bf16.mxu0 %vm2129_vm6, %v13117_v46  ;;  %v5045_v15 = vsel %vm14813_vm7, %v5004_v20, %v9689_v50  ;;  %v5044_v8 = vsel %vm14814_vm1, %v5003_v42, %v9688_v10  ;;  %v4349_v33 = vld [vmem:[#allocation3 + $0x247] sm:$0xff]  ;;  %v4350_v50 = vld [vmem:[#allocation3 + $0x24f] sm:$0xff]  ;;  %v10020_v54 = vpack.i.bf16 %v6724_v25, %v6723_v38  ;;  %vm14826_vm3 = vmmov %vm14799_vm0 }
 0x659   : > { %v9694_v30 = vunpack.i.h.bf16 %v9692_v1  ;;  %v9693_v55 = vunpack.i.l.bf16 %v9692_v1  ;;  %v13137_v2 = vpack.c.bf16 %v5045_v15, %v5044_v8  ;;  %v9699_v5 = vunpack.i.h.bf16 %v9697_v51  ;;  %v4287_v20 = vld [vmem:[#allocation3 + $0xe6] sm:$0xff]  ;;  %v4288_v42 = vld [vmem:[#allocation3 + $0xee] sm:$0xff]  ;;  %vm14827_vm7 = vmmov %vm14799_vm0 }
 0x65a   : > { %9981 = vrot.lane.b32.xlu1 %v9980_v43, %s14780_s28  ;;  %9986 = vrot.lane.b32.xlu0 %v9985_v27, %s14797_s4  ;;  %v9698_v26 = vunpack.i.l.bf16 %v9697_v51  ;;  %v13159_v1 = vpack.c.bf16 %v4448_v19, %v4447_v28  ;;  %v10025_v57 = vpack.i.bf16 %v4350_v50, %v4349_v33  ;;  %v4390_v8 = vld [vmem:[#allocation3 + $0x250] sm:$0xff]  ;;  %v4289_v19 = vld [vmem:[#allocation3 + $0x106] sm:$0xff] }
 0x65b   : > { %5320 = vmatmul.mubr.bf16.gmra.mrb[24].mxu1 %v13113_v13  ;;  %v4966_v29 = vsel %vm2129_vm6, %v4286_v23, %v9694_v30  ;;  %v4965_v60 = vsel %vm2129_vm6, %v4285_v14, %v9693_v55  ;;  %v6689_v30 = vld [vmem:[#allocation4 + $0x1e8] sm:$0xff]  ;;  %v6690_v55 = vld [vmem:[#allocation4 + $0x1f0] sm:$0xff] }
 0x65c   : > { %8136 = vmatprep.mubr.msk.bf16.mxu1 %vm2129_vm6, %v13117_v46  ;;  %v9707_v61 = vpop.permute.xlu0 %9706  ;;  %v9702_v9 = vpop.permute.xlu1 %9701  ;;  %v5005_v0 = vsel %vm14799_vm0, %v4965_v60, %v9698_v26  ;;  %v5006_v39 = vsel %vm14815_vm5, %v4966_v29, %v9699_v5  ;;  %v4450_v5 = vld [vmem:[#allocation3 + $0x112] sm:$0xff]  ;;  %v10035_v14 = vpack.i.bf16 %v6690_v55, %v6689_v30  ;;  %v4429_v23 = vld [vmem:[#allocation3 + $0x249] sm:$0xff]  ;;  %vm14828_vm0 = vmmov %vm14814_vm1 }
 0x65d   : > { %v9704_v45 = vunpack.i.h.bf16 %v9702_v9  ;;  %v9703_v34 = vunpack.i.l.bf16 %v9702_v9  ;;  %v9709_v32 = vunpack.i.h.bf16 %v9707_v61  ;;  %v9708_v43 = vunpack.i.l.bf16 %v9707_v61  ;;  %v6692_v24 = vld [vmem:[#allocation4 + $0x210] sm:$0xff]  ;;  %vm14829_vm5 = vmmov %vm14826_vm3 }
 0x65e   : > { %9991 = vrot.lane.b32.xlu1 %v9990_v58, %s14797_s4  ;;  %9996 = vrot.lane.b32.xlu0 %v9995_v6, %s14780_s28  ;;  %v4389_v58 = vld [vmem:[#allocation3 + $0x248] sm:$0xff]  ;;  %v6726_v25 = vld [vmem:[#allocation4 + $0x1f1] sm:$0xff] }
 0x65f   : > { %6058 = vmatmul.mubr.bf16.gmra.mrb[40].mxu0 %v13137_v2  ;;  %v5046_v27 = vsel %vm14816_vm11, %v5005_v0, %v9703_v34  ;;  %v5047_v56 = vsel %vm14817_vm12, %v5006_v39, %v9704_v45  ;;  %v4968_v6 = vsel %vm2129_vm6, %v4288_v42, %v9709_v32  ;;  %v4967_v63 = vsel %vm2129_vm6, %v4287_v20, %v9708_v43  ;;  %v6691_v34 = vld [vmem:[#allocation4 + $0x208] sm:$0xff]  ;;  %v6728_v50 = vld [vmem:[#allocation4 + $0x211] sm:$0xff]  ;;  %vm14830_vm11 = vmmov %vm14826_vm3 }
 0x660   : > { %v9717_v35 = vpop.permute.xlu0 %9716  ;;  %v9712_v12 = vpop.permute.xlu1 %9711  ;;  %8253 = vmatprep.mubr.msk.bf16.mxu0 %vm2129_vm6, %v13135_v37  ;;  %v13157_v51 = vpack.c.bf16 %v5047_v56, %v5046_v27  ;;  %v10030_v26 = vpack.i.bf16 %v4390_v8, %v4389_v58  ;;  %v6725_v38 = vld [vmem:[#allocation4 + $0x1e9] sm:$0xff]  ;;  %v4452_v42 = vld [vmem:[#allocation3 + $0x132] sm:$0xff]  ;;  %vm14831_vm12 = vmmov %vm14828_vm0 }
 0x661   : > { %v9714_v10 = vunpack.i.h.bf16 %v9712_v12  ;;  %v9713_v18 = vunpack.i.l.bf16 %v9712_v12  ;;  %v9719_v40 = vunpack.i.h.bf16 %v9717_v35  ;;  %v9718_v15 = vunpack.i.l.bf16 %v9717_v35  ;;  %v6727_v33 = vld [vmem:[#allocation4 + $0x209] sm:$0xff]  ;;  %v6696_v55 = vld [vmem:[#allocation4 + $0x11] sm:$0xff] }
 0x662   : > { %10001 = vrot.lane.b32.xlu1 %v10000_v41, %s14780_s28  ;;  %10006 = vrot.lane.b32.xlu0 %v10005_v62, %s14797_s4  ;;  %v4449_v41 = vld [vmem:[#allocation3 + $0x10a] sm:$0xff] }
 0x663   : > { %5328 = vmatmul.mubr.bf16.gmra.mrb[28].mxu1 %v13137_v2  ;;  %v5008_v59 = vsel %vm14818_vm4, %v4968_v6, %v9714_v10  ;;  %v5007_v7 = vsel %vm14819_vm13, %v4967_v63, %v9713_v18  ;;  %v4430_v62 = vld [vmem:[#allocation3 + $0x251] sm:$0xff]  ;;  %v13181_v35 = vpack.c.bf16 %v4450_v5, %v4449_v41  ;;  %v6659_v58 = vld [vmem:[#allocation4 + $0x8] sm:$0xff]  ;;  %vm14832_vm4 = vmmov %vm14828_vm0 }
 0x664   : > { %8137 = vmatprep.mubr.msk.bf16.mxu1 %vm2129_vm6, %v13135_v37  ;;  %v13155_v4 = vpop.permute.xlu0 %9726  ;;  %v9722_v47 = vpop.permute.xlu1 %9721  ;;  %v5049_v48 = vsel %vm14820_vm14, %v5008_v59, %v9719_v40  ;;  %v5048_v29 = vsel %vm14821_vm9, %v5007_v7, %v9718_v15  ;;  %v10040_v12 = vpack.i.bf16 %v4430_v62, %v4429_v23  ;;  %v4451_v20 = vld [vmem:[#allocation3 + $0x12a] sm:$0xff]  ;;  %vm14834_vm13 = vmmov %vm14826_vm3 }
 0x665   : > { %v9724_v60 = vunpack.i.h.bf16 %v9722_v47  ;;  %v9723_v45 = vunpack.i.l.bf16 %v9722_v47  ;;  %v13183_v0 = vpack.c.bf16 %v5049_v48, %v5048_v29  ;;  %v9729_v39 = vunpack.i.h.bf16 %v13155_v4  ;;  %v6660_v8 = vld [vmem:[#allocation4 + $0x10] sm:$0xff]  ;;  %v4291_v41 = vld [vmem:[#allocation3 + $0x126] sm:$0xff]  ;;  %vm14835_vm14 = vmmov %vm14826_vm3 }
 0x666   : > { %10011 = vrot.lane.b32.xlu1 %v10010_v22, %s14797_s4  ;;  %10016 = vrot.lane.b32.xlu0 %v10015_v3, %s14780_s28  ;;  %v9728_v28 = vunpack.i.l.bf16 %v13155_v4  ;;  %v4290_v22 = vld [vmem:[#allocation3 + $0x10e] sm:$0xff]  ;;  %v10045_v3 = vpack.i.bf16 %v6692_v24, %v6691_v34  ;;  %v10060_v23 = vpack.i.bf16 %v6660_v8, %v6659_v58  ;;  %vm14836_vm9 = vmmov %vm14828_vm0 }
 0x667   : > { %6066 = vmatmul.mubr.bf16.gmra.mrb[44].mxu0 %v13157_v51  ;;  %v4970_v32 = vsel %vm2129_vm6, %v4290_v22, %v9724_v60  ;;  %v4969_v43 = vsel %vm2129_vm6, %v4289_v19, %v9723_v45  ;;  %v6695_v30 = vld [vmem:[#allocation4 + $0x9] sm:$0xff]  ;;  %v4456_v8 = vld [vmem:[#allocation3 + $0x172] sm:$0xff] }
 0x668   : > { %v13168_v61 = vpop.permute.xlu0 %9736  ;;  %v9732_v9 = vpop.permute.xlu1 %9731  ;;  %8254 = vmatprep.mubr.msk.bf16.mxu0 %vm2129_vm6, %v13159_v1  ;;  %v5009_v4 = vsel %vm14822_vm10, %v4969_v43, %v9728_v28  ;;  %v5010_v47 = vsel %vm14823_vm15, %v4970_v32, %v9729_v39  ;;  %v4292_v5 = vld [vmem:[#allocation3 + $0x12e] sm:$0xff]  ;;  %v10065_v62 = vpack.i.bf16 %v6696_v55, %v6695_v30  ;;  %vm14837_vm10 = vmmov %vm14828_vm0 }
 0x669   : > { %v9734_v27 = vunpack.i.h.bf16 %v9732_v9  ;;  %v9733_v56 = vunpack.i.l.bf16 %v9732_v9  ;;  %v9739_v6 = vunpack.i.h.bf16 %v13168_v61  ;;  %v9738_v63 = vunpack.i.l.bf16 %v13168_v61  ;;  %v4453_v22 = vld [vmem:[#allocation3 + $0x14a] sm:$0xff]  ;;  %vm14842_vm15 = vmmov %vm14826_vm3 }
 0x66a   : > { %10021 = vrot.lane.b32.xlu1 %v10020_v54, %s14780_s28  ;;  %10026 = vrot.lane.b32.xlu0 %v10025_v57, %s14780_s28  ;;  %v10050_v54 = vpack.i.bf16 %v6726_v25, %v6725_v38  ;;  %v10055_v57 = vpack.i.bf16 %v6728_v50, %v6727_v33  ;;  %v4293_v25 = vld [vmem:[#allocation3 + $0x146] sm:$0xff]  ;;  %v4294_v33 = vld [vmem:[#allocation3 + $0x14e] sm:$0xff] }
 0x66b   : > { %5336 = vmatmul.mubr.bf16.gmra.mrb[32].mxu1 %v13157_v51  ;;  %v5050_v40 = vsel %vm14824_vm2, %v5009_v4, %v9733_v56  ;;  %v5051_v15 = vsel %vm14825_vm8, %v5010_v47, %v9734_v27  ;;  %v4972_v48 = vsel %vm2129_vm6, %v4292_v5, %v9739_v6  ;;  %v4971_v29 = vsel %vm2129_vm6, %v4291_v41, %v9738_v63  ;;  %v4296_v41 = vld [vmem:[#allocation3 + $0x16e] sm:$0xff]  ;;  %vm14843_vm2 = vmmov %vm14826_vm3 }
 0x66c   : > { %8138 = vmatprep.mubr.msk.bf16.mxu1 %vm2129_vm6, %v13159_v1  ;;  %v13179_v52 = vpop.permute.xlu0 %9746  ;;  %v9742_v17 = vpop.permute.xlu1 %9741  ;;  %vm14844_vm8 = vmmov %vm14828_vm0 }
 0x66d   : > { %v9744_v59 = vunpack.i.h.bf16 %v9742_v17  ;;  %v9743_v7 = vunpack.i.l.bf16 %v9742_v17  ;;  %v9749_v60 = vunpack.i.h.bf16 %v13179_v52  ;;  %v9748_v45 = vunpack.i.l.bf16 %v13179_v52 }
 0x66e   : > { %10031 = vrot.lane.b32.xlu1 %v10030_v26, %s14776_s20  ;;  %10036 = vrot.lane.b32.xlu0 %v10035_v14, %s14797_s4  ;;  %v13211_v26 = vpack.c.bf16 %v5051_v15, %v5050_v40  ;;  %v13213_v14 = vpack.c.bf16 %v4452_v42, %v4451_v20  ;;  %v4455_v15 = vld [vmem:[#allocation3 + $0x16a] sm:$0xff] }
 0x66f   : > { %6074 = vmatmul.mubr.bf16.gmra.mrb[48].mxu0 %v13183_v0  ;;  %v5012_v34 = vsel %vm14826_vm3, %v4972_v48, %v9744_v59  ;;  %v5011_v24 = vsel %vm14827_vm7, %v4971_v29, %v9743_v7  ;;  %vm14845_vm3 = vmmov %vm14828_vm0 }
 0x670   : > { %v13192_v10 = vpop.permute.xlu0 %9756  ;;  %v13194_v18 = vpop.permute.xlu1 %9751  ;;  %8255 = vmatprep.mubr.msk.bf16.mxu0 %vm2129_vm6, %v13181_v35  ;;  %v5053_v39 = vsel %vm14814_vm1, %v5012_v34, %v9749_v60  ;;  %v5052_v52 = vsel %vm14828_vm0, %v5011_v24, %v9748_v45  ;;  %vm14848_vm7 = vmmov %vm14843_vm2 }
 0x671   : > { %v9754_v28 = vunpack.i.h.bf16 %v13194_v18  ;;  %v9753_v19 = vunpack.i.l.bf16 %v13194_v18  ;;  %v13241_v43 = vpack.c.bf16 %v5053_v39, %v5052_v52  ;;  %v9759_v27 = vunpack.i.h.bf16 %v13192_v10  ;;  %vm14849_vm1 = vmmov %vm14843_vm2 }
 0x672   : > { %10041 = vrot.lane.b32.xlu1 %v10040_v12, %s14796_s29  ;;  %10046 = vrot.lane.b32.xlu0 %v10045_v3, %s14797_s4  ;;  %v4454_v3 = vld [vmem:[#allocation3 + $0x152] sm:$0xff]  ;;  %v9758_v56 = vunpack.i.l.bf16 %v13192_v10 }
 0x673   : > { %5344 = vmatmul.mubr.bf16.gmra.mrb[36].mxu1 %v13183_v0  ;;  %v13245_v50 = vpack.c.bf16 %v4454_v3, %v4453_v22  ;;  %v4974_v18 = vsel %vm2129_vm6, %v4294_v33, %v9754_v28  ;;  %v4973_v4 = vsel %vm2129_vm6, %v4293_v25, %v9753_v19  ;;  %v4457_v19 = vld [vmem:[#allocation3 + $0x18a] sm:$0xff]  ;;  %v4458_v22 = vld [vmem:[#allocation3 + $0x192] sm:$0xff] }
 0x674   : > { %8139 = vmatprep.mubr.msk.bf16.mxu1 %vm2129_vm6, %v13181_v35  ;;  %v13209_v9 = vpop.permute.xlu0 %9766  ;;  %v9762_v61 = vpop.permute.xlu1 %9761  ;;  %v5013_v10 = vsel %vm14829_vm5, %v4973_v4, %v9758_v56  ;;  %v10157_v56 = vld [vmem:[%s14636_s14 + $0x20] sm:$0xff]   ;;  %v4298_v4 = vld [vmem:[#allocation3 + $0x18e] sm:$0xff]  ;;  %vm14850_vm5 = vmmov %vm14828_vm0 }
 0x675   : > { %v9764_v47 = vunpack.i.h.bf16 %v9762_v61  ;;  %v9763_v20 = vunpack.i.l.bf16 %v9762_v61  ;;  %v9769_v58 = vunpack.i.h.bf16 %v13209_v9  ;;  %v9768_v6 = vunpack.i.l.bf16 %v13209_v9  ;;  %v10156_v9 = vld [vmem:[%s14636_s14 + $0x18] sm:$0xff]   ;;  %v4295_v61 = vld [vmem:[#allocation3 + $0x166] sm:$0xff] }
 0x676   : > { %10051 = vrot.lane.b32.xlu1 %v10050_v54, %s14780_s28  ;;  %10056 = vrot.lane.b32.xlu0 %v10055_v57, %s14780_s28  ;;  %v5014_v57 = vsel %vm14830_vm11, %v4974_v18, %v9759_v27  ;;  %v4297_v18 = vld [vmem:[#allocation3 + $0x186] sm:$0xff]  ;;  %vm14852_vm11 = vmmov %vm14849_vm1 }
 0x677   : > { %6082 = vmatmul.mubr.bf16.gmra.mrb[52].mxu0 %v13211_v26  ;;  %v5054_v63 = vsel %vm14831_vm12, %v5013_v10, %v9763_v20  ;;  %v5055_v40 = vsel %vm14832_vm4, %v5014_v57, %v9764_v47  ;;  %v4975_v48 = vsel %vm2129_vm6, %v4295_v61, %v9768_v6  ;;  %8821 = vmatprep.subr.bf16.mxu0 %v10156_v9  ;;  %v13309_v20 = vpop.f32.mrb[12].mxu1  ;;  %v10159_v10 = vld [vmem:[%s14636_s14 + $0x28] sm:$0xff]   ;;  %vm14853_vm12 = vmmov %vm14849_vm1 }
 0x678   : > { %v13224_v17 = vpop.permute.xlu0 %9776  ;;  %v9772_v12 = vpop.permute.xlu1 %9771  ;;  %8256 = vmatprep.mubr.msk.bf16.mxu0 %vm2129_vm6, %v13213_v14  ;;  %v13272_v5 = vpack.c.bf16 %v5055_v40, %v5054_v63  ;;  %8822 = vmatpush3.bf16.msra.mxu0 %v10156_v9  ;;  %v13307_v47 = vpack.c.bf16 %v4458_v22, %v4457_v19  ;;  %14840 = vst [vmem:[#allocation28_spill] sm:$0xff] %v13309_v20  ;;  %vm14854_vm4 = vmmov %vm14828_vm0  ;;  %v4306_v20 = vld [vmem:[#allocation3 + $0x20e] sm:$0xff] }
 0x679   : > { %v9774_v30 = vunpack.i.h.bf16 %v9772_v12  ;;  %v9773_v55 = vunpack.i.l.bf16 %v9772_v12  ;;  %v9779_v29 = vunpack.i.h.bf16 %v13224_v17  ;;  %v9778_v60 = vunpack.i.l.bf16 %v13224_v17  ;;  %8823 = vmatprep.subr.bf16.mxu0 %v10157_v56 }
 0x67a   : > { %10061 = vrot.lane.b32.xlu1 %v10060_v23, %s14797_s4  ;;  %10066 = vrot.lane.b32.xlu0 %v10065_v62, %s14780_s28  ;;  %v13274_v23 = vpack.c.bf16 %v4456_v8, %v4455_v15  ;;  %v4976_v62 = vsel %vm2129_vm6, %v4296_v41, %v9769_v58  ;;  %14839 = vst [vmem:[#allocation27_spill] sm:$0xff] %v13307_v47 }
 0x67b   : > { %5352 = vmatmul.mubr.bf16.gmra.mrb[40].mxu1 %v13211_v26  ;;  %v5016_v45 = vsel %vm14834_vm13, %v4976_v62, %v9774_v30  ;;  %v5015_v34 = vsel %vm14835_vm14, %v4975_v48, %v9773_v55  ;;  %v4459_v48 = vld [vmem:[#allocation3 + $0x1aa] sm:$0xff]  ;;  %vm14855_vm13 = vmmov %vm14828_vm0 }
 0x67c   : > { %8140 = vmatprep.mubr.msk.bf16.mxu1 %vm2129_vm6, %v13213_v14  ;;  %v13237_v38 = vpop.permute.xlu0 %9786  ;;  %v13239_v32 = vpop.permute.xlu1 %9781  ;;  %14833 = vst [vmem:[#allocation33_spill] sm:$0xff] %v13274_v23  ;;  %v5057_v39 = vsel %vm14836_vm9, %v5016_v45, %v9779_v29  ;;  %v5056_v52 = vsel %vm14837_vm10, %v5015_v34, %v9778_v60  ;;  %8824 = vmatpush3.bf16.msra.mxu0 %v10157_v56  ;;  %v4460_v29 = vld [vmem:[#allocation3 + $0x1b2] sm:$0xff]  ;;  %vm14856_vm14 = vmmov %vm14849_vm1  ;;  %vm14858_vm10 = vcmask 130048  }
 0x67d   : > { %v9784_v17 = vunpack.i.h.bf16 %v13239_v32  ;;  %v9783_v28 = vunpack.i.l.bf16 %v13239_v32  ;;  %v13303_v25 = vpack.c.bf16 %v5057_v39, %v5056_v52  ;;  %v9789_v33 = vunpack.i.h.bf16 %v13237_v38  ;;  %8825 = vmatprep.subr.bf16.mxu0 %v10159_v10  ;;  %v4300_v52 = vld [vmem:[#allocation3 + $0x1ae] sm:$0xff]  ;;  %vm14857_vm9 = vmmov %vm14849_vm1 }
 0x67e   : > { %v9788_v32 = vunpack.i.l.bf16 %v13237_v38  ;;  %v5299_v38 = vpop.f32.mrb[13].mxu1 }
 0x67f   : > { %6090 = vmatmul.mubr.bf16.gmra.mrb[56].mxu0 %v13241_v43  ;;  %14838 = vst [vmem:[#allocation8_spill] sm:$0xff] %v13303_v25  ;;  %v4978_v57 = vsel %vm2129_vm6, %v4298_v4, %v9784_v17  ;;  %v4977_v58 = vsel %vm2129_vm6, %v4297_v18, %v9783_v28  ;;  %v13319_v40 = vpop.f32.mrb[14].mxu1  ;;  %v13344_v28 = vpack.c.bf16 %v4460_v29, %v4459_v48  ;;  %v4301_v38 = vld [vmem:[#allocation3 + $0x1c6] sm:$0xff]  ;;  %v4462_v48 = vld [vmem:[#allocation3 + $0x1d2] sm:$0xff] }
 0x680   : > { %v13250_v42 = vpop.permute.xlu0 %9796  ;;  %v13252_v54 = vpop.permute.xlu1 %9791  ;;  %8257 = vmatprep.mubr.msk.bf16.mxu0 %vm2129_vm6, %v13245_v50  ;;  %14841 = vst [vmem:[#allocation29_spill] sm:$0xff] %v13319_v40  ;;  %v5017_v30 = vsel %vm14842_vm15, %v4977_v58, %v9788_v32  ;;  %v5018_v55 = vsel %vm14843_vm2, %v4978_v57, %v9789_v33  ;;  %8826 = vmatpush3.bf16.msra.mxu0 %v10159_v10  ;;  %vm14859_vm15 = vmmov %vm14858_vm10 }
 0x681   : > { %v9794_v6 = vunpack.i.h.bf16 %v13252_v54  ;;  %v9793_v63 = vunpack.i.l.bf16 %v13252_v54  ;;  %v5302_v54 = vpop.f32.mrb[15].mxu1  ;;  %v9799_v9 = vunpack.i.h.bf16 %v13250_v42  ;;  %v9798_v61 = vunpack.i.l.bf16 %v13250_v42  ;;  %v4299_v42 = vld [vmem:[#allocation3 + $0x1a6] sm:$0xff]  ;;  %14847 = vst [vmem:[#allocation31_spill] sm:$0xff] %v13344_v28  ;;  %vm14860_vm2 = vmmov %vm14858_vm10 }
 0x683   : > { %5360 = vmatmul.mubr.bf16.gmra.mrb[44].mxu1 %v13241_v43  ;;  %v5058_v41 = vsel %vm14844_vm8, %v5017_v30, %v9793_v63  ;;  %v5059_v62 = vsel %vm14845_vm3, %v5018_v55, %v9794_v6  ;;  %v4980_v19 = vsel %vm2129_vm6, %v4300_v52, %v9799_v9  ;;  %v4302_v30 = vld [vmem:[#allocation3 + $0x1ce] sm:$0xff]  ;;  %v4303_v52 = vld [vmem:[#allocation3 + $0x1e6] sm:$0xff]  ;;  %vm14861_vm8 = vmmov %vm14860_vm2 }
 0x684   : > { %8141 = vmatprep.mubr.msk.bf16.mxu1 %vm2129_vm6, %v13245_v50  ;;  %v13265_v59 = vpop.permute.xlu0 %9806  ;;  %v13267_v7 = vpop.permute.xlu1 %9801  ;;  %v13342_v17 = vpack.c.bf16 %v5059_v62, %v5058_v41  ;;  %v4461_v62 = vld [vmem:[#allocation3 + $0x1ca] sm:$0xff]  ;;  %vm14862_vm3 = vmmov %vm14828_vm0 }
 0x685   : > { %v9804_v60 = vunpack.i.h.bf16 %v13267_v7  ;;  %v9803_v45 = vunpack.i.l.bf16 %v13267_v7  ;;  %v4979_v7 = vsel %vm2129_vm6, %v4299_v42, %v9798_v61  ;;  %v9809_v22 = vunpack.i.h.bf16 %v13265_v59 }
 0x686   : > { %14846 = vst [vmem:[#allocation30_spill] sm:$0xff] %v13342_v17  ;;  %v9808_v56 = vunpack.i.l.bf16 %v13265_v59 }
 0x687   : > { %6098 = vmatmul.mubr.bf16.gmra.mrb[60].mxu0 %v13272_v5  ;;  %v5020_v33 = vsel %vm14848_vm7, %v4980_v19, %v9804_v60  ;;  %v5019_v32 = vsel %vm14849_vm1, %v4979_v7, %v9803_v45  ;;  %v4304_v19 = vld [vmem:[#allocation3 + $0x1ee] sm:$0xff]  ;;  %vm14863_vm7 = vmmov %vm14828_vm0  ;;  %vm14864_vm1 = vcmask 392192  }
 0x688   : > { %v13283_v24 = vpop.permute.xlu0 %9816  ;;  %v13285_v12 = vpop.permute.xlu1 %9811  ;;  %8258 = vmatprep.mubr.msk.bf16.mxu0 %vm2129_vm6, %v13274_v23  ;;  %v5061_v58 = vsel %vm14828_vm0, %v5020_v33, %v9809_v22  ;;  %v5060_v59 = vsel %vm14850_vm5, %v5019_v32, %v9808_v56  ;;  %v6627_v56 = vld [vmem:[#allocation4 + $0x47] sm:$0xff]  ;;  %vm14865_vm0 = vmmov %vm14860_vm2 }
 0x689   : > { %v9814_v10 = vunpack.i.h.bf16 %v13285_v12  ;;  %v9813_v57 = vunpack.i.l.bf16 %v13285_v12  ;;  %v9819_v6 = vunpack.i.h.bf16 %v13283_v24  ;;  %v9818_v63 = vunpack.i.l.bf16 %v13283_v24  ;;  %vm14867_vm5 = vmmov %vm14865_vm0 }
 0x68a   : > { %v13372_v12 = vpack.c.bf16 %v5061_v58, %v5060_v59  ;;  %v6625_v59 = vld [vmem:[#allocation4 + $0x27] sm:$0xff] }
 0x68b   : > { %5368 = vmatmul.mubr.bf16.gmra.mrb[48].mxu1 %v13272_v5  ;;  %v4982_v9 = vsel %vm2129_vm6, %v4302_v30, %v9814_v10  ;;  %v4981_v61 = vsel %vm2129_vm6, %v4301_v38, %v9813_v57 }
 0x68c   : > { %8142 = vmatprep.mubr.msk.bf16.mxu1 %vm2129_vm6, %v13274_v23  ;;  %v13296_v3 = vpop.permute.xlu0 %9826  ;;  %v13298_v27 = vpop.permute.xlu1 %9821  ;;  %14851 = vst [vmem:[#allocation9_spill] sm:$0xff] %v13372_v12  ;;  %v5021_v7 = vsel %vm14852_vm11, %v4981_v61, %v9818_v63  ;;  %v5022_v22 = vsel %vm14853_vm12, %v4982_v9, %v9819_v6  ;;  %vm14868_vm11 = vmmov %vm14865_vm0 }
 0x68d   : > { %v9829_v41 = vunpack.i.h.bf16 %v13296_v3  ;;  %v9828_v24 = vunpack.i.l.bf16 %v13296_v3  ;;  %v9824_v29 = vunpack.i.h.bf16 %v13298_v27  ;;  %v9823_v60 = vunpack.i.l.bf16 %v13298_v27  ;;  %v6628_v27 = vld [vmem:[#allocation4 + $0x4f] sm:$0xff]  ;;  %vm14869_vm12 = vmmov %vm14865_vm0 }
 0x68e   : > { %v13385_v3 = vpack.c.bf16 %v4462_v48, %v4461_v62 }
 0x68f   : > { %6106 = vmatmul.mubr.bf16.gmra.mrb[64].mxu0 %v13303_v25  ;;  %v4984_v10 = vsel %vm2129_vm6, %v4304_v19, %v9829_v41  ;;  %v4983_v30 = vsel %vm2129_vm6, %v4303_v52, %v9828_v24  ;;  %v5062_v31 = vsel %vm14854_vm4, %v5021_v7, %v9823_v60  ;;  %v5063_v63 = vsel %vm14855_vm13, %v5022_v22, %v9824_v29  ;;  %vm14870_vm4 = vmmov %vm14864_vm1 }
 0x690   : > { %v13321_v15 = vpop.permute.xlu0 %9836  ;;  %v13323_v8 = vpop.permute.xlu1 %9831  ;;  %8259 = vmatprep.mubr.msk.bf16.mxu0 %vm2129_vm6, %v13307_v47  ;;  %vm14871_vm13 = vmmov %vm14857_vm9 }
 0x691   : > { %v9834_v45 = vunpack.i.h.bf16 %v13323_v8  ;;  %v9833_v42 = vunpack.i.l.bf16 %v13323_v8  ;;  %v6626_v8 = vld [vmem:[#allocation4 + $0x2f] sm:$0xff]  ;;  %v9839_v9 = vunpack.i.h.bf16 %v13321_v15  ;;  %v9838_v61 = vunpack.i.l.bf16 %v13321_v15 }
 0x693   : > { %5376 = vmatmul.mubr.bf16.gmra.mrb[52].mxu1 %v13303_v25  ;;  %v5024_v62 = vsel %vm14856_vm14, %v4984_v10, %v9834_v45  ;;  %v5023_v41 = vsel %vm14857_vm9, %v4983_v30, %v9833_v42  ;;  %v13402_v42 = vpack.c.bf16 %v5063_v63, %v5062_v31  ;;  %v6632_v31 = vld [vmem:[#allocation4 + $0x8f] sm:$0xff]  ;;  %vm14872_vm14 = vmmov %vm14864_vm1 }
 0x694   : > { %8143 = vmatprep.mubr.msk.bf16.mxu1 %vm2129_vm6, %v13307_v47  ;;  %v13338_v34 = vpop.permute.xlu0 %9846  ;;  %v13340_v39 = vpop.permute.xlu1 %9841  ;;  %vm14873_vm9 = vmmov %vm14865_vm0 }
 0x697   : > { %6114 = vmatmul.mubr.bf16.gmra.mrb[68].mxu0 %v13342_v17 }
 0x698   : > { %v13353_v18 = vpop.permute.xlu0 %9856  ;;  %v13355_v4 = vpop.permute.xlu1 %9851  ;;  %8260 = vmatprep.mubr.msk.bf16.mxu0 %vm2129_vm6, %v13344_v28 }
 0x69b   : > { %5384 = vmatmul.mubr.bf16.gmra.mrb[56].mxu1 %v13342_v17 }
 0x69c   : > { %8144 = vmatprep.mubr.msk.bf16.mxu1 %vm2129_vm6, %v13344_v28  ;;  %v13368_v55 = vpop.permute.xlu0 %9866  ;;  %v13370_v54 = vpop.permute.xlu1 %9861 }
 0x69f   : > { %6122 = vmatmul.mubr.bf16.gmra.mrb[72].mxu0 %v13372_v12 }
 0x6a0   : > { %v9877_v33 = vpop.permute.xlu0 %9876  ;;  %v9872_v32 = vpop.permute.xlu1 %9871 }
 0x6a1   : > { %v9879_v57 = vunpack.i.h.bf16 %v9877_v33  ;;  %v9878_v58 = vunpack.i.l.bf16 %v9877_v33  ;;  %v9874_v38 = vunpack.i.h.bf16 %v9872_v32  ;;  %v9873_v6 = vunpack.i.l.bf16 %v9872_v32 }
 0x6a3   : > { %5392 = vmatmul.mubr.bf16.gmra.mrb[60].mxu1 %v13372_v12  ;;  %v7024_v48 = vsel %vm14858_vm10, %v6628_v27, %v9879_v57  ;;  %v7023_v19 = vsel %vm14859_vm15, %v6627_v56, %v9878_v58  ;;  %v7022_v24 = vsel %vm14860_vm2, %v6626_v8, %v9874_v38  ;;  %v7021_v60 = vsel %vm14861_vm8, %v6625_v59, %v9873_v6  ;;  %v4463_v27 = vld [vmem:[#allocation3 + $0x1ea] sm:$0xff]  ;;  %v4464_v57 = vld [vmem:[#allocation3 + $0x1f2] sm:$0xff]  ;;  %vm14874_vm10 = vmmov %vm14865_vm0 }
 0x6a4   : > { %8145 = vmatprep.mubr.msk.bf16.mxu1 %vm2129_vm6, %v13385_v3  ;;  %v9887_v29 = vpop.permute.xlu0 %9886  ;;  %v9882_v52 = vpop.permute.xlu1 %9881  ;;  %v5065_v58 = vsel %vm14862_vm3, %v5024_v62, %v9839_v9  ;;  %v5064_v59 = vsel %vm14863_vm7, %v5023_v41, %v9838_v61  ;;  %v4465_v6 = vld [vmem:[#allocation3 + $0x20a] sm:$0xff]  ;;  %v9843_v9 = vunpack.i.l.bf16 %v13340_v39  ;;  %v13415_v62 = vpack.c.bf16 %v4464_v57, %v4463_v27  ;;  %vm14875_vm15 = vmmov %vm14864_vm1 }
 0x6a5   : > { %v9889_v15 = vunpack.i.h.bf16 %v9887_v29  ;;  %v9888_v7 = vunpack.i.l.bf16 %v9887_v29  ;;  %v9884_v45 = vunpack.i.h.bf16 %v9882_v52  ;;  %v9883_v22 = vunpack.i.l.bf16 %v9882_v52  ;;  %v6629_v52 = vld [vmem:[#allocation4 + $0x67] sm:$0xff]  ;;  %vm14876_vm2 = vmmov %vm14871_vm13 }
 0x6a6   : > { %v13419_v61 = vpack.c.bf16 %v5065_v58, %v5064_v59  ;;  %v4305_v57 = vld [vmem:[#allocation3 + $0x206] sm:$0xff]  ;;  %vm14877_vm8 = vmmov %vm14862_vm3 }
 0x6a7   : > { %v7059_v33 = vsel %vm2129_vm6, %v7023_v19, %v9888_v7  ;;  %v7060_v32 = vsel %vm2129_vm6, %v7024_v48, %v9889_v15  ;;  %v7057_v56 = vsel %vm2129_vm6, %v7021_v60, %v9883_v22  ;;  %v7058_v10 = vsel %vm2129_vm6, %v7022_v24, %v9884_v45  ;;  %v4466_v19 = vld [vmem:[#allocation3 + $0x212] sm:$0xff]  ;;  %v6631_v48 = vld [vmem:[#allocation4 + $0x87] sm:$0xff]  ;;  %vm14878_vm7 = vmmov %vm14876_vm2 }
 0x6a8   : > { %v13410_v8 = vpack.c.bf16 %v7060_v32, %v7059_v33  ;;  %v13412_v38 = vpack.c.bf16 %v7058_v10, %v7057_v56  ;;  %v9897_v30 = vpop.permute.xlu0 %9896  ;;  %v9892_v63 = vpop.permute.xlu1 %9891  ;;  %v6630_v24 = vld [vmem:[#allocation4 + $0x6f] sm:$0xff]  ;;  %v13423_v45 = vpack.c.bf16 %v4466_v19, %v4465_v6  ;;  %v9849_v22 = vunpack.i.h.bf16 %v13338_v34 }
 0x6a9   : > { %v9899_v29 = vunpack.i.h.bf16 %v9897_v30  ;;  %v9898_v60 = vunpack.i.l.bf16 %v9897_v30  ;;  %v9894_v15 = vunpack.i.h.bf16 %v9892_v63  ;;  %v9893_v7 = vunpack.i.l.bf16 %v9892_v63 }
 0x6aa   : > { %8827 = vmatprep.mubr.msk.bf16.mxu0 %vm14864_vm1, %v13412_v38  ;;  %14866 = vst [vmem:[#allocation10_spill] sm:$0xff] %v13423_v45  ;;  %v9848_v63 = vunpack.i.l.bf16 %v13338_v34  ;;  %v9844_v6 = vunpack.i.h.bf16 %v13340_v39  ;;  %v4985_v19 = vsel %vm2129_vm6, %v4305_v57, %v9843_v9  ;;  %v6634_v57 = vld [vmem:[#allocation4 + $0xaf] sm:$0xff]  ;;  %vm14879_vm1 = vmmov %vm14876_vm2 }
 0x6ab   : > { %v7028_v41 = vsel %vm14865_vm0, %v6632_v31, %v9899_v29  ;;  %5400 = vmatmul.mubr.bf16.gmra.mrb[64].mxu1 %v13402_v42  ;;  %v7027_v33 = vsel %vm14867_vm5, %v6631_v48, %v9898_v60  ;;  %v7026_v32 = vsel %vm14868_vm11, %v6630_v24, %v9894_v15  ;;  %v7025_v56 = vsel %vm14869_vm12, %v6629_v52, %v9893_v7  ;;  %v4274_v29 = vld [vmem:[#allocation3 + $0xe] sm:$0xff]  ;;  %vm14880_vm5 = vmmov %vm14865_vm0 }
 0x6ac   : > { %8146 = vmatprep.mubr.msk.bf16.mxu1 %vm2129_vm6, %v13415_v62  ;;  %v9907_v10 = vpop.permute.xlu0 %9906  ;;  %v9902_v27 = vpop.permute.xlu1 %9901  ;;  %8828 = vmatmul.mubr.msk.bf16.vlgmr.msra.gmra.mrb[76].mxu0 %vm14870_vm4, %v13410_v8  ;;  %v9859_v48 = vunpack.i.h.bf16 %v13353_v18  ;;  %v9858_v7 = vunpack.i.l.bf16 %v13353_v18  ;;  %vm14881_vm11 = vmmov %vm14870_vm4 }
 0x6ad   : > { %v9909_v58 = vunpack.i.h.bf16 %v9907_v10  ;;  %v9908_v59 = vunpack.i.l.bf16 %v9907_v10  ;;  %v9904_v31 = vunpack.i.h.bf16 %v9902_v27  ;;  %v9903_v30 = vunpack.i.l.bf16 %v9902_v27  ;;  %v6633_v27 = vld [vmem:[#allocation4 + $0xa7] sm:$0xff]  ;;  %vm14883_vm12 = vmmov %vm14862_vm3 }
 0x6ae   : > { %v9853_v10 = vunpack.i.l.bf16 %v13355_v4  ;;  %v4954_v18 = vsel %vm2129_vm6, %v4274_v29, %v9859_v48  ;;  %v6636_v29 = vld [vmem:[#allocation4 + $0xcf] sm:$0xff]  ;;  %vm14884_vm4 = vmmov %vm14862_vm3 }
 0x6af   : > { %v7063_v60 = vsel %vm2129_vm6, %v7027_v33, %v9908_v59  ;;  %v7064_v52 = vsel %vm2129_vm6, %v7028_v41, %v9909_v58  ;;  %v7061_v24 = vsel %vm2129_vm6, %v7025_v56, %v9903_v30  ;;  %v7062_v15 = vsel %vm2129_vm6, %v7026_v32, %v9904_v31  ;;  %v4273_v33 = vld [vmem:[#allocation3 + $0x6] sm:$0xff] }
 0x6b0   : > { %v13443_v34 = vpack.c.bf16 %v7064_v52, %v7063_v60  ;;  %v13445_v39 = vpack.c.bf16 %v7062_v15, %v7061_v24  ;;  %v9922_v9 = vpop.permute.xlu0 %9921  ;;  %v9912_v40 = vpop.permute.xlu1 %9911  ;;  %v4986_v32 = vsel %vm2129_vm6, %v4306_v20, %v9844_v6  ;;  %v9854_v31 = vunpack.i.h.bf16 %v13355_v4  ;;  %v6635_v4 = vld [vmem:[#allocation4 + $0xc7] sm:$0xff] }
 0x6b1   : > { %v9924_v59 = vunpack.i.h.bf16 %v9922_v9  ;;  %v9923_v41 = vunpack.i.l.bf16 %v9922_v9  ;;  %v9914_v58 = vunpack.i.h.bf16 %v9912_v40  ;;  %v9913_v56 = vunpack.i.l.bf16 %v9912_v40 }
 0x6b2   : > { %v5025_v30 = vsel %vm14871_vm13, %v4985_v19, %v9848_v63  ;;  %8831 = vmatprep.mubr.msk.bf16.mxu0 %vm14872_vm14, %v13445_v39  ;;  %v9864_v60 = vunpack.i.h.bf16 %v13370_v54  ;;  %v9863_v52 = vunpack.i.l.bf16 %v13370_v54  ;;  %v4953_v20 = vsel %vm2129_vm6, %v4273_v33, %v9858_v7  ;;  %vm14885_vm13 = vmmov %vm14881_vm11 }
 0x6b3   : > { %v7030_v24 = vsel %vm14873_vm9, %v6634_v57, %v9914_v58  ;;  %v7029_v15 = vsel %vm14874_vm10, %v6633_v27, %v9913_v56  ;;  %5408 = vmatmul.mubr.bf16.gmra.mrb[68].mxu1 %v13419_v61  ;;  %v5026_v19 = vsel %vm14876_vm2, %v4986_v32, %v9849_v22  ;;  %v5066_v48 = vsel %vm14877_vm8, %v5025_v30, %v9853_v10  ;;  %v4433_v27 = vld [vmem:[#allocation3 + $0xa] sm:$0xff]  ;;  %v4434_v57 = vld [vmem:[#allocation3 + $0x12] sm:$0xff]  ;;  %vm14886_vm14 = vmmov %vm14865_vm0 }
 0x6b4   : > { %8147 = vmatprep.mubr.msk.bf16.mxu1 %vm2129_vm6, %v13423_v45  ;;  %v9932_v40 = vpop.permute.xlu0 %9931  ;;  %v9917_v63 = vpop.permute.xlu1 %9916  ;;  %8832 = vmatmul.mubr.msk.bf16.gmra.mrb[80].mxu0 %vm14875_vm15, %v13443_v34  ;;  %v7065_v6 = vsel %vm2129_vm6, %v7029_v15, %v9923_v41  ;;  %v7066_v54 = vsel %vm2129_vm6, %v7030_v24, %v9924_v59  ;;  %v5067_v33 = vsel %vm14862_vm3, %v5026_v19, %v9854_v31  ;;  %v9869_v58 = vunpack.i.h.bf16 %v13368_v55  ;;  %vm14887_vm9 = vmmov %vm14865_vm0 }
 0x6b5   : > { %v9919_v9 = vunpack.i.h.bf16 %v9917_v63  ;;  %v9918_v7 = vunpack.i.l.bf16 %v9917_v63  ;;  %v9868_v56 = vunpack.i.l.bf16 %v13368_v55  ;;  %v13470_v45 = vpack.c.bf16 %v7066_v54, %v7065_v6  ;;  %v6637_v6 = vld [vmem:[#allocation4 + $0xe7] sm:$0xff]  ;;  %v6638_v54 = vld [vmem:[#allocation4 + $0xef] sm:$0xff]  ;;  %vm14888_vm10 = vmmov %vm14879_vm1 }
 0x6b6   : > { %v4994_v41 = vsel %vm14878_vm7, %v4954_v18, %v9864_v60  ;;  %v4993_v59 = vsel %vm14879_vm1, %v4953_v20, %v9863_v52  ;;  %v5075_v24 = vpack.c.bf16 %v4434_v57, %v4433_v27  ;;  %v13478_v31 = vpack.c.bf16 %v5067_v33, %v5066_v48  ;;  %vm14889_vm15 = vmmov %vm14879_vm1 }
 0x6b7   : > { %v7032_v22 = vsel %vm14865_vm0, %v6636_v29, %v9919_v9  ;;  %v7031_v10 = vsel %vm14880_vm5, %v6635_v4, %v9918_v7  ;;  %8835 = vmatprep.mubr.msk.bf16.mxu0 %vm14881_vm11, %v13470_v45  ;;  %v5035_v63 = vsel %vm14883_vm12, %v4994_v41, %v9869_v58  ;;  %v5034_v18 = vsel %vm14884_vm4, %v4993_v59, %v9868_v56  ;;  %v4308_v58 = vld [vmem:[#allocation3 + $0x22e] sm:$0xff]  ;;  %vm14890_vm2 = vmmov %vm14862_vm3 }
 0x6b8   : > { %v9947_v32 = vpop.permute.xlu0 %9946  ;;  %v9927_v30 = vpop.permute.xlu1 %9926  ;;  %14882 = vst [vmem:[#allocation11_spill] sm:$0xff] %v13478_v31  ;;  %v9934_v60 = vunpack.i.h.bf16 %v9932_v40  ;;  %v9933_v52 = vunpack.i.l.bf16 %v9932_v40  ;;  %v5074_v27 = vpack.c.bf16 %v5035_v63, %v5034_v18  ;;  %v4307_v40 = vld [vmem:[#allocation3 + $0x226] sm:$0xff]  ;;  %vm14891_vm8 = vmmov %vm14890_vm2 }
 0x6b9   : > { %v9929_v15 = vunpack.i.h.bf16 %v9927_v30  ;;  %v9928_v55 = vunpack.i.l.bf16 %v9927_v30  ;;  %v9949_v57 = vunpack.i.h.bf16 %v9947_v32  ;;  %v9948_v33 = vunpack.i.l.bf16 %v9947_v32  ;;  %v6640_v32 = vld [vmem:[#allocation4 + $0x10f] sm:$0xff]  ;;  %vm14892_vm3 = vmmov %vm14865_vm0 }
 0x6ba   : > { %v7034_v56 = vsel %vm14886_vm14, %v6638_v54, %v9934_v60  ;;  %v7033_v41 = vsel %vm14887_vm9, %v6637_v6, %v9933_v52  ;;  %v6639_v60 = vld [vmem:[#allocation4 + $0x107] sm:$0xff]  ;;  %vm14893_vm7 = vmmov %vm14865_vm0 }
 0x6bb   : > { %v7067_v20 = vsel %vm2129_vm6, %v7031_v10, %v9928_v55  ;;  %v7068_v4 = vsel %vm2129_vm6, %v7032_v22, %v9929_v15  ;;  %5416 = vmatmul.mubr.bf16.gmra.mrb[72].mxu1 %v13478_v31  ;;  %vm14896_vm1 = vmmov %vm14881_vm11 }
 0x6bc   : > { %v13485_v19 = vpack.c.bf16 %v7068_v4, %v7067_v20  ;;  %v9952_v48 = vpop.permute.xlu0 %9951  ;;  %v9937_v29 = vpop.permute.xlu1 %9936  ;;  %8158 = vmatprep.mubr.msk.bf16.mxu1 %vm2129_vm6, %v5075_v24  ;;  %v10150_v24 = vld [vmem:[%s14634_s12 + $0xa0] sm:$0xff]   ;;  %vm14897_vm5 = vmmov %vm14865_vm0 }
 0x6bd   : > { %v9939_v9 = vunpack.i.h.bf16 %v9937_v29  ;;  %v9938_v7 = vunpack.i.l.bf16 %v9937_v29  ;;  %v9954_v10 = vunpack.i.h.bf16 %v9952_v48  ;;  %v9953_v30 = vunpack.i.l.bf16 %v9952_v48  ;;  %vm14898_vm11 = vmmov %vm14896_vm1 }
 0x6be   : > { %8836 = vmatmul.mubr.msk.bf16.gmra.mrb[84].mxu0 %vm14885_vm13, %v13485_v19  ;;  %vm14899_vm12 = vmmov %vm14865_vm0 }
 0x6bf   : > { %v4988_v59 = vsel %vm2129_vm6, %v4308_v58, %v9939_v9  ;;  %v4987_v22 = vsel %vm2129_vm6, %v4307_v40, %v9938_v7  ;;  %vm14900_vm4 = vmmov %vm14865_vm0 }
 0x6c0   : > { %v9942_v15 = vpop.permute.xlu1 %9941  ;;  %v9957_v55 = vpop.permute.xlu0 %9956  ;;  %v5027_v63 = vsel %vm14888_vm10, %v4987_v22, %v9948_v33  ;;  %v5028_v18 = vsel %vm14889_vm15, %v4988_v59, %v9949_v57  ;;  %v10151_v57 = vld [vmem:[%s14634_s12 + $0xa8] sm:$0xff]   ;;  %v14895_v22 = vmov 0   ;;  %vm14901_vm13 = vmmov %vm14896_vm1 }
 0x6c1   : > { %v9944_v20 = vunpack.i.h.bf16 %v9942_v15  ;;  %v9943_v52 = vunpack.i.l.bf16 %v9942_v15  ;;  %v9959_v4 = vunpack.i.h.bf16 %v9957_v55  ;;  %v9958_v6 = vunpack.i.l.bf16 %v9957_v55  ;;  %v10152_v55 = vld [vmem:[%s14634_s12 + $0xb0] sm:$0xff]   ;;  %vm14902_vm14 = vmmov %vm14865_vm0 }
 0x6c2   : > { %v5068_v54 = vsel %vm14890_vm2, %v5027_v63, %v9953_v30  ;;  %v5069_v48 = vsel %vm14891_vm8, %v5028_v18, %v9954_v10  ;;  %v6641_v10 = vld [vmem:[#allocation4 + $0x127] sm:$0xff]  ;;  %v6642_v30 = vld [vmem:[#allocation4 + $0x12f] sm:$0xff]  ;;  %vm14903_vm9 = vmmov %vm14865_vm0 }
 0x6c3   : > { %5520 = vmatmul.mubr.bf16.vlgmr.msra.gmra.mrb[76].mxu1 %v5074_v27  ;;  %v7036_v29 = vsel %vm14892_vm3, %v6640_v32, %v9944_v20  ;;  %v7069_v9 = vsel %vm2129_vm6, %v7033_v41, %v9958_v6  ;;  %v7070_v7 = vsel %vm2129_vm6, %v7034_v56, %v9959_v4  ;;  %v7035_v33 = vsel %vm14893_vm7, %v6639_v60, %v9943_v52  ;;  %v6643_v4 = vld [vmem:[#allocation4 + $0x147] sm:$0xff]  ;;  %v6644_v6 = vld [vmem:[#allocation4 + $0x14f] sm:$0xff]  ;;  %vm14904_vm10 = vmmov %vm14896_vm1 }
 0x6c4   : > { %5733 = vmatpush1.bf16.msra.mxu1 %v10150_v24  ;;  %8159 = vmatprep.mubr.msk.bf16.mxu1 %vm2129_vm6, %v12541_v36  ;;  %v13510_v40 = vpack.c.bf16 %v7070_v7, %v7069_v9  ;;  %v9962_v58 = vpop.permute.xlu1 %9961  ;;  %v9967_v27 = vpop.permute.xlu0 %9966  ;;  %v13512_v59 = vpack.c.bf16 %v5069_v48, %v5068_v54  ;;  %v10163_v7 = vld [vmem:[%s14636_s14] sm:$0xff]   ;;  %vm14905_vm15 = vmmov %vm14865_vm0 }
 0x6c5   : > { %5734 = vmatprep.subr.bf16.mxu1 %v14895_v22  ;;  %v9964_v41 = vunpack.i.h.bf16 %v9962_v58  ;;  %v9963_v56 = vunpack.i.l.bf16 %v9962_v58  ;;  %v9969_v24 = vunpack.i.h.bf16 %v9967_v27  ;;  %v9968_v36 = vunpack.i.l.bf16 %v9967_v27  ;;  %v10153_v58 = vld [vmem:[%s14634_s12 + $0xb8] sm:$0xff]   ;;  %8859 = vmatprep.subr.bf16.mxu0 %v10163_v7  ;;  %vm14906_vm2 = vmmov %vm14865_vm0 }
 0x6c6   : > { %14894 = vst [vmem:[#allocation12_spill] sm:$0xff] %v13512_v59  ;;  %8839 = vmatprep.mubr.msk.bf16.mxu0 %vm14896_vm1, %v13510_v40  ;;  %8860 = vmatpush3.bf16.msra.mxu0 %v10163_v7  ;;  %v6648_v7 = vld [vmem:[#allocation4 + $0x18f] sm:$0xff]  ;;  %vm14907_vm8 = vmmov %vm14896_vm1 }
 0x6c7   : > { %v7071_v32 = vsel %vm2129_vm6, %v7035_v33, %v9963_v56  ;;  %v7072_v15 = vsel %vm2129_vm6, %v7036_v29, %v9964_v41  ;;  %v7038_v18 = vsel %vm14865_vm0, %v6642_v30, %v9969_v24  ;;  %v7037_v60 = vsel %vm14897_vm5, %v6641_v10, %v9968_v36  ;;  %v6645_v36 = vld [vmem:[#allocation4 + $0x167] sm:$0xff]  ;;  %vm14908_vm3 = vmmov %vm14865_vm0 }
 0x6c8   : > { %5735 = vmatpush1.bf16.msra.mxu1 %v10151_v57  ;;  %v13522_v63 = vpack.c.bf16 %v7072_v15, %v7071_v32  ;;  %v9972_v20 = vpop.permute.xlu1 %9971  ;;  %v9977_v52 = vpop.permute.xlu0 %9976  ;;  %v6646_v32 = vld [vmem:[#allocation4 + $0x16f] sm:$0xff]  ;;  %vm14909_vm7 = vmmov %vm14865_vm0 }
 0x6c9   : > { %5736 = vmatprep.subr.bf16.mxu1 %v14895_v22  ;;  %v9974_v54 = vunpack.i.h.bf16 %v9972_v20  ;;  %v9973_v48 = vunpack.i.l.bf16 %v9972_v20  ;;  %v9979_v29 = vunpack.i.h.bf16 %v9977_v52  ;;  %v9978_v9 = vunpack.i.l.bf16 %v9977_v52  ;;  %v10154_v52 = vld [vmem:[%s14634_s12 + $0xc0] sm:$0xff]   ;;  %vm14910_vm5 = vmmov %vm14865_vm0 }
 0x6ca   : > { %8840 = vmatmul.mubr.msk.bf16.gmra.mrb[88].mxu0 %vm14898_vm11, %v13522_v63  ;;  %vm14911_vm11 = vmmov %vm14896_vm1 }
 0x6cb   : > { %5528 = vmatmul.mubr.bf16.gmra.mrb[80].mxu1 %v12559_v53  ;;  %v7073_v57 = vsel %vm2129_vm6, %v7037_v60, %v9978_v9  ;;  %v7074_v33 = vsel %vm2129_vm6, %v7038_v18, %v9979_v29  ;;  %v7040_v27 = vsel %vm14899_vm12, %v6644_v6, %v9974_v54  ;;  %v7039_v41 = vsel %vm14900_vm4, %v6643_v4, %v9973_v48  ;;  %v10164_v18 = vld [vmem:[%s14636_s14 + $0x8] sm:$0xff]   ;;  %vm14912_vm12 = vmmov %vm14896_vm1 }
 0x6cc   : > { %8160 = vmatprep.mubr.msk.bf16.mxu1 %vm2129_vm6, %v12945_v16  ;;  %5737 = vmatpush1.bf16.msra.mxu1 %v10152_v55  ;;  %v13542_v56 = vpack.c.bf16 %v7074_v33, %v7073_v57  ;;  %v9982_v10 = vpop.permute.xlu1 %9981  ;;  %v9987_v53 = vpop.permute.xlu0 %9986  ;;  %v6647_v9 = vld [vmem:[#allocation4 + $0x187] sm:$0xff]  ;;  %vm14913_vm4 = vcmask 523264  }
 0x6cd   : > { %5738 = vmatprep.subr.bf16.mxu1 %v14895_v22  ;;  %v9984_v30 = vunpack.i.h.bf16 %v9982_v10  ;;  %v9983_v24 = vunpack.i.l.bf16 %v9982_v10  ;;  %v9989_v15 = vunpack.i.h.bf16 %v9987_v53  ;;  %v9988_v55 = vunpack.i.l.bf16 %v9987_v53  ;;  %8861 = vmatprep.subr.bf16.mxu0 %v10164_v18 }
 0x6ce   : > { %8843 = vmatprep.mubr.msk.bf16.mxu0 %vm14901_vm13, %v13542_v56  ;;  %8862 = vmatpush3.bf16.msra.mxu0 %v10164_v18  ;;  %v6651_v18 = vld [vmem:[#allocation4 + $0x1c7] sm:$0xff]  ;;  %vm14915_vm13 = vmmov %vm14913_vm4 }
 0x6cf   : > { %v7075_v60 = vsel %vm2129_vm6, %v7039_v41, %v9983_v24  ;;  %v7076_v20 = vsel %vm2129_vm6, %v7040_v27, %v9984_v30  ;;  %v7042_v6 = vsel %vm14902_vm14, %v6646_v32, %v9989_v15  ;;  %v7041_v54 = vsel %vm14903_vm9, %v6645_v36, %v9988_v55  ;;  %v10165_v41 = vld [vmem:[%s14636_s14 + $0x10] sm:$0xff]   ;;  %v10155_v30 = vld [vmem:[%s14634_s12 + $0xc8] sm:$0xff]   ;;  %vm14917_vm14 = vmmov %vm14865_vm0 }
 0x6d0   : > { %5739 = vmatpush1.bf16.msra.mxu1 %v10153_v58  ;;  %v13555_v4 = vpack.c.bf16 %v7076_v20, %v7075_v60  ;;  %v9992_v48 = vpop.permute.xlu1 %9991  ;;  %v9997_v29 = vpop.permute.xlu0 %9996  ;;  %8863 = vmatprep.subr.bf16.mxu0 %v10165_v41  ;;  %vm14918_vm9 = vmmov %vm14865_vm0 }
 0x6d1   : > { %5740 = vmatprep.subr.bf16.mxu1 %v14895_v22  ;;  %v9994_v57 = vunpack.i.h.bf16 %v9992_v48  ;;  %v9993_v33 = vunpack.i.l.bf16 %v9992_v48  ;;  %v9999_v58 = vunpack.i.h.bf16 %v9997_v29  ;;  %v9998_v27 = vunpack.i.l.bf16 %v9997_v29 }
 0x6d2   : > { %8844 = vmatmul.mubr.msk.bf16.gmra.mrb[92].mxu0 %vm14904_vm10, %v13555_v4  ;;  %vm14919_vm10 = vmmov %vm14865_vm0 }
 0x6d3   : > { %5536 = vmatmul.mubr.bf16.gmra.mrb[84].mxu1 %v13082_v21  ;;  %v7077_v10 = vsel %vm2129_vm6, %v7041_v54, %v9998_v27  ;;  %v7078_v53 = vsel %vm2129_vm6, %v7042_v6, %v9999_v58  ;;  %v7044_v24 = vsel %vm14905_vm15, %v6648_v7, %v9994_v57  ;;  %v7043_v36 = vsel %vm14906_vm2, %v6647_v9, %v9993_v33  ;;  %v6649_v6 = vld [vmem:[#allocation4 + $0x1a7] sm:$0xff]  ;;  %v6650_v54 = vld [vmem:[#allocation4 + $0x1af] sm:$0xff]  ;;  %vm14920_vm15 = vmmov %vm14865_vm0 }
 0x6d4   : > { %8161 = vmatprep.mubr.msk.bf16.mxu1 %vm2129_vm6, %v12947_v11  ;;  %5741 = vmatpush1.bf16.msra.mxu1 %v10154_v52  ;;  %v13575_v32 = vpack.c.bf16 %v7078_v53, %v7077_v10  ;;  %v10002_v15 = vpop.permute.xlu1 %10001  ;;  %v10007_v55 = vpop.permute.xlu0 %10006  ;;  %v10158_v7 = vld [vmem:[%s14634_s12 + $0xd0] sm:$0xff]   ;;  %vm14921_vm2 = vmmov %vm14896_vm1 }
 0x6d5   : > { %5742 = vmatprep.subr.bf16.mxu1 %v14895_v22  ;;  %v10004_v60 = vunpack.i.h.bf16 %v10002_v15  ;;  %v10003_v20 = vunpack.i.l.bf16 %v10002_v15  ;;  %v10009_v48 = vunpack.i.h.bf16 %v10007_v55  ;;  %v10008_v52 = vunpack.i.l.bf16 %v10007_v55  ;;  %v6652_v53 = vld [vmem:[#allocation4 + $0x1cf] sm:$0xff]  ;;  %8864 = vmatpush3.bf16.msra.mxu0 %v10165_v41  ;;  %v4351_v55 = vld [vmem:[#allocation3 + $0x267] sm:$0xff] }
 0x6d6   : > { %8847 = vmatprep.mubr.msk.bf16.mxu0 %vm14907_vm8, %v13575_v32  ;;  %vm14922_vm8 = vmmov %vm14865_vm0 }
 0x6d7   : > { %v7079_v29 = vsel %vm2129_vm6, %v7043_v36, %v10003_v20  ;;  %v7080_v9 = vsel %vm2129_vm6, %v7044_v24, %v10004_v60  ;;  %v7046_v33 = vsel %vm14908_vm3, %v6650_v54, %v10009_v48  ;;  %v7045_v58 = vsel %vm14909_vm7, %v6649_v6, %v10008_v52  ;;  %v4352_v60 = vld [vmem:[#allocation3 + $0x26f] sm:$0xff]  ;;  %v10160_v6 = vld [vmem:[%s14634_s12 + $0xd8] sm:$0xff]   ;;  %vm14923_vm3 = vmmov %vm14865_vm0 }
 0x6d8   : > { %5743 = vmatpush1.bf16.msra.mxu1 %v10155_v30  ;;  %v13585_v57 = vpack.c.bf16 %v7080_v9, %v7079_v29  ;;  %v10012_v27 = vpop.permute.xlu1 %10011  ;;  %v10017_v10 = vpop.permute.xlu0 %10016  ;;  %v10070_v20 = vpack.i.bf16 %v4352_v60, %v4351_v55  ;;  %v4392_v55 = vld [vmem:[#allocation3 + $0x270] sm:$0xff]  ;;  %vm14924_vm7 = vmmov %vm14896_vm1 }
 0x6d9   : > { %5744 = vmatprep.subr.bf16.mxu1 %v14895_v22  ;;  %v10014_v36 = vunpack.i.h.bf16 %v10012_v27  ;;  %v10013_v15 = vunpack.i.l.bf16 %v10012_v27  ;;  %v10019_v24 = vunpack.i.h.bf16 %v10017_v10  ;;  %v10018_v30 = vunpack.i.l.bf16 %v10017_v10  ;;  %v4391_v10 = vld [vmem:[#allocation3 + $0x268] sm:$0xff] }
 0x6da   : > { %8848 = vmatmul.mubr.msk.bf16.gmra.mrb[96].mxu0 %vm14896_vm1, %v13585_v57  ;;  %v4431_v60 = vld [vmem:[#allocation3 + $0x269] sm:$0xff]  ;;  %10071 = vrot.lane.b32.xlu1 %v10070_v20, %s14780_s28 }
 0x6db   : > { %5544 = vmatmul.mubr.bf16.gmra.mrb[88].mxu1 %v13095_v49  ;;  %v7081_v54 = vsel %vm2129_vm6, %v7045_v58, %v10018_v30  ;;  %v7082_v48 = vsel %vm2129_vm6, %v7046_v33, %v10019_v24  ;;  %v7048_v41 = vsel %vm14865_vm0, %v6652_v53, %v10014_v36  ;;  %v7047_v52 = vsel %vm14910_vm5, %v6651_v18, %v10013_v15  ;;  %v4309_v33 = vld [vmem:[#allocation3 + $0x246] sm:$0xff]  ;;  %v4310_v24 = vld [vmem:[#allocation3 + $0x24e] sm:$0xff]  ;;  %vm14925_vm0 = vmmov %vm14896_vm1 }
 0x6dc   : > { %8162 = vmatprep.mubr.msk.bf16.mxu1 %vm2129_vm6, %v13097_v44  ;;  %5745 = vmatpush1.bf16.msra.mxu1 %v10158_v7  ;;  %v13602_v29 = vpack.c.bf16 %v7082_v48, %v7081_v54  ;;  %v10022_v9 = vpop.permute.xlu1 %10021  ;;  %v10027_v27 = vpop.permute.xlu0 %10026  ;;  %v4432_v7 = vld [vmem:[#allocation3 + $0x271] sm:$0xff]  ;;  %v10075_v18 = vpack.i.bf16 %v4392_v55, %v4391_v10  ;;  %v10161_v54 = vld [vmem:[%s14634_s12 + $0xe0] sm:$0xff]   ;;  %v6693_v10 = vld [vmem:[#allocation4 + $0x228] sm:$0xff] }
 0x6dd   : > { %5746 = vmatprep.subr.bf16.mxu1 %v14895_v22  ;;  %v10024_v58 = vunpack.i.h.bf16 %v10022_v9  ;;  %v10023_v30 = vunpack.i.l.bf16 %v10022_v9  ;;  %v10029_v59 = vunpack.i.h.bf16 %v10027_v27  ;;  %v10028_v31 = vunpack.i.l.bf16 %v10027_v27  ;;  %v6694_v55 = vld [vmem:[#allocation4 + $0x230] sm:$0xff]  ;;  %vm14926_vm5 = vmmov %vm14925_vm0 }
 0x6de   : > { %8851 = vmatprep.mubr.msk.bf16.mxu0 %vm14911_vm11, %v13602_v29  ;;  %v10080_v53 = vpack.i.bf16 %v4432_v7, %v4431_v60  ;;  %10076 = vrot.lane.b32.xlu0 %v10075_v18, %s14776_s20  ;;  %v6730_v60 = vld [vmem:[#allocation4 + $0x231] sm:$0xff]  ;;  %vm14927_vm11 = vmmov %vm14925_vm0  ;;  %s14400_s20 = scalar_lea.vmem [#allocation5], %s7944_s3  ;;  %s10266_s3 = smov [#allocation5]  }
 0x6df   : > { %v7083_v36 = vsel %vm2129_vm6, %v7047_v52, %v10023_v30  ;;  %v7084_v15 = vsel %vm2129_vm6, %v7048_v41, %v10024_v58  ;;  %v4990_v9 = vsel %vm2129_vm6, %v4310_v24, %v10029_v59  ;;  %v4989_v20 = vsel %vm2129_vm6, %v4309_v33, %v10028_v31  ;;  %v6729_v52 = vld [vmem:[#allocation4 + $0x229] sm:$0xff] }
 0x6e0   : > { %5747 = vmatpush1.bf16.msra.mxu1 %v10160_v6  ;;  %v13613_v48 = vpack.c.bf16 %v7084_v15, %v7083_v36  ;;  %v10032_v27 = vpop.permute.xlu1 %10031  ;;  %v10037_v44 = vpop.permute.xlu0 %10036  ;;  %10081 = vrot.lane.b32.xlu1 %v10080_v53, %s14796_s29  ;;  %v10085_v59 = vpack.i.bf16 %v6694_v55, %v6693_v10  ;;  %v10090_v58 = vpack.i.bf16 %v6730_v60, %v6729_v52  ;;  %v10162_v33 = vld [vmem:[%s14634_s12 + $0xe8] sm:$0xff]   ;;  %s8389_s29 = sshll.u32 %s10375_s25, 12  ;;  %s14581_s25 = scalar_lea.sflag [#allocation6], %s523_s2 }
 0x6e1   : > { %5748 = vmatprep.subr.bf16.mxu1 %v14895_v22  ;;  %v10034_v41 = vunpack.i.h.bf16 %v10032_v27  ;;  %v10033_v6 = vunpack.i.l.bf16 %v10032_v27  ;;  %v6653_v24 = vld [vmem:[#allocation4 + $0x1e7] sm:$0xff]  ;;  %v10039_v7 = vunpack.i.h.bf16 %v10037_v44  ;;  %v10038_v18 = vunpack.i.l.bf16 %v10037_v44  ;;  %v6654_v15 = vld [vmem:[#allocation4 + $0x1ef] sm:$0xff]  ;;  %s14570_s26 = scalar_lea.hbm %s14638_s16, %s8389_s29  ;;  %s10197_s29 = sshll.u32 %s10266_s3, 4  ;;  %s10198_s29 = int_to_ptr.vmem [resolvable:$false] %s10197_s29 }
 0x6e2   : > { %8852 = vmatmul.mubr.msk.bf16.gmra.mrb[100].mxu0 %vm14912_vm12, %v13613_v48  ;;  %10086 = vrot.lane.b32.xlu0 %v10085_v59, %s14797_s4  ;;  %vm14928_vm12 = vmmov %vm14925_vm0  ;;  %s10199_s4 = scalar_lea.vmem %s10198_s29, 8192 }
 0x6e3   : > { %5552 = vmatmul.mubr.bf16.gmra.mrb[92].mxu1 %v13113_v13  ;;  %v13624_v31 = vsel %vm14913_vm4, %v4990_v9, %v10034_v41  ;;  %v13627_v30 = vsel %vm14915_vm13, %v4989_v20, %v10033_v6  ;;  %v6655_v9 = vld [vmem:[#allocation4 + $0x207] sm:$0xff]  ;;  %v6656_v20 = vld [vmem:[#allocation4 + $0x20f] sm:$0xff]  ;;  %v7049_v55 = vsel %vm14918_vm9, %v6653_v24, %v10038_v18  ;;  %vm14929_vm4 = vmmov %vm14925_vm0 }
 0x6e4   : > { %14914 = vst [vmem:[#allocation13_spill] sm:$0xff] %v13624_v31  ;;  %14916 = vst [vmem:[#allocation14_spill] sm:$0xff] %v13627_v30  ;;  %8163 = vmatprep.mubr.msk.bf16.mxu1 %vm2129_vm6, %v13117_v46  ;;  %5749 = vmatpush1.bf16.msra.mxu1 %v10161_v54  ;;  %v13634_v53 = vpop.permute.xlu1 %10041  ;;  %v10047_v36 = vpop.permute.xlu0 %10046  ;;  %v7050_v54 = vsel %vm14917_vm14, %v6654_v15, %v10039_v7  ;;  %v6623_v15 = vld [vmem:[#allocation4 + $0x7] sm:$0xff] }
 0x6e5   : > { %5750 = vmatprep.subr.bf16.mxu1 %v14895_v22  ;;  %v10049_v27 = vunpack.i.h.bf16 %v10047_v36  ;;  %v10048_v10 = vunpack.i.l.bf16 %v10047_v36  ;;  %10091 = vrot.lane.b32.xlu1 %v10090_v58, %s14780_s28  ;;  %vm14930_vm13 = vmmov %vm14925_vm0  ;;  %s7869_s28 = sshll.u32 %s14400_s20, 4  ;;  %s14572_s28 = int_to_ptr.vmem [resolvable:$true] %s7869_s28 }
 0x6e6   : > { %vm14931_vm14 = vmmov %vm14925_vm0  ;;  %s10193_s18 = scalar_lea.vmem %s14572_s28, 4096  ;;  %p10200_p0 = scmp.lt.s32.totalorder %s14572_s28, %s10198_s29 }
 0x6e7   : > { %v7052_v44 = vsel %vm14919_vm10, %v6656_v20, %v10049_v27  ;;  %v7051_v41 = vsel %vm14920_vm15, %v6655_v9, %v10048_v10  ;;  %v6624_v9 = vld [vmem:[#allocation4 + $0xf] sm:$0xff]  ;;  %vm14932_vm9 = vmmov %vm14925_vm0  ;;  %p10194_p11 = scmp.ne.s32.totalorder %s14572_s28, %s10193_s18  ;;  %p10201_p1 = scmp.lt.s32.totalorder %s10199_s4, %s10193_s18 }
 0x6e8   : > { %5751 = vmatpush1.bf16.msra.mxu1 %v10162_v33  ;;  %v10052_v6 = vpop.permute.xlu1 %10051  ;;  %v10057_v52 = vpop.permute.xlu0 %10056  ;;  %vm14933_vm10 = vmmov %vm14925_vm0 }
 0x6e9   : > { %8953 = vmatprep.subr.bf16.mxu1 %v14895_v22  ;;  %v10054_v60 = vunpack.i.h.bf16 %v10052_v6  ;;  %v10053_v31 = vunpack.i.l.bf16 %v10052_v6  ;;  %v10059_v36 = vunpack.i.h.bf16 %v10057_v52  ;;  %v10058_v30 = vunpack.i.l.bf16 %v10057_v52  ;;  %vm14934_vm15 = vmmov %vm14925_vm0  ;;  %p10195_p12 = pnand %p10194_p11, %p10392_p5  ;;  %p10202_p2 = por %p10201_p1, %p10200_p0 }
 0x6eb   : > { %5560 = vmatmul.mubr.bf16.gmra.mrb[96].mxu1 %v13137_v2  ;;  %v7086_v59 = vsel %vm2129_vm6, %v7050_v54, %v10054_v60  ;;  %v7085_v58 = vsel %vm2129_vm6, %v7049_v55, %v10053_v31  ;;  %v7087_v33 = vsel %vm2129_vm6, %v7051_v41, %v10058_v30  ;;  %v7088_v24 = vsel %vm2129_vm6, %v7052_v44, %v10059_v36  ;;  %v10167_v60 = vld [vmem:[%s14636_s14 + $0x38] sm:$0xff]   ;;  %v10168_v36 = vld [vmem:[%s14636_s14 + $0x40] sm:$0xff]   ;;  %p10196_p13 = pneg %p10195_p12 }
 0x6ec   : > { %8164 = vmatprep.mubr.msk.bf16.mxu1 %vm2129_vm6, %v13135_v37  ;;  %v13651_v7 = vpack.c.bf16 %v7086_v59, %v7085_v58  ;;  %v13653_v18 = vpack.c.bf16 %v7088_v24, %v7087_v33  ;;  %v10062_v20 = vpop.permute.xlu1 %10061  ;;  %v10067_v27 = vpop.permute.xlu0 %10066 }
 0x6ed   : > { %v10064_v10 = vunpack.i.h.bf16 %v10062_v20  ;;  %v10063_v6 = vunpack.i.l.bf16 %v10062_v20  ;;  %v10069_v54 = vunpack.i.h.bf16 %v10067_v27  ;;  %v10068_v52 = vunpack.i.l.bf16 %v10067_v27  ;;  %p10203_p3 = pnand %p10202_p2, %p10196_p13 }
 0x6ee   : > { %8855 = vmatprep.mubr.msk.bf16.mxu0 %vm14921_vm2, %v13651_v7  ;;  %vm14935_vm2 = vmmov %vm14925_vm0 }
 0x6ef   : > { %v7020_v31 = vsel %vm14922_vm8, %v6624_v9, %v10064_v10  ;;  %v7019_v30 = vsel %vm14923_vm3, %v6623_v15, %v10063_v6  ;;  %8856 = vmatmul.mubr.msk.bf16.gmra.mrb[104].mxu0 %vm14924_vm7, %v13653_v18  ;;  %vm14936_vm8 = vmmov %vm14925_vm0 }
 0x6f0   : > { %v7055_v55 = vsel %vm2129_vm6, %v7019_v30, %v10068_v52  ;;  %v7056_v44 = vsel %vm2129_vm6, %v7020_v31, %v10069_v54  ;;  %vm14938_vm3 = vmmov %vm14925_vm0 }
 0x6f1   : > { %v7091_v41 = vpack.c.bf16 %v7056_v44, %v7055_v55  ;;  %vm14939_vm7 = vmmov %vm14925_vm0 }
 0x6f3   : > { %5568 = vmatmul.mubr.bf16.gmra.mrb[100].mxu1 %v13157_v51  ;;  %8865 = vmatprep.mubr.msk.bf16.mxu0 %vm14896_vm1, %v7091_v41  ;;  %vm14942_vm1 = vmmov %vm14925_vm0 }
 0x6f4   : > { %8165 = vmatprep.mubr.msk.bf16.mxu1 %vm2129_vm6, %v13159_v1 }
 0x6f7   : > { %8866 = vmatmul.mubr.msk.bf16.vlgmr.msra.gmra.mrb[76].mxu0 %vm14925_vm0, %v13412_v38  ;;  %v10166_v38 = vld [vmem:[%s14636_s14 + $0x30] sm:$0xff]  }
 0x6f8   : > { %8869 = vmatprep.mubr.msk.bf16.mxu0 %vm14926_vm5, %v13410_v8  ;;  %8897 = vmatprep.subr.bf16.mxu0 %v10166_v38  ;;  %vm14945_vm5 = vmmov %vm14925_vm0 }
 0x6f9   : > { %8898 = vmatpush3.bf16.msra.mxu0 %v10166_v38 }
 0x6fa   : > { %8899 = vmatprep.subr.bf16.mxu0 %v10167_v60 }
 0x6fb   : > { %5576 = vmatmul.mubr.bf16.gmra.mrb[104].mxu1 %v13183_v0 }
 0x6fc   : > { %8166 = vmatprep.mubr.msk.bf16.mxu1 %vm2129_vm6, %v13181_v35 }
 0x6fd   : > { %8900 = vmatpush3.bf16.msra.mxu0 %v10167_v60 }
 0x6fe   : > { %8901 = vmatprep.subr.bf16.mxu0 %v10168_v36 }
 0x6ff   : > { %8870 = vmatmul.mubr.msk.bf16.gmra.mrb[80].mxu0 %vm14927_vm11, %v13445_v39  ;;  %vm14946_vm11 = vmmov %vm14925_vm0 }
 0x700   : > { %8873 = vmatprep.mubr.msk.bf16.mxu0 %vm14928_vm12, %v13443_v34  ;;  %vm14949_vm12 = vmmov %vm14925_vm0 }
 0x701   : > { %8902 = vmatpush3.bf16.msra.mxu0 %v10168_v36 }
 0x703   : > { %5584 = vmatmul.mubr.bf16.gmra.mrb[108].mxu1 %v13211_v26 }
 0x704   : > { %8167 = vmatprep.mubr.msk.bf16.mxu1 %vm2129_vm6, %v13213_v14 }
 0x707   : > { %8874 = vmatmul.mubr.msk.bf16.gmra.mrb[84].mxu0 %vm14929_vm4, %v13470_v45  ;;  %vm14950_vm4 = vmmov %vm14925_vm0 }
 0x708   : > { %8877 = vmatprep.mubr.msk.bf16.mxu0 %vm14930_vm13, %v13485_v19  ;;  %vm14953_vm13 = vmmov %vm14925_vm0 }
 0x70b   : > { %5592 = vmatmul.mubr.bf16.gmra.mrb[112].mxu1 %v13241_v43 }
 0x70c   : > { %8168 = vmatprep.mubr.msk.bf16.mxu1 %vm2129_vm6, %v13245_v50 }
 0x70f   : > { %8878 = vmatmul.mubr.msk.bf16.gmra.mrb[88].mxu0 %vm14931_vm14, %v13510_v40  ;;  %vm14954_vm14 = vmmov %vm14925_vm0 }
 0x710   : > { %8881 = vmatprep.mubr.msk.bf16.mxu0 %vm14932_vm9, %v13522_v63  ;;  %vm14958_vm9 = vmmov %vm14925_vm0 }
 0x713   : > { %5600 = vmatmul.mubr.bf16.gmra.mrb[116].mxu1 %v13272_v5 }
 0x714   : > { %8169 = vmatprep.mubr.msk.bf16.mxu1 %vm2129_vm6, %v13274_v23 }
 0x717   : > { %8882 = vmatmul.mubr.msk.bf16.gmra.mrb[92].mxu0 %vm14933_vm10, %v13542_v56  ;;  %vm14959_vm10 = vmmov %vm14925_vm0 }
 0x718   : > { %8885 = vmatprep.mubr.msk.bf16.mxu0 %vm14934_vm15, %v13555_v4  ;;  %vm14962_vm15 = vcmask 523264  }
 0x71b   : > { %5608 = vmatmul.mubr.bf16.gmra.mrb[120].mxu1 %v13303_v25 }
 0x71c   : > { %8170 = vmatprep.mubr.msk.bf16.mxu1 %vm2129_vm6, %v13307_v47 }
 0x71e   : > { %v13711_v59 = vpop.f32.mrb[16].mxu1 }
 0x71f   : > { %v5307_v58 = vpop.f32.mrb[17].mxu1  ;;  %8886 = vmatmul.mubr.msk.bf16.gmra.mrb[96].mxu0 %vm14935_vm2, %v13575_v32  ;;  %vm14963_vm2 = vmmov %vm14962_vm15 }
 0x720   : > { %v13715_v33 = vpop.f32.mrb[18].mxu1  ;;  %8889 = vmatprep.mubr.msk.bf16.mxu0 %vm14936_vm8, %v13585_v57  ;;  %vm14964_vm8 = vcmask 785408  }
 0x721   : > { %v5310_v24 = vpop.f32.mrb[19].mxu1 }
 0x722   : > { %v13719_v15 = vpop.f32.mrb[32].mxu0 }
 0x723   : > { %5616 = vmatmul.mubr.bf16.gmra.mrb[124].mxu1 %v13342_v17  ;;  %v6045_v9 = vpop.f32.mrb[33].mxu0 }
 0x724   : > { %8171 = vmatprep.mubr.msk.bf16.mxu1 %vm2129_vm6, %v13344_v28  ;;  %v13724_v20 = vpop.f32.mrb[34].mxu0 }
 0x725   : > { %14937 = vst [vmem:[#allocation15_spill] sm:$0xff] %v13724_v20  ;;  %v6048_v27 = vpop.f32.mrb[35].mxu0 }
 0x726   : > { %v13726_v10 = vpop.f32.mrb[20].mxu1 }
 0x727   : > { %v5315_v6 = vpop.f32.mrb[21].mxu1  ;;  %8890 = vmatmul.mubr.msk.bf16.gmra.mrb[100].mxu0 %vm14938_vm3, %v13602_v29  ;;  %vm14966_vm3 = vmmov %vm14964_vm8 }
 0x728   : > { %v13730_v54 = vpop.f32.mrb[22].mxu1  ;;  %8893 = vmatprep.mubr.msk.bf16.mxu0 %vm14939_vm7, %v13613_v48  ;;  %vm14968_vm7 = vmmov %vm14925_vm0 }
 0x729   : > { %v5318_v52 = vpop.f32.mrb[23].mxu1 }
 0x72a   : > { %v13734_v31 = vpop.f32.mrb[36].mxu0 }
 0x72b   : > { %14940 = vst [vmem:[#allocation16_spill] sm:$0xff] %v13734_v31  ;;  %5624 = vmatmul.mubr.bf16.gmra.mrb[128].mxu1 %v13372_v12  ;;  %v6053_v30 = vpop.f32.mrb[37].mxu0 }
 0x72c   : > { %8172 = vmatprep.mubr.msk.bf16.mxu1 %vm2129_vm6, %v13385_v3  ;;  %v13739_v55 = vpop.f32.mrb[38].mxu0 }
 0x72d   : > { %14941 = vst [vmem:[#allocation17_spill] sm:$0xff] %v13739_v55  ;;  %v6056_v44 = vpop.f32.mrb[39].mxu0 }
 0x72e   : > { %v13741_v41 = vpop.f32.mrb[24].mxu1 }
 0x72f   : > { %v5323_v38 = vpop.f32.mrb[25].mxu1  ;;  %8894 = vmatmul.mubr.msk.bf16.gmra.mrb[104].mxu0 %vm14942_vm1, %v13651_v7  ;;  %vm14969_vm1 = vmmov %vm14925_vm0 }
 0x730   : > { %v13745_v60 = vpop.f32.mrb[26].mxu1  ;;  %8903 = vmatprep.mubr.msk.bf16.mxu0 %vm14925_vm0, %v13410_v8 }
 0x731   : > { %v5326_v36 = vpop.f32.mrb[27].mxu1 }
 0x732   : > { %v13749_v58 = vpop.f32.mrb[40].mxu0 }
 0x733   : > { %14943 = vst [vmem:[#allocation18_spill] sm:$0xff] %v13749_v58  ;;  %5632 = vmatmul.mubr.bf16.gmra.mrb[132].mxu1 %v13402_v42  ;;  %v6061_v24 = vpop.f32.mrb[41].mxu0 }
 0x734   : > { %8173 = vmatprep.mubr.msk.bf16.mxu1 %vm2129_vm6, %v13415_v62  ;;  %v13754_v9 = vpop.f32.mrb[42].mxu0 }
 0x735   : > { %14944 = vst [vmem:[#allocation19_spill] sm:$0xff] %v13754_v9  ;;  %v6064_v27 = vpop.f32.mrb[43].mxu0 }
 0x736   : > { %v13756_v6 = vpop.f32.mrb[28].mxu1 }
 0x737   : > { %v5331_v52 = vpop.f32.mrb[29].mxu1  ;;  %8904 = vmatmul.mubr.msk.bf16.vlgmr.msra.gmra.mrb[76].mxu0 %vm14945_vm5, %v13445_v39  ;;  %vm14972_vm5 = vmmov %vm14925_vm0 }
 0x738   : > { %v13760_v30 = vpop.f32.mrb[30].mxu1  ;;  %8907 = vmatprep.mubr.msk.bf16.mxu0 %vm14946_vm11, %v13443_v34  ;;  %vm14974_vm11 = vmmov %vm14966_vm3 }
 0x739   : > { %v5334_v8 = vpop.f32.mrb[31].mxu1 }
 0x73a   : > { %v13764_v44 = vpop.f32.mrb[44].mxu0 }
 0x73b   : > { %14947 = vst [vmem:[#allocation20_spill] sm:$0xff] %v13764_v44  ;;  %5640 = vmatmul.mubr.bf16.gmra.mrb[136].mxu1 %v13419_v61  ;;  %v6069_v38 = vpop.f32.mrb[45].mxu0 }
 0x73c   : > { %8204 = vmatprep.mubr.msk.bf16.mxu1 %vm2129_vm6, %v12945_v16  ;;  %v13769_v36 = vpop.f32.mrb[46].mxu0  ;;  %v10183_v38 = vld [vmem:[%s14634_s12 + $0xf0] sm:$0xff]  }
 0x73d   : > { %14948 = vst [vmem:[#allocation21_spill] sm:$0xff] %v13769_v36  ;;  %v6072_v24 = vpop.f32.mrb[47].mxu0 }
 0x73e   : > { %v13771_v27 = vpop.f32.mrb[32].mxu1 }
 0x73f   : > { %v5339_v39 = vpop.f32.mrb[33].mxu1  ;;  %8908 = vmatmul.mubr.msk.bf16.gmra.mrb[80].mxu0 %vm14949_vm12, %v13470_v45  ;;  %vm14976_vm12 = vmmov %vm14966_vm3 }
 0x740   : > { %v13775_v52 = vpop.f32.mrb[34].mxu1  ;;  %8911 = vmatprep.mubr.msk.bf16.mxu0 %vm14950_vm4, %v13485_v19  ;;  %vm14979_vm4 = vcmask 130048  }
 0x741   : > { %v5342_v34 = vpop.f32.mrb[35].mxu1 }
 0x742   : > { %v13779_v8 = vpop.f32.mrb[48].mxu0  ;;  %v10184_v34 = vld [vmem:[%s14634_s12 + $0xf8] sm:$0xff]  }
 0x743   : > { %14951 = vst [vmem:[#allocation22_spill] sm:$0xff] %v13779_v8  ;;  %5765 = vmatmul.mubr.bf16.vlgmr.msra.gmra.mrb[140].mxu1 %v13082_v21  ;;  %v6077_v16 = vpop.f32.mrb[49].mxu0 }
 0x744   : > { %8963 = vmatpush1.bf16.msra.mxu1 %v10183_v38  ;;  %8205 = vmatprep.mubr.msk.bf16.mxu1 %vm2129_vm6, %v12947_v11  ;;  %v13787_v45 = vpop.f32.mrb[50].mxu0 }
 0x745   : > { %14952 = vst [vmem:[#allocation23_spill] sm:$0xff] %v13787_v45  ;;  %v6080_v24 = vpop.f32.mrb[51].mxu0  ;;  %8954 = vmatprep.subr.bf16.mxu1 %v14895_v22 }
 0x746   : > { %v13790_v19 = vpop.f32.mrb[36].mxu1  ;;  %v14956_v24 = vld [vmem:[#allocation32_spill] sm:$0xff] }
 0x747   : > { %v5347_v39 = vpop.f32.mrb[37].mxu1  ;;  %8912 = vmatmul.mubr.msk.bf16.gmra.mrb[84].mxu0 %vm14953_vm13, %v13510_v40  ;;  %vm14980_vm13 = vmmov %vm14979_vm4 }
 0x748   : > { %v13794_v21 = vpop.f32.mrb[38].mxu1  ;;  %8964 = vmatpush1.bf16.msra.mxu1 %v10184_v34  ;;  %8915 = vmatprep.mubr.msk.bf16.mxu0 %vm14954_vm14, %v13522_v63  ;;  %v10185_v39 = vld [vmem:[%s14634_s12 + $0x100] sm:$0xff]   ;;  %vm14981_vm14 = vmmov %vm14925_vm0 }
 0x749   : > { %v5350_v11 = vpop.f32.mrb[39].mxu1  ;;  %8955 = vmatprep.subr.bf16.mxu1 %v14895_v22 }
 0x74a   : > { %v13802_v16 = vpop.f32.mrb[52].mxu0 }
 0x74b   : > { %14955 = vst [vmem:[#allocation24_spill] sm:$0xff] %v13802_v16  ;;  %5773 = vmatmul.mubr.bf16.gmra.mrb[144].mxu1 %v13095_v49  ;;  %v6085_v38 = vpop.f32.mrb[53].mxu0  ;;  %v4311_v49 = vld [vmem:[#allocation3 + $0x266] sm:$0xff] }
 0x74c   : > { %8206 = vmatprep.mubr.msk.bf16.mxu1 %vm2129_vm6, %v14956_v24  ;;  %v13807_v40 = vpop.f32.mrb[54].mxu0  ;;  %8965 = vmatpush1.bf16.msra.mxu1 %v10185_v39  ;;  %v4312_v38 = vld [vmem:[#allocation3 + $0x26e] sm:$0xff]  ;;  %v10072_v16 = vpop.permute.xlu1 %10071 }
 0x74d   : > { %14957 = vst [vmem:[#allocation25_spill] sm:$0xff] %v13807_v40  ;;  %v6088_v34 = vpop.f32.mrb[55].mxu0  ;;  %8956 = vmatprep.subr.bf16.mxu1 %v14895_v22  ;;  %v10186_v40 = vld [vmem:[%s14634_s12 + $0x108] sm:$0xff]   ;;  %v10074_v39 = vunpack.i.h.bf16 %v10072_v16 }
 0x74e   : > { %v13813_v63 = vpop.f32.mrb[40].mxu1  ;;  %v10073_v34 = vunpack.i.l.bf16 %v10072_v16 }
 0x74f   : > { %v5355_v11 = vpop.f32.mrb[41].mxu1  ;;  %8916 = vmatmul.mubr.msk.bf16.gmra.mrb[88].mxu0 %vm14958_vm9, %v13542_v56  ;;  %v4992_v56 = vsel %vm2129_vm6, %v4312_v38, %v10074_v39  ;;  %vm14982_vm9 = vmmov %vm14925_vm0 }
 0x750   : > { %v13817_v45 = vpop.f32.mrb[42].mxu1  ;;  %8966 = vmatpush1.bf16.msra.mxu1 %v10186_v40  ;;  %8919 = vmatprep.mubr.msk.bf16.mxu0 %vm14959_vm10, %v13555_v4  ;;  %v4991_v36 = vsel %vm2129_vm6, %v4311_v49, %v10073_v34  ;;  %v10077_v44 = vpop.permute.xlu0 %10076  ;;  %vm14985_vm10 = vmmov %vm14925_vm0 }
 0x751   : > { %v5358_v8 = vpop.f32.mrb[43].mxu1  ;;  %8957 = vmatprep.subr.bf16.mxu1 %v14895_v22  ;;  %v10079_v58 = vunpack.i.h.bf16 %v10077_v44  ;;  %v10078_v40 = vunpack.i.l.bf16 %v10077_v44 }
 0x752   : > { %v13825_v11 = vpop.f32.mrb[56].mxu0  ;;  %v10082_v55 = vpop.permute.xlu1 %10081  ;;  %v10187_v8 = vld [vmem:[%s14634_s12 + $0x110] sm:$0xff]  }
 0x753   : > { %14960 = vst [vmem:[#allocation26_spill] sm:$0xff] %v13825_v11  ;;  %5781 = vmatmul.mubr.bf16.gmra.mrb[148].mxu1 %v13113_v13  ;;  %v6093_v9 = vpop.f32.mrb[57].mxu0  ;;  %v10084_v16 = vunpack.i.h.bf16 %v10082_v55  ;;  %v10083_v38 = vunpack.i.l.bf16 %v10082_v55  ;;  %v5032_v44 = vsel %vm14963_vm2, %v4992_v56, %v10079_v58  ;;  %v10188_v58 = vld [vmem:[%s14634_s12 + $0x118] sm:$0xff]  }
 0x754   : > { %8207 = vmatprep.mubr.msk.bf16.mxu1 %vm2129_vm6, %v13117_v46  ;;  %v13832_v4 = vpop.f32.mrb[58].mxu0  ;;  %8967 = vmatpush1.bf16.msra.mxu1 %v10187_v8  ;;  %v5031_v9 = vsel %vm14962_vm15, %v4991_v36, %v10078_v40  ;;  %v10189_v40 = vld [vmem:[%s14634_s12 + $0x120] sm:$0xff]  }
 0x755   : > { %14961 = vst [vmem:[#allocation32_spill] sm:$0xff] %v13832_v4  ;;  %v6096_v49 = vpop.f32.mrb[59].mxu0  ;;  %8958 = vmatprep.subr.bf16.mxu1 %v14895_v22  ;;  %v13843_v34 = vsel %vm14964_vm8, %v5031_v9, %v10083_v38  ;;  %v13846_v4 = vsel %vm14966_vm3, %v5032_v44, %v10084_v16  ;;  %v10043_v16 = vunpack.i.l.bf16 %v13634_v53  ;;  %v10087_v9 = vpop.permute.xlu0 %10086 }
 0x756   : > { %v13840_v39 = vpop.f32.mrb[44].mxu1  ;;  %14965 = vst [vmem:[#allocation34_spill] sm:$0xff] %v13843_v34  ;;  %14967 = vst [vmem:[#allocation35_spill] sm:$0xff] %v13846_v4 }
 0x757   : > { %v5363_v11 = vpop.f32.mrb[45].mxu1  ;;  %8920 = vmatmul.mubr.msk.bf16.gmra.mrb[92].mxu0 %vm14968_vm7, %v13575_v32 }
 0x758   : > { %v13852_v8 = vpop.f32.mrb[46].mxu1  ;;  %8968 = vmatpush1.bf16.msra.mxu1 %v10188_v58  ;;  %8923 = vmatprep.mubr.msk.bf16.mxu0 %vm14969_vm1, %v13585_v57  ;;  %v10044_v57 = vunpack.i.h.bf16 %v13634_v53 }
 0x759   : > { %v5366_v36 = vpop.f32.mrb[47].mxu1  ;;  %8959 = vmatprep.subr.bf16.mxu1 %v14895_v22 }
 0x75a   : > { %v13860_v11 = vpop.f32.mrb[60].mxu0  ;;  %v10190_v36 = vld [vmem:[%s14634_s12 + $0x128] sm:$0xff]  }
 0x75b   : > { %14970 = vst [vmem:[#allocation36_spill] sm:$0xff] %v13860_v11  ;;  %5789 = vmatmul.mubr.bf16.gmra.mrb[152].mxu1 %v13137_v2  ;;  %v6101_v32 = vpop.f32.mrb[61].mxu0  ;;  %v6658_v11 = vld [vmem:[#allocation4 + $0x22f] sm:$0xff] }
 0x75c   : > { %8208 = vmatprep.mubr.msk.bf16.mxu1 %vm2129_vm6, %v13135_v37  ;;  %v13865_v56 = vpop.f32.mrb[62].mxu0  ;;  %8969 = vmatpush1.bf16.msra.mxu1 %v10189_v40  ;;  %v10089_v32 = vunpack.i.h.bf16 %v10087_v9  ;;  %v10088_v40 = vunpack.i.l.bf16 %v10087_v9 }
 0x75d   : > { %14971 = vst [vmem:[#allocation37_spill] sm:$0xff] %v13865_v56  ;;  %v6104_v38 = vpop.f32.mrb[63].mxu0  ;;  %8960 = vmatprep.subr.bf16.mxu1 %v14895_v22  ;;  %v6657_v56 = vld [vmem:[#allocation4 + $0x227] sm:$0xff] }
 0x75e   : > { %v13873_v49 = vpop.f32.mrb[48].mxu1  ;;  %v10092_v38 = vpop.permute.xlu1 %10091 }
 0x75f   : > { %v5371_v44 = vpop.f32.mrb[49].mxu1  ;;  %8924 = vmatmul.mubr.msk.bf16.gmra.mrb[96].mxu0 %vm14925_vm0, %v13602_v29  ;;  %v14975_v29 = vld [vmem:[#allocation13_spill] sm:$0xff] }
 0x760   : > { %v13877_v58 = vpop.f32.mrb[50].mxu1  ;;  %8970 = vmatpush1.bf16.msra.mxu1 %v10190_v36  ;;  %8927 = vmatprep.mubr.msk.bf16.mxu0 %vm14972_vm5, %v13613_v48  ;;  %v14973_v44 = vld [vmem:[#allocation14_spill] sm:$0xff]  ;;  %v5071_v34 = vsel %vm14976_vm12, %v14975_v29, %v10044_v57  ;;  %v10094_v57 = vunpack.i.h.bf16 %v10092_v38 }
 0x761   : > { %v5374_v53 = vpop.f32.mrb[51].mxu1  ;;  %8961 = vmatprep.subr.bf16.mxu1 %v14895_v22  ;;  %v5070_v55 = vsel %vm14974_vm11, %v14973_v44, %v10043_v16  ;;  %v10191_v16 = vld [vmem:[%s14634_s12 + $0x130] sm:$0xff]  }
 0x762   : > { %v13889_v4 = vpop.f32.mrb[64].mxu0  ;;  %v13891_v36 = vpack.c.bf16 %v5071_v34, %v5070_v55  ;;  %v10093_v53 = vunpack.i.l.bf16 %v10092_v38  ;;  %v7054_v34 = vsel %vm14979_vm4, %v6658_v11, %v10089_v32  ;;  %v7053_v55 = vsel %vm14980_vm13, %v6657_v56, %v10088_v40 }
 0x763   : > { %14977 = vst [vmem:[#allocation14_spill] sm:$0xff] %v13889_v4  ;;  %5797 = vmatmul.mubr.bf16.gmra.mrb[156].mxu1 %v13157_v51  ;;  %v6109_v48 = vpop.f32.mrb[65].mxu0  ;;  %v7090_v38 = vsel %vm2129_vm6, %v7054_v34, %v10094_v57  ;;  %v14988_v4 = vld [vmem:[#allocation28_spill] sm:$0xff] }
 0x764   : > { %8209 = vmatprep.mubr.msk.bf16.mxu1 %vm2129_vm6, %v13159_v1  ;;  %v13896_v9 = vpop.f32.mrb[66].mxu0  ;;  %8971 = vmatpush1.bf16.msra.mxu1 %v10191_v16  ;;  %v10192_v16 = vld [vmem:[%s14634_s12 + $0x138] sm:$0xff]  }
 0x765   : > { %14978 = vst [vmem:[#allocation13_spill] sm:$0xff] %v13896_v9  ;;  %v6112_v44 = vpop.f32.mrb[67].mxu0  ;;  %8962 = vmatprep.subr.bf16.mxu1 %v14895_v22 }
 0x766   : > { %v13904_v29 = vpop.f32.mrb[52].mxu1  ;;  %v7089_v44 = vsel %vm2129_vm6, %v7053_v55, %v10093_v53 }
 0x767   : > { %v5379_v48 = vpop.f32.mrb[53].mxu1  ;;  %8928 = vmatmul.mubr.msk.bf16.gmra.mrb[100].mxu0 %vm14981_vm14, %v13651_v7  ;;  %v7108_v32 = vpack.c.bf16 %v7090_v38, %v7089_v44 }
 0x768   : > { %v13908_v9 = vpop.f32.mrb[54].mxu1  ;;  %8972 = vmatpush1.bf16.msra.mxu1 %v10192_v16  ;;  %8931 = vmatprep.mubr.msk.bf16.mxu0 %vm14982_vm9, %v13653_v18 }
 0x769   : > { %v5382_v11 = vpop.f32.mrb[55].mxu1  ;;  %6286 = vmatprep.subr.bf16.mxu1 %v14895_v22 }
 0x76a   : > { %v13918_v56 = vpop.f32.mrb[68].mxu0 }
 0x76b   : > { %14983 = vst [vmem:[#allocation38_spill] sm:$0xff] %v13918_v56  ;;  %5805 = vmatmul.mubr.bf16.gmra.mrb[160].mxu1 %v13183_v0  ;;  %v6117_v7 = vpop.f32.mrb[69].mxu0 }
 0x76c   : > { %8210 = vmatprep.mubr.msk.bf16.mxu1 %vm2129_vm6, %v13181_v35  ;;  %v13923_v40 = vpop.f32.mrb[70].mxu0 }
 0x76d   : > { %14984 = vst [vmem:[#allocation39_spill] sm:$0xff] %v13923_v40  ;;  %v6120_v57 = vpop.f32.mrb[71].mxu0 }
 0x76e   : > { %v13925_v34 = vpop.f32.mrb[56].mxu1 }
 0x76f   : > { %v5387_v53 = vpop.f32.mrb[57].mxu1  ;;  %8932 = vmatmul.mubr.msk.bf16.gmra.mrb[104].mxu0 %vm14985_vm10, %v7108_v32 }
 0x770   : > { %v13928_v18 = vpop.f32.mrb[58].mxu1 }
 0x771   : > { %v5390_v55 = vpop.f32.mrb[59].mxu1 }
 0x772   : > { %v13930_v48 = vpop.f32.mrb[72].mxu0 }
 0x773   : > { %14986 = vst [vmem:[#allocation40_spill] sm:$0xff] %v13930_v48  ;;  %5813 = vmatmul.mubr.bf16.gmra.mrb[164].mxu1 %v13211_v26  ;;  %v6125_v16 = vpop.f32.mrb[73].mxu0 }
 0x774   : > { %8211 = vmatprep.mubr.msk.bf16.mxu1 %vm2129_vm6, %v13213_v14  ;;  %v13935_v38 = vpop.f32.mrb[74].mxu0 }
 0x775   : > { %14987 = vst [vmem:[#allocation41_spill] sm:$0xff] %v13935_v38  ;;  %v6128_v44 = vpop.f32.mrb[75].mxu0 }
 0x776   : > { %v13937_v11 = vpop.f32.mrb[60].mxu1 }
 0x777   : > { %v5395_v7 = vpop.f32.mrb[61].mxu1 }
 0x778   : > { %v13939_v57 = vpop.f32.mrb[62].mxu1 }
 0x779   : > { %v5398_v32 = vpop.f32.mrb[63].mxu1 }
 0x77b   : > { %5821 = vmatmul.mubr.bf16.gmra.mrb[168].mxu1 %v13241_v43 }
 0x77c   : > { %8212 = vmatprep.mubr.msk.bf16.mxu1 %vm2129_vm6, %v13245_v50 }
 0x77e   : > { %v13944_v53 = vpop.f32.mrb[64].mxu1 }
 0x77f   : > { %v5403_v55 = vpop.f32.mrb[65].mxu1 }
 0x780   : > { %v13946_v16 = vpop.f32.mrb[66].mxu1 }
 0x781   : > { %v5406_v48 = vpop.f32.mrb[67].mxu1 }
 0x783   : > { %5829 = vmatmul.mubr.bf16.gmra.mrb[172].mxu1 %v13272_v5 }
 0x784   : > { %8213 = vmatprep.mubr.msk.bf16.mxu1 %vm2129_vm6, %v13274_v23  ;;  %v14989_v23 = vld [vmem:[#allocation29_spill] sm:$0xff] }
 0x786   : > { %v13951_v44 = vpop.f32.mrb[68].mxu1 }
 0x787   : > { %v5411_v7 = vpop.f32.mrb[69].mxu1 }
 0x788   : > { %v13953_v32 = vpop.f32.mrb[70].mxu1 }
 0x789   : > { %v5414_v38 = vpop.f32.mrb[71].mxu1 }
 0x78b   : > { %5837 = vmatmul.mubr.bf16.gmra.mrb[176].mxu1 %v13303_v25 }
 0x78c   : > { %8214 = vmatprep.mubr.msk.bf16.mxu1 %vm2129_vm6, %v13307_v47 }
 0x78e   : > { %v13958_v55 = vpop.f32.mrb[72].mxu1 }
 0x78f   : > { %v5419_v40 = vpop.f32.mrb[73].mxu1 }
 0x790   : > { %v13960_v48 = vpop.f32.mrb[74].mxu1 }
 0x791   : > { %v5422_v56 = vpop.f32.mrb[75].mxu1 }
 0x793   : > { %5845 = vmatmul.mubr.bf16.gmra.mrb[180].mxu1 %v13342_v17 }
 0x794   : > { %8215 = vmatprep.mubr.msk.bf16.mxu1 %vm2129_vm6, %v13344_v28 }
 0x796   : > { %v5521_v7 = vpop.f32.mrb[76].mxu1 }
 0x797   : > { %v13966_v31 = vadd.f32 %v5521_v7, %v14988_v4  ;;  %v5523_v38 = vpop.f32.mrb[77].mxu1 }
 0x798   : > { %v5524_v25 = vpop.f32.mrb[78].mxu1 }
 0x799   : > { %v13969_v20 = vadd.f32 %v5524_v25, %v14989_v23  ;;  %v5526_v47 = vpop.f32.mrb[79].mxu1 }
 0x79b   : > { %5853 = vmatmul.mubr.bf16.gmra.mrb[184].mxu1 %v13372_v12  ;;  %v4467_v12 = vld [vmem:[#allocation3 + $0x22a] sm:$0xff] }
 0x79c   : > { %8216 = vmatprep.mubr.msk.bf16.mxu1 %vm2129_vm6, %v13385_v3 }
 0x79e   : > { %v5529_v56 = vpop.f32.mrb[80].mxu1 }
 0x79f   : > { %v13975_v40 = vadd.f32 %v5529_v56, %v13711_v59  ;;  %v5531_v28 = vpop.f32.mrb[81].mxu1 }
 0x7a0   : > { %v5532_v17 = vpop.f32.mrb[82].mxu1 }
 0x7a1   : > { %v13978_v4 = vadd.f32 %v5532_v17, %v13715_v33  ;;  %v5534_v7 = vpop.f32.mrb[83].mxu1  ;;  %v14992_v17 = vld [vmem:[#allocation10_spill] sm:$0xff] }
 0x7a3   : > { %14990 = vst [vmem:[#allocation28_spill] sm:$0xff] %v13978_v4  ;;  %5861 = vmatmul.mubr.bf16.gmra.mrb[188].mxu1 %v13402_v42  ;;  %v4468_v4 = vld [vmem:[#allocation3 + $0x232] sm:$0xff] }
 0x7a4   : > { %8217 = vmatprep.mubr.msk.bf16.mxu1 %vm2129_vm6, %v13415_v62 }
 0x7a6   : > { %v5537_v23 = vpop.f32.mrb[84].mxu1 }
 0x7a7   : > { %v13984_v25 = vadd.f32 %v5537_v23, %v13726_v10  ;;  %v5539_v47 = vpop.f32.mrb[85].mxu1 }
 0x7a8   : > { %v5540_v38 = vpop.f32.mrb[86].mxu1 }
 0x7a9   : > { %v13987_v59 = vadd.f32 %v5540_v38, %v13730_v54  ;;  %v5542_v28 = vpop.f32.mrb[87].mxu1  ;;  %v13998_v54 = vpack.c.bf16 %v4468_v4, %v4467_v12  ;;  %v14994_v38 = vld [vmem:[#allocation11_spill] sm:$0xff] }
 0x7ab   : > { %14991 = vst [vmem:[#allocation29_spill] sm:$0xff] %v13987_v59  ;;  %5869 = vmatmul.mubr.bf16.gmra.mrb[192].mxu1 %v13419_v61 }
 0x7ac   : > { %8218 = vmatprep.mubr.msk.bf16.mxu1 %vm2129_vm6, %v14992_v17 }
 0x7ae   : > { %v5545_v33 = vpop.f32.mrb[88].mxu1 }
 0x7af   : > { %v13993_v56 = vadd.f32 %v5545_v33, %v13741_v41  ;;  %v5547_v7 = vpop.f32.mrb[89].mxu1 }
 0x7b0   : > { %v5548_v10 = vpop.f32.mrb[90].mxu1 }
 0x7b1   : > { %14993 = vst [vmem:[#allocation10_spill] sm:$0xff] %v13993_v56  ;;  %v13996_v23 = vadd.f32 %v5548_v10, %v13745_v60  ;;  %v5550_v47 = vpop.f32.mrb[91].mxu1  ;;  %v14995_v60 = vld [vmem:[#allocation12_spill] sm:$0xff] }
 0x7b3   : > { %5877 = vmatmul.mubr.bf16.gmra.mrb[196].mxu1 %v14994_v38 }
 0x7b4   : > { %8219 = vmatprep.mubr.msk.bf16.mxu1 %vm2129_vm6, %v13998_v54 }
 0x7b6   : > { %v5553_v28 = vpop.f32.mrb[92].mxu1 }
 0x7b7   : > { %v14004_v59 = vadd.f32 %v5553_v28, %v13756_v6  ;;  %v5555_v41 = vpop.f32.mrb[93].mxu1  ;;  %v10169_v6 = vld [vmem:[%s14634_s12 + $0x140] sm:$0xff]  }
 0x7b8   : > { %v5556_v33 = vpop.f32.mrb[94].mxu1 }
 0x7b9   : > { %v14007_v7 = vadd.f32 %v5556_v33, %v13760_v30  ;;  %v5558_v56 = vpop.f32.mrb[95].mxu1 }
 0x7bb   : > { %5885 = vmatmul.mubr.bf16.gmra.mrb[200].mxu1 %v14995_v60 }
 0x7bc   : > { %8261 = vmatprep.mubr.msk.bf16.mxu1 %vm2129_vm6, %v13385_v3 }
 0x7be   : > { %v5561_v12 = vpop.f32.mrb[96].mxu1 }
 0x7bf   : > { %v14013_v4 = vadd.f32 %v5561_v12, %v13771_v27  ;;  %v5563_v10 = vpop.f32.mrb[97].mxu1  ;;  %v10170_v27 = vld [vmem:[%s14634_s12 + $0x148] sm:$0xff]   ;;  %v10171_v12 = vld [vmem:[%s14634_s12 + $0x150] sm:$0xff]  }
 0x7c0   : > { %v5564_v47 = vpop.f32.mrb[98].mxu1 }
 0x7c1   : > { %v14019_v28 = vadd.f32 %v5564_v47, %v13775_v52  ;;  %v5566_v30 = vpop.f32.mrb[99].mxu1 }
 0x7c3   : > { %6130 = vmatmul.mubr.bf16.vlgmr.msra.gmra.mrb[204].mxu1 %v13402_v42 }
 0x7c4   : > { %6287 = vmatpush1.bf16.msra.mxu1 %v10169_v6  ;;  %8262 = vmatprep.mubr.msk.bf16.mxu1 %vm2129_vm6, %v13415_v62 }
 0x7c5   : > { %6288 = vmatprep.subr.bf16.mxu1 %v14895_v22 }
 0x7c6   : > { %v5569_v56 = vpop.f32.mrb[100].mxu1 }
 0x7c7   : > { %v14029_v41 = vadd.f32 %v5569_v56, %v13790_v19  ;;  %v5571_v33 = vpop.f32.mrb[101].mxu1  ;;  %v10172_v19 = vld [vmem:[%s14634_s12 + $0x158] sm:$0xff]   ;;  %v10173_v56 = vld [vmem:[%s14634_s12 + $0x160] sm:$0xff]  }
 0x7c8   : > { %6289 = vmatpush1.bf16.msra.mxu1 %v10170_v27  ;;  %v5572_v52 = vpop.f32.mrb[102].mxu1 }
 0x7c9   : > { %v14035_v10 = vadd.f32 %v5572_v52, %v13794_v21  ;;  %v5574_v47 = vpop.f32.mrb[103].mxu1  ;;  %6290 = vmatprep.subr.bf16.mxu1 %v14895_v22 }
 0x7ca   : > { %v4470_v47 = vld [vmem:[#allocation3 + $0x252] sm:$0xff] }
 0x7cb   : > { %6138 = vmatmul.mubr.bf16.gmra.mrb[208].mxu1 %v13419_v61 }
 0x7cc   : > { %6291 = vmatpush1.bf16.msra.mxu1 %v10171_v12  ;;  %8263 = vmatprep.mubr.msk.bf16.mxu1 %vm2129_vm6, %v14992_v17  ;;  %v4469_v12 = vld [vmem:[#allocation3 + $0x24a] sm:$0xff] }
 0x7cd   : > { %6292 = vmatprep.subr.bf16.mxu1 %v14895_v22 }
 0x7ce   : > { %v5577_v6 = vpop.f32.mrb[104].mxu1 }
 0x7cf   : > { %v14046_v30 = vadd.f32 %v5577_v6, %v13813_v63  ;;  %v5579_v21 = vpop.f32.mrb[105].mxu1  ;;  %v10174_v63 = vld [vmem:[%s14634_s12 + $0x168] sm:$0xff]  }
 0x7d0   : > { %6293 = vmatpush1.bf16.msra.mxu1 %v10172_v19  ;;  %v5580_v27 = vpop.f32.mrb[106].mxu1 }
 0x7d1   : > { %v14052_v33 = vadd.f32 %v5580_v27, %v13817_v45  ;;  %v5582_v52 = vpop.f32.mrb[107].mxu1  ;;  %6294 = vmatprep.subr.bf16.mxu1 %v14895_v22  ;;  %v10175_v27 = vld [vmem:[%s14634_s12 + $0x170] sm:$0xff]  }
 0x7d3   : > { %14996 = vst [vmem:[#allocation11_spill] sm:$0xff] %v14052_v33  ;;  %6146 = vmatmul.mubr.bf16.gmra.mrb[212].mxu1 %v14994_v38 }
 0x7d4   : > { %6295 = vmatpush1.bf16.msra.mxu1 %v10173_v56  ;;  %8264 = vmatprep.mubr.msk.bf16.mxu1 %vm2129_vm6, %v13998_v54  ;;  %v14068_v56 = vpack.c.bf16 %v4470_v47, %v4469_v12  ;;  %v10177_v47 = vld [vmem:[%s14634_s12 + $0x180] sm:$0xff]  }
 0x7d5   : > { %6296 = vmatprep.subr.bf16.mxu1 %v14895_v22 }
 0x7d6   : > { %v5585_v19 = vpop.f32.mrb[108].mxu1 }
 0x7d7   : > { %v14063_v45 = vadd.f32 %v5585_v19, %v13840_v39  ;;  %v5587_v6 = vpop.f32.mrb[109].mxu1  ;;  %v10176_v39 = vld [vmem:[%s14634_s12 + $0x178] sm:$0xff]  }
 0x7d8   : > { %6297 = vmatpush1.bf16.msra.mxu1 %v10174_v63  ;;  %v5588_v21 = vpop.f32.mrb[110].mxu1 }
 0x7d9   : > { %v14071_v52 = vadd.f32 %v5588_v21, %v13852_v8  ;;  %v5590_v33 = vpop.f32.mrb[111].mxu1  ;;  %6298 = vmatprep.subr.bf16.mxu1 %v14895_v22 }
 0x7db   : > { %6154 = vmatmul.mubr.bf16.gmra.mrb[216].mxu1 %v14995_v60 }
 0x7dc   : > { %6299 = vmatpush1.bf16.msra.mxu1 %v10175_v27  ;;  %8265 = vmatprep.mubr.msk.bf16.mxu1 %vm2129_vm6, %v14068_v56 }
 0x7dd   : > { %6300 = vmatprep.subr.bf16.mxu1 %v14895_v22 }
 0x7de   : > { %v5593_v63 = vpop.f32.mrb[112].mxu1 }
 0x7df   : > { %v14082_v12 = vadd.f32 %v5593_v63, %v13873_v49  ;;  %v5595_v8 = vpop.f32.mrb[113].mxu1  ;;  %v10178_v49 = vld [vmem:[%s14634_s12 + $0x188] sm:$0xff]  }
 0x7e0   : > { %6301 = vmatpush1.bf16.msra.mxu1 %v10176_v39  ;;  %v5596_v33 = vpop.f32.mrb[114].mxu1 }
 0x7e1   : > { %v14088_v19 = vadd.f32 %v5596_v33, %v13877_v58  ;;  %v5598_v6 = vpop.f32.mrb[115].mxu1  ;;  %6302 = vmatprep.subr.bf16.mxu1 %v14895_v22 }
 0x7e3   : > { %6162 = vmatmul.mubr.bf16.gmra.mrb[220].mxu1 %v13891_v36 }
 0x7e4   : > { %6303 = vmatpush1.bf16.msra.mxu1 %v10177_v47  ;;  %8296 = vmatprep.mubr.msk.bf16.mxu1 %vm2129_vm6, %v14956_v24 }
 0x7e5   : > { %6304 = vmatprep.subr.bf16.mxu1 %v14895_v22 }
 0x7e6   : > { %v5601_v21 = vpop.f32.mrb[116].mxu1 }
 0x7e7   : > { %v14099_v27 = vadd.f32 %v5601_v21, %v13904_v29  ;;  %v5603_v58 = vpop.f32.mrb[117].mxu1 }
 0x7e8   : > { %6305 = vmatpush1.bf16.msra.mxu1 %v10178_v49  ;;  %v5604_v39 = vpop.f32.mrb[118].mxu1 }
 0x7e9   : > { %v14102_v63 = vadd.f32 %v5604_v39, %v13908_v9  ;;  %v5606_v8 = vpop.f32.mrb[119].mxu1 }
 0x7eb   : > { %6319 = vmatmul.mubr.bf16.vlgmr.msra.gmra.mrb[224].mxu1 %v13113_v13 }
 0x7ec   : > { %8297 = vmatprep.mubr.msk.bf16.mxu1 %vm2129_vm6, %v13117_v46 }
 0x7ee   : > { %v5609_v24 = vpop.f32.mrb[120].mxu1 }
 0x7ef   : > { %v14108_v33 = vadd.f32 %v5609_v24, %v13925_v34  ;;  %v5611_v22 = vpop.f32.mrb[121].mxu1 }
 0x7f0   : > { %v5612_v47 = vpop.f32.mrb[122].mxu1 }
 0x7f1   : > { %v14111_v29 = vadd.f32 %v5612_v47, %v13928_v18  ;;  %v5614_v6 = vpop.f32.mrb[123].mxu1 }
 0x7f3   : > { %6327 = vmatmul.mubr.bf16.gmra.mrb[228].mxu1 %v13137_v2 }
 0x7f4   : > { %8298 = vmatprep.mubr.msk.bf16.mxu1 %vm2129_vm6, %v13135_v37 }
 0x7f6   : > { %v5617_v9 = vpop.f32.mrb[124].mxu1 }
 0x7f7   : > { %v14117_v13 = vadd.f32 %v5617_v9, %v13937_v11  ;;  %v5619_v46 = vpop.f32.mrb[125].mxu1 }
 0x7f8   : > { %v5620_v49 = vpop.f32.mrb[126].mxu1 }
 0x7f9   : > { %v14120_v34 = vadd.f32 %v5620_v49, %v13939_v57  ;;  %v5622_v21 = vpop.f32.mrb[127].mxu1 }
 0x7fb   : > { %6335 = vmatmul.mubr.bf16.gmra.mrb[232].mxu1 %v13157_v51 }
 0x7fc   : > { %8299 = vmatprep.mubr.msk.bf16.mxu1 %vm2129_vm6, %v13159_v1 }
 0x7fe   : > { %v5625_v18 = vpop.f32.mrb[128].mxu1 }
 0x7ff   : > { %v14126_v2 = vadd.f32 %v5625_v18, %v13944_v53  ;;  %v5627_v37 = vpop.f32.mrb[129].mxu1 }
 0x800   : > { %v5628_v58 = vpop.f32.mrb[130].mxu1 }
 0x801   : > { %v14129_v11 = vadd.f32 %v5628_v58, %v13946_v16  ;;  %v5630_v39 = vpop.f32.mrb[131].mxu1 }
 0x803   : > { %6343 = vmatmul.mubr.bf16.gmra.mrb[236].mxu1 %v13183_v0 }
 0x804   : > { %8300 = vmatprep.mubr.msk.bf16.mxu1 %vm2129_vm6, %v13181_v35 }
 0x806   : > { %v5633_v57 = vpop.f32.mrb[132].mxu1 }
 0x807   : > { %v14135_v51 = vadd.f32 %v5633_v57, %v13951_v44  ;;  %v5635_v1 = vpop.f32.mrb[133].mxu1 }
 0x808   : > { %v5636_v8 = vpop.f32.mrb[134].mxu1  ;;  %v15000_v1 = vld [vmem:[#allocation15_spill] sm:$0xff] }
 0x809   : > { %v14138_v53 = vadd.f32 %v5636_v8, %v13953_v32  ;;  %v5638_v24 = vpop.f32.mrb[135].mxu1 }
 0x80a   : > { %v14140_v22 = vpop.f32.mrb[76].mxu0  ;;  %v15001_v24 = vld [vmem:[#allocation33_spill] sm:$0xff] }
 0x80b   : > { %6351 = vmatmul.mubr.bf16.gmra.mrb[240].mxu1 %v13211_v26  ;;  %v14143_v16 = vpop.f32.mrb[77].mxu0 }
 0x80c   : > { %8301 = vmatprep.mubr.msk.bf16.mxu1 %vm2129_vm6, %v13213_v14  ;;  %v14147_v35 = vpop.f32.mrb[78].mxu0 }
 0x80d   : > { %v14149_v0 = vpop.f32.mrb[79].mxu0 }
 0x80e   : > { %v5641_v44 = vpop.f32.mrb[136].mxu1 }
 0x80f   : > { %v14152_v47 = vadd.f32 %v5641_v44, %v13958_v55  ;;  %v5643_v32 = vpop.f32.mrb[137].mxu1 }
 0x810   : > { %v5644_v6 = vpop.f32.mrb[138].mxu1 }
 0x811   : > { %v14155_v9 = vadd.f32 %v5644_v6, %v13960_v48  ;;  %v5646_v46 = vpop.f32.mrb[139].mxu1 }
 0x812   : > { %v14157_v26 = vpop.f32.mrb[80].mxu0  ;;  %v15004_v46 = vld [vmem:[#allocation28_spill] sm:$0xff] }
 0x813   : > { %6359 = vmatmul.mubr.bf16.gmra.mrb[244].mxu1 %v13241_v43  ;;  %v14160_v49 = vpop.f32.mrb[81].mxu0 }
 0x814   : > { %8302 = vmatprep.mubr.msk.bf16.mxu1 %vm2129_vm6, %v13245_v50  ;;  %v14164_v14 = vpop.f32.mrb[82].mxu0 }
 0x815   : > { %14997 = vst [vmem:[#allocation12_spill] sm:$0xff] %v14164_v14  ;;  %v14166_v21 = vpop.f32.mrb[83].mxu0  ;;  %v15025_v14 = vld [vmem:[#allocation21_spill] sm:$0xff] }
 0x816   : > { %v5766_v55 = vpop.f32.mrb[140].mxu1 }
 0x817   : > { %v5893_v18 = vadd.f32 %v5766_v55, %v13966_v31  ;;  %v5768_v37 = vpop.f32.mrb[141].mxu1 }
 0x818   : > { %v5769_v48 = vpop.f32.mrb[142].mxu1 }
 0x819   : > { %v5894_v58 = vadd.f32 %v5769_v48, %v13969_v20  ;;  %v5771_v39 = vpop.f32.mrb[143].mxu1  ;;  %v14171_v57 = vadd.f32 %v13719_v15, %v5893_v18  ;;  %v15005_v18 = vld [vmem:[#allocation16_spill] sm:$0xff] }
 0x81a   : > { %v14173_v43 = vpop.f32.mrb[84].mxu0 }
 0x81b   : > { %14998 = vst [vmem:[#allocation42_spill] sm:$0xff] %v14173_v43  ;;  %6367 = vmatmul.mubr.bf16.gmra.mrb[248].mxu1 %v13272_v5  ;;  %v14176_v50 = vpop.f32.mrb[85].mxu0  ;;  %v14179_v8 = vadd.f32 %v15000_v1, %v5894_v58  ;;  %v15007_v58 = vld [vmem:[#allocation8_spill] sm:$0xff]  ;;  %v15009_v1 = vld [vmem:[#allocation17_spill] sm:$0xff] }
 0x81c   : > { %14999 = vst [vmem:[#allocation43_spill] sm:$0xff] %v14176_v50  ;;  %8303 = vmatprep.mubr.msk.bf16.mxu1 %vm2129_vm6, %v15001_v24  ;;  %v14183_v31 = vpop.f32.mrb[86].mxu0 }
 0x81d   : > { %15002 = vst [vmem:[#allocation15_spill] sm:$0xff] %v14183_v31  ;;  %v14185_v44 = vpop.f32.mrb[87].mxu0  ;;  %v15010_v31 = vld [vmem:[#allocation27_spill] sm:$0xff] }
 0x81e   : > { %15003 = vst [vmem:[#allocation33_spill] sm:$0xff] %v14185_v44  ;;  %v5774_v20 = vpop.f32.mrb[144].mxu1 }
 0x81f   : > { %v5895_v15 = vadd.f32 %v5774_v20, %v13975_v40  ;;  %v5776_v32 = vpop.f32.mrb[145].mxu1 }
 0x820   : > { %v5777_v6 = vpop.f32.mrb[146].mxu1 }
 0x821   : > { %v5896_v55 = vadd.f32 %v5777_v6, %v15004_v46  ;;  %v5779_v5 = vpop.f32.mrb[147].mxu1  ;;  %v14190_v37 = vadd.f32 %v15005_v18, %v5895_v15 }
 0x822   : > { %v14192_v48 = vpop.f32.mrb[88].mxu0  ;;  %v15013_v5 = vld [vmem:[#allocation29_spill] sm:$0xff] }
 0x823   : > { %15006 = vst [vmem:[#allocation28_spill] sm:$0xff] %v14192_v48  ;;  %6375 = vmatmul.mubr.bf16.gmra.mrb[252].mxu1 %v15007_v58  ;;  %v14195_v39 = vpop.f32.mrb[89].mxu0  ;;  %v14198_v24 = vadd.f32 %v15009_v1, %v5896_v55  ;;  %v15014_v48 = vld [vmem:[#allocation18_spill] sm:$0xff]  ;;  %v14214_v55 = vld [vmem:[%s14637_s15] ss:$0 sm:$0xff] }
 0x824   : > { %15008 = vst [vmem:[#allocation16_spill] sm:$0xff] %v14195_v39  ;;  %8304 = vmatprep.mubr.msk.bf16.mxu1 %vm2129_vm6, %v15010_v31  ;;  %v14202_v40 = vpop.f32.mrb[90].mxu0  ;;  %v15015_v1 = vld [vmem:[#allocation30_spill] sm:$0xff] }
 0x825   : > { %15011 = vst [vmem:[#allocation8_spill] sm:$0xff] %v14202_v40  ;;  %v14204_v20 = vpop.f32.mrb[91].mxu0 }
 0x826   : > { %15012 = vst [vmem:[#allocation17_spill] sm:$0xff] %v14204_v20  ;;  %v5782_v32 = vpop.f32.mrb[148].mxu1 }
 0x827   : > { %v5897_v15 = vadd.f32 %v5782_v32, %v13984_v25  ;;  %v5784_v6 = vpop.f32.mrb[149].mxu1  ;;  %v15017_v32 = vld [vmem:[#allocation19_spill] sm:$0xff] }
 0x828   : > { %v5785_v46 = vpop.f32.mrb[150].mxu1 }
 0x829   : > { %v5898_v18 = vadd.f32 %v5785_v46, %v15013_v5  ;;  %v5787_v58 = vpop.f32.mrb[151].mxu1  ;;  %v14209_v39 = vadd.f32 %v15014_v48, %v5897_v15  ;;  %v15018_v46 = vld [vmem:[#allocation31_spill] sm:$0xff] }
 0x82a   : > { %v8921_v31 = vpop.f32.mrb[92].mxu0 }
 0x82b   : > { %6383 = vmatmul.mubr.bf16.gmra.mrb[0].mxu1 %v15015_v1  ;;  %v14218_v40 = vadd.f32 %v8921_v31, %v14214_v55  ;;  %v7657_v25 = vpop.f32.mrb[93].mxu0  ;;  %v14221_v6 = vadd.f32 %v15017_v32, %v5898_v18  ;;  %v15021_v31 = vld [vmem:[#allocation10_spill] sm:$0xff] }
 0x82c   : > { %8305 = vmatprep.mubr.msk.bf16.mxu1 %vm2129_vm6, %v15018_v46  ;;  %v14226_v48 = vadd.f32 %v14214_v55, %v7657_v25  ;;  %v8922_v15 = vpop.f32.mrb[94].mxu0  ;;  %v15022_v46 = vld [vmem:[#allocation20_spill] sm:$0xff] }
 0x82d   : > { %15016 = vst [vmem:[#allocation27_spill] sm:$0xff] %v14218_v40  ;;  %v14229_v5 = vadd.f32 %v8922_v15, %v14214_v55  ;;  %v7660_v58 = vpop.f32.mrb[95].mxu0 }
 0x82e   : > { %15019 = vst [vmem:[#allocation29_spill] sm:$0xff] %v14226_v48  ;;  %v5790_v20 = vpop.f32.mrb[152].mxu1  ;;  %v14232_v1 = vadd.f32 %v14214_v55, %v7660_v58  ;;  %v15023_v48 = vld [vmem:[#allocation9_spill] sm:$0xff] }
 0x82f   : > { %15020 = vst [vmem:[#allocation18_spill] sm:$0xff] %v14229_v5  ;;  %v5899_v40 = vadd.f32 %v5790_v20, %v15021_v31  ;;  %v5792_v43 = vpop.f32.mrb[153].mxu1 }
 0x830   : > { %v5793_v18 = vpop.f32.mrb[154].mxu1 }
 0x831   : > { %v5900_v32 = vadd.f32 %v5793_v18, %v13996_v23  ;;  %v5795_v44 = vpop.f32.mrb[155].mxu1  ;;  %v14237_v50 = vadd.f32 %v15022_v46, %v5899_v40 }
 0x832   : > { %v8925_v25 = vpop.f32.mrb[96].mxu0 }
 0x833   : > { %6391 = vmatmul.mubr.bf16.gmra.mrb[4].mxu1 %v15023_v48  ;;  %v14241_v15 = vadd.f32 %v8925_v25, %v14214_v55  ;;  %v7673_v5 = vpop.f32.mrb[97].mxu0  ;;  %v14244_v58 = vadd.f32 %v15025_v14, %v5900_v32 }
 0x834   : > { %8306 = vmatprep.mubr.msk.bf16.mxu1 %vm2129_vm6, %v13385_v3  ;;  %v14249_v43 = vadd.f32 %v14214_v55, %v7673_v5  ;;  %v8926_v23 = vpop.f32.mrb[98].mxu0  ;;  %v15027_v3 = vld [vmem:[#allocation22_spill] sm:$0xff] }
 0x835   : > { %15024 = vst [vmem:[#allocation30_spill] sm:$0xff] %v14241_v15  ;;  %v14252_v44 = vadd.f32 %v8926_v23, %v14214_v55  ;;  %v7676_v40 = vpop.f32.mrb[99].mxu0  ;;  %v15029_v15 = vld [vmem:[#allocation23_spill] sm:$0xff] }
 0x836   : > { %v5798_v20 = vpop.f32.mrb[156].mxu1  ;;  %v14255_v48 = vadd.f32 %v14214_v55, %v7676_v40 }
 0x837   : > { %15026 = vst [vmem:[#allocation19_spill] sm:$0xff] %v14252_v44  ;;  %v5901_v31 = vadd.f32 %v5798_v20, %v14004_v59  ;;  %v5800_v18 = vpop.f32.mrb[157].mxu1 }
 0x838   : > { %v5801_v14 = vpop.f32.mrb[158].mxu1 }
 0x839   : > { %v5902_v32 = vadd.f32 %v5801_v14, %v14007_v7  ;;  %v5803_v46 = vpop.f32.mrb[159].mxu1  ;;  %v14260_v25 = vadd.f32 %v15027_v3, %v5901_v31 }
 0x83a   : > { %v8929_v5 = vpop.f32.mrb[100].mxu0 }
 0x83b   : > { %6399 = vmatmul.mubr.bf16.gmra.mrb[8].mxu1 %v13402_v42  ;;  %v14264_v23 = vadd.f32 %v8929_v5, %v14214_v55  ;;  %v7689_v44 = vpop.f32.mrb[101].mxu0  ;;  %v14267_v40 = vadd.f32 %v15029_v15, %v5902_v32 }
 0x83c   : > { %8307 = vmatprep.mubr.msk.bf16.mxu1 %vm2129_vm6, %v13415_v62  ;;  %v14272_v59 = vadd.f32 %v14214_v55, %v7689_v44  ;;  %v8930_v7 = vpop.f32.mrb[102].mxu0  ;;  %v15031_v62 = vld [vmem:[#allocation24_spill] sm:$0xff] }
 0x83d   : > { %15028 = vst [vmem:[#allocation31_spill] sm:$0xff] %v14264_v23  ;;  %v14275_v20 = vadd.f32 %v8930_v7, %v14214_v55  ;;  %v7692_v31 = vpop.f32.mrb[103].mxu0  ;;  %v15033_v23 = vld [vmem:[#allocation25_spill] sm:$0xff] }
 0x83e   : > { %v5806_v18 = vpop.f32.mrb[160].mxu1  ;;  %v14278_v42 = vadd.f32 %v14214_v55, %v7692_v31 }
 0x83f   : > { %15030 = vst [vmem:[#allocation10_spill] sm:$0xff] %v14275_v20  ;;  %v5903_v14 = vadd.f32 %v5806_v18, %v14013_v4  ;;  %v5808_v46 = vpop.f32.mrb[161].mxu1 }
 0x840   : > { %v5809_v15 = vpop.f32.mrb[162].mxu1 }
 0x841   : > { %v5904_v32 = vadd.f32 %v5809_v15, %v14019_v28  ;;  %v5811_v3 = vpop.f32.mrb[163].mxu1  ;;  %v14283_v5 = vadd.f32 %v15031_v62, %v5903_v14 }
 0x842   : > { %v8933_v44 = vpop.f32.mrb[104].mxu0 }
 0x843   : > { %6407 = vmatmul.mubr.bf16.gmra.mrb[12].mxu1 %v13419_v61  ;;  %v14287_v7 = vadd.f32 %v8933_v44, %v14214_v55  ;;  %v7705_v20 = vpop.f32.mrb[105].mxu0  ;;  %v14290_v31 = vadd.f32 %v15033_v23, %v5904_v32 }
 0x844   : > { %8308 = vmatprep.mubr.msk.bf16.mxu1 %vm2129_vm6, %v14992_v17  ;;  %v14295_v4 = vadd.f32 %v14214_v55, %v7705_v20  ;;  %v8934_v28 = vpop.f32.mrb[106].mxu0  ;;  %v15035_v17 = vld [vmem:[#allocation26_spill] sm:$0xff]  ;;  %v15036_v20 = vld [vmem:[#allocation32_spill] sm:$0xff] }
 0x845   : > { %15032 = vst [vmem:[#allocation20_spill] sm:$0xff] %v14287_v7  ;;  %v14298_v18 = vadd.f32 %v8934_v28, %v14214_v55  ;;  %v7708_v14 = vpop.f32.mrb[107].mxu0 }
 0x846   : > { %v5814_v46 = vpop.f32.mrb[164].mxu1  ;;  %v14301_v61 = vadd.f32 %v14214_v55, %v7708_v14 }
 0x847   : > { %15034 = vst [vmem:[#allocation9_spill] sm:$0xff] %v14298_v18  ;;  %v5905_v15 = vadd.f32 %v5814_v46, %v14029_v41  ;;  %v5816_v3 = vpop.f32.mrb[165].mxu1 }
 0x848   : > { %v5817_v23 = vpop.f32.mrb[166].mxu1  ;;  %v15037_v3 = vld [vmem:[#allocation11_spill] sm:$0xff] }
 0x849   : > { %v5906_v32 = vadd.f32 %v5817_v23, %v14035_v10  ;;  %v5819_v62 = vpop.f32.mrb[167].mxu1  ;;  %v14306_v44 = vadd.f32 %v15035_v17, %v5905_v15  ;;  %v15038_v23 = vld [vmem:[#allocation36_spill] sm:$0xff] }
 0x84b   : > { %6415 = vmatmul.mubr.bf16.gmra.mrb[16].mxu1 %v14994_v38  ;;  %v14310_v28 = vadd.f32 %v15036_v20, %v5906_v32  ;;  %v15039_v38 = vld [vmem:[#allocation37_spill] sm:$0xff]  ;;  %v4472_v32 = vld [vmem:[#allocation3 + $0x272] sm:$0xff] }
 0x84c   : > { %8309 = vmatprep.mubr.msk.bf16.mxu1 %vm2129_vm6, %v13998_v54  ;;  %v4471_v54 = vld [vmem:[#allocation3 + $0x26a] sm:$0xff] }
 0x84e   : > { %v5822_v14 = vpop.f32.mrb[168].mxu1 }
 0x84f   : > { %v5907_v18 = vadd.f32 %v5822_v14, %v14046_v30  ;;  %v5824_v41 = vpop.f32.mrb[169].mxu1 }
 0x850   : > { %v5825_v46 = vpop.f32.mrb[170].mxu1  ;;  %v5113_v41 = vpack.c.bf16 %v4472_v32, %v4471_v54 }
 0x851   : > { %v5908_v7 = vadd.f32 %v5825_v46, %v15037_v3  ;;  %v5827_v10 = vpop.f32.mrb[171].mxu1  ;;  %v14317_v62 = vadd.f32 %v15038_v23, %v5907_v18  ;;  %v15040_v3 = vld [vmem:[#allocation14_spill] sm:$0xff] }
 0x853   : > { %6423 = vmatmul.mubr.bf16.gmra.mrb[20].mxu1 %v14995_v60  ;;  %v14321_v15 = vadd.f32 %v15039_v38, %v5908_v7  ;;  %v15041_v60 = vld [vmem:[#allocation13_spill] sm:$0xff] }
 0x854   : > { %8310 = vmatprep.mubr.msk.bf16.mxu1 %vm2129_vm6, %v14068_v56 }
 0x856   : > { %v5830_v17 = vpop.f32.mrb[172].mxu1 }
 0x857   : > { %v5909_v30 = vadd.f32 %v5830_v17, %v14063_v45  ;;  %v5832_v20 = vpop.f32.mrb[173].mxu1 }
 0x858   : > { %v5833_v14 = vpop.f32.mrb[174].mxu1  ;;  %v15044_v20 = vld [vmem:[#allocation34_spill] sm:$0xff] }
 0x859   : > { %v5910_v46 = vadd.f32 %v5833_v14, %v14071_v52  ;;  %v5835_v18 = vpop.f32.mrb[175].mxu1  ;;  %v14328_v10 = vadd.f32 %v15040_v3, %v5909_v30  ;;  %v15042_v52 = vld [vmem:[#allocation38_spill] sm:$0xff]  ;;  %v15043_v30 = vld [vmem:[#allocation35_spill] sm:$0xff] }
 0x85a   : > { %v15045_v14 = vpack.c.bf16 %v15043_v30, %v15044_v20 }
 0x85b   : > { %6431 = vmatmul.mubr.bf16.gmra.mrb[24].mxu1 %v13891_v36  ;;  %v14332_v7 = vadd.f32 %v15041_v60, %v5910_v46  ;;  %v15046_v36 = vld [vmem:[#allocation39_spill] sm:$0xff] }
 0x85c   : > { %8311 = vmatprep.mubr.msk.bf16.mxu1 %vm2129_vm6, %v5113_v41 }
 0x85e   : > { %v5838_v56 = vpop.f32.mrb[176].mxu1 }
 0x85f   : > { %v5911_v23 = vadd.f32 %v5838_v56, %v14082_v12  ;;  %v5840_v45 = vpop.f32.mrb[177].mxu1 }
 0x860   : > { %v5841_v38 = vpop.f32.mrb[178].mxu1 }
 0x861   : > { %v5912_v54 = vadd.f32 %v5841_v38, %v14088_v19  ;;  %v5843_v32 = vpop.f32.mrb[179].mxu1  ;;  %v14338_v17 = vadd.f32 %v15042_v52, %v5911_v23  ;;  %v15047_v19 = vld [vmem:[#allocation40_spill] sm:$0xff]  ;;  %v15048_v23 = vld [vmem:[#allocation41_spill] sm:$0xff] }
 0x863   : > { %6439 = vmatmul.mubr.bf16.gmra.mrb[28].mxu1 %v15045_v14  ;;  %v14344_v46 = vadd.f32 %v15046_v36, %v5912_v54 }
 0x866   : > { %v5846_v18 = vpop.f32.mrb[180].mxu1 }
 0x867   : > { %v5913_v41 = vadd.f32 %v5846_v18, %v14099_v27  ;;  %v5848_v3 = vpop.f32.mrb[181].mxu1 }
 0x868   : > { %v5849_v12 = vpop.f32.mrb[182].mxu1 }
 0x869   : > { %v5914_v60 = vadd.f32 %v5849_v12, %v14102_v63  ;;  %v5851_v56 = vpop.f32.mrb[183].mxu1  ;;  %v14349_v45 = vadd.f32 %v15047_v19, %v5913_v41 }
 0x86b   : > { %v14352_v38 = vadd.f32 %v15048_v23, %v5914_v60 }
 0x86e   : > { %v5854_v32 = vpop.f32.mrb[184].mxu1 }
 0x86f   : > { %v5915_v52 = vadd.f32 %v5854_v32, %v14108_v33  ;;  %v5856_v30 = vpop.f32.mrb[185].mxu1 }
 0x870   : > { %v5857_v54 = vpop.f32.mrb[186].mxu1 }
 0x871   : > { %v5916_v20 = vadd.f32 %v5857_v54, %v14111_v29  ;;  %v5859_v14 = vpop.f32.mrb[187].mxu1 }
 0x876   : > { %v5862_v27 = vpop.f32.mrb[188].mxu1 }
 0x877   : > { %v5917_v36 = vadd.f32 %v5862_v27, %v14117_v13  ;;  %v5864_v18 = vpop.f32.mrb[189].mxu1 }
 0x878   : > { %v5865_v63 = vpop.f32.mrb[190].mxu1 }
 0x879   : > { %v5918_v3 = vadd.f32 %v5865_v63, %v14120_v34  ;;  %v5867_v41 = vpop.f32.mrb[191].mxu1 }
 0x87e   : > { %v5870_v12 = vpop.f32.mrb[192].mxu1 }
 0x87f   : > { %v5919_v60 = vadd.f32 %v5870_v12, %v14126_v2  ;;  %v5872_v56 = vpop.f32.mrb[193].mxu1 }
 0x880   : > { %v5873_v19 = vpop.f32.mrb[194].mxu1 }
 0x881   : > { %v5920_v33 = vadd.f32 %v5873_v19, %v14129_v11  ;;  %v5875_v23 = vpop.f32.mrb[195].mxu1 }
 0x886   : > { %v5878_v32 = vpop.f32.mrb[196].mxu1 }
 0x887   : > { %v5921_v29 = vadd.f32 %v5878_v32, %v14135_v51  ;;  %v5880_v30 = vpop.f32.mrb[197].mxu1 }
 0x888   : > { %v5881_v54 = vpop.f32.mrb[198].mxu1 }
 0x889   : > { %v5922_v13 = vadd.f32 %v5881_v54, %v14138_v53  ;;  %v5883_v14 = vpop.f32.mrb[199].mxu1 }
 0x88e   : > { %v5886_v27 = vpop.f32.mrb[200].mxu1 }
 0x88f   : > { %v5923_v34 = vadd.f32 %v5886_v27, %v14152_v47  ;;  %v5888_v18 = vpop.f32.mrb[201].mxu1 }
 0x890   : > { %v5889_v63 = vpop.f32.mrb[202].mxu1 }
 0x891   : > { %v5924_v2 = vadd.f32 %v5889_v63, %v14155_v9  ;;  %v5891_v41 = vpop.f32.mrb[203].mxu1 }
 0x896   : > { %v6131_v12 = vpop.f32.mrb[204].mxu1 }
 0x897   : > { %v14364_v56 = vadd.f32 %v6131_v12, %v5915_v52  ;;  %v6133_v11 = vpop.f32.mrb[205].mxu1 }
 0x898   : > { %v6134_v19 = vpop.f32.mrb[206].mxu1 }
 0x899   : > { %v14366_v23 = vadd.f32 %v6134_v19, %v5916_v20  ;;  %v6136_v51 = vpop.f32.mrb[207].mxu1 }
 0x89e   : > { %v6139_v32 = vpop.f32.mrb[208].mxu1 }
 0x89f   : > { %v14368_v30 = vadd.f32 %v6139_v32, %v5917_v36  ;;  %v6141_v53 = vpop.f32.mrb[209].mxu1 }
 0x8a0   : > { %v6142_v54 = vpop.f32.mrb[210].mxu1 }
 0x8a1   : > { %v14370_v14 = vadd.f32 %v6142_v54, %v5918_v3  ;;  %v6144_v47 = vpop.f32.mrb[211].mxu1 }
 0x8a6   : > { %v6147_v27 = vpop.f32.mrb[212].mxu1 }
 0x8a7   : > { %v14372_v18 = vadd.f32 %v6147_v27, %v5919_v60  ;;  %v6149_v9 = vpop.f32.mrb[213].mxu1 }
 0x8a8   : > { %v6150_v52 = vpop.f32.mrb[214].mxu1 }
 0x8a9   : > { %v14374_v63 = vadd.f32 %v6150_v52, %v5920_v33  ;;  %v6152_v41 = vpop.f32.mrb[215].mxu1 }
 0x8ae   : > { %v6155_v20 = vpop.f32.mrb[216].mxu1 }
 0x8af   : > { %v14376_v12 = vadd.f32 %v6155_v20, %v5921_v29  ;;  %v6157_v36 = vpop.f32.mrb[217].mxu1  ;;  %v14388_v29 = vld [vmem:[%s14635_s13] ss:$0 sm:$0xff]  ;;  %v7760_v20 = vadd.f32 %v14214_v55, %v14149_v0  ;;  %v7761_v0 = vadd.f32 %v14140_v22, %v14214_v55 }
 0x8b0   : > { %v6158_v11 = vpop.f32.mrb[218].mxu1 }
 0x8b1   : > { %v14378_v19 = vadd.f32 %v6158_v11, %v5922_v13  ;;  %v6160_v3 = vpop.f32.mrb[219].mxu1 }
 0x8b6   : > { %v6163_v51 = vpop.f32.mrb[220].mxu1 }
 0x8b7   : > { %v14380_v32 = vadd.f32 %v6163_v51, %v5923_v34  ;;  %v6165_v60 = vpop.f32.mrb[221].mxu1  ;;  %v7759_v34 = vadd.f32 %v14214_v55, %v14143_v16 }
 0x8b8   : > { %v6166_v53 = vpop.f32.mrb[222].mxu1 }
 0x8b9   : > { %v14382_v54 = vadd.f32 %v6166_v53, %v5924_v2  ;;  %v6168_v47 = vpop.f32.mrb[223].mxu1 }
 0x8be   : > { %v6320_v33 = vpop.f32.mrb[224].mxu1 }
 0x8bf   : > { %v6447_v13 = vadd.f32 %v6320_v33, %v14171_v57  ;;  %v6322_v27 = vpop.f32.mrb[225].mxu1  ;;  %v7762_v33 = vadd.f32 %v14147_v35, %v14214_v55 }
 0x8c0   : > { %v6323_v9 = vpop.f32.mrb[226].mxu1 }
 0x8c1   : > { %v6486_v2 = vadd.f32 %v14388_v29, %v6447_v13  ;;  %v6448_v52 = vadd.f32 %v6323_v9, %v14179_v8  ;;  %v6325_v41 = vpop.f32.mrb[227].mxu1 }
 0x8c3   : > { %v7791_v36 = vadd.f32 %v7759_v34, %v6486_v2  ;;  %v6487_v11 = vadd.f32 %v14388_v29, %v6448_v52 }
 0x8c5   : > { %7823 = vst.msk [vmem:[%s14400_s20] sm:$0xff] %vm2129_vm6, %v7791_v36  ;;  %v7792_v57 = vadd.f32 %v7760_v20, %v6487_v11  ;;  %v7764_v20 = vadd.f32 %v14214_v55, %v14166_v21 }
 0x8c6   : > { %v6328_v16 = vpop.f32.mrb[228].mxu1 }
 0x8c7   : > { %7824 = vst.msk [vmem:[%s14400_s20 + $0x8] sm:$0xff] %vm2129_vm6, %v7792_v57  ;;  %v6449_v8 = vadd.f32 %v6328_v16, %v14190_v37  ;;  %v6330_v3 = vpop.f32.mrb[229].mxu1 }
 0x8c8   : > { %v6331_v51 = vpop.f32.mrb[230].mxu1 }
 0x8c9   : > { %v6488_v60 = vadd.f32 %v14388_v29, %v6449_v8  ;;  %v6450_v53 = vadd.f32 %v6331_v51, %v14198_v24  ;;  %v6333_v47 = vpop.f32.mrb[231].mxu1  ;;  %v7763_v24 = vadd.f32 %v14214_v55, %v14160_v49 }
 0x8cb   : > { %v7793_v13 = vadd.f32 %v7761_v0, %v6488_v60  ;;  %v6489_v27 = vadd.f32 %v14388_v29, %v6450_v53  ;;  %v15049_v0 = vld [vmem:[#allocation12_spill] sm:$0xff] }
 0x8cc   : > { %v7766_v60 = vadd.f32 %v15049_v0, %v14214_v55 }
 0x8cd   : > { %7825 = vst.msk [vmem:[%s14400_s20 + $0x10] sm:$0xff] %vm2129_vm6, %v7793_v13  ;;  %v7794_v37 = vadd.f32 %v7762_v33, %v6489_v27 }
 0x8ce   : > { %v6336_v9 = vpop.f32.mrb[232].mxu1 }
 0x8cf   : > { %7826 = vst.msk [vmem:[%s14400_s20 + $0x18] sm:$0xff] %vm2129_vm6, %v7794_v37  ;;  %v6451_v22 = vadd.f32 %v6336_v9, %v14209_v39  ;;  %v6338_v34 = vpop.f32.mrb[233].mxu1 }
 0x8d0   : > { %v6339_v2 = vpop.f32.mrb[234].mxu1 }
 0x8d1   : > { %v6490_v35 = vadd.f32 %v14388_v29, %v6451_v22  ;;  %v6452_v52 = vadd.f32 %v6339_v2, %v14221_v6  ;;  %v6341_v41 = vpop.f32.mrb[235].mxu1  ;;  %v7765_v6 = vadd.f32 %v14157_v26, %v14214_v55  ;;  %v15051_v2 = vld [vmem:[#allocation33_spill] sm:$0xff] }
 0x8d3   : > { %v7795_v36 = vadd.f32 %v7763_v24, %v6490_v35  ;;  %v6491_v11 = vadd.f32 %v14388_v29, %v6452_v52  ;;  %v7768_v24 = vadd.f32 %v14214_v55, %v15051_v2 }
 0x8d5   : > { %7827 = vst.msk [vmem:[%s14400_s20 + $0x20] sm:$0xff] %vm2129_vm6, %v7795_v36  ;;  %v7796_v39 = vadd.f32 %v7764_v20, %v6491_v11 }
 0x8d6   : > { %v6344_v57 = vpop.f32.mrb[236].mxu1 }
 0x8d7   : > { %7828 = vst.msk [vmem:[%s14400_s20 + $0x28] sm:$0xff] %vm2129_vm6, %v7796_v39  ;;  %v6453_v49 = vadd.f32 %v6344_v57, %v14237_v50  ;;  %v6346_v16 = vpop.f32.mrb[237].mxu1 }
 0x8d8   : > { %v6347_v8 = vpop.f32.mrb[238].mxu1 }
 0x8d9   : > { %v6492_v21 = vadd.f32 %v14388_v29, %v6453_v49  ;;  %v6454_v3 = vadd.f32 %v6347_v8, %v14244_v58  ;;  %v6349_v51 = vpop.f32.mrb[239].mxu1  ;;  %v15050_v58 = vld [vmem:[#allocation43_spill] sm:$0xff] }
 0x8da   : > { %v7767_v37 = vadd.f32 %v14214_v55, %v15050_v58  ;;  %v15053_v8 = vld [vmem:[#allocation15_spill] sm:$0xff] }
 0x8db   : > { %v7797_v53 = vadd.f32 %v7765_v6, %v6492_v21  ;;  %v6493_v47 = vadd.f32 %v14388_v29, %v6454_v3  ;;  %v7770_v6 = vadd.f32 %v15053_v8, %v14214_v55  ;;  %v15058_v8 = vld [vmem:[#allocation29_spill] sm:$0xff] }
 0x8dd   : > { %7829 = vst.msk [vmem:[%s14400_s20 + $0x30] sm:$0xff] %vm2129_vm6, %v7797_v53  ;;  %v7798_v50 = vadd.f32 %v7766_v60, %v6493_v47 }
 0x8de   : > { %v6352_v33 = vpop.f32.mrb[240].mxu1 }
 0x8df   : > { %7830 = vst.msk [vmem:[%s14400_s20 + $0x38] sm:$0xff] %vm2129_vm6, %v7798_v50  ;;  %v6455_v26 = vadd.f32 %v6352_v33, %v14260_v25  ;;  %v6354_v13 = vpop.f32.mrb[241].mxu1 }
 0x8e0   : > { %v6355_v27 = vpop.f32.mrb[242].mxu1  ;;  %v15055_v13 = vld [vmem:[#allocation17_spill] sm:$0xff] }
 0x8e1   : > { %v6494_v9 = vadd.f32 %v14388_v29, %v6455_v26  ;;  %v6456_v22 = vadd.f32 %v6355_v27, %v14267_v40  ;;  %v6357_v34 = vpop.f32.mrb[243].mxu1  ;;  %v15052_v40 = vld [vmem:[#allocation42_spill] sm:$0xff]  ;;  %v7772_v27 = vadd.f32 %v14214_v55, %v15055_v13 }
 0x8e2   : > { %v7769_v39 = vadd.f32 %v15052_v40, %v14214_v55 }
 0x8e3   : > { %v7799_v35 = vadd.f32 %v7767_v37, %v6494_v9  ;;  %v6495_v52 = vadd.f32 %v14388_v29, %v6456_v22 }
 0x8e5   : > { %7831 = vst.msk [vmem:[%s14400_s20 + $0x40] sm:$0xff] %vm2129_vm6, %v7799_v35  ;;  %v7800_v25 = vadd.f32 %v7768_v24, %v6495_v52 }
 0x8e6   : > { %v6360_v41 = vpop.f32.mrb[244].mxu1 }
 0x8e7   : > { %7832 = vst.msk [vmem:[%s14400_s20 + $0x48] sm:$0xff] %vm2129_vm6, %v7800_v25  ;;  %v6457_v20 = vadd.f32 %v6360_v41, %v14283_v5  ;;  %v6362_v36 = vpop.f32.mrb[245].mxu1  ;;  %v15057_v41 = vld [vmem:[#allocation8_spill] sm:$0xff] }
 0x8e8   : > { %v6363_v11 = vpop.f32.mrb[246].mxu1 }
 0x8e9   : > { %v6496_v57 = vadd.f32 %v14388_v29, %v6457_v20  ;;  %v6458_v49 = vadd.f32 %v6363_v11, %v14290_v31  ;;  %v6365_v16 = vpop.f32.mrb[247].mxu1  ;;  %v15054_v31 = vld [vmem:[#allocation16_spill] sm:$0xff]  ;;  %v7774_v20 = vadd.f32 %v15057_v41, %v14214_v55 }
 0x8ea   : > { %v7771_v47 = vadd.f32 %v14214_v55, %v15054_v31  ;;  %v15059_v31 = vld [vmem:[#allocation27_spill] sm:$0xff] }
 0x8eb   : > { %v7801_v21 = vadd.f32 %v7769_v39, %v6496_v57  ;;  %v6497_v3 = vadd.f32 %v14388_v29, %v6458_v49 }
 0x8ed   : > { %7833 = vst.msk [vmem:[%s14400_s20 + $0x50] sm:$0xff] %vm2129_vm6, %v7801_v21  ;;  %v7802_v5 = vadd.f32 %v7770_v6, %v6497_v3 }
 0x8ee   : > { %v6368_v51 = vpop.f32.mrb[248].mxu1 }
 0x8ef   : > { %7834 = vst.msk [vmem:[%s14400_s20 + $0x58] sm:$0xff] %vm2129_vm6, %v7802_v5  ;;  %v6459_v0 = vadd.f32 %v6368_v51, %v14306_v44  ;;  %v6370_v60 = vpop.f32.mrb[249].mxu1 }
 0x8f0   : > { %v6371_v53 = vpop.f32.mrb[250].mxu1 }
 0x8f1   : > { %v6498_v50 = vadd.f32 %v14388_v29, %v6459_v0  ;;  %v6460_v33 = vadd.f32 %v6371_v53, %v14310_v28  ;;  %v6373_v26 = vpop.f32.mrb[251].mxu1  ;;  %v15056_v28 = vld [vmem:[#allocation28_spill] sm:$0xff] }
 0x8f2   : > { %v7773_v24 = vadd.f32 %v15056_v28, %v14214_v55 }
 0x8f3   : > { %v7803_v58 = vadd.f32 %v7771_v47, %v6498_v50  ;;  %v6499_v37 = vadd.f32 %v14388_v29, %v6460_v33 }
 0x8f5   : > { %7835 = vst.msk [vmem:[%s14400_s20 + $0x60] sm:$0xff] %vm2129_vm6, %v7803_v58  ;;  %v7804_v44 = vadd.f32 %v7772_v27, %v6499_v37 }
 0x8f6   : > { %v6376_v9 = vpop.f32.mrb[252].mxu1 }
 0x8f7   : > { %7836 = vst.msk [vmem:[%s14400_s20 + $0x68] sm:$0xff] %vm2129_vm6, %v7804_v44  ;;  %v6461_v22 = vadd.f32 %v6376_v9, %v14317_v62  ;;  %v6378_v34 = vpop.f32.mrb[253].mxu1 }
 0x8f8   : > { %v6379_v2 = vpop.f32.mrb[254].mxu1 }
 0x8f9   : > { %v6500_v35 = vadd.f32 %v14388_v29, %v6461_v22  ;;  %v6462_v52 = vadd.f32 %v6379_v2, %v14321_v15  ;;  %v6381_v25 = vpop.f32.mrb[255].mxu1 }
 0x8fb   : > { %v7805_v36 = vadd.f32 %v7773_v24, %v6500_v35  ;;  %v6501_v11 = vadd.f32 %v14388_v29, %v6462_v52  ;;  %v15061_v35 = vld [vmem:[#allocation30_spill] sm:$0xff] }
 0x8fd   : > { %7837 = vst.msk [vmem:[%s14400_s20 + $0x70] sm:$0xff] %vm2129_vm6, %v7805_v36  ;;  %v7806_v62 = vadd.f32 %v7774_v20, %v6501_v11 }
 0x8fe   : > { %v6384_v40 = vpop.f32.mrb[0].mxu1 }
 0x8ff   : > { %7838 = vst.msk [vmem:[%s14400_s20 + $0x78] sm:$0xff] %vm2129_vm6, %v7806_v62  ;;  %v6463_v39 = vadd.f32 %v6384_v40, %v14328_v10  ;;  %v6386_v57 = vpop.f32.mrb[1].mxu1 }
 0x900   : > { %v6387_v49 = vpop.f32.mrb[2].mxu1 }
 0x901   : > { %v6502_v15 = vadd.f32 %v14388_v29, %v6463_v39  ;;  %v6464_v16 = vadd.f32 %v6387_v49, %v14332_v7  ;;  %v6389_v55 = vpop.f32.mrb[3].mxu1 }
 0x903   : > { %v7807_v6 = vadd.f32 %v15058_v8, %v6502_v15  ;;  %v6503_v21 = vadd.f32 %v14388_v29, %v6464_v16 }
 0x905   : > { %7839 = vst.msk [vmem:[%s14400_s20 + $0x80] sm:$0xff] %vm2129_vm6, %v7807_v6  ;;  %v7808_v3 = vadd.f32 %v14232_v1, %v6503_v21  ;;  %v15060_v1 = vld [vmem:[#allocation18_spill] sm:$0xff]  ;;  %v15063_v6 = vld [vmem:[#allocation31_spill] sm:$0xff] }
 0x906   : > { %v6392_v5 = vpop.f32.mrb[4].mxu1 }
 0x907   : > { %7840 = vst.msk [vmem:[%s14400_s20 + $0x88] sm:$0xff] %vm2129_vm6, %v7808_v3  ;;  %v6465_v10 = vadd.f32 %v6392_v5, %v14338_v17  ;;  %v6394_v51 = vpop.f32.mrb[5].mxu1 }
 0x908   : > { %v6395_v0 = vpop.f32.mrb[6].mxu1 }
 0x909   : > { %v6504_v7 = vadd.f32 %v14388_v29, %v6465_v10  ;;  %v6466_v60 = vadd.f32 %v6395_v0, %v14344_v46  ;;  %v6397_v53 = vpop.f32.mrb[7].mxu1 }
 0x90b   : > { %v7809_v47 = vadd.f32 %v15059_v31, %v6504_v7  ;;  %v6505_v50 = vadd.f32 %v14388_v29, %v6466_v60 }
 0x90d   : > { %7841 = vst.msk [vmem:[%s14400_s20 + $0x90] sm:$0xff] %vm2129_vm6, %v7809_v47  ;;  %v7810_v33 = vadd.f32 %v15060_v1, %v6505_v50 }
 0x90e   : > { %v6400_v26 = vpop.f32.mrb[8].mxu1 }
 0x90f   : > { %7842 = vst.msk [vmem:[%s14400_s20 + $0x98] sm:$0xff] %vm2129_vm6, %v7810_v33  ;;  %v6467_v17 = vadd.f32 %v6400_v26, %v14349_v45  ;;  %v6402_v13 = vpop.f32.mrb[9].mxu1 }
 0x910   : > { %v6403_v27 = vpop.f32.mrb[10].mxu1 }
 0x911   : > { %v6506_v46 = vadd.f32 %v14388_v29, %v6467_v17  ;;  %v6468_v58 = vadd.f32 %v6403_v27, %v14352_v38  ;;  %v6405_v37 = vpop.f32.mrb[11].mxu1  ;;  %v15065_v17 = vld [vmem:[#allocation20_spill] sm:$0xff] }
 0x913   : > { %v7811_v44 = vadd.f32 %v14249_v43, %v6506_v46  ;;  %v6507_v9 = vadd.f32 %v14388_v29, %v6468_v58 }
 0x915   : > { %7843 = vst.msk [vmem:[%s14400_s20 + $0xa0] sm:$0xff] %vm2129_vm6, %v7811_v44  ;;  %v7812_v22 = vadd.f32 %v14255_v48, %v6507_v9  ;;  %v15062_v48 = vld [vmem:[#allocation19_spill] sm:$0xff] }
 0x916   : > { %v6408_v34 = vpop.f32.mrb[12].mxu1 }
 0x917   : > { %7844 = vst.msk [vmem:[%s14400_s20 + $0xa8] sm:$0xff] %vm2129_vm6, %v7812_v22  ;;  %v6469_v45 = vadd.f32 %v6408_v34, %v14364_v56  ;;  %v6410_v2 = vpop.f32.mrb[13].mxu1 }
 0x918   : > { %v6411_v28 = vpop.f32.mrb[14].mxu1 }
 0x919   : > { %v6508_v38 = vadd.f32 %v14388_v29, %v6469_v45  ;;  %v6470_v24 = vadd.f32 %v6411_v28, %v14366_v23  ;;  %v6413_v43 = vpop.f32.mrb[15].mxu1 }
 0x91b   : > { %v7813_v52 = vadd.f32 %v15061_v35, %v6508_v38  ;;  %v6509_v25 = vadd.f32 %v14388_v29, %v6470_v24 }
 0x91d   : > { %7845 = vst.msk [vmem:[%s14400_s20 + $0xb0] sm:$0xff] %vm2129_vm6, %v7813_v52  ;;  %v7814_v41 = vadd.f32 %v15062_v48, %v6509_v25 }
 0x91e   : > { %v6416_v20 = vpop.f32.mrb[16].mxu1 }
 0x91f   : > { %7846 = vst.msk [vmem:[%s14400_s20 + $0xb8] sm:$0xff] %vm2129_vm6, %v7814_v41  ;;  %v6471_v56 = vadd.f32 %v6416_v20, %v14368_v30  ;;  %v6418_v36 = vpop.f32.mrb[17].mxu1 }
 0x920   : > { %v6419_v11 = vpop.f32.mrb[18].mxu1 }
 0x921   : > { %v6510_v23 = vadd.f32 %v14388_v29, %v6471_v56  ;;  %v6472_v62 = vadd.f32 %v6419_v11, %v14370_v14  ;;  %v6421_v40 = vpop.f32.mrb[19].mxu1 }
 0x923   : > { %v7815_v39 = vadd.f32 %v14272_v59, %v6510_v23  ;;  %v6511_v57 = vadd.f32 %v14388_v29, %v6472_v62 }
 0x925   : > { %7847 = vst.msk [vmem:[%s14400_s20 + $0xc0] sm:$0xff] %vm2129_vm6, %v7815_v39  ;;  %v7816_v49 = vadd.f32 %v14278_v42, %v6511_v57  ;;  %v15064_v42 = vld [vmem:[#allocation10_spill] sm:$0xff] }
 0x926   : > { %v6424_v15 = vpop.f32.mrb[20].mxu1 }
 0x927   : > { %7848 = vst.msk [vmem:[%s14400_s20 + $0xc8] sm:$0xff] %vm2129_vm6, %v7816_v49  ;;  %v6473_v30 = vadd.f32 %v6424_v15, %v14372_v18  ;;  %v6426_v16 = vpop.f32.mrb[21].mxu1 }
 0x928   : > { %v6427_v55 = vpop.f32.mrb[22].mxu1 }
 0x929   : > { %v6512_v14 = vadd.f32 %v14388_v29, %v6473_v30  ;;  %v6474_v8 = vadd.f32 %v6427_v55, %v14374_v63  ;;  %v6429_v59 = vpop.f32.mrb[23].mxu1 }
 0x92b   : > { %v7817_v21 = vadd.f32 %v15063_v6, %v6512_v14  ;;  %v6513_v3 = vadd.f32 %v14388_v29, %v6474_v8 }
 0x92d   : > { %7849 = vst.msk [vmem:[%s14400_s20 + $0xd0] sm:$0xff] %vm2129_vm6, %v7817_v21  ;;  %v7818_v5 = vadd.f32 %v15064_v42, %v6513_v3 }
 0x92e   : > { %v6432_v10 = vpop.f32.mrb[24].mxu1 }
 0x92f   : > { %7850 = vst.msk [vmem:[%s14400_s20 + $0xd8] sm:$0xff] %vm2129_vm6, %v7818_v5  ;;  %v6475_v18 = vadd.f32 %v6432_v10, %v14376_v12  ;;  %v6434_v51 = vpop.f32.mrb[25].mxu1 }
 0x930   : > { %v6435_v0 = vpop.f32.mrb[26].mxu1 }
 0x931   : > { %v6514_v63 = vadd.f32 %v14388_v29, %v6475_v18  ;;  %v6476_v7 = vadd.f32 %v6435_v0, %v14378_v19  ;;  %v6437_v60 = vpop.f32.mrb[27].mxu1 }
 0x933   : > { %v7819_v53 = vadd.f32 %v14295_v4, %v6514_v63  ;;  %v6515_v31 = vadd.f32 %v14388_v29, %v6476_v7 }
 0x935   : > { %7851 = vst.msk [vmem:[%s14400_s20 + $0xe0] sm:$0xff] %vm2129_vm6, %v7819_v53  ;;  %v7820_v47 = vadd.f32 %v14301_v61, %v6515_v31 }
 0x936   : > { %v6440_v50 = vpop.f32.mrb[28].mxu1 }
 0x937   : > { %7852 = vst.msk [vmem:[%s14400_s20 + $0xe8] sm:$0xff] %vm2129_vm6, %v7820_v47  ;;  %v6477_v12 = vadd.f32 %v6440_v50, %v14380_v32  ;;  %v6442_v1 = vpop.f32.mrb[29].mxu1  ;;  %v15066_v32 = vld [vmem:[#allocation9_spill] sm:$0xff] }
 0x938   : > { %v6443_v33 = vpop.f32.mrb[30].mxu1 }
 0x939   : > { %v6516_v19 = vadd.f32 %v14388_v29, %v6477_v12  ;;  %v6478_v4 = vadd.f32 %v6443_v33, %v14382_v54  ;;  %v6445_v26 = vpop.f32.mrb[31].mxu1 }
 0x93b   : > { %v7821_v13 = vadd.f32 %v15065_v17, %v6516_v19  ;;  %v6517_v61 = vadd.f32 %v14388_v29, %v6478_v4 }
 0x93d   : > { %7853 = vst.msk [vmem:[%s14400_s20 + $0xf0] sm:$0xff] %vm2129_vm6, %v7821_v13  ;;  %v7822_v54 = vadd.f32 %v15066_v32, %v6517_v61 }
 0x93f   : > { %7854 = vst.msk [vmem:[%s14400_s20 + $0xf8] sm:$0xff] %vm2129_vm6, %v7822_v54 }
 0x940   : > { %10206 = shalt.err (!%p10203_p3)
}
 0x941   : > { %s10207_s2 = scalar_lea.hbm %s14570_s26, 4096  ;;  %s10211_s3 = scalar_lea.hbm %s14638_s16, 8192 }
 0x942   : > { %p10208_p4 = scmp.ne.s32.totalorder %s14570_s26, %s10207_s2  ;;  %p10212_p9 = scmp.lt.u32.totalorder %s14570_s26, %s14638_s16 }
 0x943   : > { %p10213_p10 = scmp.lt.u32.totalorder %s10211_s3, %s10207_s2  ;;  %p10215_p12 = scmp.lt.u32.totalorder %s10207_s2, %s14570_s26 }
 0x944   : > { %p10209_p7 = pnand %p10208_p4, %p10392_p5 }
 0x945   : > { %p10214_p11 = por %p10213_p10, %p10212_p9 }
 0x946   : > { %p10210_p8 = pneg %p10209_p7 }
 0x947   : > { %p10216_p13 = por %p10215_p12, %p10214_p11 }
 0x949   : > { %p10217_p0 = pnand %p10216_p13, %p10210_p8 }
 0x94b   : > { %10220 = shalt.err (!%p10217_p0)
}
 0x94c   : > { %s10267_s18 = smov 128   ;;  %s10268_s4 = smov 8  }
 0x94d   : > { %9165 = dma.vmem_to_hbm [thread:$0]  (%p10392_p5), %s14572_s28, 4096, %s14570_s26, %s14581_s25, %s10267_s18, %s10267_s18, %s10268_s4  }
 0x94e PF: > { %p9171_p1 = scmp.ge.s32.totalorder %s10255_s24, 2  ;;  %s7884_s1 = sand.u32 1, %s10243_s21  }
 0x94f   : > { %s7885_s2 = scalar_lea.sflag [#allocation6], %s7884_s1 }
 0x950   : > { %p9168_p2 = pnand %p9171_p1, %p10396_p6 }
 0x952   : > { %10238 = dma.done.wait (!%p9168_p2), %s7885_s2, 4096  }
 0x953   : > { %10240 = vsyncadd (!%p9168_p2), %s7885_s2, 4294963200  ;;  %p26_p3 = scmp.ge.s32.totalorder %s10379_s27, 4   ;;  %s15067_s21 = smov %s10247_s22 }
 0x954   : > { %s15068_s22 = smov %s10251_s23  ;;  %s15069_s23 = smov %s10390_s30 }
 0x955   : > { %s15070_s24 = smov %s10379_s27  ;;  %28 = sbr.rel (!%p26_p3) target bundleno = 9 (0x9), region = 135 }
 0x95c   :  { %7890 = vsyncpa [#allocation6], 1 }
 0x95d   :  { %7892 = vsyncpa [#allocation6 + $0x1], 1 }

</bundles_post_ra>
